<compile_context>
chip_gen: v7x
topology: tpu7x:2x2x1
jax: 0.10.0
libtpu: 0.0.40
codegen_flags: <defaults>
</compile_context>

<pallas_src>
import functools

import numpy as np
import jax
import jax.numpy as jnp
from jax.experimental import pallas as pl
from jax.experimental.pallas import tpu as pltpu

# ----------------------------- model hyper-params ---------------------------
EMBED_DIM = 128          # embed_dim (small test size; default was 400)
HIDDEN_DIM = 256         # hidden_dim (small test size; default was 1024)
FFN_DIM = 2048           # nn.TransformerEncoderLayer default dim_feedforward
NHEAD = 2                # n_diffusion_heads
N_DIFF_LAYERS = 2        # n_diffusion_layers
N_DIFF_STEPS = 1         # n_diffusion_steps
SAMPLER_EPS = 1e-4
LN_EPS = 1e-5
BN_EPS = 1e-5
LANES = 128
SUBLANES = 8
NEG_INF = -1e9


def _round_up(n, m):
    return ((n + m - 1) // m) * m


def _pad_rows(x, rows):
    return jnp.pad(x, ((0, rows - x.shape[0]), (0, 0)))


# =============================== Pallas kernels =============================

# --- K1: atom_embedder stub + Sampler + atom3d stub + pooling + all heads ---
# One gridless call: node embeddings stay in VMEM between the sampler and the
# pooled decoder heads; molecular_decoder runs once on stacked [gs2; gs3].

def _embed_heads_kernel(x1_ref, we_ref, be_ref, wm_ref, bm_ref, ws_ref, bs_ref,
                        noise_ref, x2_ref, e3w_ref, e3b_ref,
                        a2_ref, ic2_ref, a3_ref, ic3_ref,
                        molw1_ref, molb1_ref, molw2_ref, molb2_ref,
                        bns_ref, bnh_ref,
                        m3w1_ref, m3b1_ref, m3w2_ref, m3b2_ref,
                        mdsw_ref, mdsb_ref,
                        ne_ref, samp_ref, gs2_ref, gs3_ref, props_ref,
                        logit_ref, mds_ref, *, eps):
    # model2D stub (linear node embedder) + Sampler (mu / softplus-std / rsample)
    ne = jnp.dot(x1_ref[...].astype(jnp.bfloat16), we_ref[...],
                 preferred_element_type=jnp.float32) + be_ref[...]
    ne_ref[...] = ne
    xr = jnp.maximum(ne, 0.0).astype(jnp.bfloat16)
    mu = jnp.dot(xr, wm_ref[...], preferred_element_type=jnp.float32) + bm_ref[...]
    z = jnp.dot(xr, ws_ref[...], preferred_element_type=jnp.float32) + bs_ref[...]
    std = jnp.maximum(z, 0.0) + jnp.log1p(jnp.exp(-jnp.abs(z)))   # stable softplus
    # single broadcast store over all samples
    samp_ref[...] = mu[None, :, :] + (std + eps)[None, :, :] * noise_ref[...]

    # model3D stub (linear node embedder)
    e3 = jnp.dot(x2_ref[...].astype(jnp.bfloat16), e3w_ref[...],
                 preferred_element_type=jnp.float32) + e3b_ref[...]

    # mean pooling via dense 0/1 assignment matmul * precomputed inverse counts
    gs2 = jnp.dot(a2_ref[...], ne.astype(jnp.bfloat16),
                  preferred_element_type=jnp.float32) * ic2_ref[...]
    gs3 = jnp.dot(a3_ref[...], e3.astype(jnp.bfloat16),
                  preferred_element_type=jnp.float32) * ic3_ref[...]
    gs2_ref[...] = gs2
    gs3_ref[...] = gs3

    # molecular_decoder on stacked [gs2; gs3]: one weight-push pass, M doubled
    gcat = jnp.concatenate([gs2, gs3], axis=0).astype(jnp.bfloat16)
    h = jnp.maximum(
        jnp.dot(gcat, molw1_ref[...],
                preferred_element_type=jnp.float32) + molb1_ref[...], 0.0)
    props_ref[...] = (jnp.dot(h.astype(jnp.bfloat16), molw2_ref[...],
                              preferred_element_type=jnp.float32) + molb2_ref[...])

    # atom3d_embedder_mlp: BatchNorm1d(eval) -> Linear -> ReLU -> Linear(->1)
    gb = gs3 * bns_ref[...] + bnh_ref[...]
    h3 = jnp.maximum(
        jnp.dot(gb.astype(jnp.bfloat16), m3w1_ref[...],
                preferred_element_type=jnp.float32) + m3b1_ref[...], 0.0)
    logit_ref[...] = (jnp.dot(h3.astype(jnp.bfloat16), m3w2_ref[...],
                              preferred_element_type=jnp.float32) + m3b2_ref[...])

    # mds: Linear(D -> 3), padded to 128 lanes
    mds_ref[...] = (jnp.dot(e3.astype(jnp.bfloat16), mdsw_ref[...],
                            preferred_element_type=jnp.float32) + mdsb_ref[...])


def embed_sample_heads(x1p, x2p, a2d, ic2d, a3d, ic3d, noise, p):
    n1p = x1p.shape[0]
    n2p = x2p.shape[0]
    g_pad = a2d.shape[0]
    s = noise.shape[0]
    out_shape = (
        jax.ShapeDtypeStruct((n1p, EMBED_DIM), jnp.float32),      # node_emb
        jax.ShapeDtypeStruct((s, n1p, EMBED_DIM), jnp.float32),   # samples
        jax.ShapeDtypeStruct((g_pad, EMBED_DIM), jnp.float32),    # gs2d
        jax.ShapeDtypeStruct((g_pad, EMBED_DIM), jnp.float32),    # gs3d
        jax.ShapeDtypeStruct((2 * g_pad, LANES), jnp.float32),    # props 2d|3d (pad)
        jax.ShapeDtypeStruct((g_pad, LANES), jnp.float32),        # logits3d (pad)
        jax.ShapeDtypeStruct((n2p, LANES), jnp.float32),          # mds xyz (pad)
    )
    return pl.pallas_call(
        functools.partial(_embed_heads_kernel, eps=SAMPLER_EPS),
        out_shape=out_shape,
    )(x1p, p["embed2d_w"], p["embed2d_b"], p["samp_wm"], p["samp_bm"],
      p["samp_ws"], p["samp_bs"], noise, x2p, p["embed3d_w"], p["embed3d_b"],
      a2d, ic2d, a3d, ic3d,
      p["mol_w1"], p["mol_b1"], p["mol_w2"], p["mol_b2"],
      p["bn_scale"], p["bn_shift"],
      p["mlp3d_w1"], p["mlp3d_b1"], p["mlp3d_w2"], p["mlp3d_b2"],
      p["mds_w"], p["mds_b"])


# --- K2: fused diffusor on flattened graph blocks + in-kernel cdist tail ----

def _layernorm(z, g, b):
    mu = jnp.mean(z, axis=-1, keepdims=True)
    var = jnp.mean((z - mu) ** 2, axis=-1, keepdims=True)
    return (z - mu) * jax.lax.rsqrt(var + LN_EPS) * g + b


def _diffusor_kernel(x_ref, bias_ref, maskf_ref,
                     wqkv_ref, bqkv_ref, wo_ref, bo_ref, ln1g_ref, ln1b_ref,
                     w1_ref, b1_ref, w2_ref, b2_ref, ln2g_ref, ln2b_ref,
                     dist_ref, *, nhead, steps, nlayers, gpb, nmax):
    x = x_ref[0]                                   # [Mb, D] f32 (all block graphs)
    bias = bias_ref[0]                             # [Mb, Mb] block-diag key mask
    maskf = maskf_ref[0]                           # [Mb, 1]  valid-query mask
    m, d = x.shape
    hd = d // nhead
    scale = 1.0 / float(np.sqrt(hd))
    for _ in range(steps):
        y = x
        for l in range(nlayers):
            # --- multi-head self-attention (post-norm, batch_first) ---
            yb = y.astype(jnp.bfloat16)
            qkv = (jnp.dot(yb, wqkv_ref[l], preferred_element_type=jnp.float32)
                   + bqkv_ref[l])                  # [Mb, 3D]
            heads = []
            for h in range(nhead):
                q = qkv[:, h * hd:(h + 1) * hd].astype(jnp.bfloat16)
                k = qkv[:, d + h * hd:d + (h + 1) * hd].astype(jnp.bfloat16)
                v = qkv[:, 2 * d + h * hd:2 * d + (h + 1) * hd].astype(jnp.bfloat16)
                s = jax.lax.dot_general(q, k, (((1,), (1,)), ((), ())),
                                        preferred_element_type=jnp.float32)
                s = s * scale + bias
                s = s - jnp.max(s, axis=-1, keepdims=True)
                e = jnp.exp(s)
                pattn = e * pl.reciprocal(jnp.sum(e, axis=-1, keepdims=True),
                                          approx=True)
                heads.append(jnp.dot(pattn.astype(jnp.bfloat16), v,
                                     preferred_element_type=jnp.float32))
            # fused output projection: one [Mb,128]x[128,128] matmul
            cat = jnp.concatenate(heads, axis=-1).astype(jnp.bfloat16)
            attn = (jnp.dot(cat, wo_ref[l], preferred_element_type=jnp.float32)
                    + bo_ref[l])
            # --- add & LayerNorm 1 ---
            z = _layernorm(y + attn, ln1g_ref[l], ln1b_ref[l])
            # --- feed-forward ---
            hid = jnp.maximum(
                jnp.dot(z.astype(jnp.bfloat16), w1_ref[l],
                        preferred_element_type=jnp.float32) + b1_ref[l], 0.0)
            ff = jnp.dot(hid.astype(jnp.bfloat16), w2_ref[l],
                         preferred_element_type=jnp.float32) + b2_ref[l]
            # --- add & LayerNorm 2 ---
            y = _layernorm(z + ff, ln2g_ref[l], ln2b_ref[l])
        x = (y + x) * 0.5
    # zero out padded query rows (== torch re-densify of new_s[mask]) and
    # compute per-graph pairwise-distance matrices in-kernel (fused cdist).
    xm = x * maskf
    xg = xm.reshape(gpb, nmax, d)
    sq = jnp.sum(xg * xg, axis=-1, keepdims=True)           # [gpb, n, 1]
    gm = jnp.einsum('gqd,gkd->gqk', xg, xg,
                    preferred_element_type=jnp.float32)
    d2 = jnp.maximum(sq + jnp.swapaxes(sq, 1, 2) - 2.0 * gm, 0.0)
    dist_ref[...] = jnp.sqrt(d2)


def fused_diffusor(dense_blocks, bias, maskf, p, gpb, nmax):
    nb, mb, d = dense_blocks.shape
    L = N_DIFF_LAYERS
    dp = p["diff"]
    const3 = lambda i: (0, 0, 0)
    # TODO(synk): at production sizes (embed=400->512, FFN=2048) the constant
    # weight inputs should be single-buffered (pipeline_mode=pl.Buffered(1))
    # and vmem_limit_bytes raised; at these test sizes the default fits.
    return pl.pallas_call(
        functools.partial(_diffusor_kernel, nhead=NHEAD, steps=N_DIFF_STEPS,
                          nlayers=L, gpb=gpb, nmax=nmax),
        out_shape=jax.ShapeDtypeStruct((nb * gpb, nmax, nmax), jnp.float32),
        grid=(nb,),
        in_specs=[
            pl.BlockSpec((1, mb, d), lambda i: (i, 0, 0)),
            pl.BlockSpec((1, mb, mb), const3),
            pl.BlockSpec((1, mb, 1), const3),
            pl.BlockSpec((L, d, 3 * d), const3),
            pl.BlockSpec((L, 1, 3 * d), const3),
            pl.BlockSpec((L, d, d), const3),
            pl.BlockSpec((L, 1, d), const3),
            pl.BlockSpec((L, 1, d), const3),
            pl.BlockSpec((L, 1, d), const3),
            pl.BlockSpec((L, d, FFN_DIM), const3),
            pl.BlockSpec((L, 1, FFN_DIM), const3),
            pl.BlockSpec((L, FFN_DIM, d), const3),
            pl.BlockSpec((L, 1, d), const3),
            pl.BlockSpec((L, 1, d), const3),
            pl.BlockSpec((L, 1, d), const3),
        ],
        out_specs=pl.BlockSpec((gpb, nmax, nmax), lambda i: (i, 0, 0)),
        compiler_params=pltpu.CompilerParams(
            dimension_semantics=("parallel",)),
    )(dense_blocks, bias, maskf,
      dp["wqkv"], dp["bqkv"], dp["wo"], dp["bo"], dp["ln1_g"], dp["ln1_b"],
      dp["w1"], dp["b1"], dp["w2"], dp["b2"], dp["ln2_g"], dp["ln2_b"])


# --- K3: batched pairwise-distance matrix (torch.cdist), single block -------

def _cdist_kernel(x_ref, o_ref):
    x = x_ref[...]                                  # [B, N, D]
    sq = jnp.sum(x * x, axis=-1, keepdims=True)     # [B, N, 1]
    gm = jnp.einsum('bqd,bkd->bqk', x, x, preferred_element_type=jnp.float32)
    d2 = jnp.maximum(sq + jnp.swapaxes(sq, 1, 2) - 2.0 * gm, 0.0)
    o_ref[...] = jnp.sqrt(d2)


def cdist_batched(x_dense):
    b, n, _ = x_dense.shape
    return pl.pallas_call(
        _cdist_kernel,
        out_shape=jax.ShapeDtypeStruct((b, n, n), jnp.float32),
    )(x_dense)


# ============================ plain-JAX / host glue ==========================

def _positions(batch_np, num_graphs):
    batch_np = np.asarray(batch_np)
    pos = np.zeros(len(batch_np), np.int64)
    counts = np.zeros(num_graphs, np.int64)
    for i, g in enumerate(batch_np):
        pos[i] = counts[g]
        counts[g] += 1
    return pos, counts


def to_dense_batch(x, batch_np, num_graphs):
    """torch_geometric.utils.to_dense_batch equivalent (static batch vector)."""
    batch_np = np.asarray(batch_np)
    pos, counts = _positions(batch_np, num_graphs)
    n_max = int(counts.max())
    dense = jnp.zeros((num_graphs, n_max, x.shape[-1]), x.dtype)
    dense = dense.at[batch_np, pos].set(x)
    mask_np = np.zeros((num_graphs, n_max), bool)
    mask_np[batch_np, pos] = True
    return dense, mask_np


def to_dense_batch_multi(x_multi, batch_np, num_graphs):
    """to_dense_batch for all samples at once: [S, n, D] -> [S, G, n_max, D]."""
    batch_np = np.asarray(batch_np)
    pos, counts = _positions(batch_np, num_graphs)
    n_max = int(counts.max())
    s = x_multi.shape[0]
    dense = jnp.zeros((s, num_graphs, n_max, x_multi.shape[-1]), x_multi.dtype)
    dense = dense.at[:, batch_np, pos].set(x_multi)
    mask_np = np.zeros((num_graphs, n_max), bool)
    mask_np[batch_np, pos] = True
    return dense, mask_np


def _pool_matrices(batch_np, num_graphs, n_pad, g_pad):
    """Dense mean-pool assignment matrix (bf16, exact 0/1) + inverse counts."""
    batch_np = np.asarray(batch_np)
    a = np.zeros((g_pad, n_pad), np.float32)
    a[batch_np, np.arange(len(batch_np))] = 1.0
    counts = np.maximum(a.sum(axis=1, keepdims=True), 1.0)
    return (jnp.asarray(a, jnp.bfloat16),
            jnp.asarray(1.0 / counts, jnp.float32))


def distance_decoder_pair(xa, batch_a, ba, xb, batch_b, bb):
    """Both wrapper-side distance decoders folded into ONE batched cdist call."""
    dense_a, mask_a = to_dense_batch(xa, batch_a, ba)
    dense_b, mask_b = to_dense_batch(xb, batch_b, bb)
    na, nb = dense_a.shape[1], dense_b.shape[1]
    da, db = dense_a.shape[2], dense_b.shape[2]
    nmx = max(na, nb)
    dmx = max(da, db)
    pa = jnp.pad(dense_a, ((0, 0), (0, nmx - na), (0, dmx - da)))
    pb = jnp.pad(dense_b, ((0, 0), (0, nmx - nb), (0, dmx - db)))
    dm = cdist_batched(jnp.concatenate([pa, pb], axis=0))
    ma = jnp.asarray(mask_a)
    mbm = jnp.asarray(mask_b)
    return ((dm[:ba, :na, :na], ma[:, :, None] & ma[:, None, :]),
            (dm[ba:, :nb, :nb], mbm[:, :, None] & mbm[:, None, :]))


# ============================== MolGAN forward ===============================

def molgan_forward(params, x1, batch1, x2, batch2, noise, n_samples=4,
                   generate_fake=True, predict_features=True,
                   predict_features3d=True, predict_3d=True,
                   return_embeddings=True, return_mds=False):
    batch1 = np.asarray(batch1)
    batch2 = np.asarray(batch2)
    b1 = int(batch1.max()) + 1
    b2 = int(batch2.max()) + 1
    n1, n2 = len(batch1), len(batch2)
    n1p = _round_up(n1, SUBLANES)
    n2p = _round_up(n2, SUBLANES)
    g_pad = _round_up(max(b1, b2), SUBLANES)

    x1p = _pad_rows(x1, n1p)
    x2p = _pad_rows(x2, n2p)

    out = {
        "logits_fake_graphs": None, "logits_real_graphs": None,
        "embeddings_3d": None, "embeddings_2d": None,
        "predicted_properties": None, "predicted_properties3d": None,
        "predicted_distances": None, "reconstructed_geometry": None,
    }

    a2d, ic2d = _pool_matrices(batch1, b1, n1p, g_pad)
    a3d, ic3d = _pool_matrices(batch2, b2, n2p, g_pad)

    # TODO(synk): atom_embedder / atom3d_embedder (model2D/model3D) are
    # externally injected GNNs in the PyTorch module; stubbed here as
    # deterministic linear node embedders fused with Sampler + pooling + heads.
    (node_emb, samples, gs2d, gs3d, props, logits3d, mds_xyz) = embed_sample_heads(
        x1p, x2p, a2d, ic2d, a3d, ic3d, noise, params)

    if return_embeddings:
        out["embeddings_2d"] = gs2d[:b1]

    fake_distance_mats = []
    if generate_fake:
        dense, mask1_np = to_dense_batch_multi(samples[:, :n1], batch1, b1)
        s_n, _, nm, d = dense.shape
        # flatten graphs into large row blocks; keep a size-2 "parallel" axis
        # (v7x megacore) when the sample count splits evenly.
        n_blocks = 2 if s_n % 2 == 0 else 1
        spb = s_n // n_blocks
        gpb = spb * b1                       # graphs per block
        mb = gpb * nm                        # flattened rows per block
        dense_blocks = dense.reshape(n_blocks, mb, d)
        # block-diagonal additive attention bias + valid-query mask; identical
        # for every block (built once, constant index_map -> no tiling / DMA dup)
        bias_np = np.full((mb, mb), NEG_INF, np.float32)
        maskf_np = np.zeros((mb, 1), np.float32)
        for gl in range(gpb):
            bg = gl % b1
            r0 = gl * nm
            bias_np[r0:r0 + nm, r0:r0 + nm] = np.where(
                mask1_np[bg][None, :], 0.0, NEG_INF)
            maskf_np[r0:r0 + nm, 0] = mask1_np[bg].astype(np.float32)
        bias = jnp.asarray(bias_np)[None]
        maskf = jnp.asarray(maskf_np)[None]
        dists = fused_diffusor(dense_blocks, bias, maskf, params, gpb, nm)
        dists = dists.reshape(s_n, b1, nm, nm)
        mask1_j = jnp.asarray(mask1_np)
        mask_ext = mask1_j[:, :, None] & mask1_j[:, None, :]
        fake_distance_mats = [(dists[s], mask_ext) for s in range(s_n)]
        # TODO(synk): dense_to_sparse / remove_self_loops / to_undirected /
        # coalesce / Batch.from_data_list and re-running atom3d_embedder on the
        # generated fake graphs are ragged, data-dependent graph-assembly ops
        # with no clean Pallas equivalent; logits_fake_graphs stays None.
        out["logits_fake_graphs"] = None

    need_geo = generate_fake or return_embeddings or return_mds or predict_features3d
    if need_geo:
        out["logits_real_graphs"] = logits3d[:b2, :1]
        out["embeddings_3d"] = gs3d[:b2]
        out["predicted_properties3d"] = props[g_pad:g_pad + b2, :22]

    if predict_features:
        out["predicted_properties"] = props[:b1, :22]

    if need_geo or predict_3d:
        (pd, pd_mask), (rg, rg_mask) = distance_decoder_pair(
            node_emb[:n1], batch1, b1, mds_xyz[:n2, :3], batch2, b2)
        if predict_3d:
            out["predicted_distances"] = (pd, pd_mask)
        if need_geo:
            out["reconstructed_geometry"] = (rg, rg_mask)

    return out, fake_distance_mats


# ============================== parameter init ===============================

def init_params(key, f2d, f3d):
    keys = iter(jax.random.split(key, 64))

    def w(shape, scale=0.05):
        return (scale * jax.random.normal(next(keys), shape)).astype(jnp.bfloat16)

    def zeros(shape):
        return jnp.zeros(shape, jnp.float32)

    def ones(shape):
        return jnp.ones(shape, jnp.float32)

    def pad_cols(a, n):
        return jnp.pad(a, ((0, 0), (0, n - a.shape[1])))

    p = {}
    p["embed2d_w"] = w((f2d, EMBED_DIM)); p["embed2d_b"] = zeros((1, EMBED_DIM))
    p["embed3d_w"] = w((f3d, EMBED_DIM)); p["embed3d_b"] = zeros((1, EMBED_DIM))
    # Sampler
    p["samp_wm"] = w((EMBED_DIM, EMBED_DIM)); p["samp_bm"] = zeros((1, EMBED_DIM))
    p["samp_ws"] = w((EMBED_DIM, EMBED_DIM)); p["samp_bs"] = zeros((1, EMBED_DIM))
    # Diffusor transformer layers, stacked along a leading layer axis
    L = N_DIFF_LAYERS
    p["diff"] = {
        "wqkv": w((L, EMBED_DIM, 3 * EMBED_DIM)),
        "bqkv": zeros((L, 1, 3 * EMBED_DIM)),
        "wo": w((L, EMBED_DIM, EMBED_DIM)),
        "bo": zeros((L, 1, EMBED_DIM)),
        "ln1_g": ones((L, 1, EMBED_DIM)), "ln1_b": zeros((L, 1, EMBED_DIM)),
        "w1": w((L, EMBED_DIM, FFN_DIM)), "b1": zeros((L, 1, FFN_DIM)),
        "w2": w((L, FFN_DIM, EMBED_DIM)), "b2": zeros((L, 1, EMBED_DIM)),
        "ln2_g": ones((L, 1, EMBED_DIM)), "ln2_b": zeros((L, 1, EMBED_DIM)),
    }
    # molecular_decoder: Linear(D,H) -> ReLU -> Linear(H,22)  (output padded to 128)
    p["mol_w1"] = w((EMBED_DIM, HIDDEN_DIM)); p["mol_b1"] = zeros((1, HIDDEN_DIM))
    p["mol_w2"] = pad_cols(w((HIDDEN_DIM, 22)), LANES); p["mol_b2"] = zeros((1, LANES))
    # mds: Linear(D, 3)  (output padded to 128)
    p["mds_w"] = pad_cols(w((EMBED_DIM, 3)), LANES); p["mds_b"] = zeros((1, LANES))
    # atom3d_embedder_mlp: BatchNorm1d(eval) -> Linear(D,H) -> ReLU -> Linear(H,1)
    p["bn_scale"] = (ones((1, EMBED_DIM)) / np.sqrt(1.0 + BN_EPS)).astype(jnp.float32)
    p["bn_shift"] = zeros((1, EMBED_DIM))
    p["mlp3d_w1"] = w((EMBED_DIM, HIDDEN_DIM)); p["mlp3d_b1"] = zeros((1, HIDDEN_DIM))
    p["mlp3d_w2"] = pad_cols(w((HIDDEN_DIM, 1)), LANES); p["mlp3d_b2"] = zeros((1, LANES))
    return p


# ==================================== main ===================================

if __name__ == "__main__":
    key = jax.random.PRNGKey(0)
    k1, k2, k3, kn = jax.random.split(key, 4)

    F2D, F3D = 16, 16
    # two graphs per "batch" of graph data (static batch assignment vectors)
    batch1 = np.array([0] * 8 + [1] * 6, np.int32)     # 2D graphs: 8 + 6 nodes
    batch2 = np.array([0] * 7 + [1] * 5, np.int32)     # 3D graphs: 7 + 5 nodes
    n_samples = 4
    n1_pad = _round_up(len(batch1), SUBLANES)

    x1 = jax.random.normal(k1, (len(batch1), F2D), jnp.float32)
    x2 = jax.random.normal(k2, (len(batch2), F3D), jnp.float32)
    params = init_params(k3, F2D, F3D)
    noise = jax.random.normal(kn, (n_samples, n1_pad, EMBED_DIM), jnp.float32)

    fwd = jax.jit(lambda p, a, b, nz: molgan_forward(
        p, a, batch1, b, batch2, nz, n_samples=n_samples))
    out, fake_dists = fwd(params, x1, x2, noise)

    jax.block_until_ready(jax.tree_util.tree_leaves((out, fake_dists)))
    print("KERNEL_OK")
</pallas_src>

<mosaic_0001>
module attributes {stable_mosaic.version = 11 : i64} {
  func.func @_embed_heads_kernel(%arg0: memref<16x16xf32, #tpu.memory_space<vmem>>, %arg1: memref<16x128xbf16, #tpu.memory_space<vmem>>, %arg2: memref<1x128xf32, #tpu.memory_space<vmem>>, %arg3: memref<128x128xbf16, #tpu.memory_space<vmem>>, %arg4: memref<1x128xf32, #tpu.memory_space<vmem>>, %arg5: memref<128x128xbf16, #tpu.memory_space<vmem>>, %arg6: memref<1x128xf32, #tpu.memory_space<vmem>>, %arg7: memref<4x16x128xf32, #tpu.memory_space<vmem>>, %arg8: memref<16x16xf32, #tpu.memory_space<vmem>>, %arg9: memref<16x128xbf16, #tpu.memory_space<vmem>>, %arg10: memref<1x128xf32, #tpu.memory_space<vmem>>, %arg11: memref<8x16xbf16, #tpu.memory_space<vmem>>, %arg12: memref<8x1xf32, #tpu.memory_space<vmem>>, %arg13: memref<8x16xbf16, #tpu.memory_space<vmem>>, %arg14: memref<8x1xf32, #tpu.memory_space<vmem>>, %arg15: memref<128x256xbf16, #tpu.memory_space<vmem>>, %arg16: memref<1x256xf32, #tpu.memory_space<vmem>>, %arg17: memref<256x128xbf16, #tpu.memory_space<vmem>>, %arg18: memref<1x128xf32, #tpu.memory_space<vmem>>, %arg19: memref<1x128xf32, #tpu.memory_space<vmem>>, %arg20: memref<1x128xf32, #tpu.memory_space<vmem>>, %arg21: memref<128x256xbf16, #tpu.memory_space<vmem>>, %arg22: memref<1x256xf32, #tpu.memory_space<vmem>>, %arg23: memref<256x128xbf16, #tpu.memory_space<vmem>>, %arg24: memref<1x128xf32, #tpu.memory_space<vmem>>, %arg25: memref<128x128xbf16, #tpu.memory_space<vmem>>, %arg26: memref<1x128xf32, #tpu.memory_space<vmem>>, %arg27: memref<16x128xf32, #tpu.memory_space<vmem>>, %arg28: memref<4x16x128xf32, #tpu.memory_space<vmem>>, %arg29: memref<8x128xf32, #tpu.memory_space<vmem>>, %arg30: memref<8x128xf32, #tpu.memory_space<vmem>>, %arg31: memref<16x128xf32, #tpu.memory_space<vmem>>, %arg32: memref<8x128xf32, #tpu.memory_space<vmem>>, %arg33: memref<16x128xf32, #tpu.memory_space<vmem>>) attributes {dimension_semantics = [], scalar_prefetch = 0 : i64, scratch_operands = 0 : i64, tpu.core_type = #tpu.core_type<tc>} {
    %c0 = arith.constant 0 : index
    %c0_0 = arith.constant 0 : index
    %0 = vector.load %arg0[%c0, %c0_0] : memref<16x16xf32, #tpu.memory_space<vmem>>, vector<16x16xf32>
    %1 = arith.truncf %0 : vector<16x16xf32> to vector<16x16xbf16>
    %c0_1 = arith.constant 0 : index
    %c0_2 = arith.constant 0 : index
    %2 = vector.load %arg1[%c0_1, %c0_2] : memref<16x128xbf16, #tpu.memory_space<vmem>>, vector<16x128xbf16>
    %cst = arith.constant dense<0.000000e+00> : vector<16x128xf32>
    %3 = tpu.matmul %1, %2, %cst {dimension_numbers = #tpu.dot_dimension_numbers<[1], [0], [0], [1], [0, 0, 1, 1], [], []>} : vector<16x16xbf16>, vector<16x128xbf16>, vector<16x128xf32> -> vector<16x128xf32>
    %c0_3 = arith.constant 0 : index
    %c0_4 = arith.constant 0 : index
    %4 = vector.load %arg2[%c0_3, %c0_4] : memref<1x128xf32, #tpu.memory_space<vmem>>, vector<1x128xf32>
    %5 = vector.broadcast %4 : vector<1x128xf32> to vector<16x128xf32>
    %6 = arith.addf %3, %5 : vector<16x128xf32>
    %c0_5 = arith.constant 0 : index
    %c0_6 = arith.constant 0 : index
    %7 = vector.load %arg27[%c0_5, %c0_6] : memref<16x128xf32, #tpu.memory_space<vmem>>, vector<16x128xf32>
    tpu.vector_store %arg27[%c0_5, %c0_6], %6 {strides = array<i32>} : memref<16x128xf32, #tpu.memory_space<vmem>>, vector<16x128xf32>,
    %cst_7 = arith.constant 0.000000e+00 : f32
    %8 = vector.broadcast %cst_7 : f32 to vector<16x128xf32>
    %9 = arith.maximumf %6, %8 : vector<16x128xf32>
    %10 = arith.truncf %9 : vector<16x128xf32> to vector<16x128xbf16>
    %c0_8 = arith.constant 0 : index
    %c0_9 = arith.constant 0 : index
    %11 = vector.load %arg3[%c0_8, %c0_9] : memref<128x128xbf16, #tpu.memory_space<vmem>>, vector<128x128xbf16>
    %cst_10 = arith.constant dense<0.000000e+00> : vector<16x128xf32>
    %12 = tpu.matmul %10, %11, %cst_10 {dimension_numbers = #tpu.dot_dimension_numbers<[1], [0], [0], [1], [0, 0, 1, 1], [], []>} : vector<16x128xbf16>, vector<128x128xbf16>, vector<16x128xf32> -> vector<16x128xf32>
    %c0_11 = arith.constant 0 : index
    %c0_12 = arith.constant 0 : index
    %13 = vector.load %arg4[%c0_11, %c0_12] : memref<1x128xf32, #tpu.memory_space<vmem>>, vector<1x128xf32>
    %14 = vector.broadcast %13 : vector<1x128xf32> to vector<16x128xf32>
    %15 = arith.addf %12, %14 : vector<16x128xf32>
    %c0_13 = arith.constant 0 : index
    %c0_14 = arith.constant 0 : index
    %16 = vector.load %arg5[%c0_13, %c0_14] : memref<128x128xbf16, #tpu.memory_space<vmem>>, vector<128x128xbf16>
    %cst_15 = arith.constant dense<0.000000e+00> : vector<16x128xf32>
    %17 = tpu.matmul %10, %16, %cst_15 {dimension_numbers = #tpu.dot_dimension_numbers<[1], [0], [0], [1], [0, 0, 1, 1], [], []>} : vector<16x128xbf16>, vector<128x128xbf16>, vector<16x128xf32> -> vector<16x128xf32>
    %c0_16 = arith.constant 0 : index
    %c0_17 = arith.constant 0 : index
    %18 = vector.load %arg6[%c0_16, %c0_17] : memref<1x128xf32, #tpu.memory_space<vmem>>, vector<1x128xf32>
    %19 = vector.broadcast %18 : vector<1x128xf32> to vector<16x128xf32>
    %20 = arith.addf %17, %19 : vector<16x128xf32>
    %cst_18 = arith.constant 0.000000e+00 : f32
    %21 = vector.broadcast %cst_18 : f32 to vector<16x128xf32>
    %22 = arith.maximumf %20, %21 : vector<16x128xf32>
    %23 = math.absf %20 : vector<16x128xf32>
    %cst_19 = arith.constant 0.000000e+00 : f32
    %24 = vector.broadcast %cst_19 : f32 to vector<16x128xf32>
    %25 = arith.subf %24, %23 : vector<16x128xf32>
    %26 = math.exp %25 : vector<16x128xf32>
    %27 = math.log1p %26 : vector<16x128xf32>
    %28 = arith.addf %22, %27 : vector<16x128xf32>
    %29 = vector.shape_cast %15 : vector<16x128xf32> to vector<1x16x128xf32>
    %cst_20 = arith.constant 9.99999974E-5 : f32
    %30 = vector.broadcast %cst_20 : f32 to vector<16x128xf32>
    %31 = arith.addf %28, %30 : vector<16x128xf32>
    %32 = vector.shape_cast %31 : vector<16x128xf32> to vector<1x16x128xf32>
    %c0_21 = arith.constant 0 : index
    %c0_22 = arith.constant 0 : index
    %c0_23 = arith.constant 0 : index
    %33 = vector.load %arg7[%c0_21, %c0_22, %c0_23] : memref<4x16x128xf32, #tpu.memory_space<vmem>>, vector<4x16x128xf32>
    %34 = vector.broadcast %32 : vector<1x16x128xf32> to vector<4x16x128xf32>
    %35 = arith.mulf %34, %33 : vector<4x16x128xf32>
    %36 = vector.broadcast %29 : vector<1x16x128xf32> to vector<4x16x128xf32>
    %37 = arith.addf %36, %35 : vector<4x16x128xf32>
    %c0_24 = arith.constant 0 : index
    %c0_25 = arith.constant 0 : index
    %c0_26 = arith.constant 0 : index
    %38 = vector.load %arg28[%c0_24, %c0_25, %c0_26] : memref<4x16x128xf32, #tpu.memory_space<vmem>>, vector<4x16x128xf32>
    tpu.vector_store %arg28[%c0_24, %c0_25, %c0_26], %37 {strides = array<i32>} : memref<4x16x128xf32, #tpu.memory_space<vmem>>, vector<4x16x128xf32>,
    %c0_27 = arith.constant 0 : index
    %c0_28 = arith.constant 0 : index
    %39 = vector.load %arg8[%c0_27, %c0_28] : memref<16x16xf32, #tpu.memory_space<vmem>>, vector<16x16xf32>
    %40 = arith.truncf %39 : vector<16x16xf32> to vector<16x16xbf16>
    %c0_29 = arith.constant 0 : index
    %c0_30 = arith.constant 0 : index
    %41 = vector.load %arg9[%c0_29, %c0_30] : memref<16x128xbf16, #tpu.memory_space<vmem>>, vector<16x128xbf16>
    %cst_31 = arith.constant dense<0.000000e+00> : vector<16x128xf32>
    %42 = tpu.matmul %40, %41, %cst_31 {dimension_numbers = #tpu.dot_dimension_numbers<[1], [0], [0], [1], [0, 0, 1, 1], [], []>} : vector<16x16xbf16>, vector<16x128xbf16>, vector<16x128xf32> -> vector<16x128xf32>
    %c0_32 = arith.constant 0 : index
    %c0_33 = arith.constant 0 : index
    %43 = vector.load %arg10[%c0_32, %c0_33] : memref<1x128xf32, #tpu.memory_space<vmem>>, vector<1x128xf32>
    %44 = vector.broadcast %43 : vector<1x128xf32> to vector<16x128xf32>
    %45 = arith.addf %42, %44 : vector<16x128xf32>
    %c0_34 = arith.constant 0 : index
    %c0_35 = arith.constant 0 : index
    %46 = vector.load %arg11[%c0_34, %c0_35] : memref<8x16xbf16, #tpu.memory_space<vmem>>, vector<8x16xbf16>
    %47 = arith.truncf %6 : vector<16x128xf32> to vector<16x128xbf16>
    %cst_36 = arith.constant dense<0.000000e+00> : vector<8x128xf32>
    %48 = tpu.matmul %46, %47, %cst_36 {dimension_numbers = #tpu.dot_dimension_numbers<[1], [0], [0], [1], [0, 0, 1, 1], [], []>} : vector<8x16xbf16>, vector<16x128xbf16>, vector<8x128xf32> -> vector<8x128xf32>
    %c0_37 = arith.constant 0 : index
    %c0_38 = arith.constant 0 : index
    %49 = vector.load %arg12[%c0_37, %c0_38] : memref<8x1xf32, #tpu.memory_space<vmem>>, vector<8x1xf32>
    %50 = vector.broadcast %49 : vector<8x1xf32> to vector<8x128xf32>
    %51 = arith.mulf %48, %50 : vector<8x128xf32>
    %c0_39 = arith.constant 0 : index
    %c0_40 = arith.constant 0 : index
    %52 = vector.load %arg13[%c0_39, %c0_40] : memref<8x16xbf16, #tpu.memory_space<vmem>>, vector<8x16xbf16>
    %53 = arith.truncf %45 : vector<16x128xf32> to vector<16x128xbf16>
    %cst_41 = arith.constant dense<0.000000e+00> : vector<8x128xf32>
    %54 = tpu.matmul %52, %53, %cst_41 {dimension_numbers = #tpu.dot_dimension_numbers<[1], [0], [0], [1], [0, 0, 1, 1], [], []>} : vector<8x16xbf16>, vector<16x128xbf16>, vector<8x128xf32> -> vector<8x128xf32>
    %c0_42 = arith.constant 0 : index
    %c0_43 = arith.constant 0 : index
    %55 = vector.load %arg14[%c0_42, %c0_43] : memref<8x1xf32, #tpu.memory_space<vmem>>, vector<8x1xf32>
    %56 = vector.broadcast %55 : vector<8x1xf32> to vector<8x128xf32>
    %57 = arith.mulf %54, %56 : vector<8x128xf32>
    %c0_44 = arith.constant 0 : index
    %c0_45 = arith.constant 0 : index
    %58 = vector.load %arg29[%c0_44, %c0_45] : memref<8x128xf32, #tpu.memory_space<vmem>>, vector<8x128xf32>
    tpu.vector_store %arg29[%c0_44, %c0_45], %51 {strides = array<i32>} : memref<8x128xf32, #tpu.memory_space<vmem>>, vector<8x128xf32>,
    %c0_46 = arith.constant 0 : index
    %c0_47 = arith.constant 0 : index
    %59 = vector.load %arg30[%c0_46, %c0_47] : memref<8x128xf32, #tpu.memory_space<vmem>>, vector<8x128xf32>
    tpu.vector_store %arg30[%c0_46, %c0_47], %57 {strides = array<i32>} : memref<8x128xf32, #tpu.memory_space<vmem>>, vector<8x128xf32>,
    %60 = tpu.concatenate %51, %57 in 0 : vector<8x128xf32>, vector<8x128xf32> -> vector<16x128xf32>
    %61 = arith.truncf %60 : vector<16x128xf32> to vector<16x128xbf16>
    %c0_48 = arith.constant 0 : index
    %c0_49 = arith.constant 0 : index
    %62 = vector.load %arg15[%c0_48, %c0_49] : memref<128x256xbf16, #tpu.memory_space<vmem>>, vector<128x256xbf16>
    %cst_50 = arith.constant dense<0.000000e+00> : vector<16x256xf32>
    %63 = tpu.matmul %61, %62, %cst_50 {dimension_numbers = #tpu.dot_dimension_numbers<[1], [0], [0], [1], [0, 0, 1, 1], [], []>} : vector<16x128xbf16>, vector<128x256xbf16>, vector<16x256xf32> -> vector<16x256xf32>
    %c0_51 = arith.constant 0 : index
    %c0_52 = arith.constant 0 : index
    %64 = vector.load %arg16[%c0_51, %c0_52] : memref<1x256xf32, #tpu.memory_space<vmem>>, vector<1x256xf32>
    %65 = vector.broadcast %64 : vector<1x256xf32> to vector<16x256xf32>
    %66 = arith.addf %63, %65 : vector<16x256xf32>
    %cst_53 = arith.constant 0.000000e+00 : f32
    %67 = vector.broadcast %cst_53 : f32 to vector<16x256xf32>
    %68 = arith.maximumf %66, %67 : vector<16x256xf32>
    %69 = arith.truncf %68 : vector<16x256xf32> to vector<16x256xbf16>
    %c0_54 = arith.constant 0 : index
    %c0_55 = arith.constant 0 : index
    %70 = vector.load %arg17[%c0_54, %c0_55] : memref<256x128xbf16, #tpu.memory_space<vmem>>, vector<256x128xbf16>
    %cst_56 = arith.constant dense<0.000000e+00> : vector<16x128xf32>
    %71 = tpu.matmul %69, %70, %cst_56 {dimension_numbers = #tpu.dot_dimension_numbers<[1], [0], [0], [1], [0, 0, 1, 1], [], []>} : vector<16x256xbf16>, vector<256x128xbf16>, vector<16x128xf32> -> vector<16x128xf32>
    %c0_57 = arith.constant 0 : index
    %c0_58 = arith.constant 0 : index
    %72 = vector.load %arg18[%c0_57, %c0_58] : memref<1x128xf32, #tpu.memory_space<vmem>>, vector<1x128xf32>
    %73 = vector.broadcast %72 : vector<1x128xf32> to vector<16x128xf32>
    %74 = arith.addf %71, %73 : vector<16x128xf32>
    %c0_59 = arith.constant 0 : index
    %c0_60 = arith.constant 0 : index
    %75 = vector.load %arg31[%c0_59, %c0_60] : memref<16x128xf32, #tpu.memory_space<vmem>>, vector<16x128xf32>
    tpu.vector_store %arg31[%c0_59, %c0_60], %74 {strides = array<i32>} : memref<16x128xf32, #tpu.memory_space<vmem>>, vector<16x128xf32>,
    %c0_61 = arith.constant 0 : index
    %c0_62 = arith.constant 0 : index
    %76 = vector.load %arg19[%c0_61, %c0_62] : memref<1x128xf32, #tpu.memory_space<vmem>>, vector<1x128xf32>
    %77 = vector.broadcast %76 : vector<1x128xf32> to vector<8x128xf32>
    %78 = arith.mulf %57, %77 : vector<8x128xf32>
    %c0_63 = arith.constant 0 : index
    %c0_64 = arith.constant 0 : index
    %79 = vector.load %arg20[%c0_63, %c0_64] : memref<1x128xf32, #tpu.memory_space<vmem>>, vector<1x128xf32>
    %80 = vector.broadcast %79 : vector<1x128xf32> to vector<8x128xf32>
    %81 = arith.addf %78, %80 : vector<8x128xf32>
    %82 = arith.truncf %81 : vector<8x128xf32> to vector<8x128xbf16>
    %c0_65 = arith.constant 0 : index
    %c0_66 = arith.constant 0 : index
    %83 = vector.load %arg21[%c0_65, %c0_66] : memref<128x256xbf16, #tpu.memory_space<vmem>>, vector<128x256xbf16>
    %cst_67 = arith.constant dense<0.000000e+00> : vector<8x256xf32>
    %84 = tpu.matmul %82, %83, %cst_67 {dimension_numbers = #tpu.dot_dimension_numbers<[1], [0], [0], [1], [0, 0, 1, 1], [], []>} : vector<8x128xbf16>, vector<128x256xbf16>, vector<8x256xf32> -> vector<8x256xf32>
    %c0_68 = arith.constant 0 : index
    %c0_69 = arith.constant 0 : index
    %85 = vector.load %arg22[%c0_68, %c0_69] : memref<1x256xf32, #tpu.memory_space<vmem>>, vector<1x256xf32>
    %86 = vector.broadcast %85 : vector<1x256xf32> to vector<8x256xf32>
    %87 = arith.addf %84, %86 : vector<8x256xf32>
    %cst_70 = arith.constant 0.000000e+00 : f32
    %88 = vector.broadcast %cst_70 : f32 to vector<8x256xf32>
    %89 = arith.maximumf %87, %88 : vector<8x256xf32>
    %90 = arith.truncf %89 : vector<8x256xf32> to vector<8x256xbf16>
    %c0_71 = arith.constant 0 : index
    %c0_72 = arith.constant 0 : index
    %91 = vector.load %arg23[%c0_71, %c0_72] : memref<256x128xbf16, #tpu.memory_space<vmem>>, vector<256x128xbf16>
    %cst_73 = arith.constant dense<0.000000e+00> : vector<8x128xf32>
    %92 = tpu.matmul %90, %91, %cst_73 {dimension_numbers = #tpu.dot_dimension_numbers<[1], [0], [0], [1], [0, 0, 1, 1], [], []>} : vector<8x256xbf16>, vector<256x128xbf16>, vector<8x128xf32> -> vector<8x128xf32>
    %c0_74 = arith.constant 0 : index
    %c0_75 = arith.constant 0 : index
    %93 = vector.load %arg24[%c0_74, %c0_75] : memref<1x128xf32, #tpu.memory_space<vmem>>, vector<1x128xf32>
    %94 = vector.broadcast %93 : vector<1x128xf32> to vector<8x128xf32>
    %95 = arith.addf %92, %94 : vector<8x128xf32>
    %c0_76 = arith.constant 0 : index
    %c0_77 = arith.constant 0 : index
    %96 = vector.load %arg32[%c0_76, %c0_77] : memref<8x128xf32, #tpu.memory_space<vmem>>, vector<8x128xf32>
    tpu.vector_store %arg32[%c0_76, %c0_77], %95 {strides = array<i32>} : memref<8x128xf32, #tpu.memory_space<vmem>>, vector<8x128xf32>,
    %97 = arith.truncf %45 : vector<16x128xf32> to vector<16x128xbf16>
    %c0_78 = arith.constant 0 : index
    %c0_79 = arith.constant 0 : index
    %98 = vector.load %arg25[%c0_78, %c0_79] : memref<128x128xbf16, #tpu.memory_space<vmem>>, vector<128x128xbf16>
    %cst_80 = arith.constant dense<0.000000e+00> : vector<16x128xf32>
    %99 = tpu.matmul %97, %98, %cst_80 {dimension_numbers = #tpu.dot_dimension_numbers<[1], [0], [0], [1], [0, 0, 1, 1], [], []>} : vector<16x128xbf16>, vector<128x128xbf16>, vector<16x128xf32> -> vector<16x128xf32>
    %c0_81 = arith.constant 0 : index
    %c0_82 = arith.constant 0 : index
    %100 = vector.load %arg26[%c0_81, %c0_82] : memref<1x128xf32, #tpu.memory_space<vmem>>, vector<1x128xf32>
    %101 = vector.broadcast %100 : vector<1x128xf32> to vector<16x128xf32>
    %102 = arith.addf %99, %101 : vector<16x128xf32>
    %c0_83 = arith.constant 0 : index
    %c0_84 = arith.constant 0 : index
    %103 = vector.load %arg33[%c0_83, %c0_84] : memref<16x128xf32, #tpu.memory_space<vmem>>, vector<16x128xf32>
    tpu.vector_store %arg33[%c0_83, %c0_84], %102 {strides = array<i32>} : memref<16x128xf32, #tpu.memory_space<vmem>>, vector<16x128xf32>,
    return
  }
}

module attributes {stable_mosaic.version = 11 : i64} {
  func.func @_cdist_kernel(%arg0: memref<4x8x128xf32, #tpu.memory_space<vmem>>, %arg1: memref<4x8x8xf32, #tpu.memory_space<vmem>>) attributes {dimension_semantics = [], scalar_prefetch = 0 : i64, scratch_operands = 0 : i64, tpu.core_type = #tpu.core_type<tc>} {
    %c0 = arith.constant 0 : index
    %c0_0 = arith.constant 0 : index
    %c0_1 = arith.constant 0 : index
    %0 = vector.load %arg0[%c0, %c0_0, %c0_1] : memref<4x8x128xf32, #tpu.memory_space<vmem>>, vector<4x8x128xf32>
    %1 = arith.mulf %0, %0 : vector<4x8x128xf32>
    %cst = arith.constant dense<0.000000e+00> : vector<4x8xf32>
    %2 = vector.multi_reduction <add>, %1, %cst [2] : vector<4x8x128xf32> to vector<4x8xf32>
    %3 = vector.shape_cast %2 : vector<4x8xf32> to vector<4x8x1xf32>
    "tpu.trace_start"() <{level = 10 : i32, message = "bqd,bkd->bqk"}> : () -> ()
    %cst_2 = arith.constant dense<0.000000e+00> : vector<4x8x8xf32>
    %4 = tpu.matmul %0, %0, %cst_2 {dimension_numbers = #tpu.dot_dimension_numbers<[2], [2], [1], [1], [0, 0, 0, 1, 1, 1], [0], [0]>} : vector<4x8x128xf32>, vector<4x8x128xf32>, vector<4x8x8xf32> -> vector<4x8x8xf32>
    "tpu.trace_stop"() : () -> ()
    %5 = tpu.transpose %3, [0, 2, 1] : vector<4x8x1xf32> -> vector<4x1x8xf32>
    %6 = vector.broadcast %3 : vector<4x8x1xf32> to vector<4x8x8xf32>
    %7 = vector.broadcast %5 : vector<4x1x8xf32> to vector<4x8x8xf32>
    %8 = arith.addf %6, %7 : vector<4x8x8xf32>
    %cst_3 = arith.constant 2.000000e+00 : f32
    %9 = vector.broadcast %cst_3 : f32 to vector<4x8x8xf32>
    %10 = arith.mulf %9, %4 : vector<4x8x8xf32>
    %11 = arith.subf %8, %10 : vector<4x8x8xf32>
    %cst_4 = arith.constant 0.000000e+00 : f32
    %12 = vector.broadcast %cst_4 : f32 to vector<4x8x8xf32>
    %13 = arith.maximumf %11, %12 : vector<4x8x8xf32>
    %14 = math.sqrt %13 : vector<4x8x8xf32>
    %c0_5 = arith.constant 0 : index
    %c0_6 = arith.constant 0 : index
    %c0_7 = arith.constant 0 : index
    %15 = vector.load %arg1[%c0_5, %c0_6, %c0_7] : memref<4x8x8xf32, #tpu.memory_space<vmem>>, vector<4x8x8xf32>
    tpu.vector_store %arg1[%c0_5, %c0_6, %c0_7], %14 {strides = array<i32>} : memref<4x8x8xf32, #tpu.memory_space<vmem>>, vector<4x8x8xf32>,
    return
  }
}

module attributes {stable_mosaic.version = 11 : i64} {
  func.func @_diffusor_kernel(%arg0: i32, %arg1: memref<1x32x128xf32, #tpu.memory_space<vmem>>, %arg2: memref<1x32x32xf32, #tpu.memory_space<vmem>>, %arg3: memref<1x32x1xf32, #tpu.memory_space<vmem>>, %arg4: memref<2x128x384xbf16, #tpu.memory_space<vmem>>, %arg5: memref<2x1x384xf32, #tpu.memory_space<vmem>>, %arg6: memref<2x128x128xbf16, #tpu.memory_space<vmem>>, %arg7: memref<2x1x128xf32, #tpu.memory_space<vmem>>, %arg8: memref<2x1x128xf32, #tpu.memory_space<vmem>>, %arg9: memref<2x1x128xf32, #tpu.memory_space<vmem>>, %arg10: memref<2x128x2048xbf16, #tpu.memory_space<vmem>>, %arg11: memref<2x1x2048xf32, #tpu.memory_space<vmem>>, %arg12: memref<2x2048x128xbf16, #tpu.memory_space<vmem>>, %arg13: memref<2x1x128xf32, #tpu.memory_space<vmem>>, %arg14: memref<2x1x128xf32, #tpu.memory_space<vmem>>, %arg15: memref<2x1x128xf32, #tpu.memory_space<vmem>>, %arg16: memref<4x8x8xf32, #tpu.memory_space<vmem>>) attributes {dimension_semantics = [#tpu.dimension_semantics<parallel>], iteration_bounds = array<i64: 2>, scalar_prefetch = 0 : i64, scratch_operands = 0 : i64, tpu.core_type = #tpu.core_type<tc>, window_params = [{transform_indices = @transform_0, window_bounds = array<i64: 1, 32, 128>}, {pipeline_mode = #tpu.pipeline_mode<synchronous>, transform_indices = @transform_1, window_bounds = array<i64: 1, 32, 32>}, {pipeline_mode = #tpu.pipeline_mode<synchronous>, transform_indices = @transform_2, window_bounds = array<i64: 1, 32, 1>}, {pipeline_mode = #tpu.pipeline_mode<synchronous>, transform_indices = @transform_3, window_bounds = array<i64: 2, 128, 384>}, {pipeline_mode = #tpu.pipeline_mode<synchronous>, transform_indices = @transform_4, window_bounds = array<i64: 2, 1, 384>}, {pipeline_mode = #tpu.pipeline_mode<synchronous>, transform_indices = @transform_5, window_bounds = array<i64: 2, 128, 128>}, {pipeline_mode = #tpu.pipeline_mode<synchronous>, transform_indices = @transform_6, window_bounds = array<i64: 2, 1, 128>}, {pipeline_mode = #tpu.pipeline_mode<synchronous>, transform_indices = @transform_7, window_bounds = array<i64: 2, 1, 128>}, {pipeline_mode = #tpu.pipeline_mode<synchronous>, transform_indices = @transform_8, window_bounds = array<i64: 2, 1, 128>}, {pipeline_mode = #tpu.pipeline_mode<synchronous>, transform_indices = @transform_9, window_bounds = array<i64: 2, 128, 2048>}, {pipeline_mode = #tpu.pipeline_mode<synchronous>, transform_indices = @transform_10, window_bounds = array<i64: 2, 1, 2048>}, {pipeline_mode = #tpu.pipeline_mode<synchronous>, transform_indices = @transform_11, window_bounds = array<i64: 2, 2048, 128>}, {pipeline_mode = #tpu.pipeline_mode<synchronous>, transform_indices = @transform_12, window_bounds = array<i64: 2, 1, 128>}, {pipeline_mode = #tpu.pipeline_mode<synchronous>, transform_indices = @transform_13, window_bounds = array<i64: 2, 1, 128>}, {pipeline_mode = #tpu.pipeline_mode<synchronous>, transform_indices = @transform_14, window_bounds = array<i64: 2, 1, 128>}, {transform_indices = @transform_15, window_bounds = array<i64: 4, 8, 8>}]} {
    %c0 = arith.constant 0 : index
    %c0_0 = arith.constant 0 : index
    %c0_1 = arith.constant 0 : index
    %0 = vector.load %arg1[%c0, %c0_0, %c0_1] : memref<1x32x128xf32, #tpu.memory_space<vmem>>, vector<1x32x128xf32>
    %1 = vector.shape_cast %0 : vector<1x32x128xf32> to vector<32x128xf32>
    %c0_2 = arith.constant 0 : index
    %c0_3 = arith.constant 0 : index
    %c0_4 = arith.constant 0 : index
    %2 = vector.load %arg2[%c0_2, %c0_3, %c0_4] : memref<1x32x32xf32, #tpu.memory_space<vmem>>, vector<1x32x32xf32>
    %3 = vector.shape_cast %2 : vector<1x32x32xf32> to vector<32x32xf32>
    %c0_5 = arith.constant 0 : index
    %c0_6 = arith.constant 0 : index
    %c0_7 = arith.constant 0 : index
    %4 = vector.load %arg3[%c0_5, %c0_6, %c0_7] : memref<1x32x1xf32, #tpu.memory_space<vmem>>, vector<1x32x1xf32>
    %5 = vector.shape_cast %4 : vector<1x32x1xf32> to vector<32x1xf32>
    %6 = arith.truncf %1 : vector<32x128xf32> to vector<32x128xbf16>
    %c0_8 = arith.constant 0 : index
    %c0_9 = arith.constant 0 : index
    %c0_10 = arith.constant 0 : index
    %7 = vector.load %arg4[%c0_8, %c0_9, %c0_10] : memref<2x128x384xbf16, #tpu.memory_space<vmem>>, vector<1x128x384xbf16>
    %8 = vector.shape_cast %7 : vector<1x128x384xbf16> to vector<128x384xbf16>
    %cst = arith.constant dense<0.000000e+00> : vector<32x384xf32>
    %9 = tpu.matmul %6, %8, %cst {dimension_numbers = #tpu.dot_dimension_numbers<[1], [0], [0], [1], [0, 0, 1, 1], [], []>} : vector<32x128xbf16>, vector<128x384xbf16>, vector<32x384xf32> -> vector<32x384xf32>
    %c0_11 = arith.constant 0 : index
    %c0_12 = arith.constant 0 : index
    %c0_13 = arith.constant 0 : index
    %10 = vector.load %arg5[%c0_11, %c0_12, %c0_13] : memref<2x1x384xf32, #tpu.memory_space<vmem>>, vector<1x1x384xf32>
    %11 = vector.shape_cast %10 : vector<1x1x384xf32> to vector<1x384xf32>
    %12 = vector.broadcast %11 : vector<1x384xf32> to vector<32x384xf32>
    %13 = arith.addf %9, %12 : vector<32x384xf32>
    %14 = vector.extract_strided_slice %13 {offsets = [0, 0], sizes = [32, 64], strides = [1, 1]} : vector<32x384xf32> to vector<32x64xf32>
    %15 = arith.truncf %14 : vector<32x64xf32> to vector<32x64xbf16>
    %16 = vector.extract_strided_slice %13 {offsets = [0, 128], sizes = [32, 64], strides = [1, 1]} : vector<32x384xf32> to vector<32x64xf32>
    %17 = arith.truncf %16 : vector<32x64xf32> to vector<32x64xbf16>
    %18 = vector.extract_strided_slice %13 {offsets = [0, 256], sizes = [32, 64], strides = [1, 1]} : vector<32x384xf32> to vector<32x64xf32>
    %19 = arith.truncf %18 : vector<32x64xf32> to vector<32x64xbf16>
    %cst_14 = arith.constant dense<0.000000e+00> : vector<32x32xf32>
    %20 = tpu.matmul %15, %17, %cst_14 {dimension_numbers = #tpu.dot_dimension_numbers<[1], [1], [0], [0], [0, 0, 1, 0], [], []>} : vector<32x64xbf16>, vector<32x64xbf16>, vector<32x32xf32> -> vector<32x32xf32>
    %cst_15 = arith.constant 1.250000e-01 : f32
    %21 = vector.broadcast %cst_15 : f32 to vector<32x32xf32>
    %22 = arith.mulf %20, %21 : vector<32x32xf32>
    %23 = arith.addf %22, %3 : vector<32x32xf32>
    %cst_16 = arith.constant dense<0xFF800000> : vector<32xf32>
    %24 = vector.multi_reduction <maximumf>, %23, %cst_16 [1] : vector<32x32xf32> to vector<32xf32>
    %25 = vector.shape_cast %24 : vector<32xf32> to vector<32x1xf32>
    %26 = vector.broadcast %25 : vector<32x1xf32> to vector<32x32xf32>
    %27 = arith.subf %23, %26 : vector<32x32xf32>
    %28 = math.exp %27 : vector<32x32xf32>
    %cst_17 = arith.constant dense<0.000000e+00> : vector<32xf32>
    %29 = vector.multi_reduction <add>, %28, %cst_17 [1] : vector<32x32xf32> to vector<32xf32>
    %30 = vector.shape_cast %29 : vector<32xf32> to vector<32x1xf32>
    %31 = tpu.reciprocal %30 {approx = true} : vector<32x1xf32> -> vector<32x1xf32>
    %32 = vector.broadcast %31 : vector<32x1xf32> to vector<32x32xf32>
    %33 = arith.mulf %28, %32 : vector<32x32xf32>
    %34 = arith.truncf %33 : vector<32x32xf32> to vector<32x32xbf16>
    %cst_18 = arith.constant dense<0.000000e+00> : vector<32x64xf32>
    %35 = tpu.matmul %34, %19, %cst_18 {dimension_numbers = #tpu.dot_dimension_numbers<[1], [0], [0], [1], [0, 0, 1, 1], [], []>} : vector<32x32xbf16>, vector<32x64xbf16>, vector<32x64xf32> -> vector<32x64xf32>
    %36 = vector.extract_strided_slice %13 {offsets = [0, 64], sizes = [32, 64], strides = [1, 1]} : vector<32x384xf32> to vector<32x64xf32>
    %37 = arith.truncf %36 : vector<32x64xf32> to vector<32x64xbf16>
    %38 = vector.extract_strided_slice %13 {offsets = [0, 192], sizes = [32, 64], strides = [1, 1]} : vector<32x384xf32> to vector<32x64xf32>
    %39 = arith.truncf %38 : vector<32x64xf32> to vector<32x64xbf16>
    %40 = vector.extract_strided_slice %13 {offsets = [0, 320], sizes = [32, 64], strides = [1, 1]} : vector<32x384xf32> to vector<32x64xf32>
    %41 = arith.truncf %40 : vector<32x64xf32> to vector<32x64xbf16>
    %cst_19 = arith.constant dense<0.000000e+00> : vector<32x32xf32>
    %42 = tpu.matmul %37, %39, %cst_19 {dimension_numbers = #tpu.dot_dimension_numbers<[1], [1], [0], [0], [0, 0, 1, 0], [], []>} : vector<32x64xbf16>, vector<32x64xbf16>, vector<32x32xf32> -> vector<32x32xf32>
    %cst_20 = arith.constant 1.250000e-01 : f32
    %43 = vector.broadcast %cst_20 : f32 to vector<32x32xf32>
    %44 = arith.mulf %42, %43 : vector<32x32xf32>
    %45 = arith.addf %44, %3 : vector<32x32xf32>
    %cst_21 = arith.constant dense<0xFF800000> : vector<32xf32>
    %46 = vector.multi_reduction <maximumf>, %45, %cst_21 [1] : vector<32x32xf32> to vector<32xf32>
    %47 = vector.shape_cast %46 : vector<32xf32> to vector<32x1xf32>
    %48 = vector.broadcast %47 : vector<32x1xf32> to vector<32x32xf32>
    %49 = arith.subf %45, %48 : vector<32x32xf32>
    %50 = math.exp %49 : vector<32x32xf32>
    %cst_22 = arith.constant dense<0.000000e+00> : vector<32xf32>
    %51 = vector.multi_reduction <add>, %50, %cst_22 [1] : vector<32x32xf32> to vector<32xf32>
    %52 = vector.shape_cast %51 : vector<32xf32> to vector<32x1xf32>
    %53 = tpu.reciprocal %52 {approx = true} : vector<32x1xf32> -> vector<32x1xf32>
    %54 = vector.broadcast %53 : vector<32x1xf32> to vector<32x32xf32>
    %55 = arith.mulf %50, %54 : vector<32x32xf32>
    %56 = arith.truncf %55 : vector<32x32xf32> to vector<32x32xbf16>
    %cst_23 = arith.constant dense<0.000000e+00> : vector<32x64xf32>
    %57 = tpu.matmul %56, %41, %cst_23 {dimension_numbers = #tpu.dot_dimension_numbers<[1], [0], [0], [1], [0, 0, 1, 1], [], []>} : vector<32x32xbf16>, vector<32x64xbf16>, vector<32x64xf32> -> vector<32x64xf32>
    %58 = tpu.concatenate %35, %57 in 1 : vector<32x64xf32>, vector<32x64xf32> -> vector<32x128xf32>
    %59 = arith.truncf %58 : vector<32x128xf32> to vector<32x128xbf16>
    %c0_24 = arith.constant 0 : index
    %c0_25 = arith.constant 0 : index
    %c0_26 = arith.constant 0 : index
    %60 = vector.load %arg6[%c0_24, %c0_25, %c0_26] : memref<2x128x128xbf16, #tpu.memory_space<vmem>>, vector<1x128x128xbf16>
    %61 = vector.shape_cast %60 : vector<1x128x128xbf16> to vector<128x128xbf16>
    %cst_27 = arith.constant dense<0.000000e+00> : vector<32x128xf32>
    %62 = tpu.matmul %59, %61, %cst_27 {dimension_numbers = #tpu.dot_dimension_numbers<[1], [0], [0], [1], [0, 0, 1, 1], [], []>} : vector<32x128xbf16>, vector<128x128xbf16>, vector<32x128xf32> -> vector<32x128xf32>
    %c0_28 = arith.constant 0 : index
    %c0_29 = arith.constant 0 : index
    %c0_30 = arith.constant 0 : index
    %63 = vector.load %arg7[%c0_28, %c0_29, %c0_30] : memref<2x1x128xf32, #tpu.memory_space<vmem>>, vector<1x1x128xf32>
    %64 = vector.shape_cast %63 : vector<1x1x128xf32> to vector<1x128xf32>
    %65 = vector.broadcast %64 : vector<1x128xf32> to vector<32x128xf32>
    %66 = arith.addf %62, %65 : vector<32x128xf32>
    %67 = arith.addf %1, %66 : vector<32x128xf32>
    %c0_31 = arith.constant 0 : index
    %c0_32 = arith.constant 0 : index
    %c0_33 = arith.constant 0 : index
    %68 = vector.load %arg8[%c0_31, %c0_32, %c0_33] : memref<2x1x128xf32, #tpu.memory_space<vmem>>, vector<1x1x128xf32>
    %69 = vector.shape_cast %68 : vector<1x1x128xf32> to vector<1x128xf32>
    %c0_34 = arith.constant 0 : index
    %c0_35 = arith.constant 0 : index
    %c0_36 = arith.constant 0 : index
    %70 = vector.load %arg9[%c0_34, %c0_35, %c0_36] : memref<2x1x128xf32, #tpu.memory_space<vmem>>, vector<1x1x128xf32>
    %71 = vector.shape_cast %70 : vector<1x1x128xf32> to vector<1x128xf32>
    %cst_37 = arith.constant dense<0.000000e+00> : vector<32xf32>
    %72 = vector.multi_reduction <add>, %67, %cst_37 [1] : vector<32x128xf32> to vector<32xf32>
    %73 = vector.shape_cast %72 : vector<32xf32> to vector<32x1xf32>
    %cst_38 = arith.constant 1.280000e+02 : f32
    %74 = vector.broadcast %cst_38 : f32 to vector<32x1xf32>
    %75 = arith.divf %73, %74 : vector<32x1xf32>
    %76 = vector.broadcast %75 : vector<32x1xf32> to vector<32x128xf32>
    %77 = arith.subf %67, %76 : vector<32x128xf32>
    %78 = arith.mulf %77, %77 : vector<32x128xf32>
    %cst_39 = arith.constant dense<0.000000e+00> : vector<32xf32>
    %79 = vector.multi_reduction <add>, %78, %cst_39 [1] : vector<32x128xf32> to vector<32xf32>
    %80 = vector.shape_cast %79 : vector<32xf32> to vector<32x1xf32>
    %cst_40 = arith.constant 1.280000e+02 : f32
    %81 = vector.broadcast %cst_40 : f32 to vector<32x1xf32>
    %82 = arith.divf %80, %81 : vector<32x1xf32>
    %83 = vector.broadcast %75 : vector<32x1xf32> to vector<32x128xf32>
    %84 = arith.subf %67, %83 : vector<32x128xf32>
    %cst_41 = arith.constant 9.99999974E-6 : f32
    %85 = vector.broadcast %cst_41 : f32 to vector<32x1xf32>
    %86 = arith.addf %82, %85 : vector<32x1xf32>
    %87 = math.rsqrt %86 : vector<32x1xf32>
    %88 = vector.broadcast %87 : vector<32x1xf32> to vector<32x128xf32>
    %89 = arith.mulf %84, %88 : vector<32x128xf32>
    %90 = vector.broadcast %69 : vector<1x128xf32> to vector<32x128xf32>
    %91 = arith.mulf %89, %90 : vector<32x128xf32>
    %92 = vector.broadcast %71 : vector<1x128xf32> to vector<32x128xf32>
    %93 = arith.addf %91, %92 : vector<32x128xf32>
    %94 = arith.truncf %93 : vector<32x128xf32> to vector<32x128xbf16>
    %c0_42 = arith.constant 0 : index
    %c0_43 = arith.constant 0 : index
    %c0_44 = arith.constant 0 : index
    %95 = vector.load %arg10[%c0_42, %c0_43, %c0_44] : memref<2x128x2048xbf16, #tpu.memory_space<vmem>>, vector<1x128x2048xbf16>
    %96 = vector.shape_cast %95 : vector<1x128x2048xbf16> to vector<128x2048xbf16>
    %cst_45 = arith.constant dense<0.000000e+00> : vector<32x2048xf32>
    %97 = tpu.matmul %94, %96, %cst_45 {dimension_numbers = #tpu.dot_dimension_numbers<[1], [0], [0], [1], [0, 0, 1, 1], [], []>} : vector<32x128xbf16>, vector<128x2048xbf16>, vector<32x2048xf32> -> vector<32x2048xf32>
    %c0_46 = arith.constant 0 : index
    %c0_47 = arith.constant 0 : index
    %c0_48 = arith.constant 0 : index
    %98 = vector.load %arg11[%c0_46, %c0_47, %c0_48] : memref<2x1x2048xf32, #tpu.memory_space<vmem>>, vector<1x1x2048xf32>
    %99 = vector.shape_cast %98 : vector<1x1x2048xf32> to vector<1x2048xf32>
    %100 = vector.broadcast %99 : vector<1x2048xf32> to vector<32x2048xf32>
    %101 = arith.addf %97, %100 : vector<32x2048xf32>
    %cst_49 = arith.constant 0.000000e+00 : f32
    %102 = vector.broadcast %cst_49 : f32 to vector<32x2048xf32>
    %103 = arith.maximumf %101, %102 : vector<32x2048xf32>
    %104 = arith.truncf %103 : vector<32x2048xf32> to vector<32x2048xbf16>
    %c0_50 = arith.constant 0 : index
    %c0_51 = arith.constant 0 : index
    %c0_52 = arith.constant 0 : index
    %105 = vector.load %arg12[%c0_50, %c0_51, %c0_52] : memref<2x2048x128xbf16, #tpu.memory_space<vmem>>, vector<1x2048x128xbf16>
    %106 = vector.shape_cast %105 : vector<1x2048x128xbf16> to vector<2048x128xbf16>
    %cst_53 = arith.constant dense<0.000000e+00> : vector<32x128xf32>
    %107 = tpu.matmul %104, %106, %cst_53 {dimension_numbers = #tpu.dot_dimension_numbers<[1], [0], [0], [1], [0, 0, 1, 1], [], []>} : vector<32x2048xbf16>, vector<2048x128xbf16>, vector<32x128xf32> -> vector<32x128xf32>
    %c0_54 = arith.constant 0 : index
    %c0_55 = arith.constant 0 : index
    %c0_56 = arith.constant 0 : index
    %108 = vector.load %arg13[%c0_54, %c0_55, %c0_56] : memref<2x1x128xf32, #tpu.memory_space<vmem>>, vector<1x1x128xf32>
    %109 = vector.shape_cast %108 : vector<1x1x128xf32> to vector<1x128xf32>
    %110 = vector.broadcast %109 : vector<1x128xf32> to vector<32x128xf32>
    %111 = arith.addf %107, %110 : vector<32x128xf32>
    %112 = arith.addf %93, %111 : vector<32x128xf32>
    %c0_57 = arith.constant 0 : index
    %c0_58 = arith.constant 0 : index
    %c0_59 = arith.constant 0 : index
    %113 = vector.load %arg14[%c0_57, %c0_58, %c0_59] : memref<2x1x128xf32, #tpu.memory_space<vmem>>, vector<1x1x128xf32>
    %114 = vector.shape_cast %113 : vector<1x1x128xf32> to vector<1x128xf32>
    %c0_60 = arith.constant 0 : index
    %c0_61 = arith.constant 0 : index
    %c0_62 = arith.constant 0 : index
    %115 = vector.load %arg15[%c0_60, %c0_61, %c0_62] : memref<2x1x128xf32, #tpu.memory_space<vmem>>, vector<1x1x128xf32>
    %116 = vector.shape_cast %115 : vector<1x1x128xf32> to vector<1x128xf32>
    %cst_63 = arith.constant dense<0.000000e+00> : vector<32xf32>
    %117 = vector.multi_reduction <add>, %112, %cst_63 [1] : vector<32x128xf32> to vector<32xf32>
    %118 = vector.shape_cast %117 : vector<32xf32> to vector<32x1xf32>
    %cst_64 = arith.constant 1.280000e+02 : f32
    %119 = vector.broadcast %cst_64 : f32 to vector<32x1xf32>
    %120 = arith.divf %118, %119 : vector<32x1xf32>
    %121 = vector.broadcast %120 : vector<32x1xf32> to vector<32x128xf32>
    %122 = arith.subf %112, %121 : vector<32x128xf32>
    %123 = arith.mulf %122, %122 : vector<32x128xf32>
    %cst_65 = arith.constant dense<0.000000e+00> : vector<32xf32>
    %124 = vector.multi_reduction <add>, %123, %cst_65 [1] : vector<32x128xf32> to vector<32xf32>
    %125 = vector.shape_cast %124 : vector<32xf32> to vector<32x1xf32>
    %cst_66 = arith.constant 1.280000e+02 : f32
    %126 = vector.broadcast %cst_66 : f32 to vector<32x1xf32>
    %127 = arith.divf %125, %126 : vector<32x1xf32>
    %128 = vector.broadcast %120 : vector<32x1xf32> to vector<32x128xf32>
    %129 = arith.subf %112, %128 : vector<32x128xf32>
    %cst_67 = arith.constant 9.99999974E-6 : f32
    %130 = vector.broadcast %cst_67 : f32 to vector<32x1xf32>
    %131 = arith.addf %127, %130 : vector<32x1xf32>
    %132 = math.rsqrt %131 : vector<32x1xf32>
    %133 = vector.broadcast %132 : vector<32x1xf32> to vector<32x128xf32>
    %134 = arith.mulf %129, %133 : vector<32x128xf32>
    %135 = vector.broadcast %114 : vector<1x128xf32> to vector<32x128xf32>
    %136 = arith.mulf %134, %135 : vector<32x128xf32>
    %137 = vector.broadcast %116 : vector<1x128xf32> to vector<32x128xf32>
    %138 = arith.addf %136, %137 : vector<32x128xf32>
    %139 = arith.truncf %138 : vector<32x128xf32> to vector<32x128xbf16>
    %c1 = arith.constant 1 : index
    %c0_68 = arith.constant 0 : index
    %c0_69 = arith.constant 0 : index
    %140 = vector.load %arg4[%c1, %c0_68, %c0_69] : memref<2x128x384xbf16, #tpu.memory_space<vmem>>, vector<1x128x384xbf16>
    %141 = vector.shape_cast %140 : vector<1x128x384xbf16> to vector<128x384xbf16>
    %cst_70 = arith.constant dense<0.000000e+00> : vector<32x384xf32>
    %142 = tpu.matmul %139, %141, %cst_70 {dimension_numbers = #tpu.dot_dimension_numbers<[1], [0], [0], [1], [0, 0, 1, 1], [], []>} : vector<32x128xbf16>, vector<128x384xbf16>, vector<32x384xf32> -> vector<32x384xf32>
    %c1_71 = arith.constant 1 : index
    %c0_72 = arith.constant 0 : index
    %c0_73 = arith.constant 0 : index
    %143 = vector.load %arg5[%c1_71, %c0_72, %c0_73] : memref<2x1x384xf32, #tpu.memory_space<vmem>>, vector<1x1x384xf32>
    %144 = vector.shape_cast %143 : vector<1x1x384xf32> to vector<1x384xf32>
    %145 = vector.broadcast %144 : vector<1x384xf32> to vector<32x384xf32>
    %146 = arith.addf %142, %145 : vector<32x384xf32>
    %147 = vector.extract_strided_slice %146 {offsets = [0, 0], sizes = [32, 64], strides = [1, 1]} : vector<32x384xf32> to vector<32x64xf32>
    %148 = arith.truncf %147 : vector<32x64xf32> to vector<32x64xbf16>
    %149 = vector.extract_strided_slice %146 {offsets = [0, 128], sizes = [32, 64], strides = [1, 1]} : vector<32x384xf32> to vector<32x64xf32>
    %150 = arith.truncf %149 : vector<32x64xf32> to vector<32x64xbf16>
    %151 = vector.extract_strided_slice %146 {offsets = [0, 256], sizes = [32, 64], strides = [1, 1]} : vector<32x384xf32> to vector<32x64xf32>
    %152 = arith.truncf %151 : vector<32x64xf32> to vector<32x64xbf16>
    %cst_74 = arith.constant dense<0.000000e+00> : vector<32x32xf32>
    %153 = tpu.matmul %148, %150, %cst_74 {dimension_numbers = #tpu.dot_dimension_numbers<[1], [1], [0], [0], [0, 0, 1, 0], [], []>} : vector<32x64xbf16>, vector<32x64xbf16>, vector<32x32xf32> -> vector<32x32xf32>
    %cst_75 = arith.constant 1.250000e-01 : f32
    %154 = vector.broadcast %cst_75 : f32 to vector<32x32xf32>
    %155 = arith.mulf %153, %154 : vector<32x32xf32>
    %156 = arith.addf %155, %3 : vector<32x32xf32>
    %cst_76 = arith.constant dense<0xFF800000> : vector<32xf32>
    %157 = vector.multi_reduction <maximumf>, %156, %cst_76 [1] : vector<32x32xf32> to vector<32xf32>
    %158 = vector.shape_cast %157 : vector<32xf32> to vector<32x1xf32>
    %159 = vector.broadcast %158 : vector<32x1xf32> to vector<32x32xf32>
    %160 = arith.subf %156, %159 : vector<32x32xf32>
    %161 = math.exp %160 : vector<32x32xf32>
    %cst_77 = arith.constant dense<0.000000e+00> : vector<32xf32>
    %162 = vector.multi_reduction <add>, %161, %cst_77 [1] : vector<32x32xf32> to vector<32xf32>
    %163 = vector.shape_cast %162 : vector<32xf32> to vector<32x1xf32>
    %164 = tpu.reciprocal %163 {approx = true} : vector<32x1xf32> -> vector<32x1xf32>
    %165 = vector.broadcast %164 : vector<32x1xf32> to vector<32x32xf32>
    %166 = arith.mulf %161, %165 : vector<32x32xf32>
    %167 = arith.truncf %166 : vector<32x32xf32> to vector<32x32xbf16>
    %cst_78 = arith.constant dense<0.000000e+00> : vector<32x64xf32>
    %168 = tpu.matmul %167, %152, %cst_78 {dimension_numbers = #tpu.dot_dimension_numbers<[1], [0], [0], [1], [0, 0, 1, 1], [], []>} : vector<32x32xbf16>, vector<32x64xbf16>, vector<32x64xf32> -> vector<32x64xf32>
    %169 = vector.extract_strided_slice %146 {offsets = [0, 64], sizes = [32, 64], strides = [1, 1]} : vector<32x384xf32> to vector<32x64xf32>
    %170 = arith.truncf %169 : vector<32x64xf32> to vector<32x64xbf16>
    %171 = vector.extract_strided_slice %146 {offsets = [0, 192], sizes = [32, 64], strides = [1, 1]} : vector<32x384xf32> to vector<32x64xf32>
    %172 = arith.truncf %171 : vector<32x64xf32> to vector<32x64xbf16>
    %173 = vector.extract_strided_slice %146 {offsets = [0, 320], sizes = [32, 64], strides = [1, 1]} : vector<32x384xf32> to vector<32x64xf32>
    %174 = arith.truncf %173 : vector<32x64xf32> to vector<32x64xbf16>
    %cst_79 = arith.constant dense<0.000000e+00> : vector<32x32xf32>
    %175 = tpu.matmul %170, %172, %cst_79 {dimension_numbers = #tpu.dot_dimension_numbers<[1], [1], [0], [0], [0, 0, 1, 0], [], []>} : vector<32x64xbf16>, vector<32x64xbf16>, vector<32x32xf32> -> vector<32x32xf32>
    %cst_80 = arith.constant 1.250000e-01 : f32
    %176 = vector.broadcast %cst_80 : f32 to vector<32x32xf32>
    %177 = arith.mulf %175, %176 : vector<32x32xf32>
    %178 = arith.addf %177, %3 : vector<32x32xf32>
    %cst_81 = arith.constant dense<0xFF800000> : vector<32xf32>
    %179 = vector.multi_reduction <maximumf>, %178, %cst_81 [1] : vector<32x32xf32> to vector<32xf32>
    %180 = vector.shape_cast %179 : vector<32xf32> to vector<32x1xf32>
    %181 = vector.broadcast %180 : vector<32x1xf32> to vector<32x32xf32>
    %182 = arith.subf %178, %181 : vector<32x32xf32>
    %183 = math.exp %182 : vector<32x32xf32>
    %cst_82 = arith.constant dense<0.000000e+00> : vector<32xf32>
    %184 = vector.multi_reduction <add>, %183, %cst_82 [1] : vector<32x32xf32> to vector<32xf32>
    %185 = vector.shape_cast %184 : vector<32xf32> to vector<32x1xf32>
    %186 = tpu.reciprocal %185 {approx = true} : vector<32x1xf32> -> vector<32x1xf32>
    %187 = vector.broadcast %186 : vector<32x1xf32> to vector<32x32xf32>
    %188 = arith.mulf %183, %187 : vector<32x32xf32>
    %189 = arith.truncf %188 : vector<32x32xf32> to vector<32x32xbf16>
    %cst_83 = arith.constant dense<0.000000e+00> : vector<32x64xf32>
    %190 = tpu.matmul %189, %174, %cst_83 {dimension_numbers = #tpu.dot_dimension_numbers<[1], [0], [0], [1], [0, 0, 1, 1], [], []>} : vector<32x32xbf16>, vector<32x64xbf16>, vector<32x64xf32> -> vector<32x64xf32>
    %191 = tpu.concatenate %168, %190 in 1 : vector<32x64xf32>, vector<32x64xf32> -> vector<32x128xf32>
    %192 = arith.truncf %191 : vector<32x128xf32> to vector<32x128xbf16>
    %c1_84 = arith.constant 1 : index
    %c0_85 = arith.constant 0 : index
    %c0_86 = arith.constant 0 : index
    %193 = vector.load %arg6[%c1_84, %c0_85, %c0_86] : memref<2x128x128xbf16, #tpu.memory_space<vmem>>, vector<1x128x128xbf16>
    %194 = vector.shape_cast %193 : vector<1x128x128xbf16> to vector<128x128xbf16>
    %cst_87 = arith.constant dense<0.000000e+00> : vector<32x128xf32>
    %195 = tpu.matmul %192, %194, %cst_87 {dimension_numbers = #tpu.dot_dimension_numbers<[1], [0], [0], [1], [0, 0, 1, 1], [], []>} : vector<32x128xbf16>, vector<128x128xbf16>, vector<32x128xf32> -> vector<32x128xf32>
    %c1_88 = arith.constant 1 : index
    %c0_89 = arith.constant 0 : index
    %c0_90 = arith.constant 0 : index
    %196 = vector.load %arg7[%c1_88, %c0_89, %c0_90] : memref<2x1x128xf32, #tpu.memory_space<vmem>>, vector<1x1x128xf32>
    %197 = vector.shape_cast %196 : vector<1x1x128xf32> to vector<1x128xf32>
    %198 = vector.broadcast %197 : vector<1x128xf32> to vector<32x128xf32>
    %199 = arith.addf %195, %198 : vector<32x128xf32>
    %200 = arith.addf %138, %199 : vector<32x128xf32>
    %c1_91 = arith.constant 1 : index
    %c0_92 = arith.constant 0 : index
    %c0_93 = arith.constant 0 : index
    %201 = vector.load %arg8[%c1_91, %c0_92, %c0_93] : memref<2x1x128xf32, #tpu.memory_space<vmem>>, vector<1x1x128xf32>
    %202 = vector.shape_cast %201 : vector<1x1x128xf32> to vector<1x128xf32>
    %c1_94 = arith.constant 1 : index
    %c0_95 = arith.constant 0 : index
    %c0_96 = arith.constant 0 : index
    %203 = vector.load %arg9[%c1_94, %c0_95, %c0_96] : memref<2x1x128xf32, #tpu.memory_space<vmem>>, vector<1x1x128xf32>
    %204 = vector.shape_cast %203 : vector<1x1x128xf32> to vector<1x128xf32>
    %cst_97 = arith.constant dense<0.000000e+00> : vector<32xf32>
    %205 = vector.multi_reduction <add>, %200, %cst_97 [1] : vector<32x128xf32> to vector<32xf32>
    %206 = vector.shape_cast %205 : vector<32xf32> to vector<32x1xf32>
    %cst_98 = arith.constant 1.280000e+02 : f32
    %207 = vector.broadcast %cst_98 : f32 to vector<32x1xf32>
    %208 = arith.divf %206, %207 : vector<32x1xf32>
    %209 = vector.broadcast %208 : vector<32x1xf32> to vector<32x128xf32>
    %210 = arith.subf %200, %209 : vector<32x128xf32>
    %211 = arith.mulf %210, %210 : vector<32x128xf32>
    %cst_99 = arith.constant dense<0.000000e+00> : vector<32xf32>
    %212 = vector.multi_reduction <add>, %211, %cst_99 [1] : vector<32x128xf32> to vector<32xf32>
    %213 = vector.shape_cast %212 : vector<32xf32> to vector<32x1xf32>
    %cst_100 = arith.constant 1.280000e+02 : f32
    %214 = vector.broadcast %cst_100 : f32 to vector<32x1xf32>
    %215 = arith.divf %213, %214 : vector<32x1xf32>
    %216 = vector.broadcast %208 : vector<32x1xf32> to vector<32x128xf32>
    %217 = arith.subf %200, %216 : vector<32x128xf32>
    %cst_101 = arith.constant 9.99999974E-6 : f32
    %218 = vector.broadcast %cst_101 : f32 to vector<32x1xf32>
    %219 = arith.addf %215, %218 : vector<32x1xf32>
    %220 = math.rsqrt %219 : vector<32x1xf32>
    %221 = vector.broadcast %220 : vector<32x1xf32> to vector<32x128xf32>
    %222 = arith.mulf %217, %221 : vector<32x128xf32>
    %223 = vector.broadcast %202 : vector<1x128xf32> to vector<32x128xf32>
    %224 = arith.mulf %222, %223 : vector<32x128xf32>
    %225 = vector.broadcast %204 : vector<1x128xf32> to vector<32x128xf32>
    %226 = arith.addf %224, %225 : vector<32x128xf32>
    %227 = arith.truncf %226 : vector<32x128xf32> to vector<32x128xbf16>
    %c1_102 = arith.constant 1 : index
    %c0_103 = arith.constant 0 : index
    %c0_104 = arith.constant 0 : index
    %228 = vector.load %arg10[%c1_102, %c0_103, %c0_104] : memref<2x128x2048xbf16, #tpu.memory_space<vmem>>, vector<1x128x2048xbf16>
    %229 = vector.shape_cast %228 : vector<1x128x2048xbf16> to vector<128x2048xbf16>
    %cst_105 = arith.constant dense<0.000000e+00> : vector<32x2048xf32>
    %230 = tpu.matmul %227, %229, %cst_105 {dimension_numbers = #tpu.dot_dimension_numbers<[1], [0], [0], [1], [0, 0, 1, 1], [], []>} : vector<32x128xbf16>, vector<128x2048xbf16>, vector<32x2048xf32> -> vector<32x2048xf32>
    %c1_106 = arith.constant 1 : index
    %c0_107 = arith.constant 0 : index
    %c0_108 = arith.constant 0 : index
    %231 = vector.load %arg11[%c1_106, %c0_107, %c0_108] : memref<2x1x2048xf32, #tpu.memory_space<vmem>>, vector<1x1x2048xf32>
    %232 = vector.shape_cast %231 : vector<1x1x2048xf32> to vector<1x2048xf32>
    %233 = vector.broadcast %232 : vector<1x2048xf32> to vector<32x2048xf32>
    %234 = arith.addf %230, %233 : vector<32x2048xf32>
    %cst_109 = arith.constant 0.000000e+00 : f32
    %235 = vector.broadcast %cst_109 : f32 to vector<32x2048xf32>
    %236 = arith.maximumf %234, %235 : vector<32x2048xf32>
    %237 = arith.truncf %236 : vector<32x2048xf32> to vector<32x2048xbf16>
    %c1_110 = arith.constant 1 : index
    %c0_111 = arith.constant 0 : index
    %c0_112 = arith.constant 0 : index
    %238 = vector.load %arg12[%c1_110, %c0_111, %c0_112] : memref<2x2048x128xbf16, #tpu.memory_space<vmem>>, vector<1x2048x128xbf16>
    %239 = vector.shape_cast %238 : vector<1x2048x128xbf16> to vector<2048x128xbf16>
    %cst_113 = arith.constant dense<0.000000e+00> : vector<32x128xf32>
    %240 = tpu.matmul %237, %239, %cst_113 {dimension_numbers = #tpu.dot_dimension_numbers<[1], [0], [0], [1], [0, 0, 1, 1], [], []>} : vector<32x2048xbf16>, vector<2048x128xbf16>, vector<32x128xf32> -> vector<32x128xf32>
    %c1_114 = arith.constant 1 : index
    %c0_115 = arith.constant 0 : index
    %c0_116 = arith.constant 0 : index
    %241 = vector.load %arg13[%c1_114, %c0_115, %c0_116] : memref<2x1x128xf32, #tpu.memory_space<vmem>>, vector<1x1x128xf32>
    %242 = vector.shape_cast %241 : vector<1x1x128xf32> to vector<1x128xf32>
    %243 = vector.broadcast %242 : vector<1x128xf32> to vector<32x128xf32>
    %244 = arith.addf %240, %243 : vector<32x128xf32>
    %245 = arith.addf %226, %244 : vector<32x128xf32>
    %c1_117 = arith.constant 1 : index
    %c0_118 = arith.constant 0 : index
    %c0_119 = arith.constant 0 : index
    %246 = vector.load %arg14[%c1_117, %c0_118, %c0_119] : memref<2x1x128xf32, #tpu.memory_space<vmem>>, vector<1x1x128xf32>
    %247 = vector.shape_cast %246 : vector<1x1x128xf32> to vector<1x128xf32>
    %c1_120 = arith.constant 1 : index
    %c0_121 = arith.constant 0 : index
    %c0_122 = arith.constant 0 : index
    %248 = vector.load %arg15[%c1_120, %c0_121, %c0_122] : memref<2x1x128xf32, #tpu.memory_space<vmem>>, vector<1x1x128xf32>
    %249 = vector.shape_cast %248 : vector<1x1x128xf32> to vector<1x128xf32>
    %cst_123 = arith.constant dense<0.000000e+00> : vector<32xf32>
    %250 = vector.multi_reduction <add>, %245, %cst_123 [1] : vector<32x128xf32> to vector<32xf32>
    %251 = vector.shape_cast %250 : vector<32xf32> to vector<32x1xf32>
    %cst_124 = arith.constant 1.280000e+02 : f32
    %252 = vector.broadcast %cst_124 : f32 to vector<32x1xf32>
    %253 = arith.divf %251, %252 : vector<32x1xf32>
    %254 = vector.broadcast %253 : vector<32x1xf32> to vector<32x128xf32>
    %255 = arith.subf %245, %254 : vector<32x128xf32>
    %256 = arith.mulf %255, %255 : vector<32x128xf32>
    %cst_125 = arith.constant dense<0.000000e+00> : vector<32xf32>
    %257 = vector.multi_reduction <add>, %256, %cst_125 [1] : vector<32x128xf32> to vector<32xf32>
    %258 = vector.shape_cast %257 : vector<32xf32> to vector<32x1xf32>
    %cst_126 = arith.constant 1.280000e+02 : f32
    %259 = vector.broadcast %cst_126 : f32 to vector<32x1xf32>
    %260 = arith.divf %258, %259 : vector<32x1xf32>
    %261 = vector.broadcast %253 : vector<32x1xf32> to vector<32x128xf32>
    %262 = arith.subf %245, %261 : vector<32x128xf32>
    %cst_127 = arith.constant 9.99999974E-6 : f32
    %263 = vector.broadcast %cst_127 : f32 to vector<32x1xf32>
    %264 = arith.addf %260, %263 : vector<32x1xf32>
    %265 = math.rsqrt %264 : vector<32x1xf32>
    %266 = vector.broadcast %265 : vector<32x1xf32> to vector<32x128xf32>
    %267 = arith.mulf %262, %266 : vector<32x128xf32>
    %268 = vector.broadcast %247 : vector<1x128xf32> to vector<32x128xf32>
    %269 = arith.mulf %267, %268 : vector<32x128xf32>
    %270 = vector.broadcast %249 : vector<1x128xf32> to vector<32x128xf32>
    %271 = arith.addf %269, %270 : vector<32x128xf32>
    %272 = arith.addf %271, %1 : vector<32x128xf32>
    %cst_128 = arith.constant 5.000000e-01 : f32
    %273 = vector.broadcast %cst_128 : f32 to vector<32x128xf32>
    %274 = arith.mulf %272, %273 : vector<32x128xf32>
    %275 = vector.broadcast %5 : vector<32x1xf32> to vector<32x128xf32>
    %276 = arith.mulf %274, %275 : vector<32x128xf32>
    %277 = vector.shape_cast %276 : vector<32x128xf32> to vector<4x8x128xf32>
    %278 = arith.mulf %277, %277 : vector<4x8x128xf32>
    %cst_129 = arith.constant dense<0.000000e+00> : vector<4x8xf32>
    %279 = vector.multi_reduction <add>, %278, %cst_129 [2] : vector<4x8x128xf32> to vector<4x8xf32>
    %280 = vector.shape_cast %279 : vector<4x8xf32> to vector<4x8x1xf32>
    "tpu.trace_start"() <{level = 10 : i32, message = "gqd,gkd->gqk"}> : () -> ()
    %cst_130 = arith.constant dense<0.000000e+00> : vector<4x8x8xf32>
    %281 = tpu.matmul %277, %277, %cst_130 {dimension_numbers = #tpu.dot_dimension_numbers<[2], [2], [1], [1], [0, 0, 0, 1, 1, 1], [0], [0]>} : vector<4x8x128xf32>, vector<4x8x128xf32>, vector<4x8x8xf32> -> vector<4x8x8xf32>
    "tpu.trace_stop"() : () -> ()
    %282 = tpu.transpose %280, [0, 2, 1] : vector<4x8x1xf32> -> vector<4x1x8xf32>
    %283 = vector.broadcast %280 : vector<4x8x1xf32> to vector<4x8x8xf32>
    %284 = vector.broadcast %282 : vector<4x1x8xf32> to vector<4x8x8xf32>
    %285 = arith.addf %283, %284 : vector<4x8x8xf32>
    %cst_131 = arith.constant 2.000000e+00 : f32
    %286 = vector.broadcast %cst_131 : f32 to vector<4x8x8xf32>
    %287 = arith.mulf %286, %281 : vector<4x8x8xf32>
    %288 = arith.subf %285, %287 : vector<4x8x8xf32>
    %cst_132 = arith.constant 0.000000e+00 : f32
    %289 = vector.broadcast %cst_132 : f32 to vector<4x8x8xf32>
    %290 = arith.maximumf %288, %289 : vector<4x8x8xf32>
    %291 = math.sqrt %290 : vector<4x8x8xf32>
    %c0_133 = arith.constant 0 : index
    %c0_134 = arith.constant 0 : index
    %c0_135 = arith.constant 0 : index
    %292 = vector.load %arg16[%c0_133, %c0_134, %c0_135] : memref<4x8x8xf32, #tpu.memory_space<vmem>>, vector<4x8x8xf32>
    tpu.vector_store %arg16[%c0_133, %c0_134, %c0_135], %291 {strides = array<i32>} : memref<4x8x8xf32, #tpu.memory_space<vmem>>, vector<4x8x8xf32>,
    return
  }
  func.func @transform_0(%arg0: i32) -> (i32, i32, i32) {
    %c0_i32 = arith.constant 0 : i32
    %c0_i32_0 = arith.constant 0 : i32
    %c0_i32_1 = arith.constant 0 : i32
    return %arg0, %c0_i32, %c0_i32_0 : i32, i32, i32
  }
  func.func @transform_1(%arg0: i32) -> (i32, i32, i32) {
    %c0_i32 = arith.constant 0 : i32
    %c0_i32_0 = arith.constant 0 : i32
    %c0_i32_1 = arith.constant 0 : i32
    %c0_i32_2 = arith.constant 0 : i32
    return %c0_i32, %c0_i32_0, %c0_i32_1 : i32, i32, i32
  }
  func.func @transform_2(%arg0: i32) -> (i32, i32, i32) {
    %c0_i32 = arith.constant 0 : i32
    %c0_i32_0 = arith.constant 0 : i32
    %c0_i32_1 = arith.constant 0 : i32
    %c0_i32_2 = arith.constant 0 : i32
    return %c0_i32, %c0_i32_0, %c0_i32_1 : i32, i32, i32
  }
  func.func @transform_3(%arg0: i32) -> (i32, i32, i32) {
    %c0_i32 = arith.constant 0 : i32
    %c0_i32_0 = arith.constant 0 : i32
    %c0_i32_1 = arith.constant 0 : i32
    %c0_i32_2 = arith.constant 0 : i32
    return %c0_i32, %c0_i32_0, %c0_i32_1 : i32, i32, i32
  }
  func.func @transform_4(%arg0: i32) -> (i32, i32, i32) {
    %c0_i32 = arith.constant 0 : i32
    %c0_i32_0 = arith.constant 0 : i32
    %c0_i32_1 = arith.constant 0 : i32
    %c0_i32_2 = arith.constant 0 : i32
    return %c0_i32, %c0_i32_0, %c0_i32_1 : i32, i32, i32
  }
  func.func @transform_5(%arg0: i32) -> (i32, i32, i32) {
    %c0_i32 = arith.constant 0 : i32
    %c0_i32_0 = arith.constant 0 : i32
    %c0_i32_1 = arith.constant 0 : i32
    %c0_i32_2 = arith.constant 0 : i32
    return %c0_i32, %c0_i32_0, %c0_i32_1 : i32, i32, i32
  }
  func.func @transform_6(%arg0: i32) -> (i32, i32, i32) {
    %c0_i32 = arith.constant 0 : i32
    %c0_i32_0 = arith.constant 0 : i32
    %c0_i32_1 = arith.constant 0 : i32
    %c0_i32_2 = arith.constant 0 : i32
    return %c0_i32, %c0_i32_0, %c0_i32_1 : i32, i32, i32
  }
  func.func @transform_7(%arg0: i32) -> (i32, i32, i32) {
    %c0_i32 = arith.constant 0 : i32
    %c0_i32_0 = arith.constant 0 : i32
    %c0_i32_1 = arith.constant 0 : i32
    %c0_i32_2 = arith.constant 0 : i32
    return %c0_i32, %c0_i32_0, %c0_i32_1 : i32, i32, i32
  }
  func.func @transform_8(%arg0: i32) -> (i32, i32, i32) {
    %c0_i32 = arith.constant 0 : i32
    %c0_i32_0 = arith.constant 0 : i32
    %c0_i32_1 = arith.constant 0 : i32
    %c0_i32_2 = arith.constant 0 : i32
    return %c0_i32, %c0_i32_0, %c0_i32_1 : i32, i32, i32
  }
  func.func @transform_9(%arg0: i32) -> (i32, i32, i32) {
    %c0_i32 = arith.constant 0 : i32
    %c0_i32_0 = arith.constant 0 : i32
    %c0_i32_1 = arith.constant 0 : i32
    %c0_i32_2 = arith.constant 0 : i32
    return %c0_i32, %c0_i32_0, %c0_i32_1 : i32, i32, i32
  }
  func.func @transform_10(%arg0: i32) -> (i32, i32, i32) {
    %c0_i32 = arith.constant 0 : i32
    %c0_i32_0 = arith.constant 0 : i32
    %c0_i32_1 = arith.constant 0 : i32
    %c0_i32_2 = arith.constant 0 : i32
    return %c0_i32, %c0_i32_0, %c0_i32_1 : i32, i32, i32
  }
  func.func @transform_11(%arg0: i32) -> (i32, i32, i32) {
    %c0_i32 = arith.constant 0 : i32
    %c0_i32_0 = arith.constant 0 : i32
    %c0_i32_1 = arith.constant 0 : i32
    %c0_i32_2 = arith.constant 0 : i32
    return %c0_i32, %c0_i32_0, %c0_i32_1 : i32, i32, i32
  }
  func.func @transform_12(%arg0: i32) -> (i32, i32, i32) {
    %c0_i32 = arith.constant 0 : i32
    %c0_i32_0 = arith.constant 0 : i32
    %c0_i32_1 = arith.constant 0 : i32
    %c0_i32_2 = arith.constant 0 : i32
    return %c0_i32, %c0_i32_0, %c0_i32_1 : i32, i32, i32
  }
  func.func @transform_13(%arg0: i32) -> (i32, i32, i32) {
    %c0_i32 = arith.constant 0 : i32
    %c0_i32_0 = arith.constant 0 : i32
    %c0_i32_1 = arith.constant 0 : i32
    %c0_i32_2 = arith.constant 0 : i32
    return %c0_i32, %c0_i32_0, %c0_i32_1 : i32, i32, i32
  }
  func.func @transform_14(%arg0: i32) -> (i32, i32, i32) {
    %c0_i32 = arith.constant 0 : i32
    %c0_i32_0 = arith.constant 0 : i32
    %c0_i32_1 = arith.constant 0 : i32
    %c0_i32_2 = arith.constant 0 : i32
    return %c0_i32, %c0_i32_0, %c0_i32_1 : i32, i32, i32
  }
  func.func @transform_15(%arg0: i32) -> (i32, i32, i32) {
    %c0_i32 = arith.constant 0 : i32
    %c0_i32_0 = arith.constant 0 : i32
    %c0_i32_1 = arith.constant 0 : i32
    return %arg0, %c0_i32, %c0_i32_0 : i32, i32, i32
  }
}

</mosaic_0001>

<bundles_post_ra>
// kernel: _lambda_.5
= control target key start
LH: loop header
LB: loop body
LE: loop exit
PB: predicated region body
PF: predicated region fallthrough
CT: control target
= control target key end

     0   :  { %v539_v3 = vmov 0.0   ;;  %vm540_vm0 = vmmov 0   ;;  %v432_v21 = vlaneseq  ;;  %vm492_vm2 = vcmask 64512   ;;  %s583_s0 = inlined_call_operand.vmem [shape: f32[4,8,128], index: 0, kind: input, shape index: {}]   ;;  %s584_s1 = inlined_call_operand.vmem [shape: f32[4,8,8], index: 1, kind: output, shape index: {}]  }
   0x1   :  { %v8_v0 = vld [vmem:[%s583_s0] sm:$0xff]  ;;  %v10_v1 = vld [vmem:[%s583_s0 + $0x10] sm:$0xff]  ;;  %v9_v2 = vld [vmem:[%s583_s0 + $0x8] sm:$0xff]  ;;  %509 = vmatprep.subr.mxu0 %v539_v3  ;;  %511 = vmatprep.mubr.msk.f32.mxu0 %vm540_vm0, %v539_v3 }
   0x2   :  { %v12_v4 = vmul.f32 %v8_v0, %v8_v0  ;;  %v14_v5 = vmul.f32 %v10_v1, %v10_v1  ;;  %v11_v6 = vld [vmem:[%s583_s0 + $0x18] sm:$0xff]  ;;  %510 = vmatpush3.xpose.msra.mxu0 %v8_v0  ;;  %514 = vmatprep.subr.mxu1 %v539_v3  ;;  %v13_v7 = vmul.f32 %v9_v2, %v9_v2  ;;  %v433_v22 = vshrl.u32 %v432_v21, 7 }
   0x3   :  { %515 = vmatpush3.xpose.msra.mxu1 %v9_v2  ;;  %519 = vmatprep.subr.mxu0 %v539_v3  ;;  %v15_v8 = vmul.f32 %v11_v6, %v11_v6 }
   0x4   :  { %16 = vadd.xlane.f32.xlu0 %v12_v4  ;;  %20 = vadd.xlane.f32.xlu1 %v14_v5  ;;  %v434_v23 = vsub.s32 0, %v433_v22 }
   0x5   :  { %512 = vmatmul.mubr.f32.vlgmr.msra.gmra.mrb[0].mxu0 %v8_v0  ;;  %516 = vmatprep.mubr.msk.f32.mxu1 %vm540_vm0, %v539_v3 }
   0x6   :  { %520 = vmatpush3.xpose.msra.mxu0 %v10_v1  ;;  %517 = vmatmul.mubr.f32.vlgmr.msra.gmra.mrb[0].mxu1 %v9_v2 }
   0x7   :  { %521 = vmatprep.mubr.msk.f32.mxu0 %vm540_vm0, %v539_v3  ;;  %524 = vmatprep.subr.mxu1 %v539_v3 }
   0x8   :  { %18 = vadd.xlane.f32.xlu0 %v13_v7  ;;  %22 = vadd.xlane.f32.xlu1 %v15_v8 }
   0x9   :  { %522 = vmatmul.mubr.f32.vlgmr.msra.gmra.mrb[2].mxu0 %v10_v1  ;;  %525 = vmatpush3.xpose.msra.mxu1 %v11_v6 }
   0xa   :  { %526 = vmatprep.mubr.msk.f32.mxu1 %vm540_vm0, %v539_v3 }
   0xc   :  { %527 = vmatmul.mubr.f32.vlgmr.msra.gmra.mrb[2].mxu1 %v11_v6 }
  0x91   :  { %v17_v9 = vpop.xlane.xlu0 %16  ;;  %v21_v10 = vpop.xlane.xlu1 %20 }
  0x92   :  { %304 = vxpose.xlu0.b32.start.end [1/1] (short) (narrow) %v17_v9, 8 }
  0x95   :  { %v19_v11 = vpop.xlane.xlu0 %18  ;;  %v23_v12 = vpop.xlane.xlu1 %22 }
  0x96   :  { %368 = vxpose.xlu0.b32.start.end [1/1] (short) (narrow) %v21_v10, 8  ;;  %336 = vxpose.xlu1.b32.start.end [1/1] (short) (narrow) %v19_v11, 8 }
  0x9a   :  { %400 = vxpose.xlu0.b32.start.end [1/1] (short) (narrow) %v23_v12, 8 }
  0xd8   :  { %v90_v13 = vpop.f32.mrb[0].mxu0 }
  0xd9   :  { %v513_v14 = vpop.f32.mrb[1].mxu0  ;;  %v160_v15 = vpop.f32.mrb[0].mxu1  ;;  %v452_v26 = vmul.f32 2.0, %v90_v13 }
  0xda   :  { %v518_v16 = vpop.f32.mrb[1].mxu1  ;;  %v453_v33 = vmul.f32 2.0, %v160_v15 }
  0xdc   :  { %v230_v17 = vpop.f32.mrb[2].mxu0 }
  0xdd   :  { %v523_v18 = vpop.f32.mrb[3].mxu0  ;;  %v454_v34 = vmul.f32 2.0, %v230_v17 }
  0xdf   :  { %v300_v19 = vpop.f32.mrb[2].mxu1 }
  0xe0   :  { %v528_v20 = vpop.f32.mrb[3].mxu1  ;;  %v455_v45 = vmul.f32 2.0, %v300_v19 }
 0x112   :  { %v320_v24 = vpop.trf.xlu0 }
 0x113   :  { %v435_v25 = vrot.slane %v320_v24, %v434_v23 }
 0x115   :  { %v448_v27 = vadd.f32 %v435_v25, %v17_v9 }
 0x116   :  { %v352_v28 = vpop.trf.xlu1  ;;  %v384_v29 = vpop.trf.xlu0 }
 0x117   :  { %v456_v30 = vsub.f32 %v448_v27, %v452_v26  ;;  %v439_v31 = vrot.slane %v352_v28, %v434_v23  ;;  %v443_v32 = vrot.slane %v384_v29, %v434_v23 }
 0x119   :  { %v460_v35 = vmax.f32 %v456_v30, 0.0  ;;  %v449_v36 = vadd.f32 %v439_v31, %v19_v11  ;;  %v450_v37 = vadd.f32 %v443_v32, %v21_v10 }
 0x11a   :  { %v416_v38 = vpop.trf.xlu0 }
 0x11b   :  { %531 = vrsqrt.f32 %v460_v35  ;;  %v457_v39 = vsub.f32 %v449_v36, %v453_v33  ;;  %v458_v40 = vsub.f32 %v450_v37, %v454_v34  ;;  %v447_v41 = vrot.slane %v416_v38, %v434_v23 }
 0x11c   :  { %vm466_vm1 = vcmp.eq.f32.partialorder %v460_v35, inf  ;;  %v469_v50 = vand.u32 2147483648, %v460_v35  ;;  %vm468_vm3 = vcmp.eq.f32.partialorder %v460_v35, 0.0 }
 0x11d   :  { %v461_v42 = vmax.f32 %v457_v39, 0.0  ;;  %v462_v43 = vmax.f32 %v458_v40, 0.0  ;;  %v451_v44 = vadd.f32 %v447_v41, %v23_v12 }
 0x11f   :  { %533 = vrsqrt.f32 %v461_v42  ;;  %v459_v46 = vsub.f32 %v451_v44, %v455_v45  ;;  %vm473_vm4 = vcmp.eq.f32.partialorder %v461_v42, inf  ;;  %v476_v56 = vand.u32 2147483648, %v461_v42 }
 0x120   :  { %535 = vrsqrt.f32 %v462_v43  ;;  %vm475_vm5 = vcmp.eq.f32.partialorder %v461_v42, 0.0  ;;  %vm480_vm6 = vcmp.eq.f32.partialorder %v462_v43, inf  ;;  %v483_v59 = vand.u32 2147483648, %v462_v43 }
 0x121   :  { %v463_v47 = vmax.f32 %v459_v46, 0.0  ;;  %vm482_vm7 = vcmp.eq.f32.partialorder %v462_v43, 0.0 }
 0x123   :  { %537 = vrsqrt.f32 %v463_v47  ;;  %vm487_vm8 = vcmp.eq.f32.partialorder %v463_v47, inf  ;;  %v490_v1 = vand.u32 2147483648, %v463_v47  ;;  %vm489_vm9 = vcmp.eq.f32.partialorder %v463_v47, 0.0 }
 0x125   :  { %v532_v48 = vpop.eup %531 }
 0x126   :  { %v465_v49 = vmul.f32 %v532_v48, %v460_v35 }
 0x128   :  { %v467_v51 = vsel %vm466_vm1, %v460_v35, %v465_v49 }
 0x129   :  { %v470_v52 = vsel %vm468_vm3, %v469_v50, %v467_v51  ;;  %v534_v53 = vpop.eup %533 }
 0x12a   :  { %493 = vst.msk [vmem:[%s584_s1] sm:$0xff] %vm492_vm2, %v470_v52  ;;  %v536_v54 = vpop.eup %535  ;;  %v472_v55 = vmul.f32 %v534_v53, %v461_v42 }
 0x12b   :  { %v479_v57 = vmul.f32 %v536_v54, %v462_v43 }
 0x12c   :  { %v474_v58 = vsel %vm473_vm4, %v461_v42, %v472_v55 }
 0x12d   :  { %v477_v60 = vsel %vm475_vm5, %v476_v56, %v474_v58  ;;  %v481_v61 = vsel %vm480_vm6, %v462_v43, %v479_v57  ;;  %v538_v63 = vpop.eup %537 }
 0x12e   :  { %494 = vst.msk [vmem:[%s584_s1 + $0x8] sm:$0xff] %vm492_vm2, %v477_v60  ;;  %v484_v62 = vsel %vm482_vm7, %v483_v59, %v481_v61  ;;  %v486_v0 = vmul.f32 %v538_v63, %v463_v47 }
 0x12f   :  { %495 = vst.msk [vmem:[%s584_s1 + $0x10] sm:$0xff] %vm492_vm2, %v484_v62 }
 0x130   :  { %v488_v2 = vsel %vm487_vm8, %v463_v47, %v486_v0 }
 0x131   :  { %v491_v3 = vsel %vm489_vm9, %v490_v1, %v488_v2 }
 0x132   :  { %496 = vst.msk [vmem:[%s584_s1 + $0x18] sm:$0xff] %vm492_vm2, %v491_v3 }

// kernel: _lambda_.3
= control target key start
LH: loop header
LB: loop body
LE: loop exit
PB: predicated region body
PF: predicated region fallthrough
CT: control target
= control target key end

     0   :  { %s2632_s6 = smov 1   ;;  %s2633_s10 = smov 2   ;;  %s3064_s0 = inlined_call_operand.smem [shape: u32[34], index: -1, kind: input, shape index: {}] }
   0x1   :  { %s2699_s5 = sld [smem:[%s3064_s0]]   ;;  %s2634_s14 = smov 3  }
   0x2   :  { %s2704_s9 = sld [smem:[%s3064_s0 + %s2632_s6]]   ;;  %s2635_s18 = smov 4  }
   0x3   :  { %s2709_s13 = sld [smem:[%s3064_s0 + %s2633_s10]]   ;;  %s2636_s22 = smov 5  }
   0x4   :  { %s2714_s17 = sld [smem:[%s3064_s0 + %s2634_s14]]   ;;  %s2637_s26 = smov 6  }
   0x5   :  { %s2719_s21 = sld [smem:[%s3064_s0 + %s2635_s18]]   ;;  %s2638_s30 = smov 7  }
   0x6   :  { %s2724_s25 = sld [smem:[%s3064_s0 + %s2636_s22]]   ;;  %s2639_s4 = smov 8  }
   0x7   :  { %3075 = sst [smem:[#allocation41_spill]] %s2699_s5  ;;  %s2640_s10 = smov 9  }
   0x8   :  { %3076 = sst [smem:[#allocation42_spill]] %s2704_s9  ;;  %s2641_s15 = smov 10  }
   0x9   :  { %s2729_s29 = sld [smem:[%s3064_s0 + %s2637_s26]]   ;;  %s2642_s20 = smov 11  }
   0xa   :  { %s2734_s3 = sld [smem:[%s3064_s0 + %s2638_s30]]   ;;  %s2643_s26 = smov 12  }
   0xb   :  { %s2739_s8 = sld [smem:[%s3064_s0 + %s2639_s4]]   ;;  %s2644_s1 = smov 13  }
   0xc   :  { %s2744_s14 = sld [smem:[%s3064_s0 + %s2640_s10]]   ;;  %s2645_s7 = smov 14  }
   0xd   :  { %s2749_s19 = sld [smem:[%s3064_s0 + %s2641_s15]]   ;;  %s2646_s15 = smov 15  }
   0xe   :  { %s2754_s24 = sld [smem:[%s3064_s0 + %s2642_s20]]   ;;  %s2647_s22 = smov 16  }
   0xf   :  { %s2759_s30 = sld [smem:[%s3064_s0 + %s2643_s26]]   ;;  %s2648_s28 = smov 17  }
  0x10   :  { %s2764_s6 = sld [smem:[%s3064_s0 + %s2644_s1]]  }
  0x11   :  { %3077 = sst [smem:[#allocation43_spill]] %s2739_s8 }
  0x12   :  { %s2769_s12 = sld [smem:[%s3064_s0 + %s2645_s7]]   ;;  %s2649_s7 = smov 18  }
  0x13   :  { %s2774_s20 = sld [smem:[%s3064_s0 + %s2646_s15]]   ;;  %s2650_s15 = smov 19  }
  0x14   :  { %3078 = sst [smem:[#allocation44_spill]] %s2754_s24 }
  0x15   :  { %3079 = sst [smem:[#allocation45_spill]] %s2759_s30 }
  0x16   :  { %3080 = sst [smem:[#allocation46_spill]] %s2764_s6 }
  0x17   :  { %s2779_s27 = sld [smem:[%s3064_s0 + %s2647_s22]]   ;;  %s2651_s22 = smov 20  }
  0x18   :  { %3081 = sst [smem:[#allocation47_spill]] %s2769_s12 }
  0x19   :  { %3082 = sst [smem:[#allocation48_spill]] %s2774_s20 }
  0x1a   :  { %s2784_s4 = sld [smem:[%s3064_s0 + %s2648_s28]]   ;;  %s2652_s28 = smov 21  }
  0x1b   :  { %s2789_s6 = sld [smem:[%s3064_s0 + %s2649_s7]]   ;;  %s2653_s7 = smov 22  }
  0x1c   :  { %s2794_s12 = sld [smem:[%s3064_s0 + %s2650_s15]]   ;;  %s2654_s15 = smov 23  }
  0x1d   :  { %s2799_s20 = sld [smem:[%s3064_s0 + %s2651_s22]]   ;;  %s2655_s22 = smov 24  }
  0x1e   :  { %s2804_s30 = sld [smem:[%s3064_s0 + %s2652_s28]]   ;;  %s2656_s28 = smov 25  }
  0x1f   :  { %s2809_s24 = sld [smem:[%s3064_s0 + %s2653_s7]]   ;;  %s2657_s7 = smov 26  }
  0x20   :  { %s2814_s8 = sld [smem:[%s3064_s0 + %s2654_s15]]   ;;  %s2658_s15 = smov 27  }
  0x21   :  { %3083 = sst [smem:[#allocation49_spill]] %s2789_s6 }
  0x22   :  { %s2819_s5 = sld [smem:[%s3064_s0 + %s2655_s22]]   ;;  %s2659_s22 = smov 28  }
  0x23   :  { %3084 = sst [smem:[#allocation50_spill]] %s2799_s20 }
  0x24   :  { %s2824_s9 = sld [smem:[%s3064_s0 + %s2656_s28]]   ;;  %s2660_s28 = smov 29  }
  0x25   :  { %3085 = sst [smem:[#allocation51_spill]] %s2809_s24 }
  0x26   :  { %s2829_s24 = sld [smem:[%s3064_s0 + %s2657_s7]]   ;;  %s2661_s7 = smov 30  }
  0x27   :  { %s2834_s20 = sld [smem:[%s3064_s0 + %s2658_s15]]   ;;  %s2662_s15 = smov 31  }
  0x28   :  { %3086 = sst [smem:[#allocation52_spill]] %s2819_s5 }
  0x29   :  { %s2839_s5 = sld [smem:[%s3064_s0 + %s2659_s22]]   ;;  %s2663_s22 = smov 32  }
  0x2a   :  { %s2844_s6 = sld [smem:[%s3064_s0 + %s2660_s28]]   ;;  %s2664_s28 = smov 33  }
  0x2c   :  { %3087 = sst [smem:[#allocation53_spill]] %s2829_s24 }
  0x2d   :  { %3088 = sst [smem:[#allocation54_spill]] %s2834_s20 }
  0x2e   :  { %s2849_s24 = sld [smem:[%s3064_s0 + %s2661_s7]]  }
  0x2f   :  { %3089 = sst [smem:[#allocation55_spill]] %s2839_s5 }
  0x30   :  { %3090 = sst [smem:[#allocation56_spill]] %s2844_s6 }
  0x31   :  { %s2854_s20 = sld [smem:[%s3064_s0 + %s2662_s15]]  }
  0x32   :  { %s2859_s5 = sld [smem:[%s3064_s0 + %s2663_s22]]  }
  0x33   :  { %s2864_s6 = sld [smem:[%s3064_s0 + %s2664_s28]]  }
  0x34   :  { %73 = vsyncpa [#allocation3], 0 }
  0x35   :  { %74 = vsyncpa [#allocation5], 0 }
  0x36   :  { %75 = vsyncpa [#allocation8], 0 }
  0x37   :  { %76 = vsyncpa [#allocation11], 0 }
  0x38   :  { %77 = vsyncpa [#allocation14], 0 }
  0x39   :  { %78 = vsyncpa [#allocation17], 0 }
  0x3a   :  { %79 = vsyncpa [#allocation20], 0 }
  0x3b   :  { %80 = vsyncpa [#allocation23], 0 }
  0x3c   :  { %81 = vsyncpa [#allocation26], 0 }
  0x3d   :  { %82 = vsyncpa [#allocation29], 0  ;;  %s2665_s7 = smov [#allocation4]   ;;  %s2194_s11 = scalar_lea.hbm %s2714_s17, 1024 }
  0x3e   :  { %s102_s10 = sshll.u32 %s2665_s7, 4  ;;  %p2195_p0 = scmp.ne.s32.totalorder %s2714_s17, %s2194_s11  ;;  %s103_s10 = int_to_ptr.vmem [resolvable:$true] %s102_s10 }
  0x3f   :  { %p2198_p1 = scmp.lt.u32.totalorder %s2194_s11, %s2714_s17 }
  0x41   :  { %p2200_p2 = pnand %p2198_p1, %p2195_p0 }
  0x43   :  { %2203 = shalt.err (!%p2200_p2)
}
  0x44   :  { %s2204_s0 = scalar_lea.vmem %s103_s10, 1024  ;;  %p2209_p4 = scmp.lt.s32.totalorder %s103_s10, %s103_s10 }
  0x45   :  { %p2205_p3 = scmp.ne.s32.totalorder %s103_s10, %s2204_s0  ;;  %p2210_p5 = scmp.lt.s32.totalorder %s2204_s0, %s2204_s0 }
  0x47   :  { %p2211_p6 = por %p2210_p5, %p2209_p4 }
  0x49   :  { %p2212_p7 = pnand %p2211_p6, %p2205_p3 }
  0x4b   :  { %2215 = shalt.err (!%p2212_p7)
}
  0x4c   :  { %s2666_s15 = smov 64   ;;  %s2667_s16 = smov 4  }
  0x4d   :  { %108 = dma.hbm_to_vmem [thread:$0]  %s2714_s17, 1024, %s103_s10, [#allocation5], %s2666_s15, %s2666_s15, %s2667_s16  }
  0x4e   :  { %s2668_s18 = smov [#allocation7]   ;;  %s2669_s23 = smov [#allocation10]  }
  0x4f   :  { %s124_s22 = sshll.u32 %s2668_s18, 4  ;;  %s146_s26 = sshll.u32 %s2669_s23, 4  ;;  %s125_s22 = int_to_ptr.vmem [resolvable:$true] %s124_s22  ;;  %s147_s26 = int_to_ptr.vmem [resolvable:$true] %s146_s26 }
  0x50   :  { %s2216_s28 = scalar_lea.hbm %s2724_s25, 1024 }
  0x51   :  { %p2217_p8 = scmp.ne.s32.totalorder %s2724_s25, %s2216_s28  ;;  %p2220_p9 = scmp.lt.u32.totalorder %s2216_s28, %s2724_s25 }
  0x53   :  { %p2222_p10 = pnand %p2220_p9, %p2217_p8 }
  0x55   :  { %2225 = shalt.err (!%p2222_p10)
}
  0x56   :  { %s2226_s1 = scalar_lea.vmem %s125_s22, 1024  ;;  %p2231_p12 = scmp.lt.s32.totalorder %s125_s22, %s125_s22 }
  0x57   :  { %p2227_p11 = scmp.ne.s32.totalorder %s125_s22, %s2226_s1  ;;  %p2232_p13 = scmp.lt.s32.totalorder %s2226_s1, %s2226_s1 }
  0x59   :  { %p2233_p0 = por %p2232_p13, %p2231_p12 }
  0x5b   :  { %p2234_p1 = pnand %p2233_p0, %p2227_p11 }
  0x5d   :  { %2237 = shalt.err (!%p2234_p1)
}
  0x5e   :  { %130 = dma.hbm_to_vmem [thread:$0]  %s2724_s25, 1024, %s125_s22, [#allocation8], %s2666_s15, %s2666_s15, %s2667_s16  }
  0x5f   :  { %s2238_s17 = scalar_lea.hbm %s2734_s3, 1024 }
  0x60   :  { %p2239_p2 = scmp.ne.s32.totalorder %s2734_s3, %s2238_s17  ;;  %p2242_p3 = scmp.lt.u32.totalorder %s2238_s17, %s2734_s3 }
  0x62   :  { %p2244_p4 = pnand %p2242_p3, %p2239_p2 }
  0x64   :  { %2247 = shalt.err (!%p2244_p4)
}
  0x65   :  { %s2248_s2 = scalar_lea.vmem %s147_s26, 1024  ;;  %p2253_p6 = scmp.lt.s32.totalorder %s147_s26, %s147_s26 }
  0x66   :  { %p2249_p5 = scmp.ne.s32.totalorder %s147_s26, %s2248_s2  ;;  %p2254_p7 = scmp.lt.s32.totalorder %s2248_s2, %s2248_s2 }
  0x68   :  { %p2255_p8 = por %p2254_p7, %p2253_p6 }
  0x6a   :  { %p2256_p9 = pnand %p2255_p8, %p2249_p5 }
  0x6c   :  { %2259 = shalt.err (!%p2256_p9)
}
  0x6d   :  { %s2670_s7 = smov 128   ;;  %s2671_s10 = smov 8  }
  0x6e   :  { %152 = dma.hbm_to_vmem [thread:$0]  %s2734_s3, 1024, %s147_s26, [#allocation11], %s2670_s7, %s2670_s7, %s2671_s10  }
  0x6f   :  { %s2672_s25 = smov [#allocation13]   ;;  %s2673_s0 = smov [#allocation16]  }
  0x70   :  { %s173_s11 = sshll.u32 %s2672_s25, 4  ;;  %s202_s18 = sshll.u32 %s2673_s0, 4  ;;  %s174_s11 = int_to_ptr.vmem [resolvable:$true] %s173_s11  ;;  %s203_s18 = int_to_ptr.vmem [resolvable:$true] %s202_s18 }
  0x71   :  { %s2260_s22 = scalar_lea.hbm %s2749_s19, 16 }
  0x72   :  { %p2261_p10 = scmp.ne.s32.totalorder %s2749_s19, %s2260_s22  ;;  %p2264_p11 = scmp.lt.u32.totalorder %s2260_s22, %s2749_s19 }
  0x74   :  { %p2266_p12 = pnand %p2264_p11, %p2261_p10 }
  0x76   :  { %2269 = shalt.err (!%p2266_p12)
}
  0x77   :  { %s2270_s23 = scalar_lea.vmem %s174_s11, 16  ;;  %s2274_s28 = scalar_lea.vmem %s174_s11, 32 }
  0x78   :  { %p2271_p13 = scmp.ne.s32.totalorder %s174_s11, %s2270_s23  ;;  %p2275_p0 = scmp.lt.s32.totalorder %s174_s11, %s174_s11 }
  0x79   :  { %p2276_p1 = scmp.lt.s32.totalorder %s2274_s28, %s2270_s23 }
  0x7b   :  { %p2277_p2 = por %p2276_p1, %p2275_p0 }
  0x7d   :  { %p2278_p3 = pnand %p2277_p2, %p2271_p13 }
  0x7f   :  { %2281 = shalt.err (!%p2278_p3)
}
  0x80   :  { %176 = dma.hbm_to_vmem [thread:$0]  %s2749_s19, 16, %s174_s11, [#allocation14]  }
  0x81   :  { %s2282_s3 = scalar_lea.hbm %s2784_s4, 2048 }
  0x82   :  { %p2283_p4 = scmp.ne.s32.totalorder %s2784_s4, %s2282_s3  ;;  %p2286_p5 = scmp.lt.u32.totalorder %s2282_s3, %s2784_s4 }
  0x84   :  { %p2288_p6 = pnand %p2286_p5, %p2283_p4 }
  0x86   :  { %2291 = shalt.err (!%p2288_p6)
}
  0x87   :  { %s2292_s26 = scalar_lea.vmem %s203_s18, 2048  ;;  %p2297_p8 = scmp.lt.s32.totalorder %s203_s18, %s203_s18 }
  0x88   :  { %p2293_p7 = scmp.ne.s32.totalorder %s203_s18, %s2292_s26  ;;  %p2298_p9 = scmp.lt.s32.totalorder %s2292_s26, %s2292_s26 }
  0x8a   :  { %p2299_p10 = por %p2298_p9, %p2297_p8 }
  0x8c   :  { %p2300_p11 = pnand %p2299_p10, %p2293_p7 }
  0x8e   :  { %2303 = shalt.err (!%p2300_p11)
}
  0x8f   :  { %208 = dma.hbm_to_vmem [thread:$0]  %s2784_s4, 2048, %s203_s18, [#allocation17], %s2666_s15, %s2666_s15, %s2667_s16  }
  0x90   :  { %s2674_s19 = smov [#allocation19]   ;;  %s2675_s17 = smov [#allocation22]  }
  0x91   :  { %s225_s1 = sshll.u32 %s2674_s19, 4  ;;  %s244_s2 = sshll.u32 %s2675_s17, 4  ;;  %s226_s1 = int_to_ptr.vmem [resolvable:$true] %s225_s1  ;;  %s245_s2 = int_to_ptr.vmem [resolvable:$true] %s244_s2 }
  0x92   :  { %s2304_s25 = scalar_lea.hbm %s2794_s12, 16 }
  0x93   :  { %p2305_p12 = scmp.ne.s32.totalorder %s2794_s12, %s2304_s25  ;;  %p2308_p13 = scmp.lt.u32.totalorder %s2304_s25, %s2794_s12 }
  0x95   :  { %p2310_p0 = pnand %p2308_p13, %p2305_p12 }
  0x97   :  { %2313 = shalt.err (!%p2310_p0)
}
  0x98   :  { %s2314_s11 = scalar_lea.vmem %s226_s1, 16  ;;  %s2318_s0 = scalar_lea.vmem %s226_s1, 32 }
  0x99   :  { %p2315_p1 = scmp.ne.s32.totalorder %s226_s1, %s2314_s11  ;;  %p2319_p2 = scmp.lt.s32.totalorder %s226_s1, %s226_s1 }
  0x9a   :  { %p2320_p3 = scmp.lt.s32.totalorder %s2318_s0, %s2314_s11 }
  0x9c   :  { %p2321_p4 = por %p2320_p3, %p2319_p2 }
  0x9e   :  { %p2322_p5 = pnand %p2321_p4, %p2315_p1 }
  0xa0   :  { %2325 = shalt.err (!%p2322_p5)
}
  0xa1   :  { %228 = dma.hbm_to_vmem [thread:$0]  %s2794_s12, 16, %s226_s1, [#allocation20]  }
  0xa2   :  { %s2326_s4 = scalar_lea.hbm %s2804_s30, 2048 }
  0xa3   :  { %p2327_p6 = scmp.ne.s32.totalorder %s2804_s30, %s2326_s4  ;;  %p2330_p7 = scmp.lt.u32.totalorder %s2326_s4, %s2804_s30 }
  0xa5   :  { %p2332_p8 = pnand %p2330_p7, %p2327_p6 }
  0xa7   :  { %2335 = shalt.err (!%p2332_p8)
}
  0xa8   :  { %s2336_s18 = scalar_lea.vmem %s245_s2, 2048  ;;  %p2341_p10 = scmp.lt.s32.totalorder %s245_s2, %s245_s2 }
  0xa9   :  { %p2337_p9 = scmp.ne.s32.totalorder %s245_s2, %s2336_s18  ;;  %p2342_p11 = scmp.lt.s32.totalorder %s2336_s18, %s2336_s18 }
  0xab   :  { %p2343_p12 = por %p2342_p11, %p2341_p10 }
  0xad   :  { %p2344_p13 = pnand %p2343_p12, %p2337_p9 }
  0xaf   :  { %2347 = shalt.err (!%p2344_p13)
}
  0xb0   :  { %250 = dma.hbm_to_vmem [thread:$0]  %s2804_s30, 2048, %s245_s2, [#allocation23], %s2670_s7, %s2670_s7, %s2671_s10  }
  0xb1   :  { %s2676_s12 = smov [#allocation25]   ;;  %s2677_s23 = smov [#allocation28]  }
  0xb2   :  { %s266_s22 = sshll.u32 %s2676_s12, 4  ;;  %s288_s28 = sshll.u32 %s2677_s23, 4  ;;  %s267_s22 = int_to_ptr.vmem [resolvable:$true] %s266_s22  ;;  %s289_s28 = int_to_ptr.vmem [resolvable:$true] %s288_s28 }
  0xb3   :  { %s2348_s3 = scalar_lea.hbm %s2814_s8, 2048 }
  0xb4   :  { %p2349_p0 = scmp.ne.s32.totalorder %s2814_s8, %s2348_s3  ;;  %p2352_p1 = scmp.lt.u32.totalorder %s2348_s3, %s2814_s8 }
  0xb6   :  { %p2354_p2 = pnand %p2352_p1, %p2349_p0 }
  0xb8   :  { %2357 = shalt.err (!%p2354_p2)
}
  0xb9   :  { %s2358_s26 = scalar_lea.vmem %s267_s22, 2048  ;;  %p2363_p4 = scmp.lt.s32.totalorder %s267_s22, %s267_s22 }
  0xba   :  { %p2359_p3 = scmp.ne.s32.totalorder %s267_s22, %s2358_s26  ;;  %p2364_p5 = scmp.lt.s32.totalorder %s2358_s26, %s2358_s26 }
  0xbc   :  { %p2365_p6 = por %p2364_p5, %p2363_p4 }
  0xbe   :  { %p2366_p7 = pnand %p2365_p6, %p2359_p3 }
  0xc0   :  { %2369 = shalt.err (!%p2366_p7)
}
  0xc1   :  { %272 = dma.hbm_to_vmem [thread:$0]  %s2814_s8, 2048, %s267_s22, [#allocation26], %s2666_s15, %s2666_s15, %s2667_s16  }
  0xc2   :  { %s2370_s30 = scalar_lea.hbm %s2824_s9, 1024 }
  0xc3   :  { %p2371_p8 = scmp.ne.s32.totalorder %s2824_s9, %s2370_s30  ;;  %p2374_p9 = scmp.lt.u32.totalorder %s2370_s30, %s2824_s9 }
  0xc5   :  { %p2376_p10 = pnand %p2374_p9, %p2371_p8 }
  0xc7   :  { %2379 = shalt.err (!%p2376_p10)
}
  0xc8   :  { %s2380_s7 = scalar_lea.vmem %s289_s28, 1024  ;;  %p2385_p12 = scmp.lt.s32.totalorder %s289_s28, %s289_s28 }
  0xc9   :  { %p2381_p11 = scmp.ne.s32.totalorder %s289_s28, %s2380_s7  ;;  %p2386_p13 = scmp.lt.s32.totalorder %s2380_s7, %s2380_s7 }
  0xcb   :  { %p2387_p0 = por %p2386_p13, %p2385_p12 }
  0xcd   :  { %p2388_p1 = pnand %p2387_p0, %p2381_p11 }
  0xcf   :  { %2391 = shalt.err (!%p2388_p1)
}
  0xd0   :  { %294 = dma.hbm_to_vmem [thread:$0]  %s2824_s9, 1024, %s289_s28, [#allocation29], %s2666_s15, %s2666_s15, %s2667_s16  }
  0xd1   :  { %s2678_s8 = smov [#allocation2]   ;;  %s2679_s19 = smov [#allocation6]  }
  0xd2   :  { %s93_s10 = sshll.u32 %s2678_s8, 4  ;;  %s115_s1 = sshll.u32 %s2679_s19, 4  ;;  %s94_s10 = int_to_ptr.vmem [resolvable:$true] %s93_s10  ;;  %s116_s1 = int_to_ptr.vmem [resolvable:$true] %s115_s1 }
  0xd3   :  { %s2392_s17 = scalar_lea.hbm %s2709_s13, 16 }
  0xd4   :  { %p2393_p2 = scmp.ne.s32.totalorder %s2709_s13, %s2392_s17  ;;  %p2396_p3 = scmp.lt.u32.totalorder %s2392_s17, %s2709_s13 }
  0xd6   :  { %p2398_p4 = pnand %p2396_p3, %p2393_p2 }
  0xd8   :  { %2401 = shalt.err (!%p2398_p4)
}
  0xd9   :  { %s2402_s2 = scalar_lea.vmem %s94_s10, 16  ;;  %s2406_s25 = scalar_lea.vmem %s94_s10, 32 }
  0xda   :  { %p2403_p5 = scmp.ne.s32.totalorder %s94_s10, %s2402_s2  ;;  %p2407_p6 = scmp.lt.s32.totalorder %s94_s10, %s94_s10 }
  0xdb   :  { %p2408_p7 = scmp.lt.s32.totalorder %s2406_s25, %s2402_s2 }
  0xdd   :  { %p2409_p8 = por %p2408_p7, %p2407_p6 }
  0xdf   :  { %p2410_p9 = pnand %p2409_p8, %p2403_p5 }
  0xe1   :  { %2413 = shalt.err (!%p2410_p9)
}
  0xe2   :  { %96 = dma.hbm_to_vmem [thread:$0]  %s2709_s13, 16, %s94_s10, [#allocation3]  }
  0xe3   :  { %s2414_s9 = scalar_lea.hbm %s2719_s21, 16 }
  0xe4   :  { %p2415_p10 = scmp.ne.s32.totalorder %s2719_s21, %s2414_s9  ;;  %p2418_p11 = scmp.lt.u32.totalorder %s2414_s9, %s2719_s21 }
  0xe6   :  { %p2420_p12 = pnand %p2418_p11, %p2415_p10 }
  0xe8   :  { %2423 = shalt.err (!%p2420_p12)
}
  0xe9   :  { %s2424_s11 = scalar_lea.vmem %s116_s1, 16  ;;  %s2428_s0 = scalar_lea.vmem %s116_s1, 32 }
  0xea   :  { %p2425_p13 = scmp.ne.s32.totalorder %s116_s1, %s2424_s11  ;;  %p2429_p0 = scmp.lt.s32.totalorder %s116_s1, %s116_s1 }
  0xeb   :  { %p2430_p1 = scmp.lt.s32.totalorder %s2428_s0, %s2424_s11 }
  0xed   :  { %p2431_p2 = por %p2430_p1, %p2429_p0 }
  0xef   :  { %p2432_p3 = pnand %p2431_p2, %p2425_p13 }
  0xf1   :  { %2435 = shalt.err (!%p2432_p3)
}
  0xf2   :  { %118 = dma.hbm_to_vmem [thread:$0]  %s2719_s21, 16, %s116_s1, [#allocation5]  }
  0xf3   :  { %s2680_s13 = smov [#allocation9]   ;;  %s2681_s18 = smov [#allocation12]  }
  0xf4   :  { %s137_s4 = sshll.u32 %s2680_s13, 4  ;;  %s160_s12 = sshll.u32 %s2681_s18, 4  ;;  %s138_s4 = int_to_ptr.vmem [resolvable:$true] %s137_s4  ;;  %s161_s12 = int_to_ptr.vmem [resolvable:$true] %s160_s12 }
  0xf5   :  { %s2436_s22 = scalar_lea.hbm %s2729_s29, 16 }
  0xf6   :  { %p2437_p4 = scmp.ne.s32.totalorder %s2729_s29, %s2436_s22  ;;  %p2440_p5 = scmp.lt.u32.totalorder %s2436_s22, %s2729_s29 }
  0xf8   :  { %p2442_p6 = pnand %p2440_p5, %p2437_p4 }
  0xfa   :  { %2445 = shalt.err (!%p2442_p6)
}
  0xfb   :  { %s2446_s23 = scalar_lea.vmem %s138_s4, 16  ;;  %s2450_s28 = scalar_lea.vmem %s138_s4, 32 }
  0xfc   :  { %p2447_p7 = scmp.ne.s32.totalorder %s138_s4, %s2446_s23  ;;  %p2451_p8 = scmp.lt.s32.totalorder %s138_s4, %s138_s4 }
  0xfd   :  { %p2452_p9 = scmp.lt.s32.totalorder %s2450_s28, %s2446_s23 }
  0xff   :  { %p2453_p10 = por %p2452_p9, %p2451_p8 }
 0x101   :  { %p2454_p11 = pnand %p2453_p10, %p2447_p7 }
 0x103   :  { %2457 = shalt.err (!%p2454_p11)
}
 0x104   :  { %140 = dma.hbm_to_vmem [thread:$0]  %s2729_s29, 16, %s138_s4, [#allocation8]  }
 0x105   :  { %s2458_s21 = scalar_lea.hbm %s2744_s14, 128 }
 0x106   :  { %p2459_p12 = scmp.ne.s32.totalorder %s2744_s14, %s2458_s21  ;;  %p2462_p13 = scmp.lt.u32.totalorder %s2458_s21, %s2744_s14 }
 0x108   :  { %p2464_p0 = pnand %p2462_p13, %p2459_p12 }
 0x10a   :  { %2467 = shalt.err (!%p2464_p0)
}
 0x10b   :  { %s2468_s3 = scalar_lea.vmem %s161_s12, 128  ;;  %p2473_p2 = scmp.lt.s32.totalorder %s161_s12, %s161_s12 }
 0x10c   :  { %p2469_p1 = scmp.ne.s32.totalorder %s161_s12, %s2468_s3  ;;  %p2474_p3 = scmp.lt.s32.totalorder %s2468_s3, %s2468_s3 }
 0x10e   :  { %p2475_p4 = por %p2474_p3, %p2473_p2 }
 0x110   :  { %p2476_p5 = pnand %p2475_p4, %p2469_p1 }
 0x112   :  { %2479 = shalt.err (!%p2476_p5)
}
 0x113   :  { %166 = dma.hbm_to_vmem [thread:$0]  %s2744_s14, 128, %s161_s12, [#allocation11], %s2666_s15, %s2666_s15, %s2667_s16  }
 0x114   :  { %s2682_s29 = smov [#allocation15]   ;;  %s2683_s30 = smov [#allocation18]  }
 0x115   :  { %s193_s26 = sshll.u32 %s2682_s29, 4  ;;  %s215_s7 = sshll.u32 %s2683_s30, 4  ;;  %s194_s26 = int_to_ptr.vmem [resolvable:$true] %s193_s26  ;;  %s216_s7 = int_to_ptr.vmem [resolvable:$true] %s215_s7 }
 0x116   :  { %s2480_s8 = scalar_lea.hbm %s2779_s27, 32 }
 0x117   :  { %p2481_p6 = scmp.ne.s32.totalorder %s2779_s27, %s2480_s8  ;;  %p2484_p7 = scmp.lt.u32.totalorder %s2480_s8, %s2779_s27 }
 0x119   :  { %p2486_p8 = pnand %p2484_p7, %p2481_p6 }
 0x11b   :  { %2489 = shalt.err (!%p2486_p8)
}
 0x11c   :  { %s2490_s10 = scalar_lea.vmem %s194_s26, 32  ;;  %p2495_p10 = scmp.lt.s32.totalorder %s194_s26, %s194_s26 }
 0x11d   :  { %p2491_p9 = scmp.ne.s32.totalorder %s194_s26, %s2490_s10  ;;  %p2496_p11 = scmp.lt.s32.totalorder %s2490_s10, %s2490_s10 }
 0x11f   :  { %p2497_p12 = por %p2496_p11, %p2495_p10 }
 0x121   :  { %p2498_p13 = pnand %p2497_p12, %p2491_p9 }
 0x123   :  { %2501 = shalt.err (!%p2498_p13)
}
 0x124   :  { %s3091_s19 = sld [smem:[#allocation49_spill]] }
 0x125   :  { %196 = dma.hbm_to_vmem [thread:$0]  %s2779_s27, 32, %s194_s26, [#allocation14]  }
 0x12a   :  { %s2502_s14 = scalar_lea.hbm %s3091_s19, 16 }
 0x12b   :  { %p2503_p0 = scmp.ne.s32.totalorder %s3091_s19, %s2502_s14  ;;  %p2506_p1 = scmp.lt.u32.totalorder %s2502_s14, %s3091_s19 }
 0x12d   :  { %p2508_p2 = pnand %p2506_p1, %p2503_p0 }
 0x12f   :  { %2511 = shalt.err (!%p2508_p2)
}
 0x130   :  { %s2512_s15 = scalar_lea.vmem %s216_s7, 16  ;;  %s2516_s16 = scalar_lea.vmem %s216_s7, 32 }
 0x131   :  { %p2513_p3 = scmp.ne.s32.totalorder %s216_s7, %s2512_s15  ;;  %p2517_p4 = scmp.lt.s32.totalorder %s216_s7, %s216_s7 }
 0x132   :  { %p2518_p5 = scmp.lt.s32.totalorder %s2516_s16, %s2512_s15 }
 0x134   :  { %p2519_p6 = por %p2518_p5, %p2517_p4 }
 0x136   :  { %p2520_p7 = pnand %p2519_p6, %p2513_p3 }
 0x138   :  { %2523 = shalt.err (!%p2520_p7)
}
 0x139   :  { %s3092_s1 = sld [smem:[#allocation50_spill]]  ;;  %s2684_s27 = smov [#allocation21]  }
 0x13a   :  { %218 = dma.hbm_to_vmem [thread:$0]  %s3091_s19, 16, %s216_s7, [#allocation17]  }
 0x13b   :  { %s235_s17 = sshll.u32 %s2684_s27, 4  ;;  %s2685_s2 = smov [#allocation24]   ;;  %s236_s17 = int_to_ptr.vmem [resolvable:$true] %s235_s17 }
 0x13c   :  { %s257_s25 = sshll.u32 %s2685_s2, 4  ;;  %s258_s25 = int_to_ptr.vmem [resolvable:$true] %s257_s25 }
 0x13f   :  { %s2524_s9 = scalar_lea.hbm %s3092_s1, 16 }
 0x140   :  { %p2525_p8 = scmp.ne.s32.totalorder %s3092_s1, %s2524_s9  ;;  %p2528_p9 = scmp.lt.u32.totalorder %s2524_s9, %s3092_s1 }
 0x142   :  { %p2530_p10 = pnand %p2528_p9, %p2525_p8 }
 0x144   :  { %2533 = shalt.err (!%p2530_p10)
}
 0x145   :  { %s2534_s11 = scalar_lea.vmem %s236_s17, 16  ;;  %s2538_s0 = scalar_lea.vmem %s236_s17, 32 }
 0x146   :  { %p2535_p11 = scmp.ne.s32.totalorder %s236_s17, %s2534_s11  ;;  %p2539_p12 = scmp.lt.s32.totalorder %s236_s17, %s236_s17 }
 0x147   :  { %p2540_p13 = scmp.lt.s32.totalorder %s2538_s0, %s2534_s11 }
 0x149   :  { %p2541_p0 = por %p2540_p13, %p2539_p12 }
 0x14b   :  { %p2542_p1 = pnand %p2541_p0, %p2535_p11 }
 0x14d   :  { %2545 = shalt.err (!%p2542_p1)
}
 0x14e   :  { %s3093_s13 = sld [smem:[#allocation51_spill]] }
 0x14f   :  { %238 = dma.hbm_to_vmem [thread:$0]  %s3092_s1, 16, %s236_s17, [#allocation20]  }
 0x154   :  { %s2546_s4 = scalar_lea.hbm %s3093_s13, 32 }
 0x155   :  { %p2547_p2 = scmp.ne.s32.totalorder %s3093_s13, %s2546_s4  ;;  %p2550_p3 = scmp.lt.u32.totalorder %s2546_s4, %s3093_s13 }
 0x157   :  { %p2552_p4 = pnand %p2550_p3, %p2547_p2 }
 0x159   :  { %2555 = shalt.err (!%p2552_p4)
}
 0x15a   :  { %s2556_s18 = scalar_lea.vmem %s258_s25, 32  ;;  %p2561_p6 = scmp.lt.s32.totalorder %s258_s25, %s258_s25 }
 0x15b   :  { %p2557_p5 = scmp.ne.s32.totalorder %s258_s25, %s2556_s18  ;;  %p2562_p7 = scmp.lt.s32.totalorder %s2556_s18, %s2556_s18 }
 0x15d   :  { %p2563_p8 = por %p2562_p7, %p2561_p6 }
 0x15f   :  { %p2564_p9 = pnand %p2563_p8, %p2557_p5 }
 0x161   :  { %2567 = shalt.err (!%p2564_p9)
}
 0x162   :  { %s3094_s12 = sld [smem:[#allocation52_spill]]  ;;  %s2686_s22 = smov [#allocation27]  }
 0x163   :  { %260 = dma.hbm_to_vmem [thread:$0]  %s3093_s13, 32, %s258_s25, [#allocation23]  }
 0x164   :  { %s279_s23 = sshll.u32 %s2686_s22, 4  ;;  %s2687_s28 = smov [#allocation30]   ;;  %s280_s23 = int_to_ptr.vmem [resolvable:$true] %s279_s23 }
 0x165   :  { %s301_s21 = sshll.u32 %s2687_s28, 4  ;;  %s302_s21 = int_to_ptr.vmem [resolvable:$true] %s301_s21 }
 0x168   :  { %s2568_s3 = scalar_lea.hbm %s3094_s12, 16 }
 0x169   :  { %p2569_p10 = scmp.ne.s32.totalorder %s3094_s12, %s2568_s3  ;;  %p2572_p11 = scmp.lt.u32.totalorder %s2568_s3, %s3094_s12 }
 0x16b   :  { %p2574_p12 = pnand %p2572_p11, %p2569_p10 }
 0x16d   :  { %2577 = shalt.err (!%p2574_p12)
}
 0x16e   :  { %s2578_s29 = scalar_lea.vmem %s280_s23, 16  ;;  %s2582_s26 = scalar_lea.vmem %s280_s23, 32 }
 0x16f   :  { %p2579_p13 = scmp.ne.s32.totalorder %s280_s23, %s2578_s29  ;;  %p2583_p0 = scmp.lt.s32.totalorder %s280_s23, %s280_s23 }
 0x170   :  { %p2584_p1 = scmp.lt.s32.totalorder %s2582_s26, %s2578_s29 }
 0x172   :  { %p2585_p2 = por %p2584_p1, %p2583_p0 }
 0x174   :  { %p2586_p3 = pnand %p2585_p2, %p2579_p13 }
 0x176   :  { %2589 = shalt.err (!%p2586_p3)
}
 0x177   :  { %s3095_s30 = sld [smem:[#allocation53_spill]] }
 0x178   :  { %282 = dma.hbm_to_vmem [thread:$0]  %s3094_s12, 16, %s280_s23, [#allocation26]  }
 0x17d   :  { %s2590_s7 = scalar_lea.hbm %s3095_s30, 16 }
 0x17e   :  { %p2591_p4 = scmp.ne.s32.totalorder %s3095_s30, %s2590_s7  ;;  %p2594_p5 = scmp.lt.u32.totalorder %s2590_s7, %s3095_s30 }
 0x180   :  { %p2596_p6 = pnand %p2594_p5, %p2591_p4 }
 0x182   :  { %2599 = shalt.err (!%p2596_p6)
}
 0x183   :  { %s2600_s8 = scalar_lea.vmem %s302_s21, 16  ;;  %s2604_s10 = scalar_lea.vmem %s302_s21, 32 }
 0x184   :  { %p2601_p7 = scmp.ne.s32.totalorder %s302_s21, %s2600_s8  ;;  %p2605_p8 = scmp.lt.s32.totalorder %s302_s21, %s302_s21 }
 0x185   :  { %p2606_p9 = scmp.lt.s32.totalorder %s2604_s10, %s2600_s8 }
 0x187   :  { %p2607_p10 = por %p2606_p9, %p2605_p8 }
 0x189   :  { %p2608_p11 = pnand %p2607_p10, %p2601_p7 }
 0x18b   :  { %2611 = shalt.err (!%p2608_p11)
}
 0x18c   :  { %304 = dma.hbm_to_vmem [thread:$0]  %s3095_s30, 16, %s302_s21, [#allocation29]  }
 0x18d   :  { %2612 = dma.done.wait [#allocation3], 16  }
 0x18e   :  { %2613 = vsyncadd [#allocation3], 4294967280 }
 0x18f   :  { %2614 = dma.done.wait [#allocation5], 1040  }
 0x190   :  { %2615 = vsyncadd [#allocation5], 4294966256 }
 0x191   :  { %2616 = dma.done.wait [#allocation8], 1040  }
 0x192   :  { %2617 = vsyncadd [#allocation8], 4294966256 }
 0x193   :  { %2618 = dma.done.wait [#allocation11], 1152  }
 0x194   :  { %2619 = vsyncadd [#allocation11], 4294966144 }
 0x195   :  { %2620 = dma.done.wait [#allocation14], 48  }
 0x196   :  { %2621 = vsyncadd [#allocation14], 4294967248 }
 0x197   :  { %2622 = dma.done.wait [#allocation17], 2064  }
 0x198   :  { %2623 = vsyncadd [#allocation17], 4294965232 }
 0x199   :  { %2624 = dma.done.wait [#allocation20], 32  }
 0x19a   :  { %2625 = vsyncadd [#allocation20], 4294967264 }
 0x19b   :  { %2626 = dma.done.wait [#allocation23], 2080  }
 0x19c   :  { %2627 = vsyncadd [#allocation23], 4294965216 }
 0x19d   :  { %2628 = dma.done.wait [#allocation26], 2064  }
 0x19e   :  { %2629 = vsyncadd [#allocation26], 4294965232 }
 0x19f   :  { %2630 = dma.done.wait [#allocation29], 1040  }
 0x1a0   :  { %2631 = vsyncadd [#allocation29], 4294966256  ;;  %s3096_s19 = sld [smem:[#allocation42_spill]]  ;;  %s3097_s14 = sld [smem:[#allocation41_spill]]  ;;  %v2688_v0 = vmov 0.0   ;;  %vm2689_vm0 = vmmov 0  }
 0x1a1   :  { %1936 = vmatprep.subr.bf16.mxu1 %v2688_v0  ;;  %1938 = vmatprep.mubr.msk.bf16.mxu1 %vm2689_vm0, %v2688_v0  ;;  %vm381_vm1 = vcmask 130048   ;;  %v2081_v5 = vld [vmem:[#allocation4] sm:$0xff]   ;;  %v2084_v7 = vld [vmem:[#allocation7 + $0x8] sm:$0xff]   ;;  %v2086_v9 = vld [vmem:[#allocation7 + $0x10] sm:$0xff]   ;;  %s3098_s15 = sld [smem:[#allocation54_spill]]  ;;  %s3099_s16 = sld [smem:[#allocation43_spill]] }
 0x1a2   :  { %1962 = vmatprep.subr.bf16.mxu0 %v2688_v0  ;;  %1978 = vmatprep.mubr.msk.bf16.mxu0 %vm2689_vm0, %v2688_v0  ;;  %v2082_v6 = vld [vmem:[#allocation7] sm:$0xff]   ;;  %v2085_v10 = vld [vmem:[#allocation4 + $0x10] sm:$0xff]   ;;  %v2087_v11 = vld [vmem:[#allocation4 + $0x18] sm:$0xff]   ;;  %s3100_s1 = sld [smem:[#allocation44_spill]]  ;;  %s3101_s27 = sld [smem:[#allocation45_spill]]  ;;  %v2690_v39 = vmov 0  }
 0x1a3   :  { %1963 = vmatpush3.bf16.msra.mxu0 %v2082_v6  ;;  %v2083_v8 = vld [vmem:[#allocation4 + $0x8] sm:$0xff]   ;;  %v2088_v12 = vld [vmem:[#allocation7 + $0x18] sm:$0xff]   ;;  %v2093_v17 = vld [vmem:[#allocation4 + $0x30] sm:$0xff]   ;;  %s3102_s17 = sld [smem:[#allocation48_spill]]  ;;  %s3103_s2 = sld [smem:[#allocation47_spill]]  ;;  %2079 = vset.pattern.permute.xlu0 %v2690_v39 }
 0x1a4   :  { %1964 = vmatprep.subr.bf16.mxu0 %v2688_v0  ;;  %v2090_v13 = vld [vmem:[#allocation7 + $0x20] sm:$0xff]   ;;  %v2092_v15 = vld [vmem:[#allocation7 + $0x28] sm:$0xff]   ;;  %v2094_v18 = vld [vmem:[#allocation7 + $0x30] sm:$0xff]   ;;  %s3104_s25 = sld [smem:[#allocation46_spill]]  ;;  %s3105_s9 = sld [smem:[#allocation55_spill]] }
 0x1a5   :  { %v2089_v14 = vld [vmem:[#allocation4 + $0x20] sm:$0xff]   ;;  %v2091_v16 = vld [vmem:[#allocation4 + $0x28] sm:$0xff]   ;;  %v2095_v19 = vld [vmem:[#allocation4 + $0x38] sm:$0xff]   ;;  %s3106_s11 = sld [smem:[#allocation56_spill]] }
 0x1a6   :  { %v2080_v1 = vld [vmem:[%s3096_s19] sm:$0xff]   ;;  %v364_v3 = vld [vmem:[%s3097_s14 + $0x8] sm:$0xff] }
 0x1a7   :  { %v363_v2 = vld [vmem:[%s3097_s14] sm:$0xff]  ;;  %1937 = vmatpush3.bf16.msra.mxu1 %v2080_v1  ;;  %1965 = vmatpush3.bf16.msra.mxu0 %v2084_v7  ;;  %v720_v34 = vld [vmem:[%s3099_s16 + $0x8] sm:$0xff] }
 0x1a8   :  { %v365_v4 = vpack.c.bf16 %v364_v3, %v363_v2  ;;  %1942 = vmatprep.subr.bf16.mxu1 %v2688_v0  ;;  %1966 = vmatprep.subr.bf16.mxu0 %v2688_v0  ;;  %v2096_v20 = vld [vmem:[#allocation7 + $0x38] sm:$0xff]   ;;  %v2097_v31 = vld [vmem:[#allocation12] sm:$0xff]   ;;  %v1766_v54 = vld [vmem:[#allocation9] ss:$0 sm:$0xff] }
 0x1a9   :  { %v1754_v21 = vld [vmem:[#allocation2] ss:$0 sm:$0xff]  ;;  %v2100_v40 = vld [vmem:[%s3102_s17 + $0x4] ss:$8 sps:$4 sm:$0xff]   ;;  %v2103_v41 = vld [vmem:[%s3102_s17 + $0x14] ss:$8 sps:$4 sm:$0xff]  }
 0x1aa   :  { %1939 = vmatmul.mubr.msk.bf16.vlgmr.msra.gmra.mrb[0].mxu1 %vm381_vm1, %v365_v4  ;;  %v719_v33 = vld [vmem:[%s3099_s16] sm:$0xff]  ;;  %v2101_v43 = vld [vmem:[%s3102_s17 + $0x10] ss:$8 sps:$4 sm:$0xff]   ;;  %v2109_v46 = vld [vmem:[%s3102_s17 + $0x34] ss:$8 sps:$4 sm:$0xff]  }
 0x1ab   :  { %1943 = vmatpush3.bf16.msra.mxu1 %v2081_v5  ;;  %1958 = vmatprep.mubr.msk.bf16.mxu1 %vm2689_vm0, %v2688_v0  ;;  %v721_v35 = vpack.c.bf16 %v720_v34, %v719_v33  ;;  %v781_v36 = vld [vmem:[%s3100_s1] sm:$0xf]  ;;  %v2106_v44 = vld [vmem:[%s3102_s17 + $0x24] ss:$8 sps:$4 sm:$0xff]   ;;  %v2107_v47 = vld [vmem:[%s3102_s17 + $0x30] ss:$8 sps:$4 sm:$0xff]  }
 0x1ac   :  { %1944 = vmatprep.subr.bf16.mxu1 %v2688_v0  ;;  %1967 = vmatpush3.bf16.msra.mxu0 %v2086_v9  ;;  %v826_v37 = vld [vmem:[%s3101_s27] sm:$0xff]  ;;  %v2115_v50 = vld [vmem:[%s3102_s17 + $0x54] ss:$8 sps:$4 sm:$0xff]   ;;  %v2113_v51 = vld [vmem:[%s3102_s17 + $0x50] ss:$8 sps:$4 sm:$0xff]  }
 0x1ad   :  { %1968 = vmatprep.subr.bf16.mxu0 %v2688_v0  ;;  %v2098_v38 = vld [vmem:[%s3102_s17] ss:$8 sps:$4 sm:$0xff]   ;;  %829 = vperm.xlu0 %2079, %v826_v37   ;;  %v2112_v48 = vld [vmem:[%s3102_s17 + $0x44] ss:$8 sps:$4 sm:$0xff]  }
 0x1ae   :  { %v878_v42 = vld [vmem:[%s3103_s2] sm:$0xff]  ;;  %v1775_v7 = vld [vmem:[#allocation13] ss:$0 sm:$0xff] }
 0x1af   :  { %1945 = vmatpush3.bf16.msra.mxu1 %v2083_v8  ;;  %v2104_v45 = vld [vmem:[%s3102_s17 + $0x20] ss:$8 sps:$4 sm:$0xff]   ;;  %v2118_v53 = vld [vmem:[%s3102_s17 + $0x64] ss:$8 sps:$4 sm:$0xff]  }
 0x1b0   :  { %1946 = vmatprep.subr.bf16.mxu1 %v2688_v0  ;;  %1969 = vmatpush3.bf16.msra.mxu0 %v2088_v12  ;;  %v2110_v49 = vld [vmem:[%s3102_s17 + $0x40] ss:$8 sps:$4 sm:$0xff]  }
 0x1b1   :  { %1970 = vmatprep.subr.bf16.mxu0 %v2688_v0  ;;  %881 = vperm.xlu0 %2079, %v878_v42   ;;  %v2116_v52 = vld [vmem:[%s3102_s17 + $0x60] ss:$8 sps:$4 sm:$0xff]   ;;  %v693_v42 = vld [vmem:[#allocation10 + $0x30] sm:$0xff] }
 0x1b2   :  { %v687_v37 = vld [vmem:[#allocation10] sm:$0xff] }
 0x1b3   :  { %1947 = vmatpush3.bf16.msra.mxu1 %v2085_v10 }
 0x1b4   :  { %1948 = vmatprep.subr.bf16.mxu1 %v2688_v0  ;;  %1971 = vmatpush3.bf16.msra.mxu0 %v2090_v13 }
 0x1b5   :  { %1972 = vmatprep.subr.bf16.mxu0 %v2688_v0 }
 0x1b7   :  { %1949 = vmatpush3.bf16.msra.mxu1 %v2087_v11 }
 0x1b8   :  { %1950 = vmatprep.subr.bf16.mxu1 %v2688_v0  ;;  %1973 = vmatpush3.bf16.msra.mxu0 %v2092_v15 }
 0x1b9   :  { %1974 = vmatprep.subr.bf16.mxu0 %v2688_v0 }
 0x1bb   :  { %1951 = vmatpush3.bf16.msra.mxu1 %v2089_v14 }
 0x1bc   :  { %1952 = vmatprep.subr.bf16.mxu1 %v2688_v0  ;;  %1975 = vmatpush3.bf16.msra.mxu0 %v2094_v18 }
 0x1bd   :  { %1976 = vmatprep.subr.bf16.mxu0 %v2688_v0 }
 0x1bf   :  { %1953 = vmatpush3.bf16.msra.mxu1 %v2091_v16  ;;  %v833_v16 = vld [vmem:[%s3104_s25] sm:$0xf] }
 0x1c0   :  { %1954 = vmatprep.subr.bf16.mxu1 %v2688_v0  ;;  %1977 = vmatpush3.bf16.msra.mxu0 %v2096_v20 }
 0x1c1   :  { %996 = vmatprep.subr.bf16.mxu0 %v2100_v40  ;;  %v689_v40 = vld [vmem:[#allocation10 + $0x10] sm:$0xff] }
 0x1c3   :  { %1955 = vmatpush3.bf16.msra.mxu1 %v2093_v17 }
 0x1c4   :  { %1956 = vmatprep.subr.bf16.mxu1 %v2688_v0 }
 0x1c7   :  { %1957 = vmatpush3.bf16.msra.mxu1 %v2095_v19 }
 0x1c8   :  { %1982 = vmatprep.subr.bf16.mxu1 %v2688_v0 }
 0x27d   :  { %v419_v22 = vpop.f32.mrb[0].mxu1 }
 0x27e   :  { %v420_v23 = vadd.f32 %v1754_v21, %v419_v22  ;;  %v1940_v24 = vpop.f32.mrb[1].mxu1 }
 0x27f   :  { %v422_v25 = vpop.f32.mrb[2].mxu1 }
 0x280   :  { %426 = vst [vmem:[%s3098_s15] sm:$0xff] %v420_v23  ;;  %v423_v26 = vadd.f32 %v1754_v21, %v422_v25  ;;  %v1941_v27 = vpop.f32.mrb[3].mxu1  ;;  %v428_v28 = vmax.f32 %v420_v23, 0.0 }
 0x282   :  { %427 = vst [vmem:[%s3098_s15 + $0x8] sm:$0xff] %v423_v26  ;;  %v429_v29 = vmax.f32 %v423_v26, 0.0  ;;  %v782_v30 = vpack.c.bf16 %v423_v26, %v420_v23 }
 0x284   :  { %v430_v32 = vpack.c.bf16 %v429_v29, %v428_v28 }
 0x286   :  { %1959 = vmatmul.mubr.bf16.vlgmr.msra.gmra.mrb[4].mxu1 %v430_v32  ;;  %1979 = vmatmul.mubr.bf16.vlgmr.msra.gmra.mrb[0].mxu0 %v430_v32 }
 0x287   :  { %1983 = vmatpush3.bf16.msra.mxu1 %v2097_v31  ;;  %1984 = vmatprep.mubr.msk.bf16.mxu1 %vm2689_vm0, %v2688_v0 }
 0x288   :  { %1988 = vmatprep.subr.bf16.mxu1 %v2688_v0  ;;  %1028 = vmatprep.mubr.bf16.mxu0 %v2690_v39 }
 0x289   :  { %997 = vmatpush1.bf16.msra.mxu0 %v2098_v38 }
 0x28a   :  { %998 = vmatprep.subr.bf16.mxu0 %v2103_v41  ;;  %v691_v41 = vld [vmem:[#allocation10 + $0x20] sm:$0xff] }
 0x28d   :  { %999 = vmatpush1.bf16.msra.mxu0 %v2101_v43 }
 0x28e   :  { %1985 = vmatmul.mubr.msk.bf16.vlgmr.msra.gmra.mrb[8].mxu1 %vm381_vm1, %v721_v35  ;;  %1000 = vmatprep.subr.bf16.mxu0 %v2106_v44  ;;  %v1757_v35 = vld [vmem:[#allocation6] ss:$0 sm:$0xff] }
 0x28f   :  { %1989 = vmatpush3.bf16.msra.mxu1 %v782_v30  ;;  %1990 = vmatprep.mubr.msk.bf16.mxu1 %vm2689_vm0, %v2688_v0 }
 0x290   :  { %1994 = vmatprep.subr.bf16.mxu1 %v2688_v0 }
 0x291   :  { %1001 = vmatpush1.bf16.msra.mxu0 %v2104_v45 }
 0x292   :  { %1002 = vmatprep.subr.bf16.mxu0 %v2109_v46 }
 0x295   :  { %1003 = vmatpush1.bf16.msra.mxu0 %v2107_v47  ;;  %v688_v47 = vld [vmem:[#allocation10 + $0x8] sm:$0xff] }
 0x296   :  { %1991 = vmatmul.mubr.msk.bf16.vlgmr.msra.gmra.mrb[12].mxu1 %vm381_vm1, %v781_v36  ;;  %1004 = vmatprep.subr.bf16.mxu0 %v2112_v48 }
 0x297   :  { %1996 = vmatprep.mubr.msk.bf16.mxu1 %vm2689_vm0, %v2688_v0 }
 0x299   :  { %1005 = vmatpush1.bf16.msra.mxu0 %v2110_v49 }
 0x29a   :  { %1006 = vmatprep.subr.bf16.mxu0 %v2115_v50 }
 0x29d   :  { %1007 = vmatpush1.bf16.msra.mxu0 %v2113_v51 }
 0x29e   :  { %1008 = vmatprep.subr.bf16.mxu0 %v2118_v53  ;;  %v692_v53 = vld [vmem:[#allocation10 + $0x28] sm:$0xff] }
 0x2a1   :  { %1009 = vmatpush1.bf16.msra.mxu0 %v2116_v52  ;;  %v690_v52 = vld [vmem:[#allocation10 + $0x18] sm:$0xff] }
 0x359   :  { %v536_v55 = vpop.f32.mrb[4].mxu1  ;;  %v648_v56 = vpop.f32.mrb[0].mxu0 }
 0x35a   :  { %v649_v57 = vadd.f32 %v1766_v54, %v648_v56  ;;  %v1960_v58 = vpop.f32.mrb[5].mxu1  ;;  %v1980_v59 = vpop.f32.mrb[1].mxu0  ;;  %v537_v46 = vadd.f32 %v1757_v35, %v536_v55 }
 0x35b   :  { %v3027_v60 = vpop.f32.mrb[6].mxu1  ;;  %v651_v61 = vpop.f32.mrb[2].mxu0 }
 0x35c   :  { %v657_v62 = vand.u32 2147483647, %v649_v57  ;;  %v652_v63 = vadd.f32 %v1766_v54, %v651_v61  ;;  %v1961_v1 = vpop.f32.mrb[7].mxu1  ;;  %v1981_v2 = vpop.f32.mrb[3].mxu0  ;;  %v655_v31 = vmax.f32 %v649_v57, 0.0  ;;  %v694_v54 = vld [vmem:[#allocation10 + $0x38] sm:$0xff]  ;;  %v540_v56 = vadd.f32 %v1757_v35, %v3027_v60 }
 0x35e   :  { %v659_v3 = vsub.f32 0.0, %v657_v62  ;;  %v658_v4 = vand.u32 2147483647, %v652_v63  ;;  %v656_v38 = vmax.f32 %v652_v63, 0.0 }
 0x360   :  { %v661_v5 = vmul.f32 1.442695, %v659_v3  ;;  %v660_v6 = vsub.f32 0.0, %v658_v4 }
 0x361   :  { %v774_v8 = vpop.f32.mrb[8].mxu1 }
 0x362   :  { %2186 = vpow2.f32 %v661_v5  ;;  %v663_v9 = vmul.f32 1.442695, %v660_v6  ;;  %v1986_v10 = vpop.f32.mrb[9].mxu1  ;;  %v775_v12 = vadd.f32 %v1775_v7, %v774_v8  ;;  %v830_v6 = vpop.permute.xlu0 %829 }
 0x363   :  { %v777_v11 = vpop.f32.mrb[10].mxu1 }
 0x364   :  { %2188 = vpow2.f32 %v663_v9  ;;  %v778_v13 = vadd.f32 %v1775_v7, %v777_v11  ;;  %v1987_v14 = vpop.f32.mrb[11].mxu1 }
 0x365   :  { %v2124_v14 = vld [vmem:[#allocation22 + $0x4] ss:$8 sps:$4 sm:$0xff]  }
 0x366   :  { %v3029_v15 = vpack.c.bf16 %v778_v13, %v775_v12  ;;  %v2121_v12 = vld [vmem:[%s3102_s17 + $0x74] ss:$8 sps:$4 sm:$0xff]   ;;  %v2119_v13 = vld [vmem:[%s3102_s17 + $0x70] ss:$8 sps:$4 sm:$0xff]  }
 0x367   :  { %1010 = vmatprep.subr.bf16.mxu0 %v2121_v12 }
 0x368   :  { %1995 = vmatpush3.bf16.msra.mxu1 %v3029_v15  ;;  %1011 = vmatpush1.bf16.msra.mxu0 %v2119_v13 }
 0x369   :  { %v820_v7 = vpop.f32.mrb[12].mxu1  ;;  %1348 = vmatprep.subr.bf16.mxu0 %v2124_v14 }
 0x36a   :  { %v1992_v8 = vpop.f32.mrb[13].mxu1  ;;  %v832_v9 = vmul.f32 %v830_v6, %v820_v7 }
 0x36b   :  { %1997 = vmatmul.mubr.msk.bf16.vlgmr.msra.gmra.mrb[16].mxu1 %vm381_vm1, %v833_v16  ;;  %v823_v10 = vpop.f32.mrb[14].mxu1  ;;  %v2154_v16 = vld [vmem:[#allocation16 + $0x40] sm:$0xff]   ;;  %v904_v8 = vld [vmem:[#allocation15] sm:$0x3] }
 0x36c   :  { %v2187_v17 = vpop.eup %2186  ;;  %885 = vst [vmem:[%s3106_s11] sm:$0xff] %v832_v9  ;;  %v1993_v11 = vpop.f32.mrb[15].mxu1  ;;  %1883 = vmatprep.subr.bf16.mxu1 %v2154_v16 }
 0x36d   :  { %v665_v18 = vadd.f32 1.0, %v2187_v17  ;;  %v668_v21 = vmul.f32 -0.5, %v2187_v17  ;;  %v671_v24 = vand.u32 2147483647, %v2187_v17 }
 0x36e   :  { %v2189_v19 = vpop.eup %2188 }
 0x36f   :  { %2190 = vlog2.f32 %v665_v18  ;;  %v674_v20 = vadd.f32 1.0, %v2189_v19  ;;  %v677_v22 = vmul.f32 -0.5, %v2189_v19  ;;  %v669_v23 = vadd.f32 1.0, %v668_v21  ;;  %v2156_v18 = vld [vmem:[#allocation16 + $0x48] sm:$0xff]   ;;  %v2159_v21 = vld [vmem:[#allocation16 + $0x10] sm:$0xff]  }
 0x370   :  { %v680_v27 = vand.u32 2147483647, %v2189_v19  ;;  %vm672_vm2 = vcmp.lt.f32.partialorder %v671_v24, 0.0004427343  ;;  %v2162_v24 = vld [vmem:[#allocation16 + $0x60] sm:$0xff]  }
 0x371   :  { %2192 = vlog2.f32 %v674_v20  ;;  %v678_v25 = vadd.f32 1.0, %v677_v22  ;;  %v670_v29 = vmul.f32 %v2187_v17, %v669_v23  ;;  %v2155_v17 = vld [vmem:[#allocation16] sm:$0xff]   ;;  %v2158_v20 = vld [vmem:[#allocation16 + $0x50] sm:$0xff]   ;;  %v2160_v22 = vld [vmem:[#allocation16 + $0x58] sm:$0xff]  }
 0x372   :  { %vm681_vm3 = vcmp.lt.f32.partialorder %v680_v27, 0.0004427343  ;;  %1884 = vmatpush3.bf16.msra.mxu1 %v2155_v17  ;;  %v2161_v23 = vld [vmem:[#allocation16 + $0x18] sm:$0xff]   ;;  %v2165_v27 = vld [vmem:[#allocation16 + $0x28] sm:$0xff]  }
 0x373   :  { %v679_v34 = vmul.f32 %v2189_v19, %v678_v25  ;;  %v2157_v19 = vld [vmem:[#allocation16 + $0x8] sm:$0xff]   ;;  %1885 = vmatprep.subr.bf16.mxu1 %v2156_v18  ;;  %v2163_v25 = vld [vmem:[#allocation16 + $0x20] sm:$0xff]  }
 0x376   :  { %1886 = vmatpush3.bf16.msra.mxu1 %v2157_v19 }
 0x377   :  { %1887 = vmatprep.subr.bf16.mxu1 %v2158_v20 }
 0x379   :  { %v2191_v26 = vpop.eup %2190 }
 0x37a   :  { %v667_v28 = vmul.f32 0.6931472, %v2191_v26  ;;  %1888 = vmatpush3.bf16.msra.mxu1 %v2159_v21  ;;  %v2164_v26 = vld [vmem:[#allocation16 + $0x68] sm:$0xff]  }
 0x37b   :  { %v2193_v30 = vpop.eup %2192  ;;  %1889 = vmatprep.subr.bf16.mxu1 %v2160_v22 }
 0x37c   :  { %v673_v32 = vsel %vm672_vm2, %v670_v29, %v667_v28  ;;  %v676_v33 = vmul.f32 0.6931472, %v2193_v30  ;;  %v882_v28 = vpop.permute.xlu0 %881 }
 0x37d   :  { %v683_v36 = vadd.f32 %v673_v32, %v655_v31 }
 0x37e   :  { %v682_v43 = vsel %vm681_vm3, %v679_v34, %v676_v33  ;;  %1890 = vmatpush3.bf16.msra.mxu1 %v2161_v23  ;;  %v2122_v33 = vld [vmem:[#allocation22] ss:$8 sps:$4 sm:$0xff]  }
 0x37f   :  { %v685_v44 = vadd.f32 0.0001, %v683_v36  ;;  %v684_v45 = vadd.f32 %v682_v43, %v656_v38  ;;  %1891 = vmatprep.subr.bf16.mxu1 %v2162_v24  ;;  %v2127_v36 = vld [vmem:[#allocation22 + $0x14] ss:$8 sps:$4 sm:$0xff]   ;;  %v2130_v38 = vld [vmem:[#allocation22 + $0x24] ss:$8 sps:$4 sm:$0xff]  }
 0x380   :  { %v2136_v43 = vld [vmem:[#allocation22 + $0x44] ss:$8 sps:$4 sm:$0xff]  }
 0x381   :  { %v695_v48 = vmul.f32 %v687_v37, %v685_v44  ;;  %v697_v49 = vmul.f32 %v689_v40, %v685_v44  ;;  %v699_v50 = vmul.f32 %v691_v41, %v685_v44  ;;  %v701_v51 = vmul.f32 %v693_v42, %v685_v44  ;;  %v2125_v37 = vld [vmem:[#allocation22 + $0x10] ss:$8 sps:$4 sm:$0xff]   ;;  %v2128_v40 = vld [vmem:[#allocation22 + $0x20] ss:$8 sps:$4 sm:$0xff]   ;;  %v2133_v41 = vld [vmem:[#allocation22 + $0x34] ss:$8 sps:$4 sm:$0xff]  }
 0x382   :  { %v686_v57 = vadd.f32 0.0001, %v684_v45  ;;  %1892 = vmatpush3.bf16.msra.mxu1 %v2163_v25  ;;  %v2131_v42 = vld [vmem:[#allocation22 + $0x30] ss:$8 sps:$4 sm:$0xff]   ;;  %v2134_v44 = vld [vmem:[#allocation22 + $0x40] ss:$8 sps:$4 sm:$0xff]  }
 0x383   :  { %v703_v58 = vadd.f32 %v695_v48, %v537_v46  ;;  %v705_v59 = vadd.f32 %v697_v49, %v537_v46  ;;  %v707_v55 = vadd.f32 %v699_v50, %v537_v46  ;;  %v709_v61 = vadd.f32 %v701_v51, %v537_v46  ;;  %1893 = vmatprep.subr.bf16.mxu1 %v2164_v26  ;;  %v2139_v45 = vld [vmem:[#allocation22 + $0x54] ss:$8 sps:$4 sm:$0xff]   ;;  %v2137_v46 = vld [vmem:[#allocation22 + $0x50] ss:$8 sps:$4 sm:$0xff]   ;;  %v2171_v25 = vld [vmem:[#allocation25] sm:$0xff]  }
 0x384   :  { %v696_v62 = vmul.f32 %v688_v47, %v686_v57  ;;  %v698_v63 = vmul.f32 %v690_v52, %v686_v57  ;;  %v700_v1 = vmul.f32 %v692_v53, %v686_v57  ;;  %v702_v2 = vmul.f32 %v694_v54, %v686_v57  ;;  %v2142_v47 = vld [vmem:[#allocation22 + $0x64] ss:$8 sps:$4 sm:$0xff]   ;;  %v1813_v48 = vld [vmem:[#allocation19] ss:$0 sm:$0xff]  ;;  %v1814_v51 = vld [vmem:[#allocation21] ss:$0 sm:$0xff] }
 0x385   :  { %711 = vst [vmem:[%s3105_s9] sm:$0xff] %v703_v58  ;;  %713 = vst [vmem:[%s3105_s9 + $0x10] sm:$0xff] %v705_v59  ;;  %v2145_v50 = vld [vmem:[#allocation22 + $0x74] ss:$8 sps:$4 sm:$0xff]   ;;  %v2143_v52 = vld [vmem:[#allocation22 + $0x70] ss:$8 sps:$4 sm:$0xff]  }
 0x386   :  { %715 = vst [vmem:[%s3105_s9 + $0x20] sm:$0xff] %v707_v55  ;;  %717 = vst [vmem:[%s3105_s9 + $0x30] sm:$0xff] %v709_v61  ;;  %v704_v60 = vadd.f32 %v696_v62, %v540_v56  ;;  %v706_v3 = vadd.f32 %v698_v63, %v540_v56  ;;  %v708_v4 = vadd.f32 %v700_v1, %v540_v56  ;;  %1894 = vmatpush3.bf16.msra.mxu1 %v2165_v27  ;;  %v2146_v54 = vld [vmem:[#allocation28] sm:$0xff]   ;;  %v2147_v57 = vld [vmem:[#allocation28 + $0x8] sm:$0xff]  }
 0x387   :  { %v710_v5 = vadd.f32 %v702_v2, %v540_v56  ;;  %v2148_v58 = vld [vmem:[#allocation28 + $0x10] sm:$0xff]   ;;  %v2149_v59 = vld [vmem:[#allocation28 + $0x18] sm:$0xff]   ;;  %v2150_v55 = vld [vmem:[#allocation28 + $0x20] sm:$0xff]  }
 0x388   :  { %712 = vst [vmem:[%s3105_s9 + $0x8] sm:$0xff] %v704_v60  ;;  %714 = vst [vmem:[%s3105_s9 + $0x18] sm:$0xff] %v706_v3  ;;  %v2151_v61 = vld [vmem:[#allocation28 + $0x28] sm:$0xff]   ;;  %v2152_v62 = vld [vmem:[#allocation28 + $0x30] sm:$0xff]  }
 0x389   :  { %716 = vst [vmem:[%s3105_s9 + $0x28] sm:$0xff] %v708_v4  ;;  %718 = vst [vmem:[%s3105_s9 + $0x38] sm:$0xff] %v710_v5  ;;  %v2153_v63 = vld [vmem:[#allocation28 + $0x38] sm:$0xff]   ;;  %v2166_v1 = vld [vmem:[#allocation16 + $0x70] sm:$0xff]   ;;  %v906_v5 = vlaneseq }
 0x38a   :  { %v2167_v2 = vld [vmem:[#allocation16 + $0x30] sm:$0xff]   ;;  %1895 = vmatprep.subr.bf16.mxu1 %v2166_v1  ;;  %v2168_v60 = vld [vmem:[#allocation16 + $0x78] sm:$0xff]   ;;  %v2170_v4 = vld [vmem:[#allocation25 + $0x40] sm:$0xff]  }
 0x38b   :  { %1896 = vmatpush3.bf16.msra.mxu1 %v2167_v2  ;;  %v2169_v3 = vld [vmem:[#allocation16 + $0x38] sm:$0xff]   ;;  %v907_v6 = vshrl.u32 %v906_v5, 7  ;;  %v2172_v26 = vld [vmem:[#allocation25 + $0x48] sm:$0xff]  }
 0x38c   :  { %1897 = vmatprep.subr.bf16.mxu1 %v2168_v60  ;;  %v2173_v27 = vld [vmem:[#allocation25 + $0x8] sm:$0xff]  }
 0x38d   :  { %v908_v7 = vsub.s32 0, %v907_v6 }
 0x38f   :  { %1898 = vmatpush3.bf16.msra.mxu1 %v2169_v3  ;;  %v909_v10 = vrot.slane %v904_v8, %v908_v7 }
 0x390   :  { %1905 = vmatprep.subr.bf16.mxu1 %v2170_v4 }
 0x43e   :  { %v872_v29 = vpop.f32.mrb[16].mxu1 }
 0x43f   :  { %v884_v30 = vmul.f32 %v882_v28, %v872_v29  ;;  %v1998_v31 = vpop.f32.mrb[17].mxu1  ;;  %v2174_v28 = vld [vmem:[#allocation25 + $0x50] sm:$0xff]  }
 0x440   :  { %v875_v32 = vpop.f32.mrb[18].mxu1  ;;  %v2175_v29 = vld [vmem:[#allocation25 + $0x10] sm:$0xff]   ;;  %v2177_v31 = vld [vmem:[#allocation25 + $0x18] sm:$0xff]  }
 0x441   :  { %886 = vst [vmem:[%s2849_s24] sm:$0xff] %v884_v30  ;;  %v887_v34 = vpack.c.bf16 %v884_v30, %v832_v9  ;;  %v1999_v35 = vpop.f32.mrb[19].mxu1  ;;  %v1230_v49 = vmul.f32 %v1813_v48, %v884_v30  ;;  %v912_v9 = vsub.s32 1, %v907_v6  ;;  %v2176_v30 = vld [vmem:[#allocation25 + $0x58] sm:$0xff]   ;;  %v2178_v32 = vld [vmem:[#allocation25 + $0x60] sm:$0xff]  }
 0x442   :  { %v1256_v35 = vld [vmem:[#allocation24] sm:$0x3] }
 0x443   :  { %1029 = vmatmul.mubr.bf16.vlgmr.msra.gmra.mrb[4].mxu0 %v887_v34  ;;  %v1238_v53 = vadd.f32 %v1814_v51, %v1230_v49  ;;  %v2180_v34 = vld [vmem:[#allocation25 + $0x68] sm:$0xff]   ;;  %v2185_v49 = vld [vmem:[#allocation25 + $0x38] sm:$0xff]  }
 0x444   :  { %1349 = vmatpush1.bf16.msra.mxu0 %v2122_v33  ;;  %1380 = vmatprep.mubr.bf16.mxu0 %v2690_v39  ;;  %v2140_v39 = vld [vmem:[#allocation22 + $0x60] ss:$8 sps:$4 sm:$0xff]  }
 0x445   :  { %1350 = vmatprep.subr.bf16.mxu0 %v2127_v36  ;;  %v1239_v56 = vpack.c.bf16 %v1238_v53, %v1238_v53  ;;  %v2179_v33 = vld [vmem:[#allocation25 + $0x20] sm:$0xff]   ;;  %v2181_v36 = vld [vmem:[#allocation25 + $0x28] sm:$0xff]  }
 0x446   :  { %v1848_v53 = vld [vmem:[#allocation30] ss:$0 sm:$0xff] }
 0x448   :  { %1351 = vmatpush1.bf16.msra.mxu0 %v2125_v37  ;;  %v1261_v37 = vrot.slane %v1256_v35, %v908_v7  ;;  %v1831_v7 = vld [vmem:[#allocation27] ss:$0 sm:$0xff] }
 0x449   :  { %1352 = vmatprep.subr.bf16.mxu0 %v2130_v38  ;;  %v2182_v38 = vld [vmem:[#allocation25 + $0x70] sm:$0xff]  }
 0x44c   :  { %1353 = vmatpush1.bf16.msra.mxu0 %v2128_v40  ;;  %v1265_v40 = vrot.slane %v1256_v35, %v912_v9 }
 0x44d   :  { %1354 = vmatprep.subr.bf16.mxu0 %v2133_v41 }
 0x450   :  { %1355 = vmatpush1.bf16.msra.mxu0 %v2131_v42  ;;  %v2183_v42 = vld [vmem:[#allocation25 + $0x30] sm:$0xff]  }
 0x451   :  { %1356 = vmatprep.subr.bf16.mxu0 %v2136_v43 }
 0x454   :  { %1357 = vmatpush1.bf16.msra.mxu0 %v2134_v44 }
 0x455   :  { %1358 = vmatprep.subr.bf16.mxu0 %v2139_v45  ;;  %v2184_v45 = vld [vmem:[#allocation25 + $0x78] sm:$0xff]  }
 0x458   :  { %1359 = vmatpush1.bf16.msra.mxu0 %v2137_v46 }
 0x459   :  { %1360 = vmatprep.subr.bf16.mxu0 %v2142_v47 }
 0x45c   :  { %1361 = vmatpush1.bf16.msra.mxu0 %v2140_v39 }
 0x45d   :  { %1362 = vmatprep.subr.bf16.mxu0 %v2145_v50 }
 0x460   :  { %1363 = vmatpush1.bf16.msra.mxu0 %v2143_v52 }
 0x461   :  { %2000 = vmatprep.subr.bf16.mxu0 %v2688_v0 }
 0x463   :  { %1381 = vmatmul.mubr.bf16.vlgmr.msra.gmra.mrb[8].mxu0 %v1239_v56 }
 0x464   :  { %2001 = vmatpush3.bf16.msra.mxu0 %v2146_v54  ;;  %2016 = vmatprep.mubr.msk.bf16.mxu0 %vm2689_vm0, %v2688_v0 }
 0x465   :  { %2002 = vmatprep.subr.bf16.mxu0 %v2688_v0 }
 0x468   :  { %2003 = vmatpush3.bf16.msra.mxu0 %v2147_v57 }
 0x469   :  { %2004 = vmatprep.subr.bf16.mxu0 %v2688_v0 }
 0x46c   :  { %2005 = vmatpush3.bf16.msra.mxu0 %v2148_v58 }
 0x46d   :  { %2006 = vmatprep.subr.bf16.mxu0 %v2688_v0 }
 0x470   :  { %2007 = vmatpush3.bf16.msra.mxu0 %v2149_v59 }
 0x471   :  { %2008 = vmatprep.subr.bf16.mxu0 %v2688_v0 }
 0x474   :  { %2009 = vmatpush3.bf16.msra.mxu0 %v2150_v55 }
 0x475   :  { %2010 = vmatprep.subr.bf16.mxu0 %v2688_v0 }
 0x478   :  { %2011 = vmatpush3.bf16.msra.mxu0 %v2151_v61 }
 0x479   :  { %2012 = vmatprep.subr.bf16.mxu0 %v2688_v0 }
 0x47c   :  { %2013 = vmatpush3.bf16.msra.mxu0 %v2152_v62  ;;  %v1796_v62 = vld [vmem:[#allocation18] ss:$0 sm:$0xff] }
 0x47d   :  { %2014 = vmatprep.subr.bf16.mxu0 %v2688_v0  ;;  %v913_v0 = vrot.slane %v904_v8, %v912_v9 }
 0x480   :  { %2015 = vmatpush3.bf16.msra.mxu0 %v2153_v63 }
 0x483   :  { %2017 = vmatmul.mubr.bf16.vlgmr.msra.gmra.mrb[12].mxu0 %v3029_v15 }
 0x516   :  { %v1030_v11 = vpop.f32.mrb[4].mxu0 }
 0x517   :  { %v1031_v12 = vadd.f32 %v1030_v11, %v909_v10  ;;  %v1032_v15 = vpop.f32.mrb[5].mxu0 }
 0x518   :  { %v1033_v13 = vadd.f32 %v1032_v15, %v913_v0  ;;  %v1034_v14 = vpop.f32.mrb[6].mxu0 }
 0x519   :  { %v1035_v16 = vadd.f32 %v1034_v14, %v909_v10  ;;  %v1036_v17 = vpop.f32.mrb[7].mxu0  ;;  %v1039_v19 = vmax.f32 %v1031_v12, 0.0 }
 0x51a   :  { %v1037_v18 = vadd.f32 %v1036_v17, %v913_v0  ;;  %v1040_v21 = vmax.f32 %v1033_v13, 0.0 }
 0x51b   :  { %v1041_v20 = vmax.f32 %v1035_v16, 0.0 }
 0x51c   :  { %v1042_v22 = vmax.f32 %v1037_v18, 0.0 }
 0x51d   :  { %v1043_v23 = vpack.c.bf16 %v1041_v20, %v1039_v19 }
 0x51e   :  { %v1044_v24 = vpack.c.bf16 %v1042_v22, %v1040_v21 }
 0x520   :  { %1212 = vmatprep.mubr.bf16.mxu1 %v1044_v24 }
 0x521   :  { %1213 = vmatmul.mubr.bf16.vlgmr.msra.gmra.mrb[20].mxu1 %v1043_v23 }
 0x522   :  { %1906 = vmatpush3.bf16.msra.mxu1 %v2171_v25 }
 0x523   :  { %1907 = vmatprep.subr.bf16.mxu1 %v2172_v26 }
 0x526   :  { %1908 = vmatpush3.bf16.msra.mxu1 %v2173_v27 }
 0x527   :  { %1909 = vmatprep.subr.bf16.mxu1 %v2174_v28 }
 0x52a   :  { %1910 = vmatpush3.bf16.msra.mxu1 %v2175_v29 }
 0x52b   :  { %1911 = vmatprep.subr.bf16.mxu1 %v2176_v30 }
 0x52e   :  { %1912 = vmatpush3.bf16.msra.mxu1 %v2177_v31 }
 0x52f   :  { %1913 = vmatprep.subr.bf16.mxu1 %v2178_v32 }
 0x532   :  { %1914 = vmatpush3.bf16.msra.mxu1 %v2179_v33 }
 0x533   :  { %1915 = vmatprep.subr.bf16.mxu1 %v2180_v34 }
 0x536   :  { %v1382_v41 = vpop.f32.mrb[8].mxu0  ;;  %1916 = vmatpush3.bf16.msra.mxu1 %v2181_v36 }
 0x537   :  { %v1383_v43 = vadd.f32 %v1382_v41, %v1261_v37  ;;  %v1384_v44 = vpop.f32.mrb[9].mxu0  ;;  %1917 = vmatprep.subr.bf16.mxu1 %v2182_v38 }
 0x538   :  { %v1385_v46 = vadd.f32 %v1384_v44, %v1265_v40  ;;  %v1386_v47 = vpop.f32.mrb[10].mxu0 }
 0x539   :  { %v1387_v48 = vpop.f32.mrb[11].mxu0  ;;  %v1389_v50 = vmax.f32 %v1383_v43, 0.0 }
 0x53a   :  { %v1390_v39 = vmax.f32 %v1385_v46, 0.0  ;;  %1918 = vmatpush3.bf16.msra.mxu1 %v2183_v42 }
 0x53b   :  { %1919 = vmatprep.subr.bf16.mxu1 %v2184_v45  ;;  %v1391_v52 = vpack.c.bf16 %v1389_v50, %v1389_v50 }
 0x53c   :  { %v1392_v51 = vpack.c.bf16 %v1390_v39, %v1390_v39 }
 0x53e   :  { %1920 = vmatpush3.bf16.msra.mxu1 %v2185_v49  ;;  %1560 = vmatprep.mubr.bf16.mxu1 %v1392_v51 }
 0x541   :  { %1561 = vmatmul.mubr.bf16.vlgmr.msra.gmra.mrb[24].mxu1 %v1391_v52 }
 0x556   :  { %v1674_v54 = vpop.f32.mrb[12].mxu0 }
 0x557   :  { %v1675_v56 = vadd.f32 %v1848_v53, %v1674_v54  ;;  %v2018_v57 = vpop.f32.mrb[13].mxu0 }
 0x558   :  { %v1677_v58 = vpop.f32.mrb[14].mxu0 }
 0x559   :  { %1681 = vst [vmem:[%s2864_s6] sm:$0xff] %v1675_v56  ;;  %v1678_v59 = vadd.f32 %v1848_v53, %v1677_v58  ;;  %v2019_v55 = vpop.f32.mrb[15].mxu0 }
 0x55b   :  { %1682 = vst [vmem:[%s2864_s6 + $0x8] sm:$0xff] %v1678_v59 }
 0x5f4   :  { %v1899_v61 = vpop.f32.mrb[20].mxu1 }
 0x5f5   :  { %v1900_v63 = vpop.f32.mrb[21].mxu1 }
 0x5f6   :  { %v1901_v1 = vadd.f32 %v1900_v63, %v1899_v61  ;;  %v1902_v2 = vpop.f32.mrb[22].mxu1 }
 0x5f7   :  { %v1903_v60 = vpop.f32.mrb[23].mxu1 }
 0x5f8   :  { %v1215_v3 = vadd.f32 %v1901_v1, %v1796_v62  ;;  %v1904_v4 = vadd.f32 %v1903_v60, %v1902_v2 }
 0x5fa   :  { %1221 = vst [vmem:[%s2854_s20] sm:$0xff] %v1215_v3  ;;  %v1218_v5 = vadd.f32 %v1904_v4, %v1796_v62 }
 0x5fc   :  { %1222 = vst [vmem:[%s2854_s20 + $0x8] sm:$0xff] %v1218_v5 }
 0x614   :  { %v1921_v6 = vpop.f32.mrb[24].mxu1 }
 0x615   :  { %v1922_v8 = vpop.f32.mrb[25].mxu1 }
 0x616   :  { %v1923_v9 = vadd.f32 %v1922_v8, %v1921_v6  ;;  %v1924_v10 = vpop.f32.mrb[26].mxu1 }
 0x617   :  { %v1925_v0 = vpop.f32.mrb[27].mxu1 }
 0x618   :  { %v1563_v11 = vadd.f32 %v1923_v9, %v1831_v7 }
 0x61a   :  { %1568 = vst [vmem:[%s2859_s5] sm:$0xff] %v1563_v11 }
 0x61b   :  { %1711 = vsyncpa [#allocation3], 1 }
 0x61c   :  { %1712 = vsyncpa [#allocation5], 1 }
 0x61d   :  { %1713 = vsyncpa [#allocation8], 1 }
 0x61e   :  { %1714 = vsyncpa [#allocation11], 1 }
 0x61f   :  { %1715 = vsyncpa [#allocation14], 1 }
 0x620   :  { %1716 = vsyncpa [#allocation17], 1 }
 0x621   :  { %1717 = vsyncpa [#allocation20], 1 }
 0x622   :  { %1718 = vsyncpa [#allocation23], 1 }
 0x623   :  { %1719 = vsyncpa [#allocation26], 1 }
 0x624   :  { %1720 = vsyncpa [#allocation29], 1 }

// kernel: _lambda_.4
= control target key start
LH: loop header
LB: loop body
LE: loop exit
PB: predicated region body
PF: predicated region fallthrough
CT: control target
= control target key end

     0   :  { %s13195_s0 = inlined_call_operand.vmem [shape: f32[2,32,128], index: 0, kind: input, shape index: {}]   ;;  %s13196_s1 = inlined_call_operand.vmem [shape: f32[1,32,32], index: 1, kind: input, shape index: {}]   ;;  %s13197_s2 = inlined_call_operand.hbm [shape: f32[1,32,1], index: 2, kind: input, shape index: {}]   ;;  %s13198_s3 = inlined_call_operand.vmem [shape: bf16[2,128,384], index: 3, kind: input, shape index: {}]   ;;  %s13199_s4 = inlined_call_operand.hbm [shape: f32[2,1,384], index: 4, kind: input, shape index: {}]   ;;  %s13200_s5 = inlined_call_operand.hbm [shape: bf16[2,128,128], index: 5, kind: input, shape index: {}]   ;;  %s13201_s6 = inlined_call_operand.hbm [shape: f32[2,1,128], index: 6, kind: input, shape index: {}]   ;;  %s13202_s7 = inlined_call_operand.hbm [shape: f32[2,1,128], index: 7, kind: input, shape index: {}]   ;;  %s13203_s8 = inlined_call_operand.hbm [shape: f32[2,1,128], index: 8, kind: input, shape index: {}]   ;;  %s13204_s9 = inlined_call_operand.vmem [shape: bf16[2,128,2048], index: 9, kind: input, shape index: {}]   ;;  %s13205_s10 = inlined_call_operand.vmem [shape: f32[2,1,2048], index: 10, kind: input, shape index: {}]   ;;  %s13206_s11 = inlined_call_operand.hbm [shape: bf16[2,2048,128], index: 11, kind: input, shape index: {}]   ;;  %s13207_s12 = inlined_call_operand.hbm [shape: f32[2,1,128], index: 12, kind: input, shape index: {}]   ;;  %s13208_s13 = inlined_call_operand.hbm [shape: f32[2,1,128], index: 13, kind: input, shape index: {}]   ;;  %s13209_s14 = inlined_call_operand.hbm [shape: f32[2,1,128], index: 14, kind: input, shape index: {}]   ;;  %s13210_s15 = inlined_call_operand.vmem [shape: f32[8,8,8], index: 15, kind: output, shape index: {}]  }
   0x1   :  { %13220 = sst [smem:[#allocation25_spill]] %s13197_s2 }
   0x2   :  { %13221 = sst [smem:[#allocation26_spill]] %s13199_s4 }
   0x3   :  { %13222 = sst [smem:[#allocation27_spill]] %s13200_s5 }
   0x4   :  { %13223 = sst [smem:[#allocation28_spill]] %s13204_s9 }
   0x5   :  { %13224 = sst [smem:[#allocation29_spill]] %s13205_s10 }
   0x6   :  { %13225 = sst [smem:[#allocation30_spill]] %s13210_s15 }
   0x7   :  { %20 = vsyncpa [#allocation3], 0 }
   0x8   :  { %21 = vsyncpa [#allocation5], 0 }
   0x9   :  { %22 = vsyncpa [#allocation8], 0 }
   0xa   :  { %23 = vsyncpa [#allocation11], 0 }
   0xb   :  { %24 = vsyncpa [#allocation14], 0 }
   0xc   :  { %25 = vsyncpa [#allocation17], 0  ;;  %s11300_s18 = smov 0  }
   0xd LB: > { %13226 = sst [smem:[#allocation24_spill]] %s11196_s18  ;;  %s11198_s19 = smov [#allocation4]   ;;  %s11196_s18 = sphi %s11300_s18, %s31_s18  }
   0xe   : > { %s413_s20 = sshll.u32 %s11198_s19, 4  ;;  %s11306_s21 = sadd.s32 4294967295, %s11196_s18   ;;  %s11311_s20 = int_to_ptr.vmem [resolvable:$true] %s413_s20 }
   0xf   : > { %p8795_p0 = scmp.ge.s32.totalorder %s11196_s18, 1  ;;  %p382_p1 = scmp.lt.s32.totalorder %s11196_s18, 3 }
  0x10   : > { %p13214_p2 = scmp.eq.s32.totalorder %s11306_s21, 0  ;;  %s11199_s23 = smov [#allocation7]  }
  0x11   : > { %p11313_p3 = pnand %p8795_p0, %p382_p1  ;;  %s439_s24 = sshll.u32 %s11199_s23, 4  ;;  %s11319_s24 = int_to_ptr.vmem [resolvable:$true] %s439_s24 }
  0x12   : > { %s11200_s26 = smov [#allocation10]   ;;  %s13229_s4 = sld [smem:[#allocation26_spill]] }
  0x13   : > { %s13227_s22 = scalar_select %p11313_p3, 1, 0 }
  0x14   : > { %p10331_p4 = pneg %p11313_p3  ;;  %s11327_s27 = sshll.u32 %s11200_s26, 4  ;;  %s466_s27 = int_to_ptr.vmem [resolvable:$true] %s11327_s27 }
  0x16   : > { %p11323_p5 = pnand %p13214_p2, %p10331_p4 }
  0x18   : > { %s10886_s30 = scalar_lea.hbm %s13229_s4, 96  ;;  %p11337_p7 = pneg %p11323_p5 }
  0x19   : > { %p10887_p6 = scmp.ne.s32.totalorder %s13229_s4, %s10886_s30  ;;  %p10893_p10 = scmp.lt.u32.totalorder %s10886_s30, %s13229_s4 }
  0x1b   : > { %p10889_p8 = pnand %p11337_p7, %p10887_p6 }
  0x1d   : > { %p10890_p9 = pneg %p10889_p8 }
  0x1f   : > { %p10895_p11 = pnand %p10893_p10, %p10890_p9 }
  0x21   : > { %10898 = shalt.err (!%p10895_p11)
}
  0x22   : > { %s10899_s28 = scalar_lea.vmem %s11311_s20, 96  ;;  %p10907_p1 = scmp.lt.s32.totalorder %s11311_s20, %s11311_s20 }
  0x23   : > { %p10900_p12 = scmp.ne.s32.totalorder %s11311_s20, %s10899_s28  ;;  %p10908_p4 = scmp.lt.s32.totalorder %s10899_s28, %s10899_s28 }
  0x25   : > { %p10902_p13 = pnand %p10900_p12, %p11337_p7  ;;  %p10909_p6 = por %p10908_p4, %p10907_p1 }
  0x27   : > { %p10903_p0 = pneg %p10902_p13 }
  0x29   : > { %p10910_p8 = pnand %p10909_p6, %p10903_p0 }
  0x2b   : > { %10913 = shalt.err (!%p10910_p8)
}
  0x2c   : > { %s11201_s29 = smov 48   ;;  %s11202_s30 = smov 3  }
  0x2d   : > { %10337 = dma.hbm_to_vmem [thread:$0]  (!%p11323_p5), %s13229_s4, 96, %s11311_s20, [#allocation5], %s11201_s29, %s11201_s29, %s11202_s30  }
  0x2e   : > { %s10914_s18 = scalar_lea.hbm %s13201_s6, 32 }
  0x2f   : > { %p10915_p9 = scmp.ne.s32.totalorder %s13201_s6, %s10914_s18  ;;  %p10921_p12 = scmp.lt.u32.totalorder %s10914_s18, %s13201_s6 }
  0x31   : > { %p10917_p10 = pnand %p10915_p9, %p11337_p7 }
  0x33   : > { %p10918_p11 = pneg %p10917_p10 }
  0x35   : > { %p10923_p13 = pnand %p10921_p12, %p10918_p11 }
  0x37   : > { %10926 = shalt.err (!%p10923_p13)
}
  0x38   : > { %s10927_s20 = scalar_lea.vmem %s11319_s24, 32  ;;  %p10935_p6 = scmp.lt.s32.totalorder %s11319_s24, %s11319_s24 }
  0x39   : > { %p10928_p0 = scmp.ne.s32.totalorder %s11319_s24, %s10927_s20  ;;  %p10936_p8 = scmp.lt.s32.totalorder %s10927_s20, %s10927_s20 }
  0x3b   : > { %p10930_p1 = pnand %p10928_p0, %p11337_p7  ;;  %p10937_p9 = por %p10936_p8, %p10935_p6 }
  0x3d   : > { %p10931_p4 = pneg %p10930_p1 }
  0x3f   : > { %p10938_p10 = pnand %p10937_p9, %p10931_p4 }
  0x41   : > { %10941 = shalt.err (!%p10938_p10)
}
  0x42   : > { %s13216_s10 = smov 16   ;;  %s13218_s9 = smov 1  }
  0x43   : > { %10343 = dma.hbm_to_vmem [thread:$0]  (!%p11323_p5), %s13201_s6, 32, %s11319_s24, [#allocation8], %s13216_s10, %s13216_s10, %s13218_s9  }
  0x44   : > { %s11205_s29 = smov [#allocation13]   ;;  %s10942_s23 = scalar_lea.hbm %s13203_s8, 32 }
  0x45   : > { %s497_s30 = sshll.u32 %s11205_s29, 4  ;;  %p10943_p11 = scmp.ne.s32.totalorder %s13203_s8, %s10942_s23  ;;  %s498_s30 = int_to_ptr.vmem [resolvable:$true] %s497_s30 }
  0x46   : > { %p10949_p0 = scmp.lt.u32.totalorder %s10942_s23, %s13203_s8 }
  0x47   : > { %p10945_p12 = pnand %p10943_p11, %p11337_p7 }
  0x49   : > { %p10946_p13 = pneg %p10945_p12 }
  0x4b   : > { %p10951_p1 = pnand %p10949_p0, %p10946_p13 }
  0x4d   : > { %10954 = shalt.err (!%p10951_p1)
}
  0x4e   : > { %s10955_s24 = scalar_lea.vmem %s466_s27, 32  ;;  %p10963_p9 = scmp.lt.s32.totalorder %s466_s27, %s466_s27 }
  0x4f   : > { %p10956_p4 = scmp.ne.s32.totalorder %s466_s27, %s10955_s24  ;;  %p10964_p10 = scmp.lt.s32.totalorder %s10955_s24, %s10955_s24 }
  0x51   : > { %p10958_p6 = pnand %p10956_p4, %p11337_p7  ;;  %p10965_p2 = por %p10964_p10, %p10963_p9 }
  0x53   : > { %p10959_p8 = pneg %p10958_p6 }
  0x55   : > { %p10966_p3 = pnand %p10965_p2, %p10959_p8 }
  0x57   : > { %10969 = shalt.err (!%p10966_p3)
}
  0x58   : > { %10349 = dma.hbm_to_vmem [thread:$0]  (!%p11323_p5), %s13203_s8, 32, %s466_s27, [#allocation11], %s13216_s10, %s13216_s10, %s13218_s9  }
  0x59   : > { %s10970_s16 = scalar_lea.hbm %s13207_s12, 32 }
  0x5a   : > { %p10971_p2 = scmp.ne.s32.totalorder %s13207_s12, %s10970_s16  ;;  %p10977_p12 = scmp.lt.u32.totalorder %s10970_s16, %s13207_s12 }
  0x5c   : > { %p10973_p3 = pnand %p10971_p2, %p11337_p7 }
  0x5e   : > { %p10974_p11 = pneg %p10973_p3 }
  0x60   : > { %p10979_p13 = pnand %p10977_p12, %p10974_p11 }
  0x62   : > { %10982 = shalt.err (!%p10979_p13)
}
  0x63   : > { %s10983_s20 = scalar_lea.vmem %s498_s30, 32  ;;  %p10991_p6 = scmp.lt.s32.totalorder %s498_s30, %s498_s30 }
  0x64   : > { %p10984_p0 = scmp.ne.s32.totalorder %s498_s30, %s10983_s20  ;;  %p10992_p8 = scmp.lt.s32.totalorder %s10983_s20, %s10983_s20 }
  0x66   : > { %p10986_p1 = pnand %p10984_p0, %p11337_p7  ;;  %p10993_p9 = por %p10992_p8, %p10991_p6 }
  0x68   : > { %p10987_p4 = pneg %p10986_p1 }
  0x6a   : > { %p10994_p10 = pnand %p10993_p9, %p10987_p4 }
  0x6c   : > { %10997 = shalt.err (!%p10994_p10)
}
  0x6d   : > { %10355 = dma.hbm_to_vmem [thread:$0]  (!%p11323_p5), %s13207_s12, 32, %s498_s30, [#allocation14], %s13216_s10, %s13216_s10, %s13218_s9  }
  0x6e   : > { %s11206_s4 = smov [#allocation2]   ;;  %s13231_s2 = sld [smem:[#allocation25_spill]] }
  0x6f   : > { %s397_s15 = sshll.u32 %s11206_s4, 4  ;;  %s398_s15 = int_to_ptr.vmem [resolvable:$true] %s397_s15 }
  0x74   : > { %s10998_s16 = scalar_lea.hbm %s13231_s2, 512 }
  0x75   : > { %p10999_p2 = scmp.ne.s32.totalorder %s13231_s2, %s10998_s16  ;;  %p11005_p12 = scmp.lt.u32.totalorder %s10998_s16, %s13231_s2 }
  0x77   : > { %p11001_p3 = pnand %p10999_p2, %p11337_p7 }
  0x79   : > { %p11002_p11 = pneg %p11001_p3 }
  0x7b   : > { %p11007_p13 = pnand %p11005_p12, %p11002_p11 }
  0x7d   : > { %11010 = shalt.err (!%p11007_p13)
}
  0x7e   : > { %s11011_s30 = scalar_lea.vmem %s398_s15, 512  ;;  %p11019_p6 = scmp.lt.s32.totalorder %s398_s15, %s398_s15 }
  0x7f   : > { %p11012_p0 = scmp.ne.s32.totalorder %s398_s15, %s11011_s30  ;;  %p11020_p8 = scmp.lt.s32.totalorder %s11011_s30, %s11011_s30 }
  0x81   : > { %p11014_p1 = pnand %p11012_p0, %p11337_p7  ;;  %p11021_p9 = por %p11020_p8, %p11019_p6 }
  0x83   : > { %p11015_p4 = pneg %p11014_p1 }
  0x85   : > { %p11022_p10 = pnand %p11021_p9, %p11015_p4 }
  0x87   : > { %11025 = shalt.err (!%p11022_p10)
}
  0x88   : > { %s11207_s20 = smov 128   ;;  %s11208_s27 = smov 8  }
  0x89   : > { %10334 = dma.hbm_to_vmem [thread:$0]  (!%p11323_p5), %s13231_s2, 512, %s398_s15, [#allocation3], %s11207_s20, %s11207_s20, %s11208_s27  }
  0x8a   : > { %s11209_s18 = smov [#allocation6]   ;;  %s13232_s5 = sld [smem:[#allocation27_spill]] }
  0x8b   : > { %s426_s29 = sshll.u32 %s11209_s18, 4  ;;  %s427_s29 = int_to_ptr.vmem [resolvable:$true] %s426_s29 }
  0x90   : > { %s11026_s23 = scalar_lea.hbm %s13232_s5, 2048 }
  0x91   : > { %p11027_p2 = scmp.ne.s32.totalorder %s13232_s5, %s11026_s23  ;;  %p11033_p12 = scmp.lt.u32.totalorder %s11026_s23, %s13232_s5 }
  0x93   : > { %p11029_p3 = pnand %p11027_p2, %p11337_p7 }
  0x95   : > { %p11030_p11 = pneg %p11029_p3 }
  0x97   : > { %p11035_p13 = pnand %p11033_p12, %p11030_p11 }
  0x99   : > { %11038 = shalt.err (!%p11035_p13)
}
  0x9a   : > { %s11039_s15 = scalar_lea.vmem %s427_s29, 2048  ;;  %p11047_p6 = scmp.lt.s32.totalorder %s427_s29, %s427_s29 }
  0x9b   : > { %p11040_p0 = scmp.ne.s32.totalorder %s427_s29, %s11039_s15  ;;  %p11048_p8 = scmp.lt.s32.totalorder %s11039_s15, %s11039_s15 }
  0x9d   : > { %p11042_p1 = pnand %p11040_p0, %p11337_p7  ;;  %p11049_p9 = por %p11048_p8, %p11047_p6 }
  0x9f   : > { %p11043_p4 = pneg %p11042_p1 }
  0xa1   : > { %p11050_p10 = pnand %p11049_p9, %p11043_p4 }
  0xa3   : > { %11053 = shalt.err (!%p11050_p10)
}
  0xa4   : > { %s11210_s20 = smov 64   ;;  %s11211_s27 = smov 4  }
  0xa5   : > { %10340 = dma.hbm_to_vmem [thread:$0]  (!%p11323_p5), %s13232_s5, 2048, %s427_s29, [#allocation5], %s11210_s20, %s11210_s20, %s11211_s27  }
  0xa6   : > { %s11212_s4 = smov [#allocation9]   ;;  %s11213_s16 = smov [#allocation12]  }
  0xa7   : > { %s452_s18 = sshll.u32 %s11212_s4, 4  ;;  %s484_s17 = sshll.u32 %s11213_s16, 4  ;;  %s453_s18 = int_to_ptr.vmem [resolvable:$true] %s452_s18  ;;  %s485_s17 = int_to_ptr.vmem [resolvable:$true] %s484_s17 }
  0xa8   : > { %s11054_s28 = scalar_lea.hbm %s13202_s7, 32 }
  0xa9   : > { %p11055_p2 = scmp.ne.s32.totalorder %s13202_s7, %s11054_s28  ;;  %p11061_p12 = scmp.lt.u32.totalorder %s11054_s28, %s13202_s7 }
  0xab   : > { %p11057_p3 = pnand %p11055_p2, %p11337_p7 }
  0xad   : > { %p11058_p11 = pneg %p11057_p3 }
  0xaf   : > { %p11063_p13 = pnand %p11061_p12, %p11058_p11 }
  0xb1   : > { %11066 = shalt.err (!%p11063_p13)
}
  0xb2   : > { %s11067_s29 = scalar_lea.vmem %s453_s18, 32  ;;  %p11075_p6 = scmp.lt.s32.totalorder %s453_s18, %s453_s18 }
  0xb3   : > { %p11068_p0 = scmp.ne.s32.totalorder %s453_s18, %s11067_s29  ;;  %p11076_p8 = scmp.lt.s32.totalorder %s11067_s29, %s11067_s29 }
  0xb5   : > { %p11070_p1 = pnand %p11068_p0, %p11337_p7  ;;  %p11077_p9 = por %p11076_p8, %p11075_p6 }
  0xb7   : > { %p11071_p4 = pneg %p11070_p1 }
  0xb9   : > { %p11078_p10 = pnand %p11077_p9, %p11071_p4 }
  0xbb   : > { %11081 = shalt.err (!%p11078_p10)
}
  0xbc   : > { %s13233_s10 = smov 1   ;;  %s13234_s24 = smov 16  }
  0xbd   : > { %10346 = dma.hbm_to_vmem [thread:$0]  (!%p11323_p5), %s13202_s7, 32, %s453_s18, [#allocation8], %s13234_s24, %s13234_s24, %s13233_s10  }
  0xbe   : > { %s11082_s23 = scalar_lea.hbm %s13206_s11, 32768 }
  0xbf   : > { %p11083_p2 = scmp.ne.s32.totalorder %s13206_s11, %s11082_s23  ;;  %p11089_p12 = scmp.lt.u32.totalorder %s11082_s23, %s13206_s11 }
  0xc1   : > { %p11085_p3 = pnand %p11083_p2, %p11337_p7 }
  0xc3   : > { %p11086_p11 = pneg %p11085_p3 }
  0xc5   : > { %p11091_p13 = pnand %p11089_p12, %p11086_p11 }
  0xc7   : > { %11094 = shalt.err (!%p11091_p13)
}
  0xc8   : > { %s11095_s29 = scalar_lea.vmem %s485_s17, 32768  ;;  %p11103_p6 = scmp.lt.s32.totalorder %s485_s17, %s485_s17 }
  0xc9   : > { %p11096_p0 = scmp.ne.s32.totalorder %s485_s17, %s11095_s29  ;;  %p11104_p8 = scmp.lt.s32.totalorder %s11095_s29, %s11095_s29 }
  0xcb   : > { %p11098_p1 = pnand %p11096_p0, %p11337_p7  ;;  %p11105_p9 = por %p11104_p8, %p11103_p6 }
  0xcd   : > { %p11099_p4 = pneg %p11098_p1 }
  0xcf   : > { %p11106_p10 = pnand %p11105_p9, %p11099_p4 }
  0xd1   : > { %11109 = shalt.err (!%p11106_p10)
}
  0xd2   : > { %10352 = dma.hbm_to_vmem [thread:$0]  (!%p11323_p5), %s13206_s11, 32768, %s485_s17, [#allocation11], %s11210_s20, %s11210_s20, %s11211_s27  }
  0xd3   : > { %s11214_s9 = smov [#allocation15]   ;;  %s11215_s16 = smov [#allocation16]  }
  0xd4   : > { %s510_s4 = sshll.u32 %s11214_s9, 4  ;;  %s523_s23 = sshll.u32 %s11215_s16, 4  ;;  %s511_s4 = int_to_ptr.vmem [resolvable:$true] %s510_s4  ;;  %s524_s23 = int_to_ptr.vmem [resolvable:$true] %s523_s23 }
  0xd5   : > { %s11110_s30 = scalar_lea.hbm %s13208_s13, 32 }
  0xd6   : > { %p11111_p2 = scmp.ne.s32.totalorder %s13208_s13, %s11110_s30  ;;  %p11117_p12 = scmp.lt.u32.totalorder %s11110_s30, %s13208_s13 }
  0xd8   : > { %p11113_p3 = pnand %p11111_p2, %p11337_p7 }
  0xda   : > { %p11114_p11 = pneg %p11113_p3 }
  0xdc   : > { %p11119_p13 = pnand %p11117_p12, %p11114_p11 }
  0xde   : > { %11122 = shalt.err (!%p11119_p13)
}
  0xdf   : > { %s11123_s20 = scalar_lea.vmem %s511_s4, 32  ;;  %p11131_p6 = scmp.lt.s32.totalorder %s511_s4, %s511_s4 }
  0xe0   : > { %p11124_p0 = scmp.ne.s32.totalorder %s511_s4, %s11123_s20  ;;  %p11132_p8 = scmp.lt.s32.totalorder %s11123_s20, %s11123_s20 }
  0xe2   : > { %p11126_p1 = pnand %p11124_p0, %p11337_p7  ;;  %p11133_p9 = por %p11132_p8, %p11131_p6 }
  0xe4   : > { %p11127_p4 = pneg %p11126_p1 }
  0xe6   : > { %p11134_p10 = pnand %p11133_p9, %p11127_p4 }
  0xe8   : > { %11137 = shalt.err (!%p11134_p10)
}
  0xe9   : > { %10358 = dma.hbm_to_vmem [thread:$0]  (!%p11323_p5), %s13208_s13, 32, %s511_s4, [#allocation14], %s13234_s24, %s13234_s24, %s13233_s10  }
  0xea   : > { %s11138_s9 = scalar_lea.hbm %s13209_s14, 32 }
  0xeb   : > { %p11139_p2 = scmp.ne.s32.totalorder %s13209_s14, %s11138_s9  ;;  %p11145_p12 = scmp.lt.u32.totalorder %s11138_s9, %s13209_s14 }
  0xed   : > { %p11141_p3 = pnand %p11139_p2, %p11337_p7 }
  0xef   : > { %p11142_p11 = pneg %p11141_p3 }
  0xf1   : > { %p11147_p13 = pnand %p11145_p12, %p11142_p11 }
  0xf3   : > { %11150 = shalt.err (!%p11147_p13)
}
  0xf4   : > { %s11151_s15 = scalar_lea.vmem %s524_s23, 32  ;;  %p11159_p6 = scmp.lt.s32.totalorder %s524_s23, %s524_s23 }
  0xf5   : > { %p11152_p0 = scmp.ne.s32.totalorder %s524_s23, %s11151_s15  ;;  %p11160_p8 = scmp.lt.s32.totalorder %s11151_s15, %s11151_s15 }
  0xf7   : > { %p11154_p1 = pnand %p11152_p0, %p11337_p7  ;;  %p11161_p9 = por %p11160_p8, %p11159_p6 }
  0xf9   : > { %p11155_p4 = pneg %p11154_p1 }
  0xfb   : > { %p11162_p10 = pnand %p11161_p9, %p11155_p4 }
  0xfd   : > { %11165 = shalt.err (!%p11162_p10)
}
  0xfe   : > { %10361 = dma.hbm_to_vmem [thread:$0]  (!%p11323_p5), %s13209_s14, 32, %s524_s23, [#allocation17], %s13234_s24, %s13234_s24, %s13233_s10  }
  0xff   : > { %p13235_p2 = scmp.ne.s32.totalorder %s13227_s22, 0 }
 0x100   : > { %p13236_p7 = scmp.eq.s32.totalorder (!%p13235_p2), %s11306_s21, 0 }
 0x101   : > { %547 = sbr.rel (%p13235_p2) target bundleno = 6804 (0x1a94), region = 80 }
 0x108   : > { %11171 = dma.done.wait (%p13236_p7), [#allocation3], 512   ;;  %p13237_p3 = pmov %p13236_p7 }
 0x10a   : > { %11173 = vsyncadd (%p13237_p3), [#allocation3], 4294966784  ;;  %p13238_p11 = pmov %p13237_p3 }
 0x10b   : > { %p13239_p12 = pmov %p13237_p3 }
 0x10c   : > { %11175 = dma.done.wait (%p13238_p11), [#allocation5], 2144  }
 0x10d   : > { %11177 = vsyncadd (%p13239_p12), [#allocation5], 4294965152  ;;  %p13240_p13 = pmov %p13237_p3 }
 0x10e   : > { %p13241_p5 = pmov %p13237_p3 }
 0x10f   : > { %11179 = dma.done.wait (%p13240_p13), [#allocation8], 64  }
 0x110   : > { %11181 = vsyncadd (%p13241_p5), [#allocation8], 4294967232  ;;  %p13242_p0 = pmov %p13237_p3 }
 0x112   : > { %11183 = dma.done.wait (%p13242_p0), [#allocation11], 32800   ;;  %p13243_p1 = pmov %p13242_p0 }
 0x113   : > { %p13244_p4 = pmov %p13242_p0 }
 0x114   : > { %11185 = vsyncadd (%p13243_p1), [#allocation11], 4294934496 }
 0x115   : > { %11187 = dma.done.wait (%p13244_p4), [#allocation14], 64   ;;  %p13245_p6 = pmov %p13242_p0 }
 0x116   : > { %p13246_p8 = pmov %p13242_p0 }
 0x117   : > { %11189 = vsyncadd (%p13245_p6), [#allocation14], 4294967232 }
 0x118   : > { %11191 = dma.done.wait (%p13246_p8), [#allocation17], 32   ;;  %p13247_p9 = pmov %p13242_p0 }
 0x119   : > { %v11216_v0 = vmov 0   ;;  %p631_p10 = scmp.lt.s32.totalorder %s11306_s21, 1  ;;  %v10434_v1 = vld [vmem:[%s13198_s3 + $0x4] ss:$12 sps:$4 sm:$0xff]   ;;  %v10436_v2 = vld [vmem:[%s13198_s3] ss:$12 sps:$4 sm:$0xff]   ;;  %v691_v23 = vlaneseq }
 0x11a   : > { %11193 = vsyncadd (%p13247_p9), [#allocation17], 4294967264  ;;  %866 = vmatprep.mubr.bf16.mxu0 %v11216_v0  ;;  %10433 = vset.pattern.permute.xlu1 %v11216_v0  ;;  %v10437_v3 = vld [vmem:[%s13198_s3 + $0x1c] ss:$12 sps:$4 sm:$0xff]   ;;  %v10439_v4 = vld [vmem:[%s13198_s3 + $0x18] ss:$12 sps:$4 sm:$0xff]  }
 0x11b   : > { %10432 = vset.pattern.permute.xlu0 %v11216_v0  ;;  %s632_s19 = scalar_select %p631_p10, %s11306_s21, 1  ;;  %834 = vmatprep.subr.bf16.mxu0 %v10434_v1  ;;  %v10440_v5 = vld [vmem:[%s13198_s3 + $0x34] ss:$12 sps:$4 sm:$0xff]   ;;  %v10442_v6 = vld [vmem:[%s13198_s3 + $0x30] ss:$12 sps:$4 sm:$0xff]   ;;  %v11639_v24 = vshrl.u32 %v691_v23, 7 }
 0x11c   : > { %835 = vmatpush1.bf16.msra.mxu0 %v10436_v2  ;;  %v10443_v7 = vld [vmem:[%s13198_s3 + $0x4c] ss:$12 sps:$4 sm:$0xff]   ;;  %v10445_v9 = vld [vmem:[%s13198_s3 + $0x48] ss:$12 sps:$4 sm:$0xff]   ;;  %v10446_v11 = vld [vmem:[%s13198_s3 + $0x64] ss:$12 sps:$4 sm:$0xff]  }
 0x11d   : > { %836 = vmatprep.subr.bf16.mxu0 %v10437_v3  ;;  %s9590_s2 = sshll.u32 %s632_s19, 5  ;;  %v10448_v13 = vld [vmem:[%s13198_s3 + $0x60] ss:$12 sps:$4 sm:$0xff]   ;;  %v10449_v14 = vld [vmem:[%s13198_s3 + $0x7c] ss:$12 sps:$4 sm:$0xff]   ;;  %v11642_v25 = vsub.s32 0, %v11639_v24 }
 0x11e   : > { %s11602_s30 = scalar_lea.vmem %s13195_s0, %s9590_s2  ;;  %v10451_v15 = vld [vmem:[%s13198_s3 + $0x78] ss:$12 sps:$4 sm:$0xff]   ;;  %v10452_v16 = vld [vmem:[%s13198_s3 + $0x94] ss:$12 sps:$4 sm:$0xff]   ;;  %v10454_v17 = vld [vmem:[%s13198_s3 + $0x90] ss:$12 sps:$4 sm:$0xff]  }
 0x11f   : > { %v643_v8 = vld [vmem:[%s11602_s30] sm:$0xff]  ;;  %v644_v10 = vld [vmem:[%s11602_s30 + $0x8] sm:$0xff]  ;;  %v645_v20 = vld [vmem:[%s11602_s30 + $0x10] sm:$0xff]  ;;  %v11647_v27 = vsub.s32 1, %v11639_v24  ;;  %vm942_vm0 = vcmask 523264   ;;  %vm1012_vm1 = vcmask 261120  }
 0x120   : > { %837 = vmatpush1.bf16.msra.mxu0 %v10439_v4  ;;  %v655_v12 = vpack.c.bf16 %v644_v10, %v643_v8  ;;  %v10455_v18 = vld [vmem:[%s13198_s3 + $0xac] ss:$12 sps:$4 sm:$0xff]   ;;  %v10457_v19 = vld [vmem:[%s13198_s3 + $0xa8] ss:$12 sps:$4 sm:$0xff]   ;;  %v11644_v26 = vld [vmem:[#allocation4] sm:$0x7] }
 0x121   : > { %838 = vmatprep.subr.bf16.mxu0 %v10440_v5  ;;  %v646_v21 = vld [vmem:[%s11602_s30 + $0x18] sm:$0xff]  ;;  %v694_v28 = vrot.slane %v11644_v26, %v11642_v25  ;;  %v698_v30 = vrot.slane %v11644_v26, %v11647_v27  ;;  %v10458_v52 = vld [vmem:[%s13198_s3 + $0x8] ss:$12 sps:$4 sm:$0xff]   ;;  %v10459_v53 = vld [vmem:[%s13198_s3 + $0x20] ss:$12 sps:$4 sm:$0xff]   ;;  %s11217_s10 = smov 64  }
 0x122   : > { %10135 = vmatprep.mubr.bf16.mxu1 %v655_v12  ;;  %v656_v22 = vpack.c.bf16 %v646_v21, %v645_v20  ;;  %10119 = vmatprep.subr.bf16.mxu1 %v10458_v52  ;;  %v10460_v54 = vld [vmem:[%s13198_s3 + $0x38] ss:$12 sps:$4 sm:$0xff]   ;;  %v10461_v55 = vld [vmem:[%s13198_s3 + $0x50] ss:$12 sps:$4 sm:$0xff]   ;;  %v10462_v56 = vld [vmem:[%s13198_s3 + $0x68] ss:$12 sps:$4 sm:$0xff]  }
 0x123   : > { %10120 = vmatpush3.bf16.msra.mxu1 %v10458_v52  ;;  %v10463_v57 = vld [vmem:[%s13198_s3 + $0x80] ss:$12 sps:$4 sm:$0xff]   ;;  %v10464_v58 = vld [vmem:[%s13198_s3 + $0x98] ss:$12 sps:$4 sm:$0xff]   ;;  %v10465_v59 = vld [vmem:[%s13198_s3 + $0xb0] ss:$12 sps:$4 sm:$0xff]  }
 0x124   : > { %839 = vmatpush1.bf16.msra.mxu0 %v10442_v6  ;;  %10121 = vmatprep.subr.bf16.mxu1 %v10459_v53  ;;  %v11700_v61 = vld [vmem:[%s13196_s1 + $0x10] sm:$0xff]  ;;  %v11705_v1 = vld [vmem:[%s13196_s1] sm:$0xff]  ;;  %v11710_v4 = vld [vmem:[%s13196_s1 + $0x18] sm:$0xff]  ;;  %s13248_s18 = sld [smem:[#allocation28_spill]]  ;;  %s13250_s27 = sld [smem:[#allocation29_spill]]  ;;  %vm11219_vm2 = vmmov 0  }
 0x125   : > { %840 = vmatprep.subr.bf16.mxu0 %v10443_v7  ;;  %v11716_v8 = vld [vmem:[%s13196_s1 + $0x8] sm:$0xff]  ;;  %s13251_s17 = sld [smem:[#allocation30_spill]]  ;;  %vm8634_vm3 = vcmask 64512  }
 0x127   : > { %10122 = vmatpush3.bf16.msra.mxu1 %v10459_v53 }
 0x128   : > { %841 = vmatpush1.bf16.msra.mxu0 %v10445_v9  ;;  %10123 = vmatprep.subr.bf16.mxu1 %v10460_v54 }
 0x129   : > { %842 = vmatprep.subr.bf16.mxu0 %v10446_v11 }
 0x12a   : > { %s13249_s20 = smov %s13248_s18 }
 0x12b   : > { %10124 = vmatpush3.bf16.msra.mxu1 %v10460_v54 }
 0x12c   : > { %843 = vmatpush1.bf16.msra.mxu0 %v10448_v13  ;;  %10125 = vmatprep.subr.bf16.mxu1 %v10461_v55 }
 0x12d   : > { %844 = vmatprep.subr.bf16.mxu0 %v10449_v14 }
 0x12f   : > { %10126 = vmatpush3.bf16.msra.mxu1 %v10461_v55 }
 0x130   : > { %845 = vmatpush1.bf16.msra.mxu0 %v10451_v15  ;;  %10127 = vmatprep.subr.bf16.mxu1 %v10462_v56 }
 0x131   : > { %846 = vmatprep.subr.bf16.mxu0 %v10452_v16 }
 0x133   : > { %10128 = vmatpush3.bf16.msra.mxu1 %v10462_v56 }
 0x134   : > { %847 = vmatpush1.bf16.msra.mxu0 %v10454_v17  ;;  %10129 = vmatprep.subr.bf16.mxu1 %v10463_v57  ;;  %v11726_v17 = vsub.s32 2, %v11639_v24 }
 0x135   : > { %848 = vmatprep.subr.bf16.mxu0 %v10455_v18 }
 0x136   : > { %v702_v18 = vrot.slane %v11644_v26, %v11726_v17 }
 0x137   : > { %10130 = vmatpush3.bf16.msra.mxu1 %v10463_v57 }
 0x138   : > { %849 = vmatpush1.bf16.msra.mxu0 %v10457_v19  ;;  %10131 = vmatprep.subr.bf16.mxu1 %v10464_v58 }
 0x13b   : > { %867 = vmatmul.mubr.bf16.vlgmr.msra.gmra.mrb[0].mxu0 %v655_v12  ;;  %10132 = vmatpush3.bf16.msra.mxu1 %v10464_v58 }
 0x13c   : > { %876 = vmatprep.mubr.bf16.mxu0 %v11216_v0  ;;  %10133 = vmatprep.subr.bf16.mxu1 %v10465_v59 }
 0x13f   : > { %10134 = vmatpush3.bf16.msra.mxu1 %v10465_v59 }
 0x142   : > { %10136 = vmatmul.mubr.bf16.vlgmr.msra.gmra.mrb[0].mxu1 %v656_v22 }
 0x143   : > { %877 = vmatmul.mubr.bf16.gmra.mrb[4].mxu0 %v656_v22 }
 0x20e   : > { %v868_v29 = vpop.f32.mrb[0].mxu0 }
 0x20f   : > { %v870_v31 = vpop.f32.mrb[1].mxu0  ;;  %v869_v33 = vadd.f32 %v868_v29, %v694_v28 }
 0x210   : > { %v872_v32 = vpop.f32.mrb[2].mxu0  ;;  %v871_v36 = vadd.f32 %v870_v31, %v698_v30 }
 0x211   : > { %v873_v34 = vadd.f32 %v872_v32, %v694_v28  ;;  %v874_v35 = vpop.f32.mrb[3].mxu0 }
 0x212   : > { %v875_v37 = vadd.f32 %v874_v35, %v698_v30 }
 0x213   : > { %v11653_v38 = vpack.c.bf16 %v873_v34, %v869_v33 }
 0x214   : > { %v11655_v39 = vpack.c.bf16 %v875_v37, %v871_v36 }
 0x215   : > { %10143 = vmatprep.mubr.msk.bf16.mxu0 %vm942_vm0, %v11653_v38  ;;  %v10137_v19 = vpop.f32.mrb[0].mxu1 }
 0x216   : > { %v878_v40 = vpop.f32.mrb[4].mxu0  ;;  %10283 = vmatprep.subr.msk.bf16.mxu0 %vm942_vm0, %v11655_v39  ;;  %v950_v41 = vsel %vm942_vm0, %v11655_v39, 0  ;;  %v930_v20 = vadd.f32 %v10137_v19, %v702_v18  ;;  %v921_v21 = vpop.f32.mrb[1].mxu1 }
 0x217   : > { %v880_v42 = vpop.f32.mrb[5].mxu0  ;;  %10140 = vmatpush3.bf16.xpose.msra.mxu0 %v950_v41  ;;  %v879_v44 = vadd.f32 %v878_v40, %v694_v28  ;;  %v922_v22 = vadd.f32 %v921_v21, %v702_v18  ;;  %v10138_v23 = vpop.f32.mrb[2].mxu1 }
 0x218   : > { %v882_v43 = vpop.f32.mrb[6].mxu0  ;;  %v881_v47 = vadd.f32 %v880_v42, %v698_v30  ;;  %v924_v29 = vpop.f32.mrb[3].mxu1 }
 0x219   : > { %v883_v45 = vadd.f32 %v882_v43, %v694_v28  ;;  %v884_v46 = vpop.f32.mrb[7].mxu0  ;;  %v933_v28 = vadd.f32 %v10138_v23, %v702_v18 }
 0x21a   : > { %v885_v48 = vadd.f32 %v884_v46, %v698_v30  ;;  %v925_v30 = vadd.f32 %v924_v29, %v702_v18 }
 0x21b   : > { %v11663_v49 = vpack.c.bf16 %v883_v45, %v879_v44  ;;  %v11730_v31 = vpack.c.bf16 %v933_v28, %v930_v20 }
 0x21c   : > { %v11665_v50 = vpack.c.bf16 %v885_v48, %v881_v47  ;;  %v11732_v32 = vpack.c.bf16 %v925_v30, %v922_v22 }
 0x21e   : > { %10284 = vmatprep.subr.msk.bf16.mxu0 %vm942_vm0, %v11665_v50  ;;  %v953_v51 = vsel %vm942_vm0, %v11665_v50, 0  ;;  %10147 = vmatprep.subr.bf16.mxu1 %v11732_v32 }
 0x21f   : > { %10142 = vmatpush3.bf16.xpose.msra.mxu0 %v953_v51  ;;  %10148 = vmatpush3.bf16.msra.mxu1 %v11732_v32 }
 0x220   : > { %10149 = vmatprep.subr.bf16.mxu1 %v11730_v31 }
 0x223   : > { %10150 = vmatpush3.bf16.msra.mxu1 %v11730_v31 }
 0x226   : > { %10144 = vmatmul.mubr.msk.bf16.vlgmr.msra.gmra.mrb[8].mxu0 %vm942_vm0, %v11663_v49 }
 0x2f9   : > { %v10145_v60 = vpop.f32.mrb[8].mxu0 }
 0x2fa   : > { %v1006_v62 = vmul.f32 0.125, %v10145_v60  ;;  %v989_v63 = vpop.f32.mrb[9].mxu0 }
 0x2fb   : > { %v1004_v2 = vmul.f32 0.125, %v989_v63  ;;  %v10146_v3 = vpop.f32.mrb[10].mxu0 }
 0x2fc   : > { %v1007_v5 = vmul.f32 0.125, %v10146_v3  ;;  %v992_v6 = vpop.f32.mrb[11].mxu0  ;;  %v1010_v7 = vadd.f32 %v1006_v62, %v11700_v61 }
 0x2fd   : > { %v1005_v9 = vmul.f32 0.125, %v992_v6  ;;  %v1008_v10 = vadd.f32 %v1004_v2, %v11705_v1 }
 0x2fe   : > { %v1019_v11 = vsel %vm1012_vm1, %v1010_v7, -inf  ;;  %v1011_v12 = vadd.f32 %v1007_v5, %v11710_v4 }
 0x2ff   : > { %1020 = vmax.xlane.f32.xlu1 %v1019_v11  ;;  %v1013_v13 = vsel %vm1012_vm1, %v1008_v10, -inf  ;;  %v1009_v14 = vadd.f32 %v1005_v9, %v11716_v8 }
 0x300   : > { %1014 = vmax.xlane.f32.xlu0 %v1013_v13  ;;  %v1022_v15 = vsel %vm1012_vm1, %v1011_v12, -inf }
 0x301   : > { %v1016_v16 = vsel %vm1012_vm1, %v1009_v14, -inf }
 0x303   : > { %1023 = vmax.xlane.f32.xlu1 %v1022_v15 }
 0x304   : > { %1017 = vmax.xlane.f32.xlu0 %v1016_v16 }
 0x38c   : > { %v1021_v26 = vpop.xlane.xlu1 %1020 }
 0x38d   : > { %v1027_v33 = vsub.f32 %v1010_v7, %v1021_v26  ;;  %v1015_v34 = vpop.xlane.xlu0 %1014 }
 0x38e   : > { %v1025_v35 = vsub.f32 %v1008_v10, %v1015_v34 }
 0x38f   : > { %v1033_v36 = vmul.f32 1.442695, %v1027_v33 }
 0x390   : > { %v1029_v37 = vmul.f32 1.442695, %v1025_v35  ;;  %v1024_v40 = vpop.xlane.xlu1 %1023 }
 0x391   : > { %10770 = vpow2.f32 %v1033_v36  ;;  %v1028_v41 = vsub.f32 %v1011_v12, %v1024_v40  ;;  %v1018_v42 = vpop.xlane.xlu0 %1017 }
 0x392   : > { %v1026_v43 = vsub.f32 %v1009_v14, %v1018_v42  ;;  %10772 = vpow2.f32 %v1029_v37 }
 0x393   : > { %v1035_v44 = vmul.f32 1.442695, %v1028_v41 }
 0x394   : > { %v1031_v45 = vmul.f32 1.442695, %v1026_v43 }
 0x396   : > { %10774 = vpow2.f32 %v1031_v45 }
 0x397   : > { %10776 = vpow2.f32 %v1035_v44 }
 0x39b   : > { %v10771_v46 = vpop.eup %10770 }
 0x39c   : > { %v1043_v47 = vsel %vm1012_vm1, %v10771_v46, 0.0  ;;  %v10773_v48 = vpop.eup %10772 }
 0x39d   : > { %1044 = vadd.xlane.f32.xlu0 %v1043_v47  ;;  %v1037_v52 = vsel %vm1012_vm1, %v10773_v48, 0.0 }
 0x3a0   : > { %v10775_v51 = vpop.eup %10774 }
 0x3a1   : > { %1038 = vadd.xlane.f32.xlu0 %v1037_v52  ;;  %v1040_v53 = vsel %vm1012_vm1, %v10775_v51, 0.0  ;;  %v10777_v54 = vpop.eup %10776 }
 0x3a2   : > { %1041 = vadd.xlane.f32.xlu1 %v1040_v53  ;;  %v1046_v55 = vsel %vm1012_vm1, %v10777_v54, 0.0 }
 0x3a6   : > { %1047 = vadd.xlane.f32.xlu1 %v1046_v55 }
 0x3b7   : > { %1122 = vrot.lane.b32.xlu0 %v11655_v39, %s11217_s10  ;;  %1124 = vrot.lane.b32.xlu1 %v11665_v50, %s11217_s10 }
 0x3bb   : > { %1116 = vrot.lane.b32.xlu1 %v11653_v38, %s11217_s10 }
 0x3bf   : > { %1118 = vrot.lane.b32.xlu1 %v11663_v49, %s11217_s10 }
 0x42a   : > { %v1045_v56 = vpop.xlane.xlu0 %1044 }
 0x42e   : > { %v1039_v57 = vpop.xlane.xlu0 %1038 }
 0x42f   : > { %10778 = vrcp.f32 %v1039_v57  ;;  %v1042_v58 = vpop.xlane.xlu1 %1041 }
 0x430   : > { %10780 = vrcp.f32 %v1042_v58 }
 0x431   : > { %10782 = vrcp.f32 %v1045_v56 }
 0x432   : > { %v1123_v59 = vpop.permute.xlu0 %1122 }
 0x433   : > { %v1048_v60 = vpop.xlane.xlu1 %1047  ;;  %10285 = vmatprep.subr.msk.bf16.mxu1 %vm942_vm0, %v1123_v59  ;;  %v1133_v9 = vsel %vm942_vm0, %v1123_v59, 0 }
 0x434   : > { %10784 = vrcp.f32 %v1048_v60 }
 0x437   : > { %v1125_v38 = vpop.permute.xlu1 %1124 }
 0x438   : > { %v1136_v11 = vsel %vm942_vm0, %v1125_v38, 0 }
 0x439   : > { %v10779_v39 = vpop.eup %10778 }
 0x43a   : > { %v10781_v62 = vpop.eup %10780  ;;  %v1053_v50 = vmul.f32 %v10779_v39, %v10773_v48 }
 0x43b   : > { %v1054_v63 = vmul.f32 %v10781_v62, %v10775_v51  ;;  %v10783_v2 = vpop.eup %10782  ;;  %v1117_v10 = vpop.permute.xlu1 %1116 }
 0x43c   : > { %v1055_v49 = vmul.f32 %v10783_v2, %v10771_v46 }
 0x43d   : > { %v1057_v3 = vpack.c.bf16 %v1054_v63, %v1053_v50 }
 0x43e   : > { %v10785_v5 = vpop.eup %10784 }
 0x43f   : > { %v1056_v6 = vmul.f32 %v10785_v5, %v10777_v54  ;;  %10151 = vmatprep.mubr.msk.bf16.mxu1 %vm1012_vm1, %v1057_v3  ;;  %v1119_v12 = vpop.permute.xlu1 %1118 }
 0x441   : > { %v1058_v7 = vpack.c.bf16 %v1056_v6, %v1055_v49 }
 0x443   : > { %10152 = vmatmul.mubr.msk.bf16.vlgmr.msra.gmra.mrb[4].mxu1 %vm1012_vm1, %v1058_v7 }
 0x444   : > { %10156 = vmatpush3.bf16.xpose.msra.mxu1 %v1133_v9  ;;  %10159 = vmatprep.mubr.msk.bf16.mxu1 %vm942_vm0, %v1117_v10  ;;  %v10466_v10 = vld [vmem:[#allocation6] sm:$0xff]  }
 0x445   : > { %10286 = vmatprep.subr.msk.bf16.mxu1 %vm942_vm0, %v1125_v38  ;;  %10171 = vmatprep.subr.bf16.mxu0 %v10466_v10 }
 0x446   : > { %10172 = vmatpush3.bf16.msra.mxu0 %v10466_v10 }
 0x44c   : > { %10158 = vmatpush3.bf16.xpose.msra.mxu1 %v1136_v11  ;;  %v10467_v11 = vld [vmem:[#allocation6 + $0x8] sm:$0xff]  }
 0x44d   : > { %10173 = vmatprep.subr.bf16.mxu0 %v10467_v11 }
 0x44e   : > { %10174 = vmatpush3.bf16.msra.mxu0 %v10467_v11 }
 0x453   : > { %10160 = vmatmul.mubr.msk.bf16.vlgmr.msra.gmra.mrb[8].mxu1 %vm942_vm0, %v1119_v12  ;;  %v10468_v12 = vld [vmem:[#allocation6 + $0x10] sm:$0xff]  }
 0x454   : > { %10175 = vmatprep.subr.bf16.mxu0 %v10468_v12 }
 0x455   : > { %10176 = vmatpush3.bf16.msra.mxu0 %v10468_v12 }
 0x516   : > { %v11758_v13 = vpop.f32.mrb[4].mxu1 }
 0x517   : > { %v11760_v14 = vpop.f32.mrb[5].mxu1 }
 0x518   : > { %v11762_v15 = vpop.f32.mrb[6].mxu1 }
 0x519   : > { %v11764_v16 = vpop.f32.mrb[7].mxu1 }
 0x526   : > { %v10161_v18 = vpop.f32.mrb[8].mxu1 }
 0x527   : > { %v1172_v19 = vpop.f32.mrb[9].mxu1  ;;  %v1189_v20 = vmul.f32 0.125, %v10161_v18  ;;  %v10469_v18 = vld [vmem:[#allocation6 + $0x18] sm:$0xff]  }
 0x528   : > { %v1187_v21 = vmul.f32 0.125, %v1172_v19  ;;  %v10162_v22 = vpop.f32.mrb[10].mxu1  ;;  %10177 = vmatprep.subr.bf16.mxu0 %v10469_v18  ;;  %v10470_v19 = vld [vmem:[#allocation6 + $0x20] sm:$0xff]  }
 0x529   : > { %v1175_v23 = vpop.f32.mrb[11].mxu1  ;;  %v1190_v30 = vmul.f32 0.125, %v10162_v22  ;;  %v1193_v34 = vadd.f32 %v1189_v20, %v11700_v61  ;;  %10178 = vmatpush3.bf16.msra.mxu0 %v10469_v18  ;;  %v10471_v20 = vld [vmem:[#allocation6 + $0x28] sm:$0xff]   ;;  %v10473_v22 = vld [vmem:[#allocation6 + $0x38] sm:$0xff]  }
 0x52a   : > { %v1188_v28 = vmul.f32 0.125, %v1175_v23  ;;  %v1191_v29 = vadd.f32 %v1187_v21, %v11705_v1  ;;  %10179 = vmatprep.subr.bf16.mxu0 %v10470_v19  ;;  %v10472_v21 = vld [vmem:[#allocation6 + $0x30] sm:$0xff]  }
 0x52b   : > { %v1201_v36 = vsel %vm1012_vm1, %v1193_v34, -inf  ;;  %v1194_v37 = vadd.f32 %v1190_v30, %v11710_v4 }
 0x52c   : > { %v1195_v26 = vsel %vm1012_vm1, %v1191_v29, -inf  ;;  %v1192_v33 = vadd.f32 %v1188_v28, %v11716_v8 }
 0x52d   : > { %1196 = vmax.xlane.f32.xlu0 %v1195_v26  ;;  %v1204_v40 = vsel %vm1012_vm1, %v1194_v37, -inf  ;;  %10180 = vmatpush3.bf16.msra.mxu0 %v10470_v19 }
 0x52e   : > { %v1198_v35 = vsel %vm1012_vm1, %v1192_v33, -inf  ;;  %10181 = vmatprep.subr.bf16.mxu0 %v10471_v20 }
 0x52f   : > { %1199 = vmax.xlane.f32.xlu1 %v1198_v35 }
 0x531   : > { %1202 = vmax.xlane.f32.xlu0 %v1201_v36  ;;  %10182 = vmatpush3.bf16.msra.mxu0 %v10471_v20 }
 0x532   : > { %10183 = vmatprep.subr.bf16.mxu0 %v10472_v21 }
 0x535   : > { %1205 = vmax.xlane.f32.xlu0 %v1204_v40  ;;  %10184 = vmatpush3.bf16.msra.mxu0 %v10472_v21 }
 0x536   : > { %10185 = vmatprep.subr.bf16.mxu0 %v10473_v22 }
 0x539   : > { %10186 = vmatpush3.bf16.msra.mxu0 %v10473_v22 }
 0x5ba   : > { %v1197_v1 = vpop.xlane.xlu0 %1196 }
 0x5bb   : > { %v1207_v41 = vsub.f32 %v1191_v29, %v1197_v1 }
 0x5bc   : > { %v1200_v42 = vpop.xlane.xlu1 %1199 }
 0x5bd   : > { %v1211_v8 = vmul.f32 1.442695, %v1207_v41  ;;  %v1208_v45 = vsub.f32 %v1192_v33, %v1200_v42 }
 0x5be   : > { %v1203_v43 = vpop.xlane.xlu0 %1202 }
 0x5bf   : > { %v1209_v44 = vsub.f32 %v1193_v34, %v1203_v43  ;;  %v1213_v48 = vmul.f32 1.442695, %v1208_v45 }
 0x5c1   : > { %v1215_v61 = vmul.f32 1.442695, %v1209_v44 }
 0x5c2   : > { %v1206_v46 = vpop.xlane.xlu0 %1205 }
 0x5c3   : > { %10786 = vpow2.f32 %v1215_v61  ;;  %v1210_v47 = vsub.f32 %v1194_v37, %v1206_v46 }
 0x5c4   : > { %10788 = vpow2.f32 %v1211_v8 }
 0x5c5   : > { %v1217_v51 = vmul.f32 1.442695, %v1210_v47 }
 0x5c7   : > { %10790 = vpow2.f32 %v1217_v51 }
 0x5c8   : > { %10792 = vpow2.f32 %v1213_v48 }
 0x5cd   : > { %v10787_v4 = vpop.eup %10786 }
 0x5ce   : > { %v1225_v52 = vsel %vm1012_vm1, %v10787_v4, 0.0  ;;  %v10789_v53 = vpop.eup %10788 }
 0x5cf   : > { %1226 = vadd.xlane.f32.xlu0 %v1225_v52  ;;  %v1219_v55 = vsel %vm1012_vm1, %v10789_v53, 0.0  ;;  %v10874_v52 = vld [vmem:[%s11602_s30] sm:$0xff] }
 0x5d1   : > { %v10791_v54 = vpop.eup %10790 }
 0x5d2   : > { %v1228_v56 = vsel %vm1012_vm1, %v10791_v54, 0.0  ;;  %v10793_v57 = vpop.eup %10792 }
 0x5d3   : > { %1220 = vadd.xlane.f32.xlu0 %v1219_v55  ;;  %1229 = vadd.xlane.f32.xlu1 %v1228_v56  ;;  %v1222_v58 = vsel %vm1012_vm1, %v10793_v57, 0.0  ;;  %v10876_v55 = vld [vmem:[%s11602_s30 + $0x10] sm:$0xff] }
 0x5d7   : > { %1223 = vadd.xlane.f32.xlu1 %v1222_v58 }
 0x5e8   : > { %1245 = vrot.lane.b32.xlu1 %v11730_v31, %s11217_s10 }
 0x5e9   : > { %1243 = vrot.lane.b32.xlu0 %v11732_v32, %s11217_s10 }
 0x65c   : > { %v1227_v59 = vpop.xlane.xlu0 %1226 }
 0x660   : > { %v1221_v60 = vpop.xlane.xlu0 %1220  ;;  %v1230_v39 = vpop.xlane.xlu1 %1229 }
 0x661   : > { %10794 = vrcp.f32 %v1230_v39  ;;  %v1520_v39 = vld [vmem:[%s13249_s20 + $0x8] sm:$0xff] }
 0x662   : > { %10796 = vrcp.f32 %v1221_v60  ;;  %v1527_v60 = vld [vmem:[%s13249_s20 + $0x40] sm:$0xff] }
 0x663   : > { %10798 = vrcp.f32 %v1227_v59  ;;  %v1519_v59 = vld [vmem:[%s13248_s18] sm:$0xff] }
 0x664   : > { %v1244_v62 = vpop.permute.xlu0 %1243  ;;  %v1224_v50 = vpop.xlane.xlu1 %1223 }
 0x665   : > { %10800 = vrcp.f32 %v1224_v50  ;;  %10163 = vmatprep.subr.bf16.mxu1 %v1244_v62  ;;  %v8866_v50 = vcombine.high %v1519_v59, %v1527_v60 }
 0x666   : > { %10164 = vmatpush3.bf16.msra.mxu1 %v1244_v62  ;;  %v8865_v62 = vcombine.low %v1519_v59, %v1527_v60  ;;  %v1608_v60 = vld [vmem:[%s13249_s20 + $0x2c8] sm:$0xff] }
 0x668   : > { %v1246_v63 = vpop.permute.xlu1 %1245 }
 0x669   : > { %10165 = vmatprep.subr.bf16.mxu1 %v1246_v63 }
 0x66a   : > { %10166 = vmatpush3.bf16.msra.mxu1 %v1246_v63  ;;  %v1528_v63 = vld [vmem:[%s13249_s20 + $0x48] sm:$0xff] }
 0x66b   : > { %v10795_v2 = vpop.eup %10794  ;;  %2371 = vmatprep.subr.bf16.mxu1 %v8866_v50 }
 0x66c   : > { %v10797_v38 = vpop.eup %10796  ;;  %v1238_v5 = vmul.f32 %v10795_v2, %v10791_v54  ;;  %v1535_v2 = vld [vmem:[%s13249_s20 + $0x80] sm:$0xff] }
 0x66d   : > { %v10799_v31 = vpop.eup %10798  ;;  %v1235_v32 = vmul.f32 %v10797_v38, %v10789_v53  ;;  %v10875_v53 = vld [vmem:[%s11602_s30 + $0x8] sm:$0xff]  ;;  %v1543_v38 = vld [vmem:[%s13249_s20 + $0xc0] sm:$0xff] }
 0x66e   : > { %v1237_v6 = vmul.f32 %v10799_v31, %v10787_v4  ;;  %v8867_v31 = vcombine.low %v1520_v39, %v1528_v63 }
 0x66f   : > { %v10801_v3 = vpop.eup %10800 }
 0x670   : > { %v1236_v49 = vmul.f32 %v10801_v3, %v10793_v57  ;;  %v1240_v9 = vpack.c.bf16 %v1238_v5, %v1237_v6  ;;  %v10877_v57 = vld [vmem:[%s11602_s30 + $0x18] sm:$0xff]  ;;  %v8868_v3 = vcombine.high %v1520_v39, %v1528_v63  ;;  %v8882_v5 = vcombine.high %v1535_v2, %v1543_v38  ;;  %v1615_v63 = vld [vmem:[%s13249_s20 + $0x300] sm:$0xff] }
 0x672   : > { %v1239_v7 = vpack.c.bf16 %v1236_v49, %v1235_v32  ;;  %v1536_v32 = vld [vmem:[%s13249_s20 + $0x88] sm:$0xff]  ;;  %2424 = vmatprep.subr.bf16.mxu0 %v8868_v3 }
 0x673   : > { %v1544_v49 = vld [vmem:[%s13249_s20 + $0xc8] sm:$0xff] }
 0x674   : > { %10167 = vmatprep.mubr.msk.bf16.mxu1 %vm1012_vm1, %v1239_v7  ;;  %v8884_v6 = vcombine.high %v1536_v32, %v1544_v49  ;;  %v8881_v7 = vcombine.low %v1535_v2, %v1543_v38  ;;  %v1623_v2 = vld [vmem:[%s13249_s20 + $0x340] sm:$0xff]  ;;  %v1616_v38 = vld [vmem:[%s13249_s20 + $0x308] sm:$0xff] }
 0x675   : > { %10168 = vmatmul.mubr.msk.bf16.vlgmr.msra.gmra.mrb[12].mxu1 %vm1012_vm1, %v1240_v9  ;;  %v8883_v9 = vcombine.low %v1536_v32, %v1544_v49  ;;  %v1624_v3 = vld [vmem:[%s13249_s20 + $0x348] sm:$0xff] }
 0x676   : > { %2403 = vmatprep.mubr.bf16.mxu1 %v11216_v0  ;;  %2372 = vmatpush1.bf16.msra.mxu1 %v8865_v62  ;;  %v8963_v32 = vcombine.low %v1616_v38, %v1624_v3  ;;  %v8964_v49 = vcombine.high %v1616_v38, %v1624_v3  ;;  %v1562_v38 = vld [vmem:[%s13249_s20 + $0x158] sm:$0xff] }
 0x677   : > { %2373 = vmatprep.subr.bf16.mxu1 %v8882_v5  ;;  %v8961_v5 = vcombine.low %v1615_v63, %v1623_v2 }
 0x67a   : > { %2374 = vmatpush1.bf16.msra.mxu1 %v8881_v7  ;;  %v1639_v7 = vld [vmem:[%s13249_s20 + $0x3c0] sm:$0xff] }
 0x748   : > { %v10169_v23 = vpop.f32.mrb[12].mxu1 }
 0x749   : > { %v1289_v28 = vpop.f32.mrb[13].mxu1 }
 0x74a   : > { %v10170_v29 = vpop.f32.mrb[14].mxu1 }
 0x74b   : > { %v10417_v30 = vpack.i.bf16 %v10170_v29, %v10169_v23  ;;  %v1292_v26 = vpop.f32.mrb[15].mxu1 }
 0x74c   : > { %v10412_v33 = vpack.i.bf16 %v1292_v26, %v1289_v28 }
 0x74e   : > { %10413 = vrot.lane.b32.xlu1 %v10412_v33, %s11217_s10 }
 0x752   : > { %10418 = vrot.lane.b32.xlu1 %v10417_v30, %s11217_s10 }
 0x7c0   : > { %v10414_v34 = vpop.permute.xlu1 %10413 }
 0x7c1   : > { %v10416_v35 = vunpack.i.h.bf16 %v10414_v34  ;;  %v10415_v36 = vunpack.i.l.bf16 %v10414_v34 }
 0x7c3   : > { %v1320_v37 = vsel %vm942_vm0, %v11760_v14, %v10415_v36  ;;  %v1321_v40 = vsel %vm942_vm0, %v11764_v16, %v10416_v35  ;;  %v8854_v14 = vld [vmem:[#allocation7] ss:$0 sm:$0xff] }
 0x7c4   : > { %v10419_v1 = vpop.permute.xlu1 %10418  ;;  %v1324_v41 = vpack.c.bf16 %v1321_v40, %v1320_v37  ;;  %v1551_v36 = vld [vmem:[%s13249_s20 + $0x100] sm:$0xff]  ;;  %v1552_v40 = vld [vmem:[%s13249_s20 + $0x108] sm:$0xff] }
 0x7c5   : > { %v10421_v42 = vunpack.i.h.bf16 %v10419_v1  ;;  %v10420_v43 = vunpack.i.l.bf16 %v10419_v1  ;;  %v1559_v37 = vld [vmem:[%s13249_s20 + $0x140] sm:$0xff] }
 0x7c6   : > { %10187 = vmatprep.mubr.bf16.mxu0 %v1324_v41  ;;  %v8898_v1 = vcombine.high %v1551_v36, %v1559_v37  ;;  %v1560_v41 = vld [vmem:[%s13249_s20 + $0x148] sm:$0xff] }
 0x7c7   : > { %v1323_v44 = vsel %vm942_vm0, %v11762_v15, %v10421_v42  ;;  %v1322_v8 = vsel %vm942_vm0, %v11758_v13, %v10420_v43  ;;  %v8897_v42 = vcombine.low %v1551_v36, %v1559_v37  ;;  %v8899_v43 = vcombine.low %v1552_v40, %v1560_v41 }
 0x7c8   : > { %v1325_v45 = vpack.c.bf16 %v1323_v44, %v1322_v8  ;;  %v8900_v44 = vcombine.high %v1552_v40, %v1560_v41  ;;  %2375 = vmatprep.subr.bf16.mxu1 %v8898_v1  ;;  %v1567_v8 = vld [vmem:[%s13249_s20 + $0x180] sm:$0xff] }
 0x7c9   : > { %2376 = vmatpush1.bf16.msra.mxu1 %v8897_v42 }
 0x7ca   : > { %10188 = vmatmul.mubr.bf16.vlgmr.msra.gmra.mrb[12].mxu0 %v1325_v45  ;;  %v1575_v45 = vld [vmem:[%s13249_s20 + $0x1c0] sm:$0xff] }
 0x7cb   : > { %2456 = vmatprep.mubr.bf16.mxu0 %v11216_v0  ;;  %2425 = vmatpush1.bf16.msra.mxu0 %v8867_v31  ;;  %v8962_v31 = vcombine.high %v1615_v63, %v1623_v2  ;;  %v1553_v63 = vld [vmem:[%s13249_s20 + $0x110] sm:$0xff] }
 0x7cc   : > { %2426 = vmatprep.subr.bf16.mxu0 %v8884_v6  ;;  %v1631_v6 = vld [vmem:[%s13249_s20 + $0x380] sm:$0xff]  ;;  %v1561_v2 = vld [vmem:[%s13249_s20 + $0x150] sm:$0xff] }
 0x7cf   : > { %2427 = vmatpush1.bf16.msra.mxu0 %v8883_v9  ;;  %v1632_v9 = vld [vmem:[%s13249_s20 + $0x388] sm:$0xff] }
 0x7d0   : > { %2428 = vmatprep.subr.bf16.mxu0 %v8900_v44 }
 0x7d3   : > { %2429 = vmatpush1.bf16.msra.mxu0 %v8899_v43 }
 0x89d   : > { %v10189_v16 = vpop.f32.mrb[12].mxu0 }
 0x89e   : > { %v1431_v61 = vpop.f32.mrb[13].mxu0  ;;  %v1440_v51 = vadd.f32 %v10189_v16, %v8854_v14  ;;  %v8914_v16 = vcombine.high %v1567_v8, %v1575_v45 }
 0x89f   : > { %v1432_v46 = vadd.f32 %v8854_v14, %v1431_v61  ;;  %v10190_v47 = vpop.f32.mrb[14].mxu0  ;;  %v1576_v61 = vld [vmem:[%s13249_s20 + $0x1c8] sm:$0xff] }
 0x8a0   : > { %v1434_v48 = vpop.f32.mrb[15].mxu0  ;;  %v1443_v13 = vadd.f32 %v10190_v47, %v8854_v14  ;;  %v1448_v56 = vadd.f32 %v10876_v55, %v1440_v51  ;;  %2377 = vmatprep.subr.bf16.mxu1 %v8914_v16  ;;  %v1583_v51 = vld [vmem:[%s13249_s20 + $0x200] sm:$0xff] }
 0x8a1   : > { %v1435_v4 = vadd.f32 %v8854_v14, %v1434_v48  ;;  %v1446_v15 = vadd.f32 %v10874_v52, %v1432_v46  ;;  %v1568_v14 = vld [vmem:[%s13249_s20 + $0x188] sm:$0xff]  ;;  %v8913_v46 = vcombine.low %v1567_v8, %v1575_v45 }
 0x8a2   : > { %v1449_v58 = vadd.f32 %v10877_v57, %v1443_v13  ;;  %v8915_v47 = vcombine.low %v1568_v14, %v1576_v61  ;;  %v8916_v48 = vcombine.high %v1568_v14, %v1576_v61  ;;  %v1584_v52 = vld [vmem:[%s13249_s20 + $0x208] sm:$0xff]  ;;  %v1607_v57 = vld [vmem:[%s13249_s20 + $0x2c0] sm:$0xff] }
 0x8a3   : > { %1452 = vadd.xlane.f32.xlu0 %v1446_v15  ;;  %v1447_v54 = vadd.f32 %v10875_v53, %v1435_v4  ;;  %2378 = vmatpush1.bf16.msra.mxu1 %v8913_v46  ;;  %v1591_v4 = vld [vmem:[%s13249_s20 + $0x240] sm:$0xff]  ;;  %v1592_v53 = vld [vmem:[%s13249_s20 + $0x248] sm:$0xff] }
 0x8a4   : > { %2430 = vmatprep.subr.bf16.mxu0 %v8916_v48  ;;  %v8931_v13 = vcombine.low %v1584_v52, %v1592_v53  ;;  %v8932_v55 = vcombine.high %v1584_v52, %v1592_v53  ;;  %v8864_v53 = vld [vmem:[#allocation10] ss:$0 sm:$0xff] }
 0x8a5   : > { %1454 = vadd.xlane.f32.xlu1 %v1447_v54  ;;  %2431 = vmatpush1.bf16.msra.mxu0 %v8915_v47  ;;  %v8863_v47 = vld [vmem:[#allocation9] ss:$0 sm:$0xff] }
 0x8a6   : > { %2432 = vmatprep.subr.bf16.mxu0 %v8932_v55  ;;  %v1545_v55 = vld [vmem:[%s13249_s20 + $0xd0] sm:$0xff] }
 0x8a7   : > { %1456 = vadd.xlane.f32.xlu0 %v1448_v56 }
 0x8a9   : > { %2433 = vmatpush1.bf16.msra.mxu0 %v8931_v13  ;;  %v1537_v13 = vld [vmem:[%s13249_s20 + $0x90] sm:$0xff] }
 0x8aa   : > { %v8885_v3 = vcombine.low %v1537_v13, %v1545_v55 }
 0x8ab   : > { %1458 = vadd.xlane.f32.xlu0 %v1449_v58 }
 0x930   : > { %v1453_v10 = vpop.xlane.xlu0 %1452 }
 0x931   : > { %v1461_v11 = vmul.f32 0.0078125, %v1453_v10  ;;  %v8978_v10 = vcombine.high %v1631_v6, %v1639_v7 }
 0x932   : > { %v1455_v12 = vpop.xlane.xlu1 %1454 }
 0x933   : > { %v11824_v18 = vsub.f32 %v1446_v15, %v1461_v11  ;;  %v1462_v19 = vmul.f32 0.0078125, %v1455_v12  ;;  %v8930_v15 = vcombine.high %v1583_v51, %v1591_v4  ;;  %v1640_v11 = vld [vmem:[%s13249_s20 + $0x3c8] sm:$0xff]  ;;  %v8977_v12 = vcombine.low %v1631_v6, %v1639_v7  ;;  %v1569_v7 = vld [vmem:[%s13249_s20 + $0x190] sm:$0xff] }
 0x934   : > { %v1457_v20 = vpop.xlane.xlu0 %1456 }
 0x935   : > { %v11826_v21 = vsub.f32 %v1447_v54, %v1462_v19  ;;  %v1463_v22 = vmul.f32 0.0078125, %v1457_v20  ;;  %v1469_v23 = vmul.f32 %v11824_v18, %v11824_v18  ;;  %v8929_v54 = vcombine.low %v1583_v51, %v1591_v4  ;;  %2379 = vmatprep.subr.bf16.mxu1 %v8930_v15 }
 0x936   : > { %v8979_v19 = vcombine.low %v1632_v9, %v1640_v11  ;;  %v8980_v20 = vcombine.high %v1632_v9, %v1640_v11  ;;  %v1577_v9 = vld [vmem:[%s13249_s20 + $0x1d0] sm:$0xff]  ;;  %v1578_v11 = vld [vmem:[%s13249_s20 + $0x1d8] sm:$0xff] }
 0x937   : > { %v11830_v28 = vsub.f32 %v1448_v56, %v1463_v22  ;;  %1473 = vadd.xlane.f32.xlu0 %v1469_v23  ;;  %v1470_v29 = vmul.f32 %v11826_v21, %v11826_v21  ;;  %2380 = vmatpush1.bf16.msra.mxu1 %v8929_v54  ;;  %v1599_v56 = vld [vmem:[%s13249_s20 + $0x280] sm:$0xff]  ;;  %v1521_v22 = vld [vmem:[%s13249_s20 + $0x10] sm:$0xff] }
 0x938   : > { %v1459_v30 = vpop.xlane.xlu0 %1458  ;;  %v8946_v59 = vcombine.high %v1599_v56, %v1607_v57  ;;  %v8945_v39 = vcombine.low %v1599_v56, %v1607_v57  ;;  %v1529_v23 = vld [vmem:[%s13249_s20 + $0x50] sm:$0xff]  ;;  %v1538_v56 = vld [vmem:[%s13249_s20 + $0x98] sm:$0xff] }
 0x939   : > { %v1464_v26 = vmul.f32 0.0078125, %v1459_v30  ;;  %1475 = vadd.xlane.f32.xlu1 %v1470_v29  ;;  %v1471_v33 = vmul.f32 %v11830_v28, %v11830_v28  ;;  %v1522_v29 = vld [vmem:[%s13249_s20 + $0x18] sm:$0xff]  ;;  %v8870_v30 = vcombine.high %v1521_v22, %v1529_v23 }
 0x93a   : > { %2381 = vmatprep.subr.bf16.mxu1 %v8946_v59 }
 0x93b   : > { %v11836_v34 = vsub.f32 %v1449_v58, %v1464_v26  ;;  %1477 = vadd.xlane.f32.xlu0 %v1471_v33  ;;  %v1600_v58 = vld [vmem:[%s13249_s20 + $0x288] sm:$0xff]  ;;  %2382 = vmatpush1.bf16.msra.mxu1 %v8945_v39  ;;  %v1530_v26 = vld [vmem:[%s13249_s20 + $0x58] sm:$0xff]  ;;  %v8869_v33 = vcombine.low %v1521_v22, %v1529_v23  ;;  %v8918_v23 = vcombine.high %v1569_v7, %v1577_v9 }
 0x93c   : > { %v8947_v62 = vcombine.low %v1600_v58, %v1608_v60  ;;  %v8948_v50 = vcombine.high %v1600_v58, %v1608_v60  ;;  %2383 = vmatprep.subr.bf16.mxu1 %v8962_v31  ;;  %v8872_v36 = vcombine.high %v1522_v29, %v1530_v26 }
 0x93d   : > { %v1472_v35 = vmul.f32 %v11836_v34, %v11836_v34 }
 0x93e   : > { %2434 = vmatprep.subr.bf16.mxu0 %v8948_v50 }
 0x93f   : > { %1479 = vadd.xlane.f32.xlu1 %v1472_v35  ;;  %2435 = vmatpush1.bf16.msra.mxu0 %v8947_v62  ;;  %v8871_v35 = vcombine.low %v1522_v29, %v1530_v26  ;;  %v8886_v62 = vcombine.high %v1537_v13, %v1545_v55  ;;  %v1593_v26 = vld [vmem:[%s13249_s20 + $0x250] sm:$0xff]  ;;  %v1634_v13 = vld [vmem:[%s13249_s20 + $0x398] sm:$0xff] }
 0x940   : > { %2436 = vmatprep.subr.bf16.mxu0 %v8964_v49  ;;  %2384 = vmatpush1.bf16.msra.mxu1 %v8961_v5  ;;  %v8902_v49 = vcombine.high %v1553_v63, %v1561_v2  ;;  %v1642_v55 = vld [vmem:[%s13249_s20 + $0x3d8] sm:$0xff] }
 0x941   : > { %2385 = vmatprep.subr.bf16.mxu1 %v8978_v10  ;;  %v1570_v10 = vld [vmem:[%s13249_s20 + $0x198] sm:$0xff] }
 0x942   : > { %v8920_v29 = vcombine.high %v1570_v10, %v1578_v11 }
 0x943   : > { %2437 = vmatpush1.bf16.msra.mxu0 %v8963_v32 }
 0x944   : > { %2438 = vmatprep.subr.bf16.mxu0 %v8980_v20  ;;  %2386 = vmatpush1.bf16.msra.mxu1 %v8977_v12 }
 0x945   : > { %2477 = vmatprep.subr.bf16.mxu1 %v8870_v30  ;;  %v1585_v30 = vld [vmem:[%s13249_s20 + $0x210] sm:$0xff] }
 0x947   : > { %2439 = vmatpush1.bf16.msra.mxu0 %v8979_v19  ;;  %v8901_v19 = vcombine.low %v1553_v63, %v1561_v2  ;;  %v1532_v63 = vld [vmem:[%s13249_s20 + $0x68] sm:$0xff] }
 0x948   : > { %2530 = vmatprep.subr.bf16.mxu0 %v8872_v36  ;;  %v8917_v36 = vcombine.low %v1569_v7, %v1577_v9 }
 0x9c4   : > { %v1474_v37 = vpop.xlane.xlu0 %1473 }
 0x9c5   : > { %v1481_v40 = vmul.f32 0.0078125, %v1474_v37  ;;  %v8919_v37 = vcombine.low %v1570_v10, %v1578_v11  ;;  %v1555_v11 = vld [vmem:[%s13249_s20 + $0x120] sm:$0xff] }
 0x9c6   : > { %v1476_v1 = vpop.xlane.xlu1 %1475 }
 0x9c7   : > { %v1485_v41 = vadd.f32 1e-05, %v1481_v40  ;;  %v1482_v42 = vmul.f32 0.0078125, %v1476_v1  ;;  %v8934_v40 = vcombine.high %v1585_v30, %v1593_v26 }
 0x9c8   : > { %v1478_v43 = vpop.xlane.xlu0 %1477 }
 0x9c9   : > { %10802 = vrsqrt.f32 %v1485_v41  ;;  %v1486_v44 = vadd.f32 1e-05, %v1482_v42  ;;  %v1483_v8 = vmul.f32 0.0078125, %v1478_v43  ;;  %v1601_v41 = vld [vmem:[%s13249_s20 + $0x290] sm:$0xff]  ;;  %v1602_v43 = vld [vmem:[%s13249_s20 + $0x298] sm:$0xff] }
 0x9ca   : > { %v1609_v42 = vld [vmem:[%s13249_s20 + $0x2d0] sm:$0xff] }
 0x9cb   : > { %10804 = vrsqrt.f32 %v1486_v44  ;;  %v1487_v45 = vadd.f32 1e-05, %v1483_v8  ;;  %v1610_v44 = vld [vmem:[%s13249_s20 + $0x2d8] sm:$0xff]  ;;  %v8933_v8 = vcombine.low %v1585_v30, %v1593_v26 }
 0x9cc   : > { %v1480_v14 = vpop.xlane.xlu1 %1479 }
 0x9cd   : > { %10806 = vrsqrt.f32 %v1487_v45  ;;  %v1484_v16 = vmul.f32 0.0078125, %v1480_v14  ;;  %v8950_v14 = vcombine.high %v1601_v41, %v1609_v42 }
 0x9cf   : > { %v1488_v61 = vadd.f32 1e-05, %v1484_v16  ;;  %v8952_v16 = vcombine.high %v1602_v43, %v1610_v44 }
 0x9d1   : > { %10808 = vrsqrt.f32 %v1488_v61  ;;  %v1617_v61 = vld [vmem:[%s13249_s20 + $0x310] sm:$0xff] }
 0x9d3   : > { %v10803_v46 = vpop.eup %10802 }
 0x9d4   : > { %v1493_v48 = vmul.f32 %v10803_v46, %v11824_v18  ;;  %v1546_v18 = vld [vmem:[%s13249_s20 + $0xd8] sm:$0xff]  ;;  %v1625_v46 = vld [vmem:[%s13249_s20 + $0x350] sm:$0xff] }
 0x9d5   : > { %v10805_v51 = vpop.eup %10804  ;;  %v8888_v50 = vcombine.high %v1538_v56, %v1546_v18  ;;  %v8887_v5 = vcombine.low %v1538_v56, %v1546_v18  ;;  %v8965_v56 = vcombine.low %v1617_v61, %v1625_v46 }
 0x9d6   : > { %v1503_v4 = vmul.f32 %v8863_v47, %v1493_v48  ;;  %v1494_v52 = vmul.f32 %v10805_v51, %v11826_v21  ;;  %v1626_v48 = vld [vmem:[%s13249_s20 + $0x358] sm:$0xff]  ;;  %v8949_v51 = vcombine.low %v1601_v41, %v1609_v42 }
 0x9d7   : > { %v10807_v15 = vpop.eup %10806 }
 0x9d8   : > { %v1504_v54 = vmul.f32 %v8863_v47, %v1494_v52  ;;  %v11938_v21 = vadd.f32 %v8864_v53, %v1503_v4  ;;  %v1495_v58 = vmul.f32 %v10807_v15, %v11830_v28  ;;  %v1554_v28 = vld [vmem:[%s13249_s20 + $0x118] sm:$0xff]  ;;  %v8951_v4 = vcombine.low %v1602_v43, %v1610_v44  ;;  %v1587_v44 = vld [vmem:[%s13249_s20 + $0x220] sm:$0xff] }
 0x9d9   : > { %v8904_v6 = vcombine.high %v1554_v28, %v1562_v38  ;;  %v8903_v20 = vcombine.low %v1554_v28, %v1562_v38  ;;  %v8966_v52 = vcombine.high %v1617_v61, %v1625_v46  ;;  %v8983_v28 = vcombine.low %v1634_v13, %v1642_v55 }
 0x9da   : > { %v11940_v57 = vadd.f32 %v8864_v53, %v1504_v54  ;;  %v1505_v31 = vmul.f32 %v8863_v47, %v1495_v58  ;;  %v1641_v54 = vld [vmem:[%s13249_s20 + $0x3d0] sm:$0xff] }
 0x9db   : > { %v10809_v59 = vpop.eup %10808 }
 0x9dc   : > { %v11945_v60 = vpack.c.bf16 %v11940_v57, %v11938_v21  ;;  %v1496_v39 = vmul.f32 %v10809_v59, %v11836_v34  ;;  %v11978_v12 = vadd.f32 %v8864_v53, %v1505_v31  ;;  %v8984_v59 = vcombine.high %v1634_v13, %v1642_v55  ;;  %v1619_v55 = vld [vmem:[%s13249_s20 + $0x320] sm:$0xff] }
 0x9de   : > { %v1506_v34 = vmul.f32 %v8863_v47, %v1496_v39  ;;  %2404 = vmatmul.mubr.bf16.vlgmr.msra.gmra.mrb[16].mxu1 %v11945_v60  ;;  %2457 = vmatmul.mubr.bf16.vlgmr.msra.gmra.mrb[16].mxu0 %v11945_v60  ;;  %v1618_v47 = vld [vmem:[%s13249_s20 + $0x318] sm:$0xff]  ;;  %v1523_v39 = vld [vmem:[%s13249_s20 + $0x20] sm:$0xff] }
 0x9df   : > { %2478 = vmatpush1.bf16.msra.mxu1 %v8869_v33  ;;  %2531 = vmatpush1.bf16.msra.mxu0 %v8871_v35  ;;  %v1586_v33 = vld [vmem:[%s13249_s20 + $0x218] sm:$0xff]  ;;  %v8968_v15 = vcombine.high %v1618_v47, %v1626_v48  ;;  %v8967_v18 = vcombine.low %v1618_v47, %v1626_v48  ;;  %v1603_v48 = vld [vmem:[%s13249_s20 + $0x2a0] sm:$0xff] }
 0x9e0   : > { %v11962_v32 = vadd.f32 %v8864_v53, %v1506_v34  ;;  %2479 = vmatprep.subr.bf16.mxu1 %v8886_v62  ;;  %2532 = vmatprep.subr.bf16.mxu0 %v8888_v50  ;;  %v1594_v35 = vld [vmem:[%s13249_s20 + $0x258] sm:$0xff]  ;;  %v1633_v53 = vld [vmem:[%s13249_s20 + $0x390] sm:$0xff]  ;;  %v1531_v62 = vld [vmem:[%s13249_s20 + $0x60] sm:$0xff] }
 0x9e1   : > { %2413 = vmatprep.mubr.bf16.mxu1 %v11216_v0  ;;  %2466 = vmatprep.mubr.bf16.mxu0 %v11216_v0  ;;  %v8936_v1 = vcombine.high %v1586_v33, %v1594_v35  ;;  %v8935_v45 = vcombine.low %v1586_v33, %v1594_v35  ;;  %v8982_v58 = vcombine.high %v1633_v53, %v1641_v54  ;;  %v1524_v50 = vld [vmem:[%s13249_s20 + $0x28] sm:$0xff]  ;;  %v1539_v34 = vld [vmem:[%s13249_s20 + $0xa0] sm:$0xff] }
 0x9e2   : > { %v11982_v22 = vpack.c.bf16 %v11962_v32, %v11978_v12  ;;  %v8981_v2 = vcombine.low %v1633_v53, %v1641_v54  ;;  %v8874_v38 = vcombine.high %v1523_v39, %v1531_v62  ;;  %v8876_v31 = vcombine.high %v1524_v50, %v1532_v63  ;;  %v1571_v35 = vld [vmem:[%s13249_s20 + $0x1a0] sm:$0xff] }
 0x9e3   : > { %2480 = vmatpush1.bf16.msra.mxu1 %v8885_v3  ;;  %2533 = vmatpush1.bf16.msra.mxu0 %v8887_v5  ;;  %v1547_v3 = vld [vmem:[%s13249_s20 + $0xe0] sm:$0xff]  ;;  %v1540_v5 = vld [vmem:[%s13249_s20 + $0xa8] sm:$0xff]  ;;  %v8875_v7 = vcombine.low %v1524_v50, %v1532_v63 }
 0x9e4   : > { %2481 = vmatprep.subr.bf16.mxu1 %v8902_v49  ;;  %2534 = vmatprep.subr.bf16.mxu0 %v8904_v6  ;;  %v1548_v49 = vld [vmem:[%s13249_s20 + $0xe8] sm:$0xff]  ;;  %v8873_v6 = vcombine.low %v1523_v39, %v1531_v62  ;;  %v8890_v9 = vcombine.high %v1539_v34, %v1547_v3  ;;  %v1635_v63 = vld [vmem:[%s13249_s20 + $0x3a0] sm:$0xff] }
 0x9e5   : > { %v8892_v10 = vcombine.high %v1540_v5, %v1548_v49  ;;  %v8891_v30 = vcombine.low %v1540_v5, %v1548_v49  ;;  %v1525_v49 = vld [vmem:[%s13249_s20 + $0x30] sm:$0xff] }
 0x9e6   : > { %2414 = vmatmul.mubr.bf16.gmra.mrb[20].mxu1 %v11982_v22  ;;  %2467 = vmatmul.mubr.bf16.gmra.mrb[20].mxu0 %v11982_v22 }
 0x9e7   : > { %2482 = vmatpush1.bf16.msra.mxu1 %v8901_v19  ;;  %2535 = vmatpush1.bf16.msra.mxu0 %v8903_v20  ;;  %v1563_v19 = vld [vmem:[%s13249_s20 + $0x160] sm:$0xff]  ;;  %v1556_v20 = vld [vmem:[%s13249_s20 + $0x128] sm:$0xff] }
 0x9e8   : > { %2483 = vmatprep.subr.bf16.mxu1 %v8918_v23  ;;  %2536 = vmatprep.subr.bf16.mxu0 %v8920_v29  ;;  %v1564_v23 = vld [vmem:[%s13249_s20 + $0x168] sm:$0xff]  ;;  %v8889_v29 = vcombine.low %v1539_v34, %v1547_v3  ;;  %v8906_v26 = vcombine.high %v1555_v11, %v1563_v19 }
 0x9e9   : > { %2509 = vmatprep.mubr.bf16.mxu1 %v11216_v0  ;;  %2562 = vmatprep.mubr.bf16.mxu0 %v11216_v0  ;;  %v8908_v33 = vcombine.high %v1556_v20, %v1564_v23  ;;  %v8907_v41 = vcombine.low %v1556_v20, %v1564_v23  ;;  %v1541_v23 = vld [vmem:[%s13249_s20 + $0xb0] sm:$0xff] }
 0x9eb   : > { %2484 = vmatpush1.bf16.msra.mxu1 %v8917_v36  ;;  %2537 = vmatpush1.bf16.msra.mxu0 %v8919_v37  ;;  %v1579_v36 = vld [vmem:[%s13249_s20 + $0x1e0] sm:$0xff]  ;;  %v1572_v37 = vld [vmem:[%s13249_s20 + $0x1a8] sm:$0xff] }
 0x9ec   : > { %2485 = vmatprep.subr.bf16.mxu1 %v8934_v40  ;;  %2538 = vmatprep.subr.bf16.mxu0 %v8936_v1  ;;  %v1580_v40 = vld [vmem:[%s13249_s20 + $0x1e8] sm:$0xff]  ;;  %v8905_v1 = vcombine.low %v1555_v11, %v1563_v19  ;;  %v8922_v42 = vcombine.high %v1571_v35, %v1579_v36 }
 0x9ed   : > { %v8924_v43 = vcombine.high %v1572_v37, %v1580_v40  ;;  %v8923_v61 = vcombine.low %v1572_v37, %v1580_v40  ;;  %v1557_v40 = vld [vmem:[%s13249_s20 + $0x130] sm:$0xff] }
 0x9ef   : > { %2486 = vmatpush1.bf16.msra.mxu1 %v8933_v8  ;;  %2539 = vmatpush1.bf16.msra.mxu0 %v8935_v45  ;;  %v1595_v8 = vld [vmem:[%s13249_s20 + $0x260] sm:$0xff]  ;;  %v1588_v45 = vld [vmem:[%s13249_s20 + $0x228] sm:$0xff] }
 0x9f0   : > { %2487 = vmatprep.subr.bf16.mxu1 %v8950_v14  ;;  %2540 = vmatprep.subr.bf16.mxu0 %v8952_v16  ;;  %v1596_v14 = vld [vmem:[%s13249_s20 + $0x268] sm:$0xff]  ;;  %v8921_v16 = vcombine.low %v1571_v35, %v1579_v36  ;;  %v8938_v46 = vcombine.high %v1587_v44, %v1595_v8 }
 0x9f1   : > { %v8940_v47 = vcombine.high %v1588_v45, %v1596_v14  ;;  %v8939_v53 = vcombine.low %v1588_v45, %v1596_v14  ;;  %v1573_v14 = vld [vmem:[%s13249_s20 + $0x1b0] sm:$0xff] }
 0x9f3   : > { %2488 = vmatpush1.bf16.msra.mxu1 %v8949_v51  ;;  %2541 = vmatpush1.bf16.msra.mxu0 %v8951_v4  ;;  %v1611_v51 = vld [vmem:[%s13249_s20 + $0x2e0] sm:$0xff]  ;;  %v1604_v4 = vld [vmem:[%s13249_s20 + $0x2a8] sm:$0xff] }
 0x9f4   : > { %2489 = vmatprep.subr.bf16.mxu1 %v8966_v52  ;;  %2542 = vmatprep.subr.bf16.mxu0 %v8968_v15  ;;  %v1612_v52 = vld [vmem:[%s13249_s20 + $0x2e8] sm:$0xff]  ;;  %v8937_v15 = vcombine.low %v1587_v44, %v1595_v8  ;;  %v8954_v54 = vcombine.high %v1603_v48, %v1611_v51 }
 0x9f5   : > { %v8956_v13 = vcombine.high %v1604_v4, %v1612_v52  ;;  %v8955_v39 = vcombine.low %v1604_v4, %v1612_v52  ;;  %v1589_v52 = vld [vmem:[%s13249_s20 + $0x230] sm:$0xff] }
 0x9f7   : > { %2490 = vmatpush1.bf16.msra.mxu1 %v8965_v56  ;;  %2543 = vmatpush1.bf16.msra.mxu0 %v8967_v18  ;;  %v1627_v56 = vld [vmem:[%s13249_s20 + $0x360] sm:$0xff]  ;;  %v1620_v18 = vld [vmem:[%s13249_s20 + $0x328] sm:$0xff] }
 0x9f8   : > { %2491 = vmatprep.subr.bf16.mxu1 %v8982_v58  ;;  %2544 = vmatprep.subr.bf16.mxu0 %v8984_v59  ;;  %v1628_v58 = vld [vmem:[%s13249_s20 + $0x368] sm:$0xff]  ;;  %v8953_v59 = vcombine.low %v1603_v48, %v1611_v51  ;;  %v8970_v62 = vcombine.high %v1619_v55, %v1627_v56 }
 0x9f9   : > { %v8972_v50 = vcombine.high %v1620_v18, %v1628_v58  ;;  %v8971_v34 = vcombine.low %v1620_v18, %v1628_v58  ;;  %v1605_v58 = vld [vmem:[%s13249_s20 + $0x2b0] sm:$0xff] }
 0x9fb   : > { %2492 = vmatpush1.bf16.msra.mxu1 %v8981_v2  ;;  %2545 = vmatpush1.bf16.msra.mxu0 %v8983_v28  ;;  %v1643_v2 = vld [vmem:[%s13249_s20 + $0x3e0] sm:$0xff]  ;;  %v1636_v28 = vld [vmem:[%s13249_s20 + $0x3a8] sm:$0xff] }
 0x9fc   : > { %2583 = vmatprep.subr.bf16.mxu1 %v8874_v38  ;;  %2636 = vmatprep.subr.bf16.mxu0 %v8876_v31  ;;  %v1644_v38 = vld [vmem:[%s13249_s20 + $0x3e8] sm:$0xff]  ;;  %v8969_v31 = vcombine.low %v1619_v55, %v1627_v56  ;;  %v8986_v3 = vcombine.high %v1635_v63, %v1643_v2 }
 0x9fd   : > { %v8988_v5 = vcombine.high %v1636_v28, %v1644_v38  ;;  %v8987_v11 = vcombine.low %v1636_v28, %v1644_v38  ;;  %v1621_v38 = vld [vmem:[%s13249_s20 + $0x330] sm:$0xff] }
 0x9fe   : > { %2510 = vmatmul.mubr.bf16.vlgmr.msra.gmra.mrb[24].mxu1 %v11945_v60  ;;  %2563 = vmatmul.mubr.bf16.vlgmr.msra.gmra.mrb[24].mxu0 %v11945_v60 }
 0x9ff   : > { %2584 = vmatpush1.bf16.msra.mxu1 %v8873_v6  ;;  %2637 = vmatpush1.bf16.msra.mxu0 %v8875_v7  ;;  %v1533_v6 = vld [vmem:[%s13249_s20 + $0x70] sm:$0xff]  ;;  %v1526_v7 = vld [vmem:[%s13249_s20 + $0x38] sm:$0xff] }
 0xa00   : > { %2585 = vmatprep.subr.bf16.mxu1 %v8890_v9  ;;  %2638 = vmatprep.subr.bf16.mxu0 %v8892_v10  ;;  %v1534_v9 = vld [vmem:[%s13249_s20 + $0x78] sm:$0xff]  ;;  %v8985_v10 = vcombine.low %v1635_v63, %v1643_v2  ;;  %v8878_v19 = vcombine.high %v1525_v49, %v1533_v6 }
 0xa01   : > { %2519 = vmatprep.mubr.bf16.mxu1 %v11216_v0  ;;  %2572 = vmatprep.mubr.bf16.mxu0 %v11216_v0  ;;  %v8880_v20 = vcombine.high %v1526_v7, %v1534_v9  ;;  %v8879_v35 = vcombine.low %v1526_v7, %v1534_v9  ;;  %v1637_v9 = vld [vmem:[%s13249_s20 + $0x3b0] sm:$0xff] }
 0xa03   : > { %2586 = vmatpush1.bf16.msra.mxu1 %v8889_v29  ;;  %2639 = vmatpush1.bf16.msra.mxu0 %v8891_v30  ;;  %v1549_v29 = vld [vmem:[%s13249_s20 + $0xf0] sm:$0xff]  ;;  %v1542_v30 = vld [vmem:[%s13249_s20 + $0xb8] sm:$0xff] }
 0xa04   : > { %2587 = vmatprep.subr.bf16.mxu1 %v8906_v26  ;;  %2640 = vmatprep.subr.bf16.mxu0 %v8908_v33  ;;  %v1550_v26 = vld [vmem:[%s13249_s20 + $0xf8] sm:$0xff]  ;;  %v8877_v33 = vcombine.low %v1525_v49, %v1533_v6  ;;  %v8894_v36 = vcombine.high %v1541_v23, %v1549_v29 }
 0xa05   : > { %v8896_v37 = vcombine.high %v1542_v30, %v1550_v26  ;;  %v8895_v44 = vcombine.low %v1542_v30, %v1550_v26 }
 0xa06   : > { %2520 = vmatmul.mubr.bf16.gmra.mrb[28].mxu1 %v11982_v22  ;;  %2573 = vmatmul.mubr.bf16.gmra.mrb[28].mxu0 %v11982_v22 }
 0xa07   : > { %2588 = vmatpush1.bf16.msra.mxu1 %v8905_v1  ;;  %2641 = vmatpush1.bf16.msra.mxu0 %v8907_v41  ;;  %v1565_v1 = vld [vmem:[%s13249_s20 + $0x170] sm:$0xff]  ;;  %v1558_v41 = vld [vmem:[%s13249_s20 + $0x138] sm:$0xff] }
 0xa08   : > { %2589 = vmatprep.subr.bf16.mxu1 %v8922_v42  ;;  %2642 = vmatprep.subr.bf16.mxu0 %v8924_v43  ;;  %v1566_v42 = vld [vmem:[%s13249_s20 + $0x178] sm:$0xff]  ;;  %v8893_v43 = vcombine.low %v1541_v23, %v1549_v29  ;;  %v8910_v8 = vcombine.high %v1557_v40, %v1565_v1 }
 0xa09   : > { %2615 = vmatprep.mubr.bf16.mxu1 %v11216_v0  ;;  %2668 = vmatprep.mubr.bf16.mxu0 %v11216_v0  ;;  %v8912_v45 = vcombine.high %v1558_v41, %v1566_v42  ;;  %v8911_v48 = vcombine.low %v1558_v41, %v1566_v42  ;;  %v10479_v41 = vld [vmem:[#allocation12 + $0xc8] sm:$0xff]  }
 0xa0a   : > { %v10480_v42 = vld [vmem:[#allocation12 + $0x8] sm:$0xff]  }
 0xa0b   : > { %2590 = vmatpush1.bf16.msra.mxu1 %v8921_v16  ;;  %2643 = vmatpush1.bf16.msra.mxu0 %v8923_v61  ;;  %v1581_v16 = vld [vmem:[%s13249_s20 + $0x1f0] sm:$0xff]  ;;  %v1574_v61 = vld [vmem:[%s13249_s20 + $0x1b8] sm:$0xff] }
 0xa0c   : > { %2591 = vmatprep.subr.bf16.mxu1 %v8938_v46  ;;  %2644 = vmatprep.subr.bf16.mxu0 %v8940_v47  ;;  %v1582_v46 = vld [vmem:[%s13249_s20 + $0x1f8] sm:$0xff]  ;;  %v8909_v47 = vcombine.low %v1557_v40, %v1565_v1  ;;  %v8926_v51 = vcombine.high %v1573_v14, %v1581_v16  ;;  %v10477_v40 = vld [vmem:[#allocation12 + $0x80] sm:$0xff]  }
 0xa0d   : > { %v8928_v4 = vcombine.high %v1574_v61, %v1582_v46  ;;  %v8927_v55 = vcombine.low %v1574_v61, %v1582_v46  ;;  %v10478_v1 = vld [vmem:[#allocation12 + $0x48] sm:$0xff]   ;;  %v10488_v61 = vld [vmem:[#allocation12 + $0x18] sm:$0xff]  }
 0xa0e   : > { %v10489_v46 = vld [vmem:[#allocation12 + $0x98] sm:$0xff]  }
 0xa0f   : > { %2592 = vmatpush1.bf16.msra.mxu1 %v8937_v15  ;;  %2645 = vmatpush1.bf16.msra.mxu0 %v8939_v53  ;;  %v1597_v15 = vld [vmem:[%s13249_s20 + $0x270] sm:$0xff]  ;;  %v1590_v53 = vld [vmem:[%s13249_s20 + $0x238] sm:$0xff] }
 0xa10   : > { %2593 = vmatprep.subr.bf16.mxu1 %v8954_v54  ;;  %2646 = vmatprep.subr.bf16.mxu0 %v8956_v13  ;;  %v1598_v54 = vld [vmem:[%s13249_s20 + $0x278] sm:$0xff]  ;;  %v8925_v13 = vcombine.low %v1573_v14, %v1581_v16  ;;  %v8942_v56 = vcombine.high %v1589_v52, %v1597_v15  ;;  %v10486_v16 = vld [vmem:[#allocation12 + $0x58] sm:$0xff]  }
 0xa11   : > { %v8944_v18 = vcombine.high %v1590_v53, %v1598_v54  ;;  %v8943_v63 = vcombine.low %v1590_v53, %v1598_v54  ;;  %v10485_v14 = vld [vmem:[#allocation12 + $0x90] sm:$0xff]   ;;  %v10496_v53 = vld [vmem:[#allocation12 + $0x28] sm:$0xff]  }
 0xa12   : > { %v10498_v54 = vld [vmem:[#allocation12 + $0x70] sm:$0xff]  }
 0xa13   : > { %2594 = vmatpush1.bf16.msra.mxu1 %v8953_v59  ;;  %2647 = vmatpush1.bf16.msra.mxu0 %v8955_v39  ;;  %v1613_v59 = vld [vmem:[%s13249_s20 + $0x2f0] sm:$0xff]  ;;  %v1606_v39 = vld [vmem:[%s13249_s20 + $0x2b8] sm:$0xff] }
 0xa14   : > { %2595 = vmatprep.subr.bf16.mxu1 %v8970_v62  ;;  %2648 = vmatprep.subr.bf16.mxu0 %v8972_v50  ;;  %v1614_v62 = vld [vmem:[%s13249_s20 + $0x2f8] sm:$0xff]  ;;  %v8941_v50 = vcombine.low %v1589_v52, %v1597_v15  ;;  %v8958_v2 = vcombine.high %v1605_v58, %v1613_v59 }
 0xa15   : > { %v8960_v28 = vcombine.high %v1606_v39, %v1614_v62  ;;  %v8959_v49 = vcombine.low %v1606_v39, %v1614_v62  ;;  %v10494_v52 = vld [vmem:[#allocation12 + $0x68] sm:$0xff]   ;;  %v10505_v39 = vld [vmem:[#allocation12 + $0xb8] sm:$0xff]   ;;  %v10506_v62 = vld [vmem:[#allocation12 + $0x140] sm:$0xff]  }
 0xa16   : > { %v10495_v15 = vld [vmem:[#allocation12 + $0xe8] sm:$0xff]  }
 0xa17   : > { %2596 = vmatpush1.bf16.msra.mxu1 %v8969_v31  ;;  %2649 = vmatpush1.bf16.msra.mxu0 %v8971_v34  ;;  %v1629_v31 = vld [vmem:[%s13249_s20 + $0x370] sm:$0xff]  ;;  %v1622_v34 = vld [vmem:[%s13249_s20 + $0x338] sm:$0xff] }
 0xa18   : > { %2597 = vmatprep.subr.bf16.mxu1 %v8986_v3  ;;  %2650 = vmatprep.subr.bf16.mxu0 %v8988_v5  ;;  %v1630_v3 = vld [vmem:[%s13249_s20 + $0x378] sm:$0xff]  ;;  %v8957_v5 = vcombine.low %v1605_v58, %v1613_v59  ;;  %v8974_v6 = vcombine.high %v1621_v38, %v1629_v31  ;;  %v10503_v58 = vld [vmem:[#allocation12 + $0xf8] sm:$0xff]  }
 0xa19   : > { %v8976_v7 = vcombine.high %v1622_v34, %v1630_v3  ;;  %v8975_v23 = vcombine.low %v1622_v34, %v1630_v3  ;;  %v10504_v59 = vld [vmem:[#allocation12 + $0x38] sm:$0xff]  }
 0xa1b   : > { %2598 = vmatpush1.bf16.msra.mxu1 %v8985_v10  ;;  %2651 = vmatpush1.bf16.msra.mxu0 %v8987_v11  ;;  %v1645_v10 = vld [vmem:[%s13249_s20 + $0x3f0] sm:$0xff]  ;;  %v1638_v11 = vld [vmem:[%s13249_s20 + $0x3b8] sm:$0xff] }
 0xa1c   : > { %2689 = vmatprep.subr.bf16.mxu1 %v8878_v19  ;;  %2742 = vmatprep.subr.bf16.mxu0 %v8880_v20  ;;  %v1646_v19 = vld [vmem:[%s13249_s20 + $0x3f8] sm:$0xff]  ;;  %v8973_v20 = vcombine.low %v1621_v38, %v1629_v31  ;;  %v8990_v29 = vcombine.high %v1637_v9, %v1645_v10  ;;  %v8989_v26 = vcombine.low %v1637_v9, %v1645_v10 }
 0xa1d   : > { %v8992_v30 = vcombine.high %v1638_v11, %v1646_v19 }
 0xa1e   : > { %2616 = vmatmul.mubr.bf16.vlgmr.msra.gmra.mrb[32].mxu1 %v11945_v60  ;;  %2669 = vmatmul.mubr.bf16.vlgmr.msra.gmra.mrb[32].mxu0 %v11945_v60 }
 0xa1f   : > { %2690 = vmatpush1.bf16.msra.mxu1 %v8877_v33  ;;  %2743 = vmatpush1.bf16.msra.mxu0 %v8879_v35  ;;  %v8991_v33 = vcombine.low %v1638_v11, %v1646_v19  ;;  %v10474_v35 = vld [vmem:[#allocation12 + $0x40] sm:$0xff]  }
 0xa20   : > { %2691 = vmatprep.subr.bf16.mxu1 %v8894_v36  ;;  %2744 = vmatprep.subr.bf16.mxu0 %v8896_v37  ;;  %v10475_v36 = vld [vmem:[#allocation12 + $0xc0] sm:$0xff]  }
 0xa21   : > { %2625 = vmatprep.mubr.bf16.mxu1 %v11216_v0  ;;  %2678 = vmatprep.mubr.bf16.mxu0 %v11216_v0  ;;  %v10476_v37 = vld [vmem:[#allocation12] sm:$0xff]  }
 0xa23   : > { %2692 = vmatpush1.bf16.msra.mxu1 %v8893_v43  ;;  %2745 = vmatpush1.bf16.msra.mxu0 %v8895_v44  ;;  %v10481_v43 = vld [vmem:[#allocation12 + $0x88] sm:$0xff]   ;;  %v10482_v44 = vld [vmem:[#allocation12 + $0x50] sm:$0xff]  }
 0xa24   : > { %2693 = vmatprep.subr.bf16.mxu1 %v8910_v8  ;;  %2746 = vmatprep.subr.bf16.mxu0 %v8912_v45  ;;  %v10483_v8 = vld [vmem:[#allocation12 + $0xd0] sm:$0xff]  }
 0xa25   : > { %v10484_v45 = vld [vmem:[#allocation12 + $0x10] sm:$0xff]  }
 0xa26   : > { %2626 = vmatmul.mubr.bf16.gmra.mrb[36].mxu1 %v11982_v22  ;;  %2679 = vmatmul.mubr.bf16.gmra.mrb[36].mxu0 %v11982_v22 }
 0xa27   : > { %2694 = vmatpush1.bf16.msra.mxu1 %v8909_v47  ;;  %2747 = vmatpush1.bf16.msra.mxu0 %v8911_v48  ;;  %v10490_v47 = vld [vmem:[#allocation12 + $0x60] sm:$0xff]  }
 0xa28   : > { %2695 = vmatprep.subr.bf16.mxu1 %v8926_v51  ;;  %2748 = vmatprep.subr.bf16.mxu0 %v8928_v4  ;;  %v10491_v48 = vld [vmem:[#allocation12 + $0xe0] sm:$0xff]  }
 0xa29   : > { %2721 = vmatprep.mubr.bf16.mxu1 %v11216_v0  ;;  %2774 = vmatprep.mubr.bf16.mxu0 %v11216_v0  ;;  %v10492_v51 = vld [vmem:[#allocation12 + $0x20] sm:$0xff]  }
 0xa2a   : > { %v10493_v4 = vld [vmem:[#allocation12 + $0xa0] sm:$0xff]  }
 0xa2b   : > { %2696 = vmatpush1.bf16.msra.mxu1 %v8925_v13  ;;  %2749 = vmatpush1.bf16.msra.mxu0 %v8927_v55  ;;  %v10499_v13 = vld [vmem:[#allocation12 + $0xf0] sm:$0xff]  }
 0xa2c   : > { %2697 = vmatprep.subr.bf16.mxu1 %v8942_v56  ;;  %2750 = vmatprep.subr.bf16.mxu0 %v8944_v18  ;;  %v10500_v55 = vld [vmem:[#allocation12 + $0x30] sm:$0xff]   ;;  %v10502_v18 = vld [vmem:[#allocation12 + $0x78] sm:$0xff]  }
 0xa2d   : > { %v10501_v56 = vld [vmem:[#allocation12 + $0xb0] sm:$0xff]  }
 0xa2f   : > { %2698 = vmatpush1.bf16.msra.mxu1 %v8941_v50  ;;  %2751 = vmatpush1.bf16.msra.mxu0 %v8943_v63  ;;  %v10507_v50 = vld [vmem:[#allocation12 + $0x1c0] sm:$0xff]   ;;  %v12253_v63 = vld [vmem:[%s13250_s27] sm:$0xff] }
 0xa30   : > { %2699 = vmatprep.subr.bf16.mxu1 %v8958_v2  ;;  %2752 = vmatprep.subr.bf16.mxu0 %v8960_v28  ;;  %v12256_v2 = vsub.s32 3, %v11639_v24  ;;  %v1654_v28 = vrot.slane %v12253_v63, %v11642_v25  ;;  %v1662_v38 = vrot.slane %v12253_v63, %v11726_v17  ;;  %v1658_v31 = vrot.slane %v12253_v63, %v11647_v27 }
 0xa32   : > { %v1666_v34 = vrot.slane %v12253_v63, %v12256_v2 }
 0xa33   : > { %2700 = vmatpush1.bf16.msra.mxu1 %v8957_v5  ;;  %2753 = vmatpush1.bf16.msra.mxu0 %v8959_v49 }
 0xa34   : > { %2701 = vmatprep.subr.bf16.mxu1 %v8974_v6  ;;  %2754 = vmatprep.subr.bf16.mxu0 %v8976_v7 }
 0xa37   : > { %2702 = vmatpush1.bf16.msra.mxu1 %v8973_v20  ;;  %2755 = vmatpush1.bf16.msra.mxu0 %v8975_v23 }
 0xa38   : > { %2703 = vmatprep.subr.bf16.mxu1 %v8990_v29  ;;  %2756 = vmatprep.subr.bf16.mxu0 %v8992_v30 }
 0xa3b   : > { %2704 = vmatpush1.bf16.msra.mxu1 %v8989_v26  ;;  %2757 = vmatpush1.bf16.msra.mxu0 %v8991_v33 }
 0xa3c   : > { %9627 = vmatprep.subr.bf16.mxu1 %v10474_v35  ;;  %9655 = vmatprep.subr.bf16.mxu0 %v10475_v36 }
 0xa3e   : > { %2722 = vmatmul.mubr.bf16.vlgmr.msra.gmra.mrb[40].mxu1 %v11945_v60  ;;  %2775 = vmatmul.mubr.bf16.vlgmr.msra.gmra.mrb[40].mxu0 %v11945_v60  ;;  %v10487_v60 = vld [vmem:[#allocation12 + $0xd8] sm:$0xff]  }
 0xa3f   : > { %2731 = vmatprep.mubr.bf16.mxu1 %v11216_v0  ;;  %2784 = vmatprep.mubr.bf16.mxu0 %v11216_v0 }
 0xa40   : > { %9628 = vmatpush3.bf16.msra.mxu1 %v10476_v37  ;;  %9656 = vmatpush3.bf16.msra.mxu0 %v10477_v40 }
 0xa41   : > { %9629 = vmatprep.subr.bf16.mxu1 %v10478_v1  ;;  %9657 = vmatprep.subr.bf16.mxu0 %v10479_v41 }
 0xa44   : > { %9630 = vmatpush3.bf16.msra.mxu1 %v10480_v42  ;;  %9658 = vmatpush3.bf16.msra.mxu0 %v10481_v43 }
 0xa45   : > { %9631 = vmatprep.subr.bf16.mxu1 %v10482_v44  ;;  %9659 = vmatprep.subr.bf16.mxu0 %v10483_v8 }
 0xa46   : > { %2732 = vmatmul.mubr.bf16.gmra.mrb[44].mxu1 %v11982_v22  ;;  %2785 = vmatmul.mubr.bf16.gmra.mrb[44].mxu0 %v11982_v22  ;;  %v10497_v22 = vld [vmem:[#allocation12 + $0xa8] sm:$0xff]  }
 0xa48   : > { %9632 = vmatpush3.bf16.msra.mxu1 %v10484_v45  ;;  %9660 = vmatpush3.bf16.msra.mxu0 %v10485_v14 }
 0xa49   : > { %9633 = vmatprep.subr.bf16.mxu1 %v10486_v16  ;;  %9661 = vmatprep.subr.bf16.mxu0 %v10487_v60 }
 0xa4c   : > { %9634 = vmatpush3.bf16.msra.mxu1 %v10488_v61  ;;  %9662 = vmatpush3.bf16.msra.mxu0 %v10489_v46  ;;  %v10508_v46 = vld [vmem:[#allocation12 + $0x100] sm:$0xff]  }
 0xa4d   : > { %9635 = vmatprep.subr.bf16.mxu1 %v10490_v47  ;;  %9663 = vmatprep.subr.bf16.mxu0 %v10491_v48  ;;  %v10509_v47 = vld [vmem:[#allocation12 + $0x180] sm:$0xff]  }
 0xa50   : > { %9636 = vmatpush3.bf16.msra.mxu1 %v10492_v51  ;;  %9664 = vmatpush3.bf16.msra.mxu0 %v10493_v4 }
 0xa51   : > { %9637 = vmatprep.subr.bf16.mxu1 %v10494_v52  ;;  %9665 = vmatprep.subr.bf16.mxu0 %v10495_v15  ;;  %v10510_v15 = vld [vmem:[#allocation12 + $0x148] sm:$0xff]  }
 0xa54   : > { %9638 = vmatpush3.bf16.msra.mxu1 %v10496_v53  ;;  %9666 = vmatpush3.bf16.msra.mxu0 %v10497_v22  ;;  %v10511_v53 = vld [vmem:[#allocation12 + $0x1c8] sm:$0xff]  }
 0xa55   : > { %9639 = vmatprep.subr.bf16.mxu1 %v10498_v54  ;;  %9667 = vmatprep.subr.bf16.mxu0 %v10499_v13 }
 0xa58   : > { %9640 = vmatpush3.bf16.msra.mxu1 %v10500_v55  ;;  %9668 = vmatpush3.bf16.msra.mxu0 %v10501_v56 }
 0xa59   : > { %9641 = vmatprep.subr.bf16.mxu1 %v10502_v18  ;;  %9669 = vmatprep.subr.bf16.mxu0 %v10503_v58 }
 0xa5c   : > { %9642 = vmatpush3.bf16.msra.mxu1 %v10504_v59  ;;  %9670 = vmatpush3.bf16.msra.mxu0 %v10505_v39 }
 0xa5d   : > { %9683 = vmatprep.subr.bf16.mxu1 %v10506_v62  ;;  %9711 = vmatprep.subr.bf16.mxu0 %v10507_v50  ;;  %v10512_v50 = vld [vmem:[#allocation12 + $0x108] sm:$0xff]  }
 0xab1   : > { %v2405_v3 = vpop.f32.mrb[16].mxu1  ;;  %v2458_v5 = vpop.f32.mrb[16].mxu0 }
 0xab2   : > { %v2406_v49 = vadd.f32 %v2405_v3, %v1654_v28  ;;  %v2459_v6 = vadd.f32 %v2458_v5, %v1662_v38  ;;  %v2407_v7 = vpop.f32.mrb[17].mxu1  ;;  %v2460_v9 = vpop.f32.mrb[17].mxu0  ;;  %v10513_v3 = vld [vmem:[#allocation12 + $0x188] sm:$0xff]  }
 0xab3   : > { %v2408_v10 = vadd.f32 %v2407_v7, %v1658_v31  ;;  %v2461_v11 = vadd.f32 %v2460_v9, %v1666_v34  ;;  %v2409_v19 = vpop.f32.mrb[18].mxu1  ;;  %v2462_v20 = vpop.f32.mrb[18].mxu0  ;;  %v10514_v9 = vld [vmem:[#allocation12 + $0x150] sm:$0xff]  }
 0xab4   : > { %v2410_v23 = vadd.f32 %v2409_v19, %v1654_v28  ;;  %v2463_v29 = vadd.f32 %v2462_v20, %v1662_v38  ;;  %v2411_v30 = vpop.f32.mrb[19].mxu1  ;;  %v2464_v26 = vpop.f32.mrb[19].mxu0  ;;  %v2795_v36 = vmax.f32 %v2406_v49, 0.0  ;;  %v2797_v37 = vmax.f32 %v2459_v6, 0.0 }
 0xab5   : > { %v2412_v33 = vadd.f32 %v2411_v30, %v1658_v31  ;;  %v2465_v35 = vadd.f32 %v2464_v26, %v1666_v34  ;;  %v2796_v41 = vmax.f32 %v2408_v10, 0.0  ;;  %v2798_v42 = vmax.f32 %v2461_v11, 0.0  ;;  %v10515_v10 = vld [vmem:[#allocation12 + $0x1d0] sm:$0xff]   ;;  %v10518_v26 = vld [vmem:[#allocation12 + $0x158] sm:$0xff]  }
 0xab6   : > { %v2811_v40 = vmax.f32 %v2410_v23, 0.0  ;;  %v2813_v1 = vmax.f32 %v2463_v29, 0.0  ;;  %v10516_v29 = vld [vmem:[#allocation12 + $0x110] sm:$0xff]  }
 0xab7   : > { %v2812_v43 = vmax.f32 %v2412_v33, 0.0  ;;  %v2814_v44 = vmax.f32 %v2465_v35, 0.0  ;;  %v10517_v30 = vld [vmem:[#allocation12 + $0x190] sm:$0xff]   ;;  %v10519_v33 = vld [vmem:[#allocation12 + $0x1d8] sm:$0xff]  }
 0xab8   : > { %v2859_v8 = vpack.c.bf16 %v2811_v40, %v2795_v36  ;;  %v2861_v45 = vpack.c.bf16 %v2813_v1, %v2797_v37  ;;  %v10520_v35 = vld [vmem:[#allocation12 + $0x118] sm:$0xff]   ;;  %v10522_v37 = vld [vmem:[#allocation12 + $0x160] sm:$0xff]  }
 0xab9   : > { %v2860_v14 = vpack.c.bf16 %v2812_v43, %v2796_v41  ;;  %v2862_v16 = vpack.c.bf16 %v2814_v44, %v2798_v42  ;;  %v2415_v60 = vpop.f32.mrb[20].mxu1  ;;  %v2468_v61 = vpop.f32.mrb[20].mxu0  ;;  %v10521_v36 = vld [vmem:[#allocation12 + $0x198] sm:$0xff]   ;;  %v10523_v40 = vld [vmem:[#allocation12 + $0x1e0] sm:$0xff]   ;;  %v10526_v42 = vld [vmem:[#allocation12 + $0x168] sm:$0xff]   ;;  %v12267_v44 = vsub.s32 4, %v11639_v24 }
 0xaba   : > { %v2416_v48 = vadd.f32 %v2415_v60, %v1654_v28  ;;  %v2469_v51 = vadd.f32 %v2468_v61, %v1662_v38  ;;  %v2417_v4 = vpop.f32.mrb[21].mxu1  ;;  %v2470_v52 = vpop.f32.mrb[21].mxu0  ;;  %v10524_v1 = vld [vmem:[#allocation12 + $0x120] sm:$0xff]   ;;  %v10527_v43 = vld [vmem:[#allocation12 + $0x1e8] sm:$0xff]  }
 0xabb   : > { %v2418_v22 = vadd.f32 %v2417_v4, %v1658_v31  ;;  %v2471_v54 = vadd.f32 %v2470_v52, %v1666_v34  ;;  %v2419_v13 = vpop.f32.mrb[22].mxu1  ;;  %v2472_v55 = vpop.f32.mrb[22].mxu0  ;;  %3954 = vmatprep.mubr.bf16.mxu1 %v2860_v14  ;;  %4003 = vmatprep.mubr.bf16.mxu0 %v2862_v16  ;;  %v10525_v41 = vld [vmem:[#allocation12 + $0x1a0] sm:$0xff]   ;;  %v12276_v14 = vsub.s32 7, %v11639_v24  ;;  %v10528_v16 = vld [vmem:[#allocation12 + $0x128] sm:$0xff]   ;;  %v12280_v61 = vrot.slane %v12253_v63, %v12267_v44 }
 0xabc   : > { %v2420_v56 = vadd.f32 %v2419_v13, %v1654_v28  ;;  %v2473_v18 = vadd.f32 %v2472_v55, %v1662_v38  ;;  %v2421_v58 = vpop.f32.mrb[23].mxu1  ;;  %v2474_v59 = vpop.f32.mrb[23].mxu0  ;;  %3955 = vmatmul.mubr.bf16.vlgmr.msra.gmra.mrb[48].mxu1 %v2859_v8  ;;  %4004 = vmatmul.mubr.bf16.vlgmr.msra.gmra.mrb[48].mxu0 %v2861_v45  ;;  %v2827_v5 = vmax.f32 %v2416_v48, 0.0  ;;  %v2829_v49 = vmax.f32 %v2469_v51, 0.0  ;;  %v10529_v60 = vld [vmem:[#allocation12 + $0x1a8] sm:$0xff]   ;;  %v10531_v48 = vld [vmem:[#allocation12 + $0x1f0] sm:$0xff]  }
 0xabd   : > { %v2422_v39 = vadd.f32 %v2421_v58, %v1658_v31  ;;  %v2475_v62 = vadd.f32 %v2474_v59, %v1666_v34  ;;  %9684 = vmatpush3.bf16.msra.mxu1 %v10508_v46  ;;  %9712 = vmatpush3.bf16.msra.mxu0 %v10509_v47  ;;  %v2828_v28 = vmax.f32 %v2418_v22, 0.0  ;;  %v2830_v38 = vmax.f32 %v2471_v54, 0.0  ;;  %v10530_v47 = vld [vmem:[#allocation12 + $0x170] sm:$0xff]  }
 0xabe   : > { %v2843_v6 = vmax.f32 %v2420_v56, 0.0  ;;  %v2845_v7 = vmax.f32 %v2473_v18, 0.0  ;;  %9685 = vmatprep.subr.bf16.mxu1 %v10510_v15  ;;  %9713 = vmatprep.subr.bf16.mxu0 %v10511_v53  ;;  %v12270_v8 = vsub.s32 6, %v11639_v24  ;;  %v12273_v45 = vsub.s32 5, %v11639_v24  ;;  %v10532_v15 = vld [vmem:[#allocation12 + $0x130] sm:$0xff]   ;;  %v10534_v56 = vld [vmem:[#allocation12 + $0x178] sm:$0xff]  }
 0xabf   : > { %v2844_v11 = vmax.f32 %v2422_v39, 0.0  ;;  %v2846_v19 = vmax.f32 %v2475_v62, 0.0  ;;  %v12292_v51 = vrot.slane %v12253_v63, %v12276_v14  ;;  %v10533_v53 = vld [vmem:[#allocation12 + $0x1b0] sm:$0xff]   ;;  %v10535_v18 = vld [vmem:[#allocation12 + $0x1f8] sm:$0xff]  }
 0xac0   : > { %v2875_v20 = vpack.c.bf16 %v2843_v6, %v2827_v5  ;;  %v2877_v23 = vpack.c.bf16 %v2845_v7, %v2829_v49  ;;  %v12284_v46 = vrot.slane %v12253_v63, %v12270_v8  ;;  %v12288_v24 = vrot.slane %v12253_v63, %v12273_v45  ;;  %v10536_v7 = vld [vmem:[#allocation12 + $0x138] sm:$0xff]  }
 0xac1   : > { %v2876_v31 = vpack.c.bf16 %v2844_v11, %v2828_v28  ;;  %v2878_v34 = vpack.c.bf16 %v2846_v19, %v2830_v38  ;;  %9686 = vmatpush3.bf16.msra.mxu1 %v10512_v50  ;;  %9714 = vmatpush3.bf16.msra.mxu0 %v10513_v3  ;;  %v10538_v19 = vld [vmem:[#allocation12 + $0x240] sm:$0xff]  }
 0xac2   : > { %9687 = vmatprep.subr.bf16.mxu1 %v10514_v9  ;;  %9715 = vmatprep.subr.bf16.mxu0 %v10515_v10  ;;  %v10537_v9 = vld [vmem:[#allocation12 + $0x1b8] sm:$0xff]  }
 0xac3   : > { %3962 = vmatprep.mubr.bf16.mxu1 %v2876_v31  ;;  %4011 = vmatprep.mubr.bf16.mxu0 %v2878_v34 }
 0xac4   : > { %3963 = vmatmul.mubr.bf16.gmra.mrb[52].mxu1 %v2875_v20  ;;  %4012 = vmatmul.mubr.bf16.gmra.mrb[52].mxu0 %v2877_v23  ;;  %v10539_v20 = vld [vmem:[#allocation12 + $0x2c0] sm:$0xff]  }
 0xac5   : > { %9688 = vmatpush3.bf16.msra.mxu1 %v10516_v29  ;;  %9716 = vmatpush3.bf16.msra.mxu0 %v10517_v30 }
 0xac6   : > { %9689 = vmatprep.subr.bf16.mxu1 %v10518_v26  ;;  %9717 = vmatprep.subr.bf16.mxu0 %v10519_v33 }
 0xac9   : > { %9690 = vmatpush3.bf16.msra.mxu1 %v10520_v35  ;;  %9718 = vmatpush3.bf16.msra.mxu0 %v10521_v36 }
 0xaca   : > { %9691 = vmatprep.subr.bf16.mxu1 %v10522_v37  ;;  %9719 = vmatprep.subr.bf16.mxu0 %v10523_v40  ;;  %v10540_v40 = vld [vmem:[#allocation12 + $0x200] sm:$0xff]  }
 0xacd   : > { %9692 = vmatpush3.bf16.msra.mxu1 %v10524_v1  ;;  %9720 = vmatpush3.bf16.msra.mxu0 %v10525_v41  ;;  %v10541_v1 = vld [vmem:[#allocation12 + $0x280] sm:$0xff]  }
 0xace   : > { %9693 = vmatprep.subr.bf16.mxu1 %v10526_v42  ;;  %9721 = vmatprep.subr.bf16.mxu0 %v10527_v43 }
 0xad1   : > { %v2511_v4 = vpop.f32.mrb[24].mxu1  ;;  %v2564_v52 = vpop.f32.mrb[24].mxu0  ;;  %9694 = vmatpush3.bf16.msra.mxu1 %v10528_v16  ;;  %9722 = vmatpush3.bf16.msra.mxu0 %v10529_v60  ;;  %v10542_v60 = vld [vmem:[#allocation12 + $0x248] sm:$0xff]  }
 0xad2   : > { %v2512_v22 = vadd.f32 %v2511_v4, %v12280_v61  ;;  %v2565_v54 = vadd.f32 %v2564_v52, %v12284_v46  ;;  %v2513_v13 = vpop.f32.mrb[25].mxu1  ;;  %v2566_v55 = vpop.f32.mrb[25].mxu0  ;;  %9695 = vmatprep.subr.bf16.mxu1 %v10530_v47  ;;  %9723 = vmatprep.subr.bf16.mxu0 %v10531_v48  ;;  %v10543_v47 = vld [vmem:[#allocation12 + $0x2c8] sm:$0xff]  }
 0xad3   : > { %v2514_v58 = vadd.f32 %v2513_v13, %v12288_v24  ;;  %v2567_v63 = vadd.f32 %v2566_v55, %v12292_v51  ;;  %v2515_v59 = vpop.f32.mrb[26].mxu1  ;;  %v2568_v39 = vpop.f32.mrb[26].mxu0 }
 0xad4   : > { %v2516_v62 = vadd.f32 %v2515_v59, %v12280_v61  ;;  %v2569_v50 = vadd.f32 %v2568_v39, %v12284_v46  ;;  %v2517_v3 = vpop.f32.mrb[27].mxu1  ;;  %v2570_v5 = vpop.f32.mrb[27].mxu0  ;;  %v2799_v10 = vmax.f32 %v2512_v22, 0.0  ;;  %v2801_v28 = vmax.f32 %v2565_v54, 0.0 }
 0xad5   : > { %v2518_v49 = vadd.f32 %v2517_v3, %v12288_v24  ;;  %v2571_v6 = vadd.f32 %v2570_v5, %v12292_v51  ;;  %9696 = vmatpush3.bf16.msra.mxu1 %v10532_v15  ;;  %9724 = vmatpush3.bf16.msra.mxu0 %v10533_v53  ;;  %v2800_v23 = vmax.f32 %v2514_v58, 0.0  ;;  %v2802_v31 = vmax.f32 %v2567_v63, 0.0  ;;  %v10545_v58 = vld [vmem:[#allocation12 + $0x288] sm:$0xff]  }
 0xad6   : > { %v2815_v38 = vmax.f32 %v2516_v62, 0.0  ;;  %v2817_v11 = vmax.f32 %v2569_v50, 0.0  ;;  %9697 = vmatprep.subr.bf16.mxu1 %v10534_v56  ;;  %9725 = vmatprep.subr.bf16.mxu0 %v10535_v18  ;;  %v10544_v18 = vld [vmem:[#allocation12 + $0x208] sm:$0xff]  }
 0xad7   : > { %v2816_v34 = vmax.f32 %v2518_v49, 0.0  ;;  %v2818_v29 = vmax.f32 %v2571_v6, 0.0 }
 0xad8   : > { %v2863_v30 = vpack.c.bf16 %v2815_v38, %v2799_v10  ;;  %v2865_v26 = vpack.c.bf16 %v2817_v11, %v2801_v28  ;;  %v10549_v10 = vld [vmem:[#allocation12 + $0x290] sm:$0xff]   ;;  %v10550_v28 = vld [vmem:[#allocation12 + $0x258] sm:$0xff]  }
 0xad9   : > { %v2864_v33 = vpack.c.bf16 %v2816_v34, %v2800_v23  ;;  %v2866_v35 = vpack.c.bf16 %v2818_v29, %v2802_v31  ;;  %v2521_v36 = vpop.f32.mrb[28].mxu1  ;;  %v2574_v37 = vpop.f32.mrb[28].mxu0  ;;  %9698 = vmatpush3.bf16.msra.mxu1 %v10536_v7  ;;  %9726 = vmatpush3.bf16.msra.mxu0 %v10537_v9  ;;  %v10548_v9 = vld [vmem:[#allocation12 + $0x210] sm:$0xff]   ;;  %v10551_v38 = vld [vmem:[#allocation12 + $0x2d8] sm:$0xff]   ;;  %v10555_v23 = vld [vmem:[#allocation12 + $0x2e0] sm:$0xff]  }
 0xada   : > { %v2522_v41 = vadd.f32 %v2521_v36, %v12280_v61  ;;  %v2575_v42 = vadd.f32 %v2574_v37, %v12284_v46  ;;  %v2523_v43 = vpop.f32.mrb[29].mxu1  ;;  %v2576_v16 = vpop.f32.mrb[29].mxu0  ;;  %9739 = vmatprep.subr.bf16.mxu1 %v10538_v19  ;;  %9767 = vmatprep.subr.bf16.mxu0 %v10539_v20  ;;  %v10552_v11 = vld [vmem:[#allocation12 + $0x218] sm:$0xff]   ;;  %v10554_v20 = vld [vmem:[#allocation12 + $0x260] sm:$0xff]   ;;  %v10558_v29 = vld [vmem:[#allocation12 + $0x268] sm:$0xff]  }
 0xadb   : > { %v2524_v48 = vadd.f32 %v2523_v43, %v12288_v24  ;;  %v2577_v4 = vadd.f32 %v2576_v16, %v12292_v51  ;;  %v2525_v52 = vpop.f32.mrb[30].mxu1  ;;  %v2578_v15 = vpop.f32.mrb[30].mxu0  ;;  %4052 = vmatprep.mubr.bf16.mxu1 %v2864_v33  ;;  %4101 = vmatprep.mubr.bf16.mxu0 %v2866_v35  ;;  %v10553_v19 = vld [vmem:[#allocation12 + $0x298] sm:$0xff]   ;;  %v10556_v31 = vld [vmem:[#allocation12 + $0x220] sm:$0xff]   ;;  %v10560_v33 = vld [vmem:[#allocation12 + $0x228] sm:$0xff]  }
 0xadc   : > { %v2526_v53 = vadd.f32 %v2525_v52, %v12280_v61  ;;  %v2579_v22 = vadd.f32 %v2578_v15, %v12284_v46  ;;  %v2527_v54 = vpop.f32.mrb[31].mxu1  ;;  %v2580_v13 = vpop.f32.mrb[31].mxu0  ;;  %4053 = vmatmul.mubr.bf16.vlgmr.msra.gmra.mrb[56].mxu1 %v2863_v30  ;;  %4102 = vmatmul.mubr.bf16.vlgmr.msra.gmra.mrb[56].mxu0 %v2865_v26  ;;  %v2831_v63 = vmax.f32 %v2522_v41, 0.0  ;;  %v2833_v59 = vmax.f32 %v2575_v42, 0.0  ;;  %v10546_v61 = vld [vmem:[#allocation12 + $0x250] sm:$0xff]   ;;  %v10557_v34 = vld [vmem:[#allocation12 + $0x2a0] sm:$0xff]  }
 0xadd   : > { %v2528_v55 = vadd.f32 %v2527_v54, %v12288_v24  ;;  %v2581_v56 = vadd.f32 %v2580_v13, %v12292_v51  ;;  %9740 = vmatpush3.bf16.msra.mxu1 %v10540_v40  ;;  %9768 = vmatpush3.bf16.msra.mxu0 %v10541_v1  ;;  %v10547_v46 = vld [vmem:[#allocation12 + $0x2d0] sm:$0xff]   ;;  %v2832_v50 = vmax.f32 %v2524_v48, 0.0  ;;  %v2834_v3 = vmax.f32 %v2577_v4, 0.0  ;;  %v10559_v30 = vld [vmem:[#allocation12 + $0x2e8] sm:$0xff]   ;;  %v12313_v26 = vld [vmem:[%s13250_s27 + $0x8] sm:$0xff] }
 0xade   : > { %v2847_v39 = vmax.f32 %v2526_v53, 0.0  ;;  %v2849_v62 = vmax.f32 %v2579_v22, 0.0  ;;  %9741 = vmatprep.subr.bf16.mxu1 %v10542_v60  ;;  %9769 = vmatprep.subr.bf16.mxu0 %v10543_v47  ;;  %v10561_v35 = vld [vmem:[#allocation12 + $0x2a8] sm:$0xff]   ;;  %v12317_v36 = vrot.slane %v12313_v26, %v11642_v25  ;;  %v12321_v37 = vrot.slane %v12313_v26, %v11726_v17  ;;  %v10562_v40 = vld [vmem:[#allocation12 + $0x270] sm:$0xff]   ;;  %v10566_v53 = vld [vmem:[#allocation12 + $0x278] sm:$0xff]  }
 0xadf   : > { %v2848_v5 = vmax.f32 %v2528_v55, 0.0  ;;  %v2850_v49 = vmax.f32 %v2581_v56, 0.0  ;;  %v10563_v1 = vld [vmem:[#allocation12 + $0x2f0] sm:$0xff]   ;;  %v12325_v41 = vrot.slane %v12313_v26, %v11647_v27  ;;  %v12329_v42 = vrot.slane %v12313_v26, %v12256_v2  ;;  %v10567_v22 = vld [vmem:[#allocation12 + $0x2f8] sm:$0xff]  }
 0xae0   : > { %v2879_v6 = vpack.c.bf16 %v2847_v39, %v2831_v63  ;;  %v2881_v24 = vpack.c.bf16 %v2849_v62, %v2833_v59  ;;  %v10564_v60 = vld [vmem:[#allocation12 + $0x230] sm:$0xff]  }
 0xae1   : > { %v2880_v7 = vpack.c.bf16 %v2848_v5, %v2832_v50  ;;  %v2882_v51 = vpack.c.bf16 %v2850_v49, %v2834_v3  ;;  %9742 = vmatpush3.bf16.msra.mxu1 %v10544_v18  ;;  %9770 = vmatpush3.bf16.msra.mxu0 %v10545_v58  ;;  %v10565_v47 = vld [vmem:[#allocation12 + $0x2b0] sm:$0xff]  }
 0xae2   : > { %9743 = vmatprep.subr.bf16.mxu1 %v10546_v61  ;;  %9771 = vmatprep.subr.bf16.mxu0 %v10547_v46  ;;  %v10568_v61 = vld [vmem:[#allocation12 + $0x238] sm:$0xff]  }
 0xae3   : > { %4060 = vmatprep.mubr.bf16.mxu1 %v2880_v7  ;;  %4109 = vmatprep.mubr.bf16.mxu0 %v2882_v51  ;;  %v10569_v46 = vld [vmem:[#allocation12 + $0x2b8] sm:$0xff]  }
 0xae4   : > { %4061 = vmatmul.mubr.bf16.gmra.mrb[60].mxu1 %v2879_v6  ;;  %4110 = vmatmul.mubr.bf16.gmra.mrb[60].mxu0 %v2881_v24  ;;  %v10570_v6 = vld [vmem:[#allocation12 + $0x340] sm:$0xff]  }
 0xae5   : > { %9744 = vmatpush3.bf16.msra.mxu1 %v10548_v9  ;;  %9772 = vmatpush3.bf16.msra.mxu0 %v10549_v10  ;;  %v10571_v24 = vld [vmem:[#allocation12 + $0x3c0] sm:$0xff]  }
 0xae6   : > { %9745 = vmatprep.subr.bf16.mxu1 %v10550_v28  ;;  %9773 = vmatprep.subr.bf16.mxu0 %v10551_v38 }
 0xae9   : > { %9746 = vmatpush3.bf16.msra.mxu1 %v10552_v11  ;;  %9774 = vmatpush3.bf16.msra.mxu0 %v10553_v19 }
 0xaea   : > { %9747 = vmatprep.subr.bf16.mxu1 %v10554_v20  ;;  %9775 = vmatprep.subr.bf16.mxu0 %v10555_v23 }
 0xaed   : > { %9748 = vmatpush3.bf16.msra.mxu1 %v10556_v31  ;;  %9776 = vmatpush3.bf16.msra.mxu0 %v10557_v34  ;;  %v10572_v31 = vld [vmem:[#allocation12 + $0x300] sm:$0xff]  }
 0xaee   : > { %9749 = vmatprep.subr.bf16.mxu1 %v10558_v29  ;;  %9777 = vmatprep.subr.bf16.mxu0 %v10559_v30  ;;  %v10573_v34 = vld [vmem:[#allocation12 + $0x380] sm:$0xff]  }
 0xaf1   : > { %v2617_v43 = vpop.f32.mrb[32].mxu1  ;;  %v2670_v16 = vpop.f32.mrb[32].mxu0  ;;  %9750 = vmatpush3.bf16.msra.mxu1 %v10560_v33  ;;  %9778 = vmatpush3.bf16.msra.mxu0 %v10561_v35 }
 0xaf2   : > { %v2618_v48 = vadd.f32 %v2617_v43, %v12317_v36  ;;  %v2671_v4 = vadd.f32 %v2670_v16, %v12321_v37  ;;  %v2619_v52 = vpop.f32.mrb[33].mxu1  ;;  %v2672_v15 = vpop.f32.mrb[33].mxu0  ;;  %9751 = vmatprep.subr.bf16.mxu1 %v10562_v40  ;;  %9779 = vmatprep.subr.bf16.mxu0 %v10563_v1  ;;  %v10574_v40 = vld [vmem:[#allocation12 + $0x348] sm:$0xff]  }
 0xaf3   : > { %v2620_v54 = vadd.f32 %v2619_v52, %v12325_v41  ;;  %v2673_v13 = vadd.f32 %v2672_v15, %v12329_v42  ;;  %v2621_v55 = vpop.f32.mrb[34].mxu1  ;;  %v2674_v56 = vpop.f32.mrb[34].mxu0  ;;  %v10575_v1 = vld [vmem:[#allocation12 + $0x3c8] sm:$0xff]  }
 0xaf4   : > { %v2622_v18 = vadd.f32 %v2621_v55, %v12317_v36  ;;  %v2675_v58 = vadd.f32 %v2674_v56, %v12321_v37  ;;  %v2623_v63 = vpop.f32.mrb[35].mxu1  ;;  %v2676_v59 = vpop.f32.mrb[35].mxu0  ;;  %v2803_v50 = vmax.f32 %v2618_v48, 0.0  ;;  %v2805_v3 = vmax.f32 %v2671_v4, 0.0 }
 0xaf5   : > { %v2624_v39 = vadd.f32 %v2623_v63, %v12325_v41  ;;  %v2677_v62 = vadd.f32 %v2676_v59, %v12329_v42  ;;  %9752 = vmatpush3.bf16.msra.mxu1 %v10564_v60  ;;  %9780 = vmatpush3.bf16.msra.mxu0 %v10565_v47  ;;  %v2804_v7 = vmax.f32 %v2620_v54, 0.0  ;;  %v2806_v51 = vmax.f32 %v2673_v13, 0.0  ;;  %v10576_v54 = vld [vmem:[#allocation12 + $0x308] sm:$0xff]  }
 0xaf6   : > { %v2819_v5 = vmax.f32 %v2622_v18, 0.0  ;;  %v2821_v49 = vmax.f32 %v2675_v58, 0.0  ;;  %9753 = vmatprep.subr.bf16.mxu1 %v10566_v53  ;;  %9781 = vmatprep.subr.bf16.mxu0 %v10567_v22  ;;  %v10577_v13 = vld [vmem:[#allocation12 + $0x388] sm:$0xff]  }
 0xaf7   : > { %v2820_v9 = vmax.f32 %v2624_v39, 0.0  ;;  %v2822_v10 = vmax.f32 %v2677_v62, 0.0 }
 0xaf8   : > { %v2867_v28 = vpack.c.bf16 %v2819_v5, %v2803_v50  ;;  %v2869_v38 = vpack.c.bf16 %v2821_v49, %v2805_v3  ;;  %v10580_v50 = vld [vmem:[#allocation12 + $0x310] sm:$0xff]   ;;  %v10582_v5 = vld [vmem:[#allocation12 + $0x358] sm:$0xff]  }
 0xaf9   : > { %v2868_v11 = vpack.c.bf16 %v2820_v9, %v2804_v7  ;;  %v2870_v19 = vpack.c.bf16 %v2822_v10, %v2806_v51  ;;  %v2627_v20 = vpop.f32.mrb[36].mxu1  ;;  %v2680_v23 = vpop.f32.mrb[36].mxu0  ;;  %9754 = vmatpush3.bf16.msra.mxu1 %v10568_v61  ;;  %9782 = vmatpush3.bf16.msra.mxu0 %v10569_v46  ;;  %v10581_v3 = vld [vmem:[#allocation12 + $0x390] sm:$0xff]   ;;  %v10583_v49 = vld [vmem:[#allocation12 + $0x3d8] sm:$0xff]   ;;  %v10586_v7 = vld [vmem:[#allocation12 + $0x360] sm:$0xff]  }
 0xafa   : > { %v2628_v29 = vadd.f32 %v2627_v20, %v12317_v36  ;;  %v2681_v30 = vadd.f32 %v2680_v23, %v12321_v37  ;;  %v2629_v33 = vpop.f32.mrb[37].mxu1  ;;  %v2682_v35 = vpop.f32.mrb[37].mxu0  ;;  %9795 = vmatprep.subr.bf16.mxu1 %v10570_v6  ;;  %9823 = vmatprep.subr.bf16.mxu0 %v10571_v24  ;;  %v10584_v6 = vld [vmem:[#allocation12 + $0x318] sm:$0xff]   ;;  %v10587_v51 = vld [vmem:[#allocation12 + $0x3e0] sm:$0xff]   ;;  %v1702_v20 = vrot.slane %v12313_v26, %v12267_v44 }
 0xafb   : > { %v2630_v43 = vadd.f32 %v2629_v33, %v12325_v41  ;;  %v2683_v16 = vadd.f32 %v2682_v35, %v12329_v42  ;;  %v2631_v60 = vpop.f32.mrb[38].mxu1  ;;  %v2684_v47 = vpop.f32.mrb[38].mxu0  ;;  %4150 = vmatprep.mubr.bf16.mxu1 %v2868_v11  ;;  %4199 = vmatprep.mubr.bf16.mxu0 %v2870_v19  ;;  %v10585_v24 = vld [vmem:[#allocation12 + $0x398] sm:$0xff]   ;;  %v10588_v9 = vld [vmem:[#allocation12 + $0x320] sm:$0xff]   ;;  %v10592_v11 = vld [vmem:[#allocation12 + $0x328] sm:$0xff]   ;;  %v1710_v23 = vrot.slane %v12313_v26, %v12270_v8 }
 0xafc   : > { %v2632_v48 = vadd.f32 %v2631_v60, %v12317_v36  ;;  %v2685_v4 = vadd.f32 %v2684_v47, %v12321_v37  ;;  %v2633_v52 = vpop.f32.mrb[39].mxu1  ;;  %v2686_v15 = vpop.f32.mrb[39].mxu0  ;;  %4151 = vmatmul.mubr.bf16.vlgmr.msra.gmra.mrb[64].mxu1 %v2867_v28  ;;  %4200 = vmatmul.mubr.bf16.vlgmr.msra.gmra.mrb[64].mxu0 %v2869_v38  ;;  %v2835_v55 = vmax.f32 %v2628_v29, 0.0  ;;  %v2837_v56 = vmax.f32 %v2681_v30, 0.0  ;;  %v10578_v36 = vld [vmem:[#allocation12 + $0x350] sm:$0xff]   ;;  %v10589_v10 = vld [vmem:[#allocation12 + $0x3a0] sm:$0xff]  }
 0xafd   : > { %v2634_v53 = vadd.f32 %v2633_v52, %v12325_v41  ;;  %v2687_v22 = vadd.f32 %v2686_v15, %v12329_v42  ;;  %9796 = vmatpush3.bf16.msra.mxu1 %v10572_v31  ;;  %9824 = vmatpush3.bf16.msra.mxu0 %v10573_v34  ;;  %v10579_v37 = vld [vmem:[#allocation12 + $0x3d0] sm:$0xff]   ;;  %v2836_v63 = vmax.f32 %v2630_v43, 0.0  ;;  %v2838_v59 = vmax.f32 %v2683_v16, 0.0  ;;  %v10590_v28 = vld [vmem:[#allocation12 + $0x368] sm:$0xff]  }
 0xafe   : > { %v2851_v18 = vmax.f32 %v2632_v48, 0.0  ;;  %v2853_v58 = vmax.f32 %v2685_v4, 0.0  ;;  %9797 = vmatprep.subr.bf16.mxu1 %v10574_v40  ;;  %9825 = vmatprep.subr.bf16.mxu0 %v10575_v1  ;;  %v10591_v38 = vld [vmem:[#allocation12 + $0x3e8] sm:$0xff]   ;;  %v10594_v31 = vld [vmem:[#allocation12 + $0x370] sm:$0xff]   ;;  %v12353_v29 = vrot.slane %v12313_v26, %v12273_v45  ;;  %v12357_v30 = vrot.slane %v12313_v26, %v12276_v14  ;;  %v10598_v48 = vld [vmem:[#allocation12 + $0x378] sm:$0xff]  }
 0xaff   : > { %v2852_v39 = vmax.f32 %v2634_v53, 0.0  ;;  %v2854_v62 = vmax.f32 %v2687_v22, 0.0  ;;  %v10593_v19 = vld [vmem:[#allocation12 + $0x3a8] sm:$0xff]   ;;  %v10595_v34 = vld [vmem:[#allocation12 + $0x3f0] sm:$0xff]   ;;  %v10599_v4 = vld [vmem:[#allocation12 + $0x3f8] sm:$0xff]  }
 0xb00   : > { %v2883_v61 = vpack.c.bf16 %v2851_v18, %v2835_v55  ;;  %v2885_v41 = vpack.c.bf16 %v2853_v58, %v2837_v56  ;;  %v10596_v40 = vld [vmem:[#allocation12 + $0x330] sm:$0xff]   ;;  %v10600_v58 = vld [vmem:[#allocation12 + $0x338] sm:$0xff]  }
 0xb01   : > { %v2884_v46 = vpack.c.bf16 %v2852_v39, %v2836_v63  ;;  %v2886_v42 = vpack.c.bf16 %v2854_v62, %v2838_v59  ;;  %9798 = vmatpush3.bf16.msra.mxu1 %v10576_v54  ;;  %9826 = vmatpush3.bf16.msra.mxu0 %v10577_v13  ;;  %v10597_v1 = vld [vmem:[#allocation12 + $0x3b0] sm:$0xff]  }
 0xb02   : > { %9799 = vmatprep.subr.bf16.mxu1 %v10578_v36  ;;  %9827 = vmatprep.subr.bf16.mxu0 %v10579_v37  ;;  %v10601_v36 = vld [vmem:[#allocation12 + $0x3b8] sm:$0xff]  }
 0xb03   : > { %4158 = vmatprep.mubr.bf16.mxu1 %v2884_v46  ;;  %4207 = vmatprep.mubr.bf16.mxu0 %v2886_v42 }
 0xb04   : > { %4159 = vmatmul.mubr.bf16.gmra.mrb[68].mxu1 %v2883_v61  ;;  %4208 = vmatmul.mubr.bf16.gmra.mrb[68].mxu0 %v2885_v41 }
 0xb05   : > { %9800 = vmatpush3.bf16.msra.mxu1 %v10580_v50  ;;  %9828 = vmatpush3.bf16.msra.mxu0 %v10581_v3 }
 0xb06   : > { %9801 = vmatprep.subr.bf16.mxu1 %v10582_v5  ;;  %9829 = vmatprep.subr.bf16.mxu0 %v10583_v49 }
 0xb09   : > { %9802 = vmatpush3.bf16.msra.mxu1 %v10584_v6  ;;  %9830 = vmatpush3.bf16.msra.mxu0 %v10585_v24 }
 0xb0a   : > { %9803 = vmatprep.subr.bf16.mxu1 %v10586_v7  ;;  %9831 = vmatprep.subr.bf16.mxu0 %v10587_v51 }
 0xb0d   : > { %9804 = vmatpush3.bf16.msra.mxu1 %v10588_v9  ;;  %9832 = vmatpush3.bf16.msra.mxu0 %v10589_v10 }
 0xb0e   : > { %9805 = vmatprep.subr.bf16.mxu1 %v10590_v28  ;;  %9833 = vmatprep.subr.bf16.mxu0 %v10591_v38 }
 0xb11   : > { %v2723_v33 = vpop.f32.mrb[40].mxu1  ;;  %v2776_v35 = vpop.f32.mrb[40].mxu0  ;;  %9806 = vmatpush3.bf16.msra.mxu1 %v10592_v11  ;;  %9834 = vmatpush3.bf16.msra.mxu0 %v10593_v19 }
 0xb12   : > { %v2724_v43 = vadd.f32 %v2723_v33, %v1702_v20  ;;  %v2777_v16 = vadd.f32 %v2776_v35, %v1710_v23  ;;  %v2725_v60 = vpop.f32.mrb[41].mxu1  ;;  %v2778_v47 = vpop.f32.mrb[41].mxu0  ;;  %9807 = vmatprep.subr.bf16.mxu1 %v10594_v31  ;;  %9835 = vmatprep.subr.bf16.mxu0 %v10595_v34 }
 0xb13   : > { %v2726_v52 = vadd.f32 %v2725_v60, %v12353_v29  ;;  %v2779_v15 = vadd.f32 %v2778_v47, %v12357_v30  ;;  %v2727_v26 = vpop.f32.mrb[42].mxu1  ;;  %v2780_v53 = vpop.f32.mrb[42].mxu0 }
 0xb14   : > { %v2728_v22 = vadd.f32 %v2727_v26, %v1702_v20  ;;  %v2781_v54 = vadd.f32 %v2780_v53, %v1710_v23  ;;  %v2729_v13 = vpop.f32.mrb[43].mxu1  ;;  %v2782_v55 = vpop.f32.mrb[43].mxu0  ;;  %v2807_v37 = vmax.f32 %v2724_v43, 0.0  ;;  %v2809_v63 = vmax.f32 %v2777_v16, 0.0  ;;  %v8993_v53 = vld [vmem:[#allocation13] ss:$0 sm:$0xff] }
 0xb15   : > { %v2730_v56 = vadd.f32 %v2729_v13, %v12353_v29  ;;  %v2783_v18 = vadd.f32 %v2782_v55, %v12357_v30  ;;  %9808 = vmatpush3.bf16.msra.mxu1 %v10596_v40  ;;  %9836 = vmatpush3.bf16.msra.mxu0 %v10597_v1  ;;  %v2808_v62 = vmax.f32 %v2726_v52, 0.0  ;;  %v2810_v61 = vmax.f32 %v2779_v15, 0.0 }
 0xb16   : > { %v2823_v59 = vmax.f32 %v2728_v22, 0.0  ;;  %v2825_v39 = vmax.f32 %v2781_v54, 0.0  ;;  %9809 = vmatprep.subr.bf16.mxu1 %v10598_v48  ;;  %9837 = vmatprep.subr.bf16.mxu0 %v10599_v4 }
 0xb17   : > { %v2824_v41 = vmax.f32 %v2730_v56, 0.0  ;;  %v2826_v46 = vmax.f32 %v2783_v18, 0.0 }
 0xb18   : > { %v2871_v42 = vpack.c.bf16 %v2823_v59, %v2807_v37  ;;  %v2873_v50 = vpack.c.bf16 %v2825_v39, %v2809_v63 }
 0xb19   : > { %v2872_v3 = vpack.c.bf16 %v2824_v41, %v2808_v62  ;;  %v2874_v5 = vpack.c.bf16 %v2826_v46, %v2810_v61  ;;  %v2733_v49 = vpop.f32.mrb[44].mxu1  ;;  %v2786_v6 = vpop.f32.mrb[44].mxu0  ;;  %9810 = vmatpush3.bf16.msra.mxu1 %v10600_v58  ;;  %9838 = vmatpush3.bf16.msra.mxu0 %v10601_v36 }
 0xb1a   : > { %v2734_v24 = vadd.f32 %v2733_v49, %v1702_v20  ;;  %v2787_v7 = vadd.f32 %v2786_v6, %v1710_v23  ;;  %v2735_v51 = vpop.f32.mrb[45].mxu1  ;;  %v2788_v9 = vpop.f32.mrb[45].mxu0 }
 0xb1b   : > { %v2736_v10 = vadd.f32 %v2735_v51, %v12353_v29  ;;  %v2789_v28 = vadd.f32 %v2788_v9, %v12357_v30  ;;  %v2737_v38 = vpop.f32.mrb[46].mxu1  ;;  %v2790_v11 = vpop.f32.mrb[46].mxu0  ;;  %4248 = vmatprep.mubr.bf16.mxu1 %v2872_v3  ;;  %4297 = vmatprep.mubr.bf16.mxu0 %v2874_v5 }
 0xb1c   : > { %v2738_v19 = vadd.f32 %v2737_v38, %v1702_v20  ;;  %v2791_v31 = vadd.f32 %v2790_v11, %v1710_v23  ;;  %v2739_v34 = vpop.f32.mrb[47].mxu1  ;;  %v2792_v33 = vpop.f32.mrb[47].mxu0  ;;  %4249 = vmatmul.mubr.bf16.vlgmr.msra.gmra.mrb[72].mxu1 %v2871_v42  ;;  %4298 = vmatmul.mubr.bf16.vlgmr.msra.gmra.mrb[72].mxu0 %v2873_v50  ;;  %v2839_v1 = vmax.f32 %v2734_v24, 0.0  ;;  %v2841_v43 = vmax.f32 %v2787_v7, 0.0 }
 0xb1d   : > { %v2740_v35 = vadd.f32 %v2739_v34, %v12353_v29  ;;  %v2793_v40 = vadd.f32 %v2792_v33, %v12357_v30  ;;  %v2840_v47 = vmax.f32 %v2736_v10, 0.0  ;;  %v2842_v48 = vmax.f32 %v2789_v28, 0.0 }
 0xb1e   : > { %v2855_v16 = vmax.f32 %v2738_v19, 0.0  ;;  %v2857_v60 = vmax.f32 %v2791_v31, 0.0 }
 0xb1f   : > { %v2856_v4 = vmax.f32 %v2740_v35, 0.0  ;;  %v2858_v52 = vmax.f32 %v2793_v40, 0.0 }
 0xb20   : > { %v2887_v15 = vpack.c.bf16 %v2855_v16, %v2839_v1  ;;  %v2889_v26 = vpack.c.bf16 %v2857_v60, %v2841_v43 }
 0xb21   : > { %v2888_v20 = vpack.c.bf16 %v2856_v4, %v2840_v47  ;;  %v2890_v23 = vpack.c.bf16 %v2858_v52, %v2842_v48 }
 0xb23   : > { %4256 = vmatprep.mubr.bf16.mxu1 %v2888_v20  ;;  %4305 = vmatprep.mubr.bf16.mxu0 %v2890_v23 }
 0xb24   : > { %4257 = vmatmul.mubr.bf16.gmra.mrb[76].mxu1 %v2887_v15  ;;  %4306 = vmatmul.mubr.bf16.gmra.mrb[76].mxu0 %v2889_v26 }
 0xb25   : > { %4597 = vmatprep.mubr.bf16.mxu1 %v11216_v0 }
 0xb8f   : > { %v9643_v29 = vpop.f32.mrb[48].mxu1  ;;  %v9671_v30 = vpop.f32.mrb[48].mxu0 }
 0xb90   : > { %v9644_v22 = vpop.f32.mrb[49].mxu1  ;;  %v9672_v54 = vpop.f32.mrb[49].mxu0 }
 0xb91   : > { %v9645_v13 = vadd.f32 %v9644_v22, %v9643_v29  ;;  %v9673_v55 = vadd.f32 %v9672_v54, %v9671_v30  ;;  %v9646_v56 = vpop.f32.mrb[50].mxu1  ;;  %v9674_v18 = vpop.f32.mrb[50].mxu0 }
 0xb92   : > { %v9647_v58 = vpop.f32.mrb[51].mxu1  ;;  %v9675_v36 = vpop.f32.mrb[51].mxu0 }
 0xb93   : > { %v3957_v37 = vadd.f32 %v9645_v13, %v8993_v53  ;;  %v9648_v63 = vadd.f32 %v9647_v58, %v9646_v56  ;;  %v9676_v59 = vadd.f32 %v9675_v36, %v9674_v18 }
 0xb95   : > { %v4006_v39 = vadd.f32 %v9673_v55, %v3957_v37  ;;  %v3960_v62 = vadd.f32 %v9648_v63, %v8993_v53 }
 0xb97   : > { %v4009_v61 = vadd.f32 %v9676_v59, %v3960_v62  ;;  %v9649_v41 = vpop.f32.mrb[52].mxu1  ;;  %v9677_v46 = vpop.f32.mrb[52].mxu0 }
 0xb98   : > { %v9650_v42 = vpop.f32.mrb[53].mxu1  ;;  %v9678_v50 = vpop.f32.mrb[53].mxu0 }
 0xb99   : > { %v9651_v3 = vadd.f32 %v9650_v42, %v9649_v41  ;;  %v9679_v5 = vadd.f32 %v9678_v50, %v9677_v46  ;;  %v9652_v49 = vpop.f32.mrb[54].mxu1  ;;  %v9680_v6 = vpop.f32.mrb[54].mxu0 }
 0xb9a   : > { %v9653_v24 = vpop.f32.mrb[55].mxu1  ;;  %v9681_v7 = vpop.f32.mrb[55].mxu0 }
 0xb9b   : > { %v3965_v51 = vadd.f32 %v9651_v3, %v8993_v53  ;;  %v9654_v9 = vadd.f32 %v9653_v24, %v9652_v49  ;;  %v9682_v10 = vadd.f32 %v9681_v7, %v9680_v6 }
 0xb9d   : > { %v4014_v28 = vadd.f32 %v9679_v5, %v3965_v51  ;;  %v3968_v38 = vadd.f32 %v9654_v9, %v8993_v53 }
 0xb9f   : > { %v4017_v11 = vadd.f32 %v9682_v10, %v3968_v38 }
 0xbaf   : > { %v9699_v19 = vpop.f32.mrb[56].mxu1  ;;  %v9727_v31 = vpop.f32.mrb[56].mxu0 }
 0xbb0   : > { %v9700_v34 = vpop.f32.mrb[57].mxu1  ;;  %v9728_v33 = vpop.f32.mrb[57].mxu0 }
 0xbb1   : > { %v9701_v35 = vadd.f32 %v9700_v34, %v9699_v19  ;;  %v9729_v40 = vadd.f32 %v9728_v33, %v9727_v31  ;;  %v9702_v1 = vpop.f32.mrb[58].mxu1  ;;  %v9730_v43 = vpop.f32.mrb[58].mxu0 }
 0xbb2   : > { %v9703_v16 = vpop.f32.mrb[59].mxu1  ;;  %v9731_v60 = vpop.f32.mrb[59].mxu0 }
 0xbb3   : > { %v4055_v47 = vadd.f32 %v9701_v35, %v4006_v39  ;;  %v9704_v48 = vadd.f32 %v9703_v16, %v9702_v1  ;;  %v9732_v4 = vadd.f32 %v9731_v60, %v9730_v43 }
 0xbb5   : > { %v4104_v52 = vadd.f32 %v9729_v40, %v4055_v47  ;;  %v4058_v15 = vadd.f32 %v9704_v48, %v4009_v61 }
 0xbb7   : > { %v4107_v26 = vadd.f32 %v9732_v4, %v4058_v15  ;;  %v9705_v20 = vpop.f32.mrb[60].mxu1  ;;  %v9733_v23 = vpop.f32.mrb[60].mxu0 }
 0xbb8   : > { %v9706_v29 = vpop.f32.mrb[61].mxu1  ;;  %v9734_v30 = vpop.f32.mrb[61].mxu0 }
 0xbb9   : > { %v9707_v53 = vadd.f32 %v9706_v29, %v9705_v20  ;;  %v9735_v22 = vadd.f32 %v9734_v30, %v9733_v23  ;;  %v9708_v54 = vpop.f32.mrb[62].mxu1  ;;  %v9736_v13 = vpop.f32.mrb[62].mxu0 }
 0xbba   : > { %v9709_v55 = vpop.f32.mrb[63].mxu1  ;;  %v9737_v56 = vpop.f32.mrb[63].mxu0 }
 0xbbb   : > { %v4063_v18 = vadd.f32 %v9707_v53, %v4014_v28  ;;  %v9710_v58 = vadd.f32 %v9709_v55, %v9708_v54  ;;  %v9738_v36 = vadd.f32 %v9737_v56, %v9736_v13 }
 0xbbd   : > { %v4112_v37 = vadd.f32 %v9735_v22, %v4063_v18  ;;  %v4066_v63 = vadd.f32 %v9710_v58, %v4017_v11 }
 0xbbf   : > { %v4115_v59 = vadd.f32 %v9738_v36, %v4066_v63 }
 0xbcf   : > { %v9755_v39 = vpop.f32.mrb[64].mxu1  ;;  %v9783_v62 = vpop.f32.mrb[64].mxu0 }
 0xbd0   : > { %v9756_v61 = vpop.f32.mrb[65].mxu1  ;;  %v9784_v41 = vpop.f32.mrb[65].mxu0 }
 0xbd1   : > { %v9757_v46 = vadd.f32 %v9756_v61, %v9755_v39  ;;  %v9785_v42 = vadd.f32 %v9784_v41, %v9783_v62  ;;  %v9758_v50 = vpop.f32.mrb[66].mxu1  ;;  %v9786_v3 = vpop.f32.mrb[66].mxu0 }
 0xbd2   : > { %v9759_v5 = vpop.f32.mrb[67].mxu1  ;;  %v9787_v49 = vpop.f32.mrb[67].mxu0 }
 0xbd3   : > { %v4153_v6 = vadd.f32 %v9757_v46, %v4104_v52  ;;  %v9760_v24 = vadd.f32 %v9759_v5, %v9758_v50  ;;  %v9788_v7 = vadd.f32 %v9787_v49, %v9786_v3 }
 0xbd5   : > { %v4202_v51 = vadd.f32 %v9785_v42, %v4153_v6  ;;  %v4156_v9 = vadd.f32 %v9760_v24, %v4107_v26 }
 0xbd7   : > { %v4205_v10 = vadd.f32 %v9788_v7, %v4156_v9  ;;  %v9761_v28 = vpop.f32.mrb[68].mxu1  ;;  %v9789_v38 = vpop.f32.mrb[68].mxu0 }
 0xbd8   : > { %v9762_v11 = vpop.f32.mrb[69].mxu1  ;;  %v9790_v19 = vpop.f32.mrb[69].mxu0 }
 0xbd9   : > { %v9763_v31 = vadd.f32 %v9762_v11, %v9761_v28  ;;  %v9791_v34 = vadd.f32 %v9790_v19, %v9789_v38  ;;  %v9764_v33 = vpop.f32.mrb[70].mxu1  ;;  %v9792_v35 = vpop.f32.mrb[70].mxu0  ;;  %v10602_v28 = vld [vmem:[%s13198_s3 + $0xc0] ss:$12 sps:$4 sm:$0xff]   ;;  %v10607_v38 = vld [vmem:[%s13198_s3 + $0xdc] ss:$12 sps:$4 sm:$0xff]  }
 0xbda   : > { %v9765_v40 = vpop.f32.mrb[71].mxu1  ;;  %v9793_v1 = vpop.f32.mrb[71].mxu0 }
 0xbdb   : > { %v4161_v43 = vadd.f32 %v9763_v31, %v4112_v37  ;;  %v9766_v16 = vadd.f32 %v9765_v40, %v9764_v33  ;;  %v9794_v60 = vadd.f32 %v9793_v1, %v9792_v35 }
 0xbdd   : > { %v4210_v47 = vadd.f32 %v9791_v34, %v4161_v43  ;;  %v4164_v48 = vadd.f32 %v9766_v16, %v4115_v59 }
 0xbdf   : > { %v4213_v4 = vadd.f32 %v9794_v60, %v4164_v48 }
 0xbef   : > { %v9811_v52 = vpop.f32.mrb[72].mxu1  ;;  %v9839_v15 = vpop.f32.mrb[72].mxu0 }
 0xbf0   : > { %v9812_v26 = vpop.f32.mrb[73].mxu1  ;;  %v9840_v20 = vpop.f32.mrb[73].mxu0 }
 0xbf1   : > { %v9813_v23 = vadd.f32 %v9812_v26, %v9811_v52  ;;  %v9841_v29 = vadd.f32 %v9840_v20, %v9839_v15  ;;  %v9814_v30 = vpop.f32.mrb[74].mxu1  ;;  %v9842_v53 = vpop.f32.mrb[74].mxu0  ;;  %v10610_v15 = vld [vmem:[%s13198_s3 + $0xf4] ss:$12 sps:$4 sm:$0xff]   ;;  %v10608_v20 = vld [vmem:[%s13198_s3 + $0xf0] ss:$12 sps:$4 sm:$0xff]  }
 0xbf2   : > { %v9815_v22 = vpop.f32.mrb[75].mxu1  ;;  %v9843_v54 = vpop.f32.mrb[75].mxu0  ;;  %v10611_v26 = vld [vmem:[%s13198_s3 + $0xc8] ss:$12 sps:$4 sm:$0xff]  }
 0xbf3   : > { %v4251_v13 = vadd.f32 %v9813_v23, %v4202_v51  ;;  %v9816_v55 = vadd.f32 %v9815_v22, %v9814_v30  ;;  %v9844_v56 = vadd.f32 %v9843_v54, %v9842_v53  ;;  %10191 = vmatprep.subr.bf16.mxu0 %v10611_v26  ;;  %v10614_v23 = vld [vmem:[%s13198_s3 + $0x10c] ss:$12 sps:$4 sm:$0xff]   ;;  %v10612_v30 = vld [vmem:[%s13198_s3 + $0x108] ss:$12 sps:$4 sm:$0xff]   ;;  %v10618_v53 = vld [vmem:[%s13198_s3 + $0x124] ss:$12 sps:$4 sm:$0xff]  }
 0xbf4   : > { %10192 = vmatpush3.bf16.msra.mxu0 %v10611_v26  ;;  %v10619_v22 = vld [vmem:[%s13198_s3 + $0xf8] ss:$12 sps:$4 sm:$0xff]   ;;  %v10616_v54 = vld [vmem:[%s13198_s3 + $0x120] ss:$12 sps:$4 sm:$0xff]  }
 0xbf5   : > { %v4300_v18 = vadd.f32 %v9841_v29, %v4251_v13  ;;  %v4254_v58 = vadd.f32 %v9816_v55, %v4205_v10  ;;  %v10615_v29 = vld [vmem:[%s13198_s3 + $0xe0] ss:$12 sps:$4 sm:$0xff]   ;;  %v10622_v13 = vld [vmem:[%s13198_s3 + $0x13c] ss:$12 sps:$4 sm:$0xff]  }
 0xbf6   : > { %10193 = vmatprep.subr.bf16.mxu0 %v10615_v29  ;;  %v10623_v55 = vld [vmem:[%s13198_s3 + $0x110] ss:$12 sps:$4 sm:$0xff]  }
 0xbf7   : > { %v4303_v36 = vadd.f32 %v9844_v56, %v4254_v58  ;;  %v9817_v37 = vpop.f32.mrb[76].mxu1  ;;  %v9845_v63 = vpop.f32.mrb[76].mxu0  ;;  %v4314_v59 = vadd.f32 %v4300_v18, %v11938_v21  ;;  %v10620_v56 = vld [vmem:[%s13198_s3 + $0x138] ss:$12 sps:$4 sm:$0xff]   ;;  %v10626_v18 = vld [vmem:[%s13198_s3 + $0x154] ss:$12 sps:$4 sm:$0xff]  }
 0xbf8   : > { %v9818_v39 = vpop.f32.mrb[77].mxu1  ;;  %v9846_v62 = vpop.f32.mrb[77].mxu0  ;;  %10194 = vmatpush3.bf16.msra.mxu0 %v10615_v29  ;;  %v10627_v58 = vld [vmem:[%s13198_s3 + $0x128] ss:$12 sps:$4 sm:$0xff]  }
 0xbf9   : > { %v9819_v61 = vadd.f32 %v9818_v39, %v9817_v37  ;;  %v9847_v41 = vadd.f32 %v9846_v62, %v9845_v63  ;;  %v9820_v46 = vpop.f32.mrb[78].mxu1  ;;  %v9848_v42 = vpop.f32.mrb[78].mxu0  ;;  %4320 = vadd.xlane.f32.xlu0 %v4314_v59  ;;  %v4315_v50 = vadd.f32 %v4303_v36, %v11940_v57  ;;  %v10604_v57 = vld [vmem:[%s13198_s3 + $0xc4] ss:$12 sps:$4 sm:$0xff]   ;;  %10195 = vmatprep.subr.bf16.mxu0 %v10619_v22  ;;  %v10628_v37 = vld [vmem:[%s13198_s3 + $0x168] ss:$12 sps:$4 sm:$0xff]  }
 0xbfa   : > { %v9821_v3 = vpop.f32.mrb[79].mxu1  ;;  %v9849_v5 = vpop.f32.mrb[79].mxu0  ;;  %4565 = vmatprep.subr.bf16.mxu1 %v10604_v57  ;;  %v10624_v36 = vld [vmem:[%s13198_s3 + $0x150] ss:$12 sps:$4 sm:$0xff]   ;;  %v10630_v63 = vld [vmem:[%s13198_s3 + $0x16c] ss:$12 sps:$4 sm:$0xff]  }
 0xbfb   : > { %v4259_v49 = vadd.f32 %v9819_v61, %v4210_v47  ;;  %v9822_v6 = vadd.f32 %v9821_v3, %v9820_v46  ;;  %v9850_v24 = vadd.f32 %v9849_v5, %v9848_v42  ;;  %4322 = vadd.xlane.f32.xlu1 %v4315_v50  ;;  %4566 = vmatpush1.bf16.msra.mxu1 %v10602_v28  ;;  %v10632_v39 = vld [vmem:[%s13198_s3 + $0x158] ss:$12 sps:$4 sm:$0xff]   ;;  %v10633_v62 = vld [vmem:[%s13198_s3 + $0x170] ss:$12 sps:$4 sm:$0xff]  }
 0xbfc   : > { %4567 = vmatprep.subr.bf16.mxu1 %v10607_v38  ;;  %10196 = vmatpush3.bf16.msra.mxu0 %v10619_v22 }
 0xbfd   : > { %v4308_v7 = vadd.f32 %v9847_v41, %v4259_v49  ;;  %v4262_v51 = vadd.f32 %v9822_v6, %v4213_v4  ;;  %10197 = vmatprep.subr.bf16.mxu0 %v10623_v55 }
 0xbff   : > { %v4311_v9 = vadd.f32 %v9850_v24, %v4262_v51  ;;  %v4316_v21 = vadd.f32 %v4308_v7, %v11978_v12  ;;  %v10605_v12 = vld [vmem:[%s13198_s3 + $0xd8] ss:$12 sps:$4 sm:$0xff]  }
 0xc00   : > { %4568 = vmatpush1.bf16.msra.mxu1 %v10605_v12  ;;  %10198 = vmatpush3.bf16.msra.mxu0 %v10623_v55  ;;  %v9123_v12 = vld [vmem:[#allocation16] ss:$0 sm:$0xff] }
 0xc01   : > { %4324 = vadd.xlane.f32.xlu0 %v4316_v21  ;;  %v4317_v10 = vadd.f32 %v4311_v9, %v11962_v32  ;;  %4569 = vmatprep.subr.bf16.mxu1 %v10610_v15 }
 0xc02   : > { %10199 = vmatprep.subr.bf16.mxu0 %v10627_v58 }
 0xc03   : > { %4326 = vadd.xlane.f32.xlu1 %v4317_v10 }
 0xc04   : > { %4570 = vmatpush1.bf16.msra.mxu1 %v10608_v20  ;;  %10200 = vmatpush3.bf16.msra.mxu0 %v10627_v58 }
 0xc05   : > { %4571 = vmatprep.subr.bf16.mxu1 %v10614_v23 }
 0xc08   : > { %4572 = vmatpush1.bf16.msra.mxu1 %v10612_v30 }
 0xc09   : > { %4573 = vmatprep.subr.bf16.mxu1 %v10618_v53 }
 0xc0c   : > { %4574 = vmatpush1.bf16.msra.mxu1 %v10616_v54 }
 0xc0d   : > { %4575 = vmatprep.subr.bf16.mxu1 %v10622_v13 }
 0xc10   : > { %4576 = vmatpush1.bf16.msra.mxu1 %v10620_v56 }
 0xc11   : > { %4577 = vmatprep.subr.bf16.mxu1 %v10626_v18 }
 0xc14   : > { %4578 = vmatpush1.bf16.msra.mxu1 %v10624_v36 }
 0xc15   : > { %4579 = vmatprep.subr.bf16.mxu1 %v10630_v63 }
 0xc18   : > { %4580 = vmatpush1.bf16.msra.mxu1 %v10628_v37 }
 0xc86   : > { %v4321_v32 = vpop.xlane.xlu0 %4320 }
 0xc87   : > { %v4328_v11 = vmul.f32 0.0078125, %v4321_v32 }
 0xc88   : > { %v4323_v19 = vpop.xlane.xlu1 %4322 }
 0xc89   : > { %v12384_v31 = vsub.f32 %v4314_v59, %v4328_v11  ;;  %v4329_v34 = vmul.f32 0.0078125, %v4323_v19  ;;  %v10631_v59 = vld [vmem:[%s13198_s3 + $0x140] ss:$12 sps:$4 sm:$0xff]  }
 0xc8a   : > { %10201 = vmatprep.subr.bf16.mxu0 %v10631_v59 }
 0xc8b   : > { %v12386_v33 = vsub.f32 %v4315_v50, %v4329_v34  ;;  %v4336_v35 = vmul.f32 %v12384_v31, %v12384_v31  ;;  %10202 = vmatpush3.bf16.msra.mxu0 %v10631_v59 }
 0xc8c   : > { %10203 = vmatprep.subr.bf16.mxu0 %v10632_v39 }
 0xc8d   : > { %4340 = vadd.xlane.f32.xlu0 %v4336_v35  ;;  %v4337_v40 = vmul.f32 %v12386_v33, %v12386_v33 }
 0xc8e   : > { %v4325_v1 = vpop.xlane.xlu0 %4324 }
 0xc8f   : > { %v4330_v43 = vmul.f32 0.0078125, %v4325_v1  ;;  %4342 = vadd.xlane.f32.xlu1 %v4337_v40  ;;  %10204 = vmatpush3.bf16.msra.mxu0 %v10632_v39 }
 0xc90   : > { %v4327_v16 = vpop.xlane.xlu1 %4326  ;;  %10205 = vmatprep.subr.bf16.mxu0 %v10633_v62 }
 0xc91   : > { %v12392_v60 = vsub.f32 %v4316_v21, %v4330_v43  ;;  %v4331_v47 = vmul.f32 0.0078125, %v4327_v16  ;;  %v9122_v21 = vld [vmem:[#allocation15] ss:$0 sm:$0xff] }
 0xc93   : > { %v12394_v48 = vsub.f32 %v4317_v10, %v4331_v47  ;;  %v4338_v4 = vmul.f32 %v12392_v60, %v12392_v60  ;;  %10206 = vmatpush3.bf16.msra.mxu0 %v10633_v62 }
 0xc95   : > { %4344 = vadd.xlane.f32.xlu0 %v4338_v4  ;;  %v4339_v52 = vmul.f32 %v12394_v48, %v12394_v48 }
 0xc97   : > { %4346 = vadd.xlane.f32.xlu1 %v4339_v52  ;;  %v4420_v52 = vld [vmem:[#allocation4 + $0x3] sm:$0x7] }
 0xc98   : > { %v4429_v26 = vrot.slane %v4420_v52, %v11647_v27  ;;  %v4433_v55 = vrot.slane %v4420_v52, %v11726_v17 }
 0xd1a   : > { %v4341_v61 = vpop.xlane.xlu0 %4340 }
 0xd1b   : > { %v4348_v41 = vmul.f32 0.0078125, %v4341_v61 }
 0xd1c   : > { %v4343_v46 = vpop.xlane.xlu1 %4342 }
 0xd1d   : > { %v4352_v42 = vadd.f32 1e-05, %v4348_v41  ;;  %v4349_v50 = vmul.f32 0.0078125, %v4343_v46 }
 0xd1f   : > { %10810 = vrsqrt.f32 %v4352_v42  ;;  %v4353_v3 = vadd.f32 1e-05, %v4349_v50 }
 0xd21   : > { %10812 = vrsqrt.f32 %v4353_v3 }
 0xd22   : > { %v4345_v5 = vpop.xlane.xlu0 %4344 }
 0xd23   : > { %v4350_v49 = vmul.f32 0.0078125, %v4345_v5 }
 0xd24   : > { %v4347_v6 = vpop.xlane.xlu1 %4346 }
 0xd25   : > { %v4354_v24 = vadd.f32 1e-05, %v4350_v49  ;;  %v4351_v7 = vmul.f32 0.0078125, %v4347_v6 }
 0xd27   : > { %10814 = vrsqrt.f32 %v4354_v24  ;;  %v4355_v51 = vadd.f32 1e-05, %v4351_v7 }
 0xd29   : > { %v10811_v9 = vpop.eup %10810  ;;  %10816 = vrsqrt.f32 %v4355_v51 }
 0xd2a   : > { %v4360_v10 = vmul.f32 %v10811_v9, %v12384_v31 }
 0xd2b   : > { %v10813_v28 = vpop.eup %10812 }
 0xd2c   : > { %v4370_v57 = vmul.f32 %v9122_v21, %v4360_v10  ;;  %v4361_v38 = vmul.f32 %v10813_v28, %v12386_v33 }
 0xd2e   : > { %v4371_v32 = vmul.f32 %v9122_v21, %v4361_v38  ;;  %v12462_v11 = vadd.f32 %v9123_v12, %v4370_v57 }
 0xd30   : > { %v12464_v19 = vadd.f32 %v9123_v12, %v4371_v32 }
 0xd31   : > { %v10815_v34 = vpop.eup %10814 }
 0xd32   : > { %v4384_v35 = vpack.c.bf16 %v12464_v19, %v12462_v11  ;;  %v4362_v40 = vmul.f32 %v10815_v34, %v12392_v60  ;;  %v4425_v60 = vrot.slane %v4420_v52, %v11642_v25 }
 0xd33   : > { %v10817_v1 = vpop.eup %10816 }
 0xd34   : > { %4598 = vmatmul.mubr.bf16.vlgmr.msra.gmra.mrb[80].mxu1 %v4384_v35  ;;  %10207 = vmatprep.mubr.bf16.mxu0 %v4384_v35  ;;  %v4363_v31 = vmul.f32 %v10817_v1, %v12394_v48  ;;  %v4372_v43 = vmul.f32 %v9122_v21, %v4362_v40  ;;  %v12507_v35 = vld [vmem:[%s13196_s1] sm:$0xff] }
 0xd35   : > { %4607 = vmatprep.mubr.bf16.mxu1 %v11216_v0 }
 0xd36   : > { %v4373_v33 = vmul.f32 %v9122_v21, %v4363_v31  ;;  %v12471_v16 = vadd.f32 %v9123_v12, %v4372_v43  ;;  %v12514_v31 = vld [vmem:[%s13196_s1 + $0x8] sm:$0xff] }
 0xd38   : > { %v12473_v47 = vadd.f32 %v9123_v12, %v4373_v33  ;;  %v12520_v33 = vld [vmem:[%s13196_s1 + $0x10] sm:$0xff] }
 0xd3a   : > { %v4385_v4 = vpack.c.bf16 %v12473_v47, %v12471_v16 }
 0xd3c   : > { %4608 = vmatmul.mubr.bf16.gmra.mrb[84].mxu1 %v4385_v4  ;;  %10208 = vmatmul.mubr.bf16.vlgmr.msra.gmra.mrb[80].mxu0 %v4385_v4 }
 0xe07   : > { %v4599_v15 = vpop.f32.mrb[80].mxu1 }
 0xe08   : > { %v4601_v48 = vpop.f32.mrb[81].mxu1  ;;  %v4600_v23 = vadd.f32 %v4599_v15, %v4425_v60 }
 0xe09   : > { %v4603_v20 = vpop.f32.mrb[82].mxu1  ;;  %v4602_v53 = vadd.f32 %v4601_v48, %v4429_v26 }
 0xe0a   : > { %v4604_v29 = vadd.f32 %v4603_v20, %v4425_v60  ;;  %v4605_v30 = vpop.f32.mrb[83].mxu1 }
 0xe0b   : > { %v4606_v22 = vadd.f32 %v4605_v30, %v4429_v26 }
 0xe0c   : > { %v12479_v54 = vpack.c.bf16 %v4604_v29, %v4600_v23 }
 0xe0d   : > { %v12481_v13 = vpack.c.bf16 %v4606_v22, %v4602_v53 }
 0xe0e   : > { %10215 = vmatprep.mubr.msk.bf16.mxu1 %vm942_vm0, %v12479_v54 }
 0xe0f   : > { %v4609_v56 = vpop.f32.mrb[84].mxu1  ;;  %v10209_v18 = vpop.f32.mrb[80].mxu0  ;;  %10287 = vmatprep.subr.msk.bf16.mxu1 %vm942_vm0, %v12481_v13  ;;  %v4680_v58 = vsel %vm942_vm0, %v12481_v13, 0 }
 0xe10   : > { %v4611_v36 = vpop.f32.mrb[85].mxu1  ;;  %v4652_v37 = vpop.f32.mrb[81].mxu0  ;;  %10212 = vmatpush3.bf16.xpose.msra.mxu1 %v4680_v58  ;;  %v4610_v39 = vadd.f32 %v4609_v56, %v4425_v60  ;;  %v4661_v62 = vadd.f32 %v10209_v18, %v4433_v55 }
 0xe11   : > { %v4613_v63 = vpop.f32.mrb[86].mxu1  ;;  %v10210_v59 = vpop.f32.mrb[82].mxu0  ;;  %v4612_v50 = vadd.f32 %v4611_v36, %v4429_v26  ;;  %v4653_v3 = vadd.f32 %v4652_v37, %v4433_v55 }
 0xe12   : > { %v4614_v61 = vadd.f32 %v4613_v63, %v4425_v60  ;;  %v4664_v41 = vadd.f32 %v10210_v59, %v4433_v55  ;;  %v4615_v46 = vpop.f32.mrb[87].mxu1  ;;  %v4655_v42 = vpop.f32.mrb[83].mxu0  ;;  %v12527_v60 = vld [vmem:[%s13196_s1 + $0x18] sm:$0xff] }
 0xe13   : > { %v4616_v5 = vadd.f32 %v4615_v46, %v4429_v26  ;;  %v4656_v49 = vadd.f32 %v4655_v42, %v4433_v55 }
 0xe14   : > { %v12490_v6 = vpack.c.bf16 %v4614_v61, %v4610_v39  ;;  %v12492_v24 = vpack.c.bf16 %v4664_v41, %v4661_v62 }
 0xe15   : > { %v4670_v7 = vpack.c.bf16 %v4616_v5, %v4612_v50  ;;  %v12494_v51 = vpack.c.bf16 %v4656_v49, %v4653_v3 }
 0xe17   : > { %10288 = vmatprep.subr.msk.bf16.mxu1 %vm942_vm0, %v4670_v7  ;;  %v4683_v9 = vsel %vm942_vm0, %v4670_v7, 0 }
 0xe18   : > { %10214 = vmatpush3.bf16.xpose.msra.mxu1 %v4683_v9 }
 0xe19   : > { %10219 = vmatprep.subr.bf16.mxu1 %v12494_v51 }
 0xe1f   : > { %10216 = vmatmul.mubr.msk.bf16.vlgmr.msra.gmra.mrb[88].mxu1 %vm942_vm0, %v12490_v6 }
 0xe20   : > { %10220 = vmatpush3.bf16.msra.mxu1 %v12494_v51 }
 0xe21   : > { %10221 = vmatprep.subr.bf16.mxu1 %v12492_v24 }
 0xe24   : > { %10222 = vmatpush3.bf16.msra.mxu1 %v12492_v24 }
 0xef2   : > { %v10217_v21 = vpop.f32.mrb[88].mxu1 }
 0xef3   : > { %v4719_v10 = vpop.f32.mrb[89].mxu1  ;;  %v4736_v28 = vmul.f32 0.125, %v10217_v21 }
 0xef4   : > { %v4734_v57 = vmul.f32 0.125, %v4719_v10  ;;  %v10218_v38 = vpop.f32.mrb[90].mxu1 }
 0xef5   : > { %v4722_v12 = vpop.f32.mrb[91].mxu1  ;;  %v4737_v32 = vmul.f32 0.125, %v10218_v38  ;;  %v4740_v4 = vadd.f32 %v12520_v33, %v4736_v28 }
 0xef6   : > { %v4735_v34 = vmul.f32 0.125, %v4722_v12  ;;  %v4738_v40 = vadd.f32 %v12507_v35, %v4734_v57 }
 0xef7   : > { %v4741_v15 = vadd.f32 %v12527_v60, %v4737_v32  ;;  %v4748_v26 = vsel %vm1012_vm1, %v4740_v4, -inf }
 0xef8   : > { %v4742_v1 = vsel %vm1012_vm1, %v4738_v40, -inf  ;;  %v4739_v43 = vadd.f32 %v12514_v31, %v4735_v34 }
 0xef9   : > { %4743 = vmax.xlane.f32.xlu0 %v4742_v1  ;;  %v4751_v48 = vsel %vm1012_vm1, %v4741_v15, -inf }
 0xefa   : > { %v4745_v52 = vsel %vm1012_vm1, %v4739_v43, -inf }
 0xefb   : > { %4746 = vmax.xlane.f32.xlu1 %v4745_v52 }
 0xefd   : > { %4749 = vmax.xlane.f32.xlu0 %v4748_v26 }
 0xeff   : > { %4752 = vmax.xlane.f32.xlu1 %v4751_v48 }
 0xf86   : > { %v4744_v20 = vpop.xlane.xlu0 %4743 }
 0xf87   : > { %v4754_v23 = vsub.f32 %v4738_v40, %v4744_v20 }
 0xf88   : > { %v4747_v29 = vpop.xlane.xlu1 %4746 }
 0xf89   : > { %v4755_v30 = vsub.f32 %v4739_v43, %v4747_v29  ;;  %v4758_v56 = vmul.f32 1.442695, %v4754_v23 }
 0xf8a   : > { %v4750_v53 = vpop.xlane.xlu0 %4749 }
 0xf8b   : > { %v4760_v22 = vmul.f32 1.442695, %v4755_v30  ;;  %v4756_v55 = vsub.f32 %v4740_v4, %v4750_v53 }
 0xf8c   : > { %v4753_v18 = vpop.xlane.xlu1 %4752 }
 0xf8d   : > { %10818 = vpow2.f32 %v4760_v22  ;;  %v4762_v58 = vmul.f32 1.442695, %v4756_v55  ;;  %v4757_v36 = vsub.f32 %v4741_v15, %v4753_v18 }
 0xf8f   : > { %10820 = vpow2.f32 %v4762_v58  ;;  %v4764_v37 = vmul.f32 1.442695, %v4757_v36 }
 0xf90   : > { %10822 = vpow2.f32 %v4758_v56 }
 0xf91   : > { %10824 = vpow2.f32 %v4764_v37 }
 0xf97   : > { %v10819_v63 = vpop.eup %10818 }
 0xf98   : > { %v4769_v59 = vsel %vm1012_vm1, %v10819_v63, 0.0 }
 0xf99   : > { %v10821_v39 = vpop.eup %10820  ;;  %4770 = vadd.xlane.f32.xlu1 %v4769_v59 }
 0xf9a   : > { %v10823_v62 = vpop.eup %10822  ;;  %v4772_v61 = vsel %vm1012_vm1, %v10821_v39, 0.0 }
 0xf9b   : > { %v10825_v41 = vpop.eup %10824  ;;  %4773 = vadd.xlane.f32.xlu0 %v4772_v61  ;;  %v4766_v42 = vsel %vm1012_vm1, %v10823_v62, 0.0 }
 0xf9c   : > { %v4775_v46 = vsel %vm1012_vm1, %v10825_v41, 0.0 }
 0xf9d   : > { %4776 = vadd.xlane.f32.xlu1 %v4775_v46 }
 0xf9f   : > { %4767 = vadd.xlane.f32.xlu0 %v4766_v42 }
 0xfae   : > { %4853 = vrot.lane.b32.xlu1 %v4670_v7, %s11217_s10 }
 0xfb2   : > { %4845 = vrot.lane.b32.xlu1 %v12479_v54, %s11217_s10 }
 0xfb5   : > { %4851 = vrot.lane.b32.xlu0 %v12481_v13, %s11217_s10 }
 0xfb6   : > { %4847 = vrot.lane.b32.xlu1 %v12490_v6, %s11217_s10 }
0x1026   : > { %v4771_v50 = vpop.xlane.xlu1 %4770 }
0x1027   : > { %10826 = vrcp.f32 %v4771_v50 }
0x1028   : > { %v4774_v3 = vpop.xlane.xlu0 %4773 }
0x102a   : > { %v4777_v5 = vpop.xlane.xlu1 %4776 }
0x102b   : > { %10828 = vrcp.f32 %v4777_v5 }
0x102c   : > { %10830 = vrcp.f32 %v4774_v3  ;;  %v4768_v49 = vpop.xlane.xlu0 %4767 }
0x102d   : > { %10832 = vrcp.f32 %v4768_v49 }
0x102e   : > { %v4854_v13 = vpop.permute.xlu1 %4853 }
0x102f   : > { %v4865_v1 = vsel %vm942_vm0, %v4854_v13, 0 }
0x1030   : > { %v4852_v9 = vpop.permute.xlu0 %4851 }
0x1031   : > { %10289 = vmatprep.subr.msk.bf16.mxu1 %vm942_vm0, %v4852_v9  ;;  %v10827_v7 = vpop.eup %10826  ;;  %v4862_v34 = vsel %vm942_vm0, %v4852_v9, 0 }
0x1032   : > { %v4783_v38 = vmul.f32 %v10827_v7, %v10819_v63  ;;  %v4846_v40 = vpop.permute.xlu1 %4845 }
0x1035   : > { %v10829_v21 = vpop.eup %10828 }
0x1036   : > { %v10831_v54 = vpop.eup %10830  ;;  %v4785_v28 = vmul.f32 %v10829_v21, %v10825_v41  ;;  %v4848_v43 = vpop.permute.xlu1 %4847 }
0x1037   : > { %v10833_v10 = vpop.eup %10832  ;;  %v4784_v6 = vmul.f32 %v10831_v54, %v10821_v39 }
0x1038   : > { %v4782_v57 = vmul.f32 %v10833_v10, %v10823_v62 }
0x1039   : > { %v4787_v32 = vpack.c.bf16 %v4785_v28, %v4784_v6 }
0x103a   : > { %v4786_v12 = vpack.c.bf16 %v4783_v38, %v4782_v57 }
0x103c   : > { %10223 = vmatprep.mubr.msk.bf16.mxu1 %vm1012_vm1, %v4786_v12 }
0x103d   : > { %10224 = vmatmul.mubr.msk.bf16.vlgmr.msra.gmra.mrb[92].mxu1 %vm1012_vm1, %v4787_v32 }
0x103e   : > { %10228 = vmatpush3.bf16.xpose.msra.mxu1 %v4862_v34  ;;  %10231 = vmatprep.mubr.msk.bf16.mxu1 %vm942_vm0, %v4846_v40 }
0x103f   : > { %10290 = vmatprep.subr.msk.bf16.mxu1 %vm942_vm0, %v4854_v13 }
0x1046   : > { %10230 = vmatpush3.bf16.xpose.msra.mxu1 %v4865_v1 }
0x104d   : > { %10232 = vmatmul.mubr.msk.bf16.vlgmr.msra.gmra.mrb[96].mxu1 %vm942_vm0, %v4848_v43 }
0x104e   : > { %6137 = vmatprep.mubr.bf16.mxu1 %v11216_v0 }
0x1110   : > { %v12552_v4 = vpop.f32.mrb[92].mxu1 }
0x1111   : > { %v12554_v52 = vpop.f32.mrb[93].mxu1 }
0x1112   : > { %v12556_v15 = vpop.f32.mrb[94].mxu1 }
0x1113   : > { %v12558_v26 = vpop.f32.mrb[95].mxu1 }
0x1120   : > { %v10233_v48 = vpop.f32.mrb[96].mxu1 }
0x1121   : > { %v4901_v20 = vpop.f32.mrb[97].mxu1  ;;  %v4918_v23 = vmul.f32 0.125, %v10233_v48 }
0x1122   : > { %v4916_v29 = vmul.f32 0.125, %v4901_v20  ;;  %v10234_v30 = vpop.f32.mrb[98].mxu1 }
0x1123   : > { %v4904_v53 = vpop.f32.mrb[99].mxu1  ;;  %v4919_v56 = vmul.f32 0.125, %v10234_v30  ;;  %v4922_v36 = vadd.f32 %v12520_v33, %v4918_v23 }
0x1124   : > { %v4917_v22 = vmul.f32 0.125, %v4904_v53  ;;  %v4920_v55 = vadd.f32 %v12507_v35, %v4916_v29  ;;  %v10634_v53 = vld [vmem:[#allocation6 + $0x40] sm:$0xff]  }
0x1125   : > { %v4930_v63 = vsel %vm1012_vm1, %v4922_v36, -inf  ;;  %v4923_v59 = vadd.f32 %v12527_v60, %v4919_v56  ;;  %v10637_v56 = vld [vmem:[#allocation6 + $0x58] sm:$0xff]  }
0x1126   : > { %v4924_v18 = vsel %vm1012_vm1, %v4920_v55, -inf  ;;  %v4921_v58 = vadd.f32 %v12514_v31, %v4917_v22  ;;  %v10635_v22 = vld [vmem:[#allocation6 + $0x48] sm:$0xff]  }
0x1127   : > { %4925 = vmax.xlane.f32.xlu0 %v4924_v18  ;;  %v4933_v39 = vsel %vm1012_vm1, %v4923_v59, -inf  ;;  %v10638_v18 = vld [vmem:[#allocation6 + $0x60] sm:$0xff]  }
0x1128   : > { %v4927_v37 = vsel %vm1012_vm1, %v4921_v58, -inf }
0x1129   : > { %4928 = vmax.xlane.f32.xlu1 %v4927_v37  ;;  %v10641_v37 = vld [vmem:[#allocation6 + $0x78] sm:$0xff]  }
0x112b   : > { %4931 = vmax.xlane.f32.xlu0 %v4930_v63 }
0x112f   : > { %4934 = vmax.xlane.f32.xlu0 %v4933_v39 }
0x11b4   : > { %v4926_v35 = vpop.xlane.xlu0 %4925 }
0x11b5   : > { %v4936_v62 = vsub.f32 %v4920_v55, %v4926_v35  ;;  %v10636_v55 = vld [vmem:[#allocation6 + $0x50] sm:$0xff]  }
0x11b6   : > { %v4929_v61 = vpop.xlane.xlu1 %4928 }
0x11b7   : > { %v4940_v31 = vmul.f32 1.442695, %v4936_v62  ;;  %v4937_v42 = vsub.f32 %v4921_v58, %v4929_v61  ;;  %v10639_v58 = vld [vmem:[#allocation6 + $0x68] sm:$0xff]  }
0x11b8   : > { %v4932_v41 = vpop.xlane.xlu0 %4931 }
0x11b9   : > { %v4938_v46 = vsub.f32 %v4922_v36, %v4932_v41  ;;  %v4942_v5 = vmul.f32 1.442695, %v4937_v42  ;;  %v10640_v36 = vld [vmem:[#allocation6 + $0x70] sm:$0xff]  }
0x11bb   : > { %v4944_v33 = vmul.f32 1.442695, %v4938_v46 }
0x11bc   : > { %v4935_v50 = vpop.xlane.xlu0 %4934 }
0x11bd   : > { %10834 = vpow2.f32 %v4944_v33  ;;  %v4939_v3 = vsub.f32 %v4923_v59, %v4935_v50 }
0x11be   : > { %10836 = vpow2.f32 %v4940_v31 }
0x11bf   : > { %v4946_v49 = vmul.f32 1.442695, %v4939_v3 }
0x11c1   : > { %10838 = vpow2.f32 %v4946_v49 }
0x11c2   : > { %10840 = vpow2.f32 %v4942_v5 }
0x11c7   : > { %v10835_v60 = vpop.eup %10834 }
0x11c8   : > { %v4954_v9 = vsel %vm1012_vm1, %v10835_v60, 0.0  ;;  %v10837_v7 = vpop.eup %10836 }
0x11c9   : > { %4955 = vadd.xlane.f32.xlu0 %v4954_v9  ;;  %v4948_v54 = vsel %vm1012_vm1, %v10837_v7, 0.0 }
0x11cb   : > { %v10839_v21 = vpop.eup %10838 }
0x11cc   : > { %v4957_v10 = vsel %vm1012_vm1, %v10839_v21, 0.0  ;;  %v10841_v28 = vpop.eup %10840 }
0x11cd   : > { %4949 = vadd.xlane.f32.xlu0 %v4948_v54  ;;  %4958 = vadd.xlane.f32.xlu1 %v4957_v10  ;;  %v4951_v13 = vsel %vm1012_vm1, %v10841_v28, 0.0 }
0x11d1   : > { %4952 = vadd.xlane.f32.xlu1 %v4951_v13 }
0x11e2   : > { %4974 = vrot.lane.b32.xlu1 %v12492_v24, %s11217_s10 }
0x11e3   : > { %4972 = vrot.lane.b32.xlu0 %v12494_v51, %s11217_s10 }
0x1256   : > { %v4956_v57 = vpop.xlane.xlu0 %4955 }
0x125a   : > { %v4950_v38 = vpop.xlane.xlu0 %4949  ;;  %v4959_v6 = vpop.xlane.xlu1 %4958 }
0x125b   : > { %10842 = vrcp.f32 %v4959_v6 }
0x125c   : > { %10844 = vrcp.f32 %v4950_v38 }
0x125d   : > { %10846 = vrcp.f32 %v4956_v57 }
0x125e   : > { %v4973_v12 = vpop.permute.xlu0 %4972  ;;  %v4953_v32 = vpop.xlane.xlu1 %4952 }
0x125f   : > { %10848 = vrcp.f32 %v4953_v32  ;;  %10235 = vmatprep.subr.bf16.mxu0 %v4973_v12  ;;  %v9199_v32 = vld [vmem:[%s13249_s20 + $0x400] sm:$0xff] }
0x1260   : > { %10236 = vmatpush3.bf16.msra.mxu0 %v4973_v12 }
0x1262   : > { %v4975_v34 = vpop.permute.xlu1 %4974 }
0x1263   : > { %10237 = vmatprep.subr.bf16.mxu0 %v4975_v34 }
0x1264   : > { %10238 = vmatpush3.bf16.msra.mxu0 %v4975_v34  ;;  %v9207_v34 = vld [vmem:[%s13249_s20 + $0x440] sm:$0xff] }
0x1265   : > { %v10843_v40 = vpop.eup %10842  ;;  %10243 = vmatprep.subr.bf16.mxu0 %v10634_v53 }
0x1266   : > { %v10845_v1 = vpop.eup %10844  ;;  %v4967_v48 = vmul.f32 %v10843_v40, %v10839_v21  ;;  %v9188_v21 = vld [vmem:[#allocation7 + $0x1] ss:$0 sm:$0xff]  ;;  %v9330_v40 = vcombine.high %v9199_v32, %v9207_v34 }
0x1267   : > { %v10847_v24 = vpop.eup %10846  ;;  %v4964_v51 = vmul.f32 %v10845_v1, %v10837_v7  ;;  %v9223_v1 = vld [vmem:[%s13249_s20 + $0x4c0] sm:$0xff] }
0x1268   : > { %v4966_v23 = vmul.f32 %v10847_v24, %v10835_v60  ;;  %6105 = vmatprep.subr.bf16.mxu1 %v9330_v40 }
0x1269   : > { %v10849_v43 = vpop.eup %10848 }
0x126a   : > { %v4965_v20 = vmul.f32 %v10849_v43, %v10841_v28  ;;  %v4969_v30 = vpack.c.bf16 %v4967_v48, %v4966_v23 }
0x126c   : > { %v4968_v29 = vpack.c.bf16 %v4965_v20, %v4964_v51  ;;  %v9216_v51 = vld [vmem:[%s13249_s20 + $0x488] sm:$0xff] }
0x126d   : > { %v9224_v20 = vld [vmem:[%s13249_s20 + $0x4c8] sm:$0xff] }
0x126e   : > { %10239 = vmatprep.mubr.msk.bf16.mxu0 %vm1012_vm1, %v4968_v29  ;;  %v9348_v23 = vcombine.high %v9216_v51, %v9224_v20 }
0x126f   : > { %10240 = vmatmul.mubr.msk.bf16.vlgmr.msra.gmra.mrb[84].mxu0 %vm1012_vm1, %v4969_v30  ;;  %v9347_v30 = vcombine.low %v9216_v51, %v9224_v20  ;;  %v9296_v51 = vld [vmem:[%s13249_s20 + $0x708] sm:$0xff] }
0x1270   : > { %10244 = vmatpush3.bf16.msra.mxu0 %v10634_v53 }
0x1271   : > { %10245 = vmatprep.subr.bf16.mxu0 %v10635_v22 }
0x1274   : > { %10246 = vmatpush3.bf16.msra.mxu0 %v10635_v22 }
0x1275   : > { %10247 = vmatprep.subr.bf16.mxu0 %v10636_v55 }
0x1278   : > { %10248 = vmatpush3.bf16.msra.mxu0 %v10636_v55 }
0x1279   : > { %10249 = vmatprep.subr.bf16.mxu0 %v10637_v56 }
0x127c   : > { %10250 = vmatpush3.bf16.msra.mxu0 %v10637_v56 }
0x127d   : > { %10251 = vmatprep.subr.bf16.mxu0 %v10638_v18 }
0x1280   : > { %10252 = vmatpush3.bf16.msra.mxu0 %v10638_v18 }
0x1281   : > { %10253 = vmatprep.subr.bf16.mxu0 %v10639_v58 }
0x1284   : > { %10254 = vmatpush3.bf16.msra.mxu0 %v10639_v58 }
0x1285   : > { %10255 = vmatprep.subr.bf16.mxu0 %v10640_v36 }
0x1288   : > { %10256 = vmatpush3.bf16.msra.mxu0 %v10640_v36 }
0x1289   : > { %10257 = vmatprep.subr.bf16.mxu0 %v10641_v37 }
0x128c   : > { %10258 = vmatpush3.bf16.msra.mxu0 %v10641_v37 }
0x1342   : > { %v10241_v63 = vpop.f32.mrb[84].mxu0 }
0x1343   : > { %v5018_v59 = vpop.f32.mrb[85].mxu0 }
0x1344   : > { %v10242_v39 = vpop.f32.mrb[86].mxu0 }
0x1345   : > { %v10427_v35 = vpack.i.bf16 %v10242_v39, %v10241_v63  ;;  %v5021_v62 = vpop.f32.mrb[87].mxu0 }
0x1346   : > { %v10422_v61 = vpack.i.bf16 %v5021_v62, %v5018_v59 }
0x1348   : > { %10423 = vrot.lane.b32.xlu1 %v10422_v61, %s11217_s10 }
0x134c   : > { %10428 = vrot.lane.b32.xlu1 %v10427_v35, %s11217_s10 }
0x13ba   : > { %v10424_v41 = vpop.permute.xlu1 %10423 }
0x13bb   : > { %v10426_v46 = vunpack.i.h.bf16 %v10424_v41  ;;  %v10425_v31 = vunpack.i.l.bf16 %v10424_v41 }
0x13bd   : > { %v5049_v42 = vsel %vm942_vm0, %v12554_v52, %v10425_v31  ;;  %v5050_v33 = vsel %vm942_vm0, %v12558_v26, %v10426_v46  ;;  %v9231_v31 = vld [vmem:[%s13249_s20 + $0x500] sm:$0xff] }
0x13be   : > { %v10429_v50 = vpop.permute.xlu1 %10428  ;;  %v5053_v3 = vpack.c.bf16 %v5050_v33, %v5049_v42  ;;  %v9239_v42 = vld [vmem:[%s13249_s20 + $0x540] sm:$0xff]  ;;  %v9232_v33 = vld [vmem:[%s13249_s20 + $0x508] sm:$0xff] }
0x13bf   : > { %v10431_v5 = vunpack.i.h.bf16 %v10429_v50  ;;  %v10430_v49 = vunpack.i.l.bf16 %v10429_v50  ;;  %v9362_v50 = vcombine.high %v9231_v31, %v9239_v42 }
0x13c0   : > { %10259 = vmatprep.mubr.bf16.mxu0 %v5053_v3  ;;  %v9240_v3 = vld [vmem:[%s13249_s20 + $0x548] sm:$0xff] }
0x13c1   : > { %v5052_v60 = vsel %vm942_vm0, %v12556_v15, %v10431_v5  ;;  %v5051_v9 = vsel %vm942_vm0, %v12552_v4, %v10430_v49  ;;  %v9361_v5 = vcombine.low %v9231_v31, %v9239_v42  ;;  %v9363_v49 = vcombine.low %v9232_v33, %v9240_v3  ;;  %v9210_v42 = vld [vmem:[%s13249_s20 + $0x458] sm:$0xff] }
0x13c2   : > { %v5054_v7 = vpack.c.bf16 %v5052_v60, %v5051_v9  ;;  %v9364_v60 = vcombine.high %v9232_v33, %v9240_v3  ;;  %v9247_v9 = vld [vmem:[%s13249_s20 + $0x580] sm:$0xff] }
0x13c4   : > { %10260 = vmatmul.mubr.bf16.vlgmr.msra.gmra.mrb[88].mxu0 %v5054_v7  ;;  %v9255_v7 = vld [vmem:[%s13249_s20 + $0x5c0] sm:$0xff] }
0x13c5   : > { %6190 = vmatprep.mubr.bf16.mxu0 %v11216_v0 }
0x1497   : > { %v10261_v52 = vpop.f32.mrb[88].mxu0 }
0x1498   : > { %v5162_v54 = vpop.f32.mrb[89].mxu0  ;;  %v5171_v13 = vadd.f32 %v10261_v52, %v9188_v21  ;;  %v9378_v52 = vcombine.high %v9247_v9, %v9255_v7 }
0x1499   : > { %v5163_v10 = vadd.f32 %v9188_v21, %v5162_v54  ;;  %v10262_v26 = vpop.f32.mrb[90].mxu0  ;;  %v9256_v54 = vld [vmem:[%s13249_s20 + $0x5c8] sm:$0xff] }
0x149a   : > { %v5165_v28 = vpop.f32.mrb[91].mxu0  ;;  %v5174_v6 = vadd.f32 %v10262_v26, %v9188_v21  ;;  %v5179_v4 = vadd.f32 %v5171_v13, %v12471_v16  ;;  %v9208_v16 = vld [vmem:[%s13249_s20 + $0x448] sm:$0xff]  ;;  %v9263_v13 = vld [vmem:[%s13249_s20 + $0x600] sm:$0xff] }
0x149b   : > { %v5166_v57 = vadd.f32 %v9188_v21, %v5165_v28  ;;  %v5177_v38 = vadd.f32 %v5163_v10, %v12462_v11  ;;  %v9200_v11 = vld [vmem:[%s13249_s20 + $0x408] sm:$0xff]  ;;  %v9377_v10 = vcombine.low %v9247_v9, %v9255_v7 }
0x149c   : > { %v5180_v12 = vadd.f32 %v5174_v6, %v12473_v47  ;;  %v9215_v47 = vld [vmem:[%s13249_s20 + $0x480] sm:$0xff]  ;;  %v9331_v24 = vcombine.low %v9200_v11, %v9208_v16  ;;  %v9332_v43 = vcombine.high %v9200_v11, %v9208_v16  ;;  %v9248_v21 = vld [vmem:[%s13249_s20 + $0x588] sm:$0xff] }
0x149d   : > { %5185 = vadd.xlane.f32.xlu0 %v5177_v38  ;;  %v5178_v15 = vadd.f32 %v5166_v57, %v12464_v19  ;;  %v9329_v19 = vcombine.low %v9199_v32, %v9207_v34  ;;  %v9346_v48 = vcombine.high %v9215_v47, %v9223_v1  ;;  %v9345_v29 = vcombine.low %v9215_v47, %v9223_v1  ;;  %v9271_v57 = vld [vmem:[%s13249_s20 + $0x640] sm:$0xff]  ;;  %v9272_v6 = vld [vmem:[%s13249_s20 + $0x648] sm:$0xff] }
0x149e   : > { %6158 = vmatprep.subr.bf16.mxu0 %v9332_v43  ;;  %v9379_v26 = vcombine.low %v9248_v21, %v9256_v54  ;;  %v9380_v28 = vcombine.high %v9248_v21, %v9256_v54  ;;  %v9279_v34 = vld [vmem:[%s13249_s20 + $0x680] sm:$0xff]  ;;  %v9288_v16 = vld [vmem:[%s13249_s20 + $0x6c8] sm:$0xff] }
0x149f   : > { %5187 = vadd.xlane.f32.xlu1 %v5178_v15  ;;  %6106 = vmatpush1.bf16.msra.mxu1 %v9329_v19  ;;  %v9287_v11 = vld [vmem:[%s13249_s20 + $0x6c0] sm:$0xff]  ;;  %v9280_v19 = vld [vmem:[%s13249_s20 + $0x688] sm:$0xff] }
0x14a0   : > { %6159 = vmatpush1.bf16.msra.mxu0 %v9331_v24  ;;  %6107 = vmatprep.subr.bf16.mxu1 %v9346_v48  ;;  %v9410_v40 = vcombine.high %v9279_v34, %v9287_v11  ;;  %v9409_v47 = vcombine.low %v9279_v34, %v9287_v11  ;;  %v9411_v1 = vcombine.low %v9280_v19, %v9288_v16  ;;  %v9295_v43 = vld [vmem:[%s13249_s20 + $0x700] sm:$0xff]  ;;  %v9198_v34 = vld [vmem:[#allocation10 + $0x1] ss:$0 sm:$0xff] }
0x14a1   : > { %5189 = vadd.xlane.f32.xlu0 %v5179_v4  ;;  %6160 = vmatprep.subr.bf16.mxu0 %v9348_v23  ;;  %v9412_v24 = vcombine.high %v9280_v19, %v9288_v16  ;;  %v9303_v48 = vld [vmem:[%s13249_s20 + $0x740] sm:$0xff]  ;;  %v9304_v23 = vld [vmem:[%s13249_s20 + $0x748] sm:$0xff]  ;;  %v9217_v19 = vld [vmem:[%s13249_s20 + $0x490] sm:$0xff] }
0x14a2   : > { %v9426_v20 = vcombine.high %v9295_v43, %v9303_v48  ;;  %v9218_v16 = vld [vmem:[%s13249_s20 + $0x498] sm:$0xff] }
0x14a3   : > { %6108 = vmatpush1.bf16.msra.mxu1 %v9345_v29  ;;  %v9425_v29 = vcombine.low %v9295_v43, %v9303_v48 }
0x14a4   : > { %6161 = vmatpush1.bf16.msra.mxu0 %v9347_v30  ;;  %6109 = vmatprep.subr.bf16.mxu1 %v9362_v50  ;;  %v9427_v30 = vcombine.low %v9296_v51, %v9304_v23 }
0x14a5   : > { %5191 = vadd.xlane.f32.xlu0 %v5180_v12  ;;  %6162 = vmatprep.subr.bf16.mxu0 %v9364_v60 }
0x14a7   : > { %6110 = vmatpush1.bf16.msra.mxu1 %v9361_v5 }
0x14a8   : > { %6163 = vmatpush1.bf16.msra.mxu0 %v9363_v49  ;;  %6111 = vmatprep.subr.bf16.mxu1 %v9378_v52 }
0x14a9   : > { %6164 = vmatprep.subr.bf16.mxu0 %v9380_v28 }
0x14ab   : > { %6112 = vmatpush1.bf16.msra.mxu1 %v9377_v10 }
0x14ac   : > { %6165 = vmatpush1.bf16.msra.mxu0 %v9379_v26 }
0x152a   : > { %v5186_v53 = vpop.xlane.xlu0 %5185 }
0x152b   : > { %v5193_v22 = vmul.f32 0.0078125, %v5186_v53  ;;  %v9428_v53 = vcombine.high %v9296_v51, %v9304_v23  ;;  %v9233_v23 = vld [vmem:[%s13249_s20 + $0x510] sm:$0xff] }
0x152c   : > { %v5188_v55 = vpop.xlane.xlu1 %5187 }
0x152d   : > { %v12617_v56 = vsub.f32 %v5177_v38, %v5193_v22  ;;  %v5194_v18 = vmul.f32 0.0078125, %v5188_v55  ;;  %v9264_v38 = vld [vmem:[%s13249_s20 + $0x608] sm:$0xff]  ;;  %v9311_v22 = vld [vmem:[%s13249_s20 + $0x780] sm:$0xff] }
0x152e   : > { %v5190_v58 = vpop.xlane.xlu0 %5189  ;;  %v9396_v32 = vcombine.high %v9264_v38, %v9272_v6  ;;  %v9319_v55 = vld [vmem:[%s13249_s20 + $0x7c0] sm:$0xff] }
0x152f   : > { %v12619_v36 = vsub.f32 %v5178_v15, %v5194_v18  ;;  %v5195_v37 = vmul.f32 0.0078125, %v5190_v58  ;;  %v5201_v63 = vmul.f32 %v12617_v56, %v12617_v56  ;;  %v9394_v15 = vcombine.high %v9263_v13, %v9271_v57  ;;  %v9312_v18 = vld [vmem:[%s13249_s20 + $0x788] sm:$0xff] }
0x1530   : > { %6166 = vmatprep.subr.bf16.mxu0 %v9396_v32  ;;  %v9442_v58 = vcombine.high %v9311_v22, %v9319_v55 }
0x1531   : > { %v12623_v59 = vsub.f32 %v5179_v4, %v5195_v37  ;;  %5205 = vadd.xlane.f32.xlu0 %v5201_v63  ;;  %v5202_v39 = vmul.f32 %v12619_v36, %v12619_v36  ;;  %v9393_v4 = vcombine.low %v9263_v13, %v9271_v57  ;;  %6113 = vmatprep.subr.bf16.mxu1 %v9394_v15  ;;  %v9320_v37 = vld [vmem:[%s13249_s20 + $0x7c8] sm:$0xff] }
0x1532   : > { %v5192_v35 = vpop.xlane.xlu0 %5191  ;;  %v9441_v63 = vcombine.low %v9311_v22, %v9319_v55 }
0x1533   : > { %v5196_v62 = vmul.f32 0.0078125, %v5192_v35  ;;  %5207 = vadd.xlane.f32.xlu1 %v5202_v39  ;;  %v5203_v61 = vmul.f32 %v12623_v59, %v12623_v59  ;;  %6114 = vmatpush1.bf16.msra.mxu1 %v9393_v4  ;;  %v9443_v39 = vcombine.low %v9312_v18, %v9320_v37  ;;  %v9444_v35 = vcombine.high %v9312_v18, %v9320_v37 }
0x1534   : > { %6115 = vmatprep.subr.bf16.mxu1 %v9410_v40  ;;  %v9225_v40 = vld [vmem:[%s13249_s20 + $0x4d0] sm:$0xff] }
0x1535   : > { %v12629_v41 = vsub.f32 %v5180_v12, %v5196_v62  ;;  %5209 = vadd.xlane.f32.xlu0 %v5203_v61  ;;  %v9395_v12 = vcombine.low %v9264_v38, %v9272_v6  ;;  %v9201_v62 = vld [vmem:[%s13249_s20 + $0x410] sm:$0xff]  ;;  %v9197_v38 = vld [vmem:[#allocation9 + $0x1] ss:$0 sm:$0xff]  ;;  %v9350_v51 = vcombine.high %v9217_v19, %v9225_v40  ;;  %v9349_v22 = vcombine.low %v9217_v19, %v9225_v40 }
0x1536   : > { %v9209_v61 = vld [vmem:[%s13249_s20 + $0x450] sm:$0xff] }
0x1537   : > { %v5204_v46 = vmul.f32 %v12629_v41, %v12629_v41  ;;  %6167 = vmatpush1.bf16.msra.mxu0 %v9395_v12  ;;  %6116 = vmatpush1.bf16.msra.mxu1 %v9409_v47  ;;  %v9334_v31 = vcombine.high %v9201_v62, %v9209_v61  ;;  %v9333_v33 = vcombine.low %v9201_v62, %v9209_v61  ;;  %v9258_v62 = vld [vmem:[%s13249_s20 + $0x5d8] sm:$0xff] }
0x1538   : > { %6168 = vmatprep.subr.bf16.mxu0 %v9412_v24  ;;  %6117 = vmatprep.subr.bf16.mxu1 %v9426_v20 }
0x1539   : > { %5211 = vadd.xlane.f32.xlu1 %v5204_v46  ;;  %v9202_v46 = vld [vmem:[%s13249_s20 + $0x418] sm:$0xff] }
0x153a   : > { %v9335_v50 = vcombine.low %v9202_v46, %v9210_v42  ;;  %v9336_v3 = vcombine.high %v9202_v46, %v9210_v42 }
0x153b   : > { %6169 = vmatpush1.bf16.msra.mxu0 %v9411_v1  ;;  %6118 = vmatpush1.bf16.msra.mxu1 %v9425_v29  ;;  %v9241_v29 = vld [vmem:[%s13249_s20 + $0x550] sm:$0xff] }
0x153c   : > { %6170 = vmatprep.subr.bf16.mxu0 %v9428_v53  ;;  %6119 = vmatprep.subr.bf16.mxu1 %v9442_v58  ;;  %v9366_v58 = vcombine.high %v9233_v23, %v9241_v29  ;;  %v9365_v46 = vcombine.low %v9233_v23, %v9241_v29  ;;  %v9203_v29 = vld [vmem:[%s13249_s20 + $0x420] sm:$0xff] }
0x153f   : > { %6171 = vmatpush1.bf16.msra.mxu0 %v9427_v30  ;;  %6120 = vmatpush1.bf16.msra.mxu1 %v9441_v63  ;;  %v9242_v30 = vld [vmem:[%s13249_s20 + $0x558] sm:$0xff]  ;;  %v9249_v63 = vld [vmem:[%s13249_s20 + $0x590] sm:$0xff] }
0x1540   : > { %6172 = vmatprep.subr.bf16.mxu0 %v9444_v35  ;;  %6211 = vmatprep.subr.bf16.mxu1 %v9334_v31  ;;  %v9250_v35 = vld [vmem:[%s13249_s20 + $0x598] sm:$0xff] }
0x1543   : > { %6173 = vmatpush1.bf16.msra.mxu0 %v9443_v39  ;;  %v9257_v39 = vld [vmem:[%s13249_s20 + $0x5d0] sm:$0xff] }
0x1544   : > { %6264 = vmatprep.subr.bf16.mxu0 %v9336_v3  ;;  %v9265_v3 = vld [vmem:[%s13249_s20 + $0x610] sm:$0xff] }
0x15be   : > { %v5206_v5 = vpop.xlane.xlu0 %5205 }
0x15bf   : > { %v5213_v49 = vmul.f32 0.0078125, %v5206_v5  ;;  %v9273_v5 = vld [vmem:[%s13249_s20 + $0x650] sm:$0xff] }
0x15c0   : > { %v5208_v60 = vpop.xlane.xlu1 %5207 }
0x15c1   : > { %v5217_v9 = vadd.f32 1e-05, %v5213_v49  ;;  %v5214_v7 = vmul.f32 0.0078125, %v5208_v60  ;;  %v9266_v49 = vld [vmem:[%s13249_s20 + $0x618] sm:$0xff] }
0x15c2   : > { %v5210_v21 = vpop.xlane.xlu0 %5209  ;;  %v9274_v60 = vld [vmem:[%s13249_s20 + $0x658] sm:$0xff] }
0x15c3   : > { %10850 = vrsqrt.f32 %v5217_v9  ;;  %v5218_v52 = vadd.f32 1e-05, %v5214_v7  ;;  %v5215_v54 = vmul.f32 0.0078125, %v5210_v21  ;;  %v9381_v9 = vcombine.low %v9249_v63, %v9257_v39 }
0x15c4   : > { %v9383_v7 = vcombine.low %v9250_v35, %v9258_v62  ;;  %v9398_v21 = vcombine.high %v9265_v3, %v9273_v5 }
0x15c5   : > { %10852 = vrsqrt.f32 %v5218_v52  ;;  %v5219_v10 = vadd.f32 1e-05, %v5215_v54  ;;  %v9400_v52 = vcombine.high %v9266_v49, %v9274_v60  ;;  %v9281_v54 = vld [vmem:[%s13249_s20 + $0x690] sm:$0xff] }
0x15c6   : > { %v5212_v26 = vpop.xlane.xlu1 %5211 }
0x15c7   : > { %10854 = vrsqrt.f32 %v5219_v10  ;;  %v5216_v28 = vmul.f32 0.0078125, %v5212_v26  ;;  %v9289_v10 = vld [vmem:[%s13249_s20 + $0x6d0] sm:$0xff]  ;;  %v9282_v26 = vld [vmem:[%s13249_s20 + $0x698] sm:$0xff] }
0x15c9   : > { %v5220_v13 = vadd.f32 1e-05, %v5216_v28  ;;  %v9290_v28 = vld [vmem:[%s13249_s20 + $0x6d8] sm:$0xff] }
0x15cb   : > { %10856 = vrsqrt.f32 %v5220_v13  ;;  %v9397_v13 = vcombine.low %v9265_v3, %v9273_v5  ;;  %v9243_v3 = vld [vmem:[%s13249_s20 + $0x560] sm:$0xff]  ;;  %v9236_v5 = vld [vmem:[%s13249_s20 + $0x528] sm:$0xff] }
0x15cd   : > { %v10851_v57 = vpop.eup %10850 }
0x15ce   : > { %v5225_v15 = vmul.f32 %v10851_v57, %v12617_v56  ;;  %v9226_v56 = vld [vmem:[%s13249_s20 + $0x4d8] sm:$0xff]  ;;  %v9399_v57 = vcombine.low %v9266_v49, %v9274_v60  ;;  %v9244_v49 = vld [vmem:[%s13249_s20 + $0x568] sm:$0xff] }
0x15cf   : > { %v10853_v6 = vpop.eup %10852  ;;  %v9352_v20 = vcombine.high %v9218_v16, %v9226_v56  ;;  %v9351_v55 = vcombine.low %v9218_v16, %v9226_v56  ;;  %v9313_v16 = vld [vmem:[%s13249_s20 + $0x790] sm:$0xff] }
0x15d0   : > { %v5235_v4 = vmul.f32 %v9197_v38, %v5225_v15  ;;  %v5226_v12 = vmul.f32 %v10853_v6, %v12619_v36  ;;  %v9416_v15 = vcombine.high %v9282_v26, %v9290_v28  ;;  %v9297_v6 = vld [vmem:[%s13249_s20 + $0x710] sm:$0xff] }
0x15d1   : > { %v10855_v32 = vpop.eup %10854  ;;  %v9321_v56 = vld [vmem:[%s13249_s20 + $0x7d0] sm:$0xff] }
0x15d2   : > { %v5236_v11 = vmul.f32 %v9197_v38, %v5226_v12  ;;  %v12731_v36 = vadd.f32 %v9198_v34, %v5235_v4  ;;  %v5227_v1 = vmul.f32 %v10855_v32, %v12623_v59  ;;  %v9234_v59 = vld [vmem:[%s13249_s20 + $0x518] sm:$0xff]  ;;  %v9305_v4 = vld [vmem:[%s13249_s20 + $0x750] sm:$0xff] }
0x15d3   : > { %v9368_v37 = vcombine.high %v9234_v59, %v9242_v30  ;;  %v9367_v31 = vcombine.low %v9234_v59, %v9242_v30  ;;  %v9298_v12 = vld [vmem:[%s13249_s20 + $0x718] sm:$0xff]  ;;  %v9430_v19 = vcombine.high %v9297_v6, %v9305_v4  ;;  %v9211_v59 = vld [vmem:[%s13249_s20 + $0x460] sm:$0xff]  ;;  %v9204_v30 = vld [vmem:[%s13249_s20 + $0x428] sm:$0xff] }
0x15d4   : > { %v12733_v47 = vadd.f32 %v9198_v34, %v5236_v11  ;;  %v5237_v53 = vmul.f32 %v9197_v38, %v5227_v1  ;;  %v9306_v32 = vld [vmem:[%s13249_s20 + $0x758] sm:$0xff]  ;;  %v9415_v11 = vcombine.low %v9282_v26, %v9290_v28  ;;  %v9260_v26 = vld [vmem:[%s13249_s20 + $0x5e8] sm:$0xff] }
0x15d5   : > { %v10857_v24 = vpop.eup %10856  ;;  %v9432_v40 = vcombine.high %v9298_v12, %v9306_v32  ;;  %v9314_v1 = vld [vmem:[%s13249_s20 + $0x798] sm:$0xff] }
0x15d6   : > { %v12738_v43 = vpack.c.bf16 %v12733_v47, %v12731_v36  ;;  %v5228_v48 = vmul.f32 %v10857_v24, %v12629_v41  ;;  %v12771_v61 = vadd.f32 %v9198_v34, %v5237_v53  ;;  %v9322_v24 = vld [vmem:[%s13249_s20 + $0x7d8] sm:$0xff]  ;;  %v9212_v53 = vld [vmem:[%s13249_s20 + $0x468] sm:$0xff] }
0x15d7   : > { %v9448_v23 = vcombine.high %v9314_v1, %v9322_v24 }
0x15d8   : > { %v5238_v41 = vmul.f32 %v9197_v38, %v5228_v48  ;;  %6138 = vmatmul.mubr.bf16.vlgmr.msra.gmra.mrb[100].mxu1 %v12738_v43  ;;  %6191 = vmatmul.mubr.bf16.vlgmr.msra.gmra.mrb[92].mxu0 %v12738_v43  ;;  %v9414_v38 = vcombine.high %v9281_v54, %v9289_v10  ;;  %v9429_v48 = vcombine.low %v9297_v6, %v9305_v4  ;;  %v9275_v6 = vld [vmem:[%s13249_s20 + $0x660] sm:$0xff]  ;;  %v9268_v4 = vld [vmem:[%s13249_s20 + $0x628] sm:$0xff] }
0x15d9   : > { %6212 = vmatpush1.bf16.msra.mxu1 %v9333_v33  ;;  %6265 = vmatpush1.bf16.msra.mxu0 %v9335_v50  ;;  %v9382_v33 = vcombine.high %v9249_v63, %v9257_v39  ;;  %v9384_v50 = vcombine.high %v9250_v35, %v9258_v62  ;;  %v9227_v63 = vld [vmem:[%s13249_s20 + $0x4e0] sm:$0xff]  ;;  %v9220_v39 = vld [vmem:[%s13249_s20 + $0x4a8] sm:$0xff]  ;;  %v9337_v62 = vcombine.low %v9203_v29, %v9211_v59 }
0x15da   : > { %v12755_v18 = vadd.f32 %v9198_v34, %v5238_v41  ;;  %6213 = vmatprep.subr.bf16.mxu1 %v9350_v51  ;;  %6266 = vmatprep.subr.bf16.mxu0 %v9352_v20  ;;  %v9413_v34 = vcombine.low %v9281_v54, %v9289_v10  ;;  %v9431_v51 = vcombine.low %v9298_v12, %v9306_v32  ;;  %v9228_v35 = vld [vmem:[%s13249_s20 + $0x4e8] sm:$0xff]  ;;  %v9259_v54 = vld [vmem:[%s13249_s20 + $0x5e0] sm:$0xff] }
0x15db   : > { %6147 = vmatprep.mubr.bf16.mxu1 %v11216_v0  ;;  %6200 = vmatprep.mubr.bf16.mxu0 %v11216_v0  ;;  %v9446_v20 = vcombine.high %v9313_v16, %v9321_v56  ;;  %v9445_v41 = vcombine.low %v9313_v16, %v9321_v56  ;;  %v9252_v10 = vld [vmem:[%s13249_s20 + $0x5a8] sm:$0xff]  ;;  %v9291_v16 = vld [vmem:[%s13249_s20 + $0x6e0] sm:$0xff] }
0x15dc   : > { %v12775_v42 = vpack.c.bf16 %v12755_v18, %v12771_v61  ;;  %v9276_v12 = vld [vmem:[%s13249_s20 + $0x668] sm:$0xff] }
0x15dd   : > { %6214 = vmatpush1.bf16.msra.mxu1 %v9349_v22  ;;  %6267 = vmatpush1.bf16.msra.mxu0 %v9351_v55  ;;  %v9447_v22 = vcombine.low %v9314_v1, %v9322_v24  ;;  %v9338_v55 = vcombine.high %v9203_v29, %v9211_v59  ;;  %v9284_v56 = vld [vmem:[%s13249_s20 + $0x6a8] sm:$0xff]  ;;  %v9307_v29 = vld [vmem:[%s13249_s20 + $0x760] sm:$0xff] }
0x15de   : > { %6215 = vmatprep.subr.bf16.mxu1 %v9366_v58  ;;  %6268 = vmatprep.subr.bf16.mxu0 %v9368_v37  ;;  %v9340_v58 = vcombine.high %v9204_v30, %v9212_v53  ;;  %v9219_v37 = vld [vmem:[%s13249_s20 + $0x4a0] sm:$0xff]  ;;  %v9292_v1 = vld [vmem:[%s13249_s20 + $0x6e8] sm:$0xff] }
0x15df   : > { %v9353_v60 = vcombine.low %v9219_v37, %v9227_v63  ;;  %v9300_v59 = vld [vmem:[%s13249_s20 + $0x728] sm:$0xff] }
0x15e0   : > { %6148 = vmatmul.mubr.bf16.gmra.mrb[104].mxu1 %v12775_v42  ;;  %6201 = vmatmul.mubr.bf16.gmra.mrb[96].mxu0 %v12775_v42 }
0x15e1   : > { %6216 = vmatpush1.bf16.msra.mxu1 %v9365_v46  ;;  %6269 = vmatpush1.bf16.msra.mxu0 %v9367_v31  ;;  %v9339_v46 = vcombine.low %v9204_v30, %v9212_v53  ;;  %v9354_v31 = vcombine.high %v9219_v37, %v9227_v63  ;;  %v9308_v30 = vld [vmem:[%s13249_s20 + $0x768] sm:$0xff]  ;;  %v9323_v37 = vld [vmem:[%s13249_s20 + $0x7e0] sm:$0xff] }
0x15e2   : > { %6217 = vmatprep.subr.bf16.mxu1 %v9382_v33  ;;  %6270 = vmatprep.subr.bf16.mxu0 %v9384_v50  ;;  %v9356_v33 = vcombine.high %v9220_v39, %v9228_v35  ;;  %v9235_v50 = vld [vmem:[%s13249_s20 + $0x520] sm:$0xff]  ;;  %v9316_v63 = vld [vmem:[%s13249_s20 + $0x7a8] sm:$0xff] }
0x15e3   : > { %6243 = vmatprep.mubr.bf16.mxu1 %v11216_v0  ;;  %6296 = vmatprep.mubr.bf16.mxu0 %v11216_v0  ;;  %v9369_v28 = vcombine.low %v9235_v50, %v9243_v3 }
0x15e5   : > { %6218 = vmatpush1.bf16.msra.mxu1 %v9381_v9  ;;  %6271 = vmatpush1.bf16.msra.mxu0 %v9383_v7  ;;  %v9355_v9 = vcombine.low %v9220_v39, %v9228_v35  ;;  %v9370_v7 = vcombine.high %v9235_v50, %v9243_v3  ;;  %v9324_v39 = vld [vmem:[%s13249_s20 + $0x7e8] sm:$0xff]  ;;  %v9213_v50 = vld [vmem:[%s13249_s20 + $0x470] sm:$0xff]  ;;  %v9206_v3 = vld [vmem:[%s13249_s20 + $0x438] sm:$0xff] }
0x15e6   : > { %6219 = vmatprep.subr.bf16.mxu1 %v9398_v21  ;;  %6272 = vmatprep.subr.bf16.mxu0 %v9400_v52  ;;  %v9372_v21 = vcombine.high %v9236_v5, %v9244_v49  ;;  %v9251_v52 = vld [vmem:[%s13249_s20 + $0x5a0] sm:$0xff] }
0x15e7   : > { %v9385_v32 = vcombine.low %v9251_v52, %v9259_v54 }
0x15e9   : > { %6220 = vmatpush1.bf16.msra.mxu1 %v9397_v13  ;;  %6273 = vmatpush1.bf16.msra.mxu0 %v9399_v57  ;;  %v9371_v13 = vcombine.low %v9236_v5, %v9244_v49  ;;  %v9386_v57 = vcombine.high %v9251_v52, %v9259_v54  ;;  %v9214_v5 = vld [vmem:[%s13249_s20 + $0x478] sm:$0xff]  ;;  %v9229_v52 = vld [vmem:[%s13249_s20 + $0x4f0] sm:$0xff] }
0x15ea   : > { %6221 = vmatprep.subr.bf16.mxu1 %v9414_v38  ;;  %6274 = vmatprep.subr.bf16.mxu0 %v9416_v15  ;;  %v9388_v38 = vcombine.high %v9252_v10, %v9260_v26  ;;  %v9267_v15 = vld [vmem:[%s13249_s20 + $0x620] sm:$0xff]  ;;  %v9222_v54 = vld [vmem:[%s13249_s20 + $0x4b8] sm:$0xff] }
0x15eb   : > { %v9401_v24 = vcombine.low %v9267_v15, %v9275_v6 }
0x15ed   : > { %6222 = vmatpush1.bf16.msra.mxu1 %v9413_v34  ;;  %6275 = vmatpush1.bf16.msra.mxu0 %v9415_v11  ;;  %v9387_v34 = vcombine.low %v9252_v10, %v9260_v26  ;;  %v9402_v11 = vcombine.high %v9267_v15, %v9275_v6  ;;  %v9230_v10 = vld [vmem:[%s13249_s20 + $0x4f8] sm:$0xff]  ;;  %v9245_v15 = vld [vmem:[%s13249_s20 + $0x570] sm:$0xff] }
0x15ee   : > { %6223 = vmatprep.subr.bf16.mxu1 %v9430_v19  ;;  %6276 = vmatprep.subr.bf16.mxu0 %v9432_v40  ;;  %v9404_v19 = vcombine.high %v9268_v4, %v9276_v12  ;;  %v9283_v40 = vld [vmem:[%s13249_s20 + $0x6a0] sm:$0xff]  ;;  %v9238_v6 = vld [vmem:[%s13249_s20 + $0x538] sm:$0xff] }
0x15ef   : > { %v9417_v53 = vcombine.low %v9283_v40, %v9291_v16 }
0x15f1   : > { %6224 = vmatpush1.bf16.msra.mxu1 %v9429_v48  ;;  %6277 = vmatpush1.bf16.msra.mxu0 %v9431_v51  ;;  %v9403_v48 = vcombine.low %v9268_v4, %v9276_v12  ;;  %v9418_v51 = vcombine.high %v9283_v40, %v9291_v16  ;;  %v9246_v4 = vld [vmem:[%s13249_s20 + $0x578] sm:$0xff]  ;;  %v9261_v40 = vld [vmem:[%s13249_s20 + $0x5f0] sm:$0xff] }
0x15f2   : > { %6225 = vmatprep.subr.bf16.mxu1 %v9446_v20  ;;  %6278 = vmatprep.subr.bf16.mxu0 %v9448_v23  ;;  %v9420_v20 = vcombine.high %v9284_v56, %v9292_v1  ;;  %v9299_v23 = vld [vmem:[%s13249_s20 + $0x720] sm:$0xff]  ;;  %v9254_v16 = vld [vmem:[%s13249_s20 + $0x5b8] sm:$0xff] }
0x15f3   : > { %v9433_v35 = vcombine.low %v9299_v23, %v9307_v29 }
0x15f5   : > { %6226 = vmatpush1.bf16.msra.mxu1 %v9445_v41  ;;  %6279 = vmatpush1.bf16.msra.mxu0 %v9447_v22  ;;  %v9419_v41 = vcombine.low %v9284_v56, %v9292_v1  ;;  %v9434_v22 = vcombine.high %v9299_v23, %v9307_v29  ;;  %v9262_v56 = vld [vmem:[%s13249_s20 + $0x5f8] sm:$0xff]  ;;  %v9277_v23 = vld [vmem:[%s13249_s20 + $0x670] sm:$0xff] }
0x15f6   : > { %6317 = vmatprep.subr.bf16.mxu1 %v9338_v55  ;;  %6370 = vmatprep.subr.bf16.mxu0 %v9340_v58  ;;  %v9436_v55 = vcombine.high %v9300_v59, %v9308_v30  ;;  %v9315_v58 = vld [vmem:[%s13249_s20 + $0x7a0] sm:$0xff]  ;;  %v9270_v29 = vld [vmem:[%s13249_s20 + $0x638] sm:$0xff] }
0x15f7   : > { %v9449_v49 = vcombine.low %v9315_v58, %v9323_v37 }
0x15f8   : > { %6244 = vmatmul.mubr.bf16.vlgmr.msra.gmra.mrb[108].mxu1 %v12738_v43  ;;  %6297 = vmatmul.mubr.bf16.vlgmr.msra.gmra.mrb[100].mxu0 %v12738_v43 }
0x15f9   : > { %6318 = vmatpush1.bf16.msra.mxu1 %v9337_v62  ;;  %6371 = vmatpush1.bf16.msra.mxu0 %v9339_v46  ;;  %v9435_v62 = vcombine.low %v9300_v59, %v9308_v30  ;;  %v9450_v46 = vcombine.high %v9315_v58, %v9323_v37  ;;  %v9278_v59 = vld [vmem:[%s13249_s20 + $0x678] sm:$0xff]  ;;  %v9293_v58 = vld [vmem:[%s13249_s20 + $0x6f0] sm:$0xff] }
0x15fa   : > { %6319 = vmatprep.subr.bf16.mxu1 %v9354_v31  ;;  %6372 = vmatprep.subr.bf16.mxu0 %v9356_v33  ;;  %v9452_v31 = vcombine.high %v9316_v63, %v9324_v39  ;;  %v9205_v33 = vld [vmem:[%s13249_s20 + $0x430] sm:$0xff]  ;;  %v9286_v37 = vld [vmem:[%s13249_s20 + $0x6b8] sm:$0xff] }
0x15fb   : > { %6253 = vmatprep.mubr.bf16.mxu1 %v11216_v0  ;;  %6306 = vmatprep.mubr.bf16.mxu0 %v11216_v0  ;;  %v9341_v26 = vcombine.low %v9205_v33, %v9213_v50 }
0x15fd   : > { %6320 = vmatpush1.bf16.msra.mxu1 %v9353_v60  ;;  %6373 = vmatpush1.bf16.msra.mxu0 %v9355_v9  ;;  %v9451_v60 = vcombine.low %v9316_v63, %v9324_v39  ;;  %v9342_v9 = vcombine.high %v9205_v33, %v9213_v50  ;;  %v9294_v63 = vld [vmem:[%s13249_s20 + $0x6f8] sm:$0xff]  ;;  %v9309_v33 = vld [vmem:[%s13249_s20 + $0x770] sm:$0xff] }
0x15fe   : > { %6321 = vmatprep.subr.bf16.mxu1 %v9370_v7  ;;  %6374 = vmatprep.subr.bf16.mxu0 %v9372_v21  ;;  %v9344_v7 = vcombine.high %v9206_v3, %v9214_v5  ;;  %v9221_v21 = vld [vmem:[%s13249_s20 + $0x4b0] sm:$0xff]  ;;  %v9302_v50 = vld [vmem:[%s13249_s20 + $0x738] sm:$0xff] }
0x15ff   : > { %v9357_v12 = vcombine.low %v9221_v21, %v9229_v52 }
0x1600   : > { %6254 = vmatmul.mubr.bf16.gmra.mrb[112].mxu1 %v12775_v42  ;;  %6307 = vmatmul.mubr.bf16.gmra.mrb[104].mxu0 %v12775_v42 }
0x1601   : > { %6322 = vmatpush1.bf16.msra.mxu1 %v9369_v28  ;;  %6375 = vmatpush1.bf16.msra.mxu0 %v9371_v13  ;;  %v9343_v28 = vcombine.low %v9206_v3, %v9214_v5  ;;  %v9358_v13 = vcombine.high %v9221_v21, %v9229_v52  ;;  %v9310_v3 = vld [vmem:[%s13249_s20 + $0x778] sm:$0xff]  ;;  %v9325_v21 = vld [vmem:[%s13249_s20 + $0x7f0] sm:$0xff] }
0x1602   : > { %6323 = vmatprep.subr.bf16.mxu1 %v9386_v57  ;;  %6376 = vmatprep.subr.bf16.mxu0 %v9388_v38  ;;  %v9360_v57 = vcombine.high %v9222_v54, %v9230_v10  ;;  %v9237_v38 = vld [vmem:[%s13249_s20 + $0x530] sm:$0xff]  ;;  %v9318_v52 = vld [vmem:[%s13249_s20 + $0x7b8] sm:$0xff] }
0x1603   : > { %6349 = vmatprep.mubr.bf16.mxu1 %v11216_v0  ;;  %6402 = vmatprep.mubr.bf16.mxu0 %v11216_v0  ;;  %v9373_v1 = vcombine.low %v9237_v38, %v9245_v15 }
0x1605   : > { %6324 = vmatpush1.bf16.msra.mxu1 %v9385_v32  ;;  %6377 = vmatpush1.bf16.msra.mxu0 %v9387_v34  ;;  %v9359_v32 = vcombine.low %v9222_v54, %v9230_v10  ;;  %v9374_v34 = vcombine.high %v9237_v38, %v9245_v15  ;;  %v9326_v54 = vld [vmem:[%s13249_s20 + $0x7f8] sm:$0xff]  ;;  %v10642_v15 = vld [vmem:[#allocation12 + $0x440] sm:$0xff]  }
0x1606   : > { %6325 = vmatprep.subr.bf16.mxu1 %v9402_v11  ;;  %6378 = vmatprep.subr.bf16.mxu0 %v9404_v19  ;;  %v9376_v11 = vcombine.high %v9238_v6, %v9246_v4  ;;  %v9253_v19 = vld [vmem:[%s13249_s20 + $0x5b0] sm:$0xff]  ;;  %v9455_v38 = vcombine.low %v9318_v52, %v9326_v54 }
0x1607   : > { %v9389_v30 = vcombine.low %v9253_v19, %v9261_v40 }
0x1609   : > { %6326 = vmatpush1.bf16.msra.mxu1 %v9401_v24  ;;  %6379 = vmatpush1.bf16.msra.mxu0 %v9403_v48  ;;  %v9375_v24 = vcombine.low %v9238_v6, %v9246_v4  ;;  %v9390_v48 = vcombine.high %v9253_v19, %v9261_v40  ;;  %v10643_v6 = vld [vmem:[#allocation12 + $0x4c0] sm:$0xff]   ;;  %v10649_v19 = vld [vmem:[#allocation12 + $0x488] sm:$0xff]   ;;  %v10650_v40 = vld [vmem:[#allocation12 + $0x450] sm:$0xff]  }
0x160a   : > { %6327 = vmatprep.subr.bf16.mxu1 %v9418_v51  ;;  %6380 = vmatprep.subr.bf16.mxu0 %v9420_v20  ;;  %v9392_v51 = vcombine.high %v9254_v16, %v9262_v56  ;;  %v9269_v20 = vld [vmem:[%s13249_s20 + $0x630] sm:$0xff] }
0x160b   : > { %v9405_v39 = vcombine.low %v9269_v20, %v9277_v23  ;;  %v10644_v4 = vld [vmem:[#allocation12 + $0x400] sm:$0xff]  }
0x160d   : > { %6328 = vmatpush1.bf16.msra.mxu1 %v9417_v53  ;;  %6381 = vmatpush1.bf16.msra.mxu0 %v9419_v41  ;;  %v9391_v53 = vcombine.low %v9254_v16, %v9262_v56  ;;  %v9406_v41 = vcombine.high %v9269_v20, %v9277_v23  ;;  %v10651_v16 = vld [vmem:[#allocation12 + $0x4d0] sm:$0xff]   ;;  %v10659_v20 = vld [vmem:[#allocation12 + $0x4e0] sm:$0xff]  }
0x160e   : > { %6329 = vmatprep.subr.bf16.mxu1 %v9434_v22  ;;  %6382 = vmatprep.subr.bf16.mxu0 %v9436_v55  ;;  %v9408_v22 = vcombine.high %v9270_v29, %v9278_v59  ;;  %v9285_v55 = vld [vmem:[%s13249_s20 + $0x6b0] sm:$0xff]  ;;  %v10652_v56 = vld [vmem:[#allocation12 + $0x410] sm:$0xff]  }
0x160f   : > { %v9421_v5 = vcombine.low %v9285_v55, %v9293_v58  ;;  %v10660_v23 = vld [vmem:[#allocation12 + $0x420] sm:$0xff]  }
0x1611   : > { %6330 = vmatpush1.bf16.msra.mxu1 %v9433_v35  ;;  %6383 = vmatpush1.bf16.msra.mxu0 %v9435_v62  ;;  %v9407_v35 = vcombine.low %v9270_v29, %v9278_v59  ;;  %v9422_v62 = vcombine.high %v9285_v55, %v9293_v58  ;;  %v10661_v29 = vld [vmem:[#allocation12 + $0x4a0] sm:$0xff]   ;;  %v10662_v59 = vld [vmem:[#allocation12 + $0x468] sm:$0xff]   ;;  %v10668_v55 = vld [vmem:[#allocation12 + $0x430] sm:$0xff]  }
0x1612   : > { %6331 = vmatprep.subr.bf16.mxu1 %v9450_v46  ;;  %6384 = vmatprep.subr.bf16.mxu0 %v9452_v31  ;;  %v9424_v46 = vcombine.high %v9286_v37, %v9294_v63  ;;  %v9301_v31 = vld [vmem:[%s13249_s20 + $0x730] sm:$0xff]  ;;  %v10669_v58 = vld [vmem:[#allocation12 + $0x4b0] sm:$0xff]  }
0x1613   : > { %v9437_v10 = vcombine.low %v9301_v31, %v9309_v33 }
0x1615   : > { %6332 = vmatpush1.bf16.msra.mxu1 %v9449_v49  ;;  %6385 = vmatpush1.bf16.msra.mxu0 %v9451_v60  ;;  %v9423_v49 = vcombine.low %v9286_v37, %v9294_v63  ;;  %v9438_v60 = vcombine.high %v9301_v31, %v9309_v33  ;;  %v10670_v37 = vld [vmem:[#allocation12 + $0x478] sm:$0xff]   ;;  %v13046_v31 = vld [vmem:[%s13250_s27 + $0x10] sm:$0xff] }
0x1616   : > { %6423 = vmatprep.subr.bf16.mxu1 %v9342_v9  ;;  %6476 = vmatprep.subr.bf16.mxu0 %v9344_v7  ;;  %v9440_v9 = vcombine.high %v9302_v50, %v9310_v3  ;;  %v9317_v7 = vld [vmem:[%s13249_s20 + $0x7b0] sm:$0xff]  ;;  %v10671_v63 = vld [vmem:[#allocation12 + $0x4f8] sm:$0xff]   ;;  %v5388_v33 = vrot.slane %v13046_v31, %v11642_v25 }
0x1618   : > { %6350 = vmatmul.mubr.bf16.vlgmr.msra.gmra.mrb[116].mxu1 %v12738_v43  ;;  %6403 = vmatmul.mubr.bf16.vlgmr.msra.gmra.mrb[108].mxu0 %v12738_v43 }
0x1619   : > { %6424 = vmatpush1.bf16.msra.mxu1 %v9341_v26  ;;  %6477 = vmatpush1.bf16.msra.mxu0 %v9343_v28  ;;  %v9439_v26 = vcombine.low %v9302_v50, %v9310_v3  ;;  %v9454_v28 = vcombine.high %v9317_v7, %v9325_v21  ;;  %v5396_v50 = vrot.slane %v13046_v31, %v11726_v17 }
0x161a   : > { %6425 = vmatprep.subr.bf16.mxu1 %v9358_v13  ;;  %6478 = vmatprep.subr.bf16.mxu0 %v9360_v57  ;;  %v9456_v13 = vcombine.high %v9318_v52, %v9326_v54  ;;  %v9453_v57 = vcombine.low %v9317_v7, %v9325_v21  ;;  %v5392_v3 = vrot.slane %v13046_v31, %v11647_v27 }
0x161b   : > { %6359 = vmatprep.mubr.bf16.mxu1 %v11216_v0  ;;  %6412 = vmatprep.mubr.bf16.mxu0 %v11216_v0 }
0x161d   : > { %6426 = vmatpush1.bf16.msra.mxu1 %v9357_v12  ;;  %6479 = vmatpush1.bf16.msra.mxu0 %v9359_v32  ;;  %v10645_v12 = vld [vmem:[#allocation12 + $0x480] sm:$0xff]   ;;  %v10646_v32 = vld [vmem:[#allocation12 + $0x448] sm:$0xff]  }
0x161e   : > { %6427 = vmatprep.subr.bf16.mxu1 %v9374_v34  ;;  %6480 = vmatprep.subr.bf16.mxu0 %v9376_v11  ;;  %v10647_v34 = vld [vmem:[#allocation12 + $0x4c8] sm:$0xff]  }
0x161f   : > { %v10648_v11 = vld [vmem:[#allocation12 + $0x408] sm:$0xff]  }
0x1620   : > { %6360 = vmatmul.mubr.bf16.gmra.mrb[120].mxu1 %v12775_v42  ;;  %6413 = vmatmul.mubr.bf16.gmra.mrb[112].mxu0 %v12775_v42 }
0x1621   : > { %6428 = vmatpush1.bf16.msra.mxu1 %v9373_v1  ;;  %6481 = vmatpush1.bf16.msra.mxu0 %v9375_v24  ;;  %v10653_v1 = vld [vmem:[#allocation12 + $0x490] sm:$0xff]   ;;  %v10654_v24 = vld [vmem:[#allocation12 + $0x458] sm:$0xff]  }
0x1622   : > { %6429 = vmatprep.subr.bf16.mxu1 %v9390_v48  ;;  %6482 = vmatprep.subr.bf16.mxu0 %v9392_v51  ;;  %v10657_v48 = vld [vmem:[#allocation12 + $0x498] sm:$0xff]   ;;  %v10658_v51 = vld [vmem:[#allocation12 + $0x460] sm:$0xff]  }
0x1623   : > { %6455 = vmatprep.mubr.bf16.mxu1 %v11216_v0  ;;  %6508 = vmatprep.mubr.bf16.mxu0 %v11216_v0 }
0x1625   : > { %6430 = vmatpush1.bf16.msra.mxu1 %v9389_v30  ;;  %6483 = vmatpush1.bf16.msra.mxu0 %v9391_v53  ;;  %v10663_v30 = vld [vmem:[#allocation12 + $0x4e8] sm:$0xff]  }
0x1626   : > { %6431 = vmatprep.subr.bf16.mxu1 %v9406_v41  ;;  %6484 = vmatprep.subr.bf16.mxu0 %v9408_v22  ;;  %v10664_v53 = vld [vmem:[#allocation12 + $0x428] sm:$0xff]   ;;  %v10666_v41 = vld [vmem:[#allocation12 + $0x470] sm:$0xff]  }
0x1627   : > { %v10667_v22 = vld [vmem:[#allocation12 + $0x4f0] sm:$0xff]  }
0x1629   : > { %6432 = vmatpush1.bf16.msra.mxu1 %v9405_v39  ;;  %6485 = vmatpush1.bf16.msra.mxu0 %v9407_v35  ;;  %v10672_v39 = vld [vmem:[#allocation12 + $0x438] sm:$0xff]  }
0x162a   : > { %6433 = vmatprep.subr.bf16.mxu1 %v9422_v62  ;;  %6486 = vmatprep.subr.bf16.mxu0 %v9424_v46  ;;  %v10673_v35 = vld [vmem:[#allocation12 + $0x4b8] sm:$0xff]   ;;  %v10674_v62 = vld [vmem:[#allocation12 + $0x540] sm:$0xff]  }
0x162b   : > { %v10675_v46 = vld [vmem:[#allocation12 + $0x5c0] sm:$0xff]  }
0x162d   : > { %6434 = vmatpush1.bf16.msra.mxu1 %v9421_v5  ;;  %6487 = vmatpush1.bf16.msra.mxu0 %v9423_v49  ;;  %v5400_v5 = vrot.slane %v13046_v31, %v12256_v2 }
0x162e   : > { %6435 = vmatprep.subr.bf16.mxu1 %v9438_v60  ;;  %6488 = vmatprep.subr.bf16.mxu0 %v9440_v9 }
0x1631   : > { %6436 = vmatpush1.bf16.msra.mxu1 %v9437_v10  ;;  %6489 = vmatpush1.bf16.msra.mxu0 %v9439_v26 }
0x1632   : > { %6437 = vmatprep.subr.bf16.mxu1 %v9454_v28  ;;  %6490 = vmatprep.subr.bf16.mxu0 %v9456_v13 }
0x1635   : > { %6438 = vmatpush1.bf16.msra.mxu1 %v9453_v57  ;;  %6491 = vmatpush1.bf16.msra.mxu0 %v9455_v38 }
0x1636   : > { %9887 = vmatprep.subr.bf16.mxu1 %v10642_v15  ;;  %9915 = vmatprep.subr.bf16.mxu0 %v10643_v6 }
0x1638   : > { %6456 = vmatmul.mubr.bf16.vlgmr.msra.gmra.mrb[124].mxu1 %v12738_v43  ;;  %6509 = vmatmul.mubr.bf16.vlgmr.msra.gmra.mrb[116].mxu0 %v12738_v43  ;;  %v10655_v43 = vld [vmem:[#allocation12 + $0x4d8] sm:$0xff]  }
0x1639   : > { %6465 = vmatprep.mubr.bf16.mxu1 %v11216_v0  ;;  %6518 = vmatprep.mubr.bf16.mxu0 %v11216_v0  ;;  %v10656_v0 = vld [vmem:[#allocation12 + $0x418] sm:$0xff]  }
0x163a   : > { %9888 = vmatpush3.bf16.msra.mxu1 %v10644_v4  ;;  %9916 = vmatpush3.bf16.msra.mxu0 %v10645_v12 }
0x163b   : > { %9889 = vmatprep.subr.bf16.mxu1 %v10646_v32  ;;  %9917 = vmatprep.subr.bf16.mxu0 %v10647_v34 }
0x163e   : > { %9890 = vmatpush3.bf16.msra.mxu1 %v10648_v11  ;;  %9918 = vmatpush3.bf16.msra.mxu0 %v10649_v19 }
0x163f   : > { %9891 = vmatprep.subr.bf16.mxu1 %v10650_v40  ;;  %9919 = vmatprep.subr.bf16.mxu0 %v10651_v16 }
0x1640   : > { %6466 = vmatmul.mubr.bf16.gmra.mrb[128].mxu1 %v12775_v42  ;;  %6519 = vmatmul.mubr.bf16.gmra.mrb[120].mxu0 %v12775_v42  ;;  %v10665_v42 = vld [vmem:[#allocation12 + $0x4a8] sm:$0xff]  }
0x1642   : > { %9892 = vmatpush3.bf16.msra.mxu1 %v10652_v56  ;;  %9920 = vmatpush3.bf16.msra.mxu0 %v10653_v1 }
0x1643   : > { %9893 = vmatprep.subr.bf16.mxu1 %v10654_v24  ;;  %9921 = vmatprep.subr.bf16.mxu0 %v10655_v43 }
0x1646   : > { %9894 = vmatpush3.bf16.msra.mxu1 %v10656_v0  ;;  %9922 = vmatpush3.bf16.msra.mxu0 %v10657_v48 }
0x1647   : > { %9895 = vmatprep.subr.bf16.mxu1 %v10658_v51  ;;  %9923 = vmatprep.subr.bf16.mxu0 %v10659_v20  ;;  %v10676_v20 = vld [vmem:[#allocation12 + $0x500] sm:$0xff]  }
0x164a   : > { %9896 = vmatpush3.bf16.msra.mxu1 %v10660_v23  ;;  %9924 = vmatpush3.bf16.msra.mxu0 %v10661_v29  ;;  %v10677_v23 = vld [vmem:[#allocation12 + $0x580] sm:$0xff]  }
0x164b   : > { %9897 = vmatprep.subr.bf16.mxu1 %v10662_v59  ;;  %9925 = vmatprep.subr.bf16.mxu0 %v10663_v30 }
0x164e   : > { %9898 = vmatpush3.bf16.msra.mxu1 %v10664_v53  ;;  %9926 = vmatpush3.bf16.msra.mxu0 %v10665_v42  ;;  %v10678_v42 = vld [vmem:[#allocation12 + $0x548] sm:$0xff]  }
0x164f   : > { %9899 = vmatprep.subr.bf16.mxu1 %v10666_v41  ;;  %9927 = vmatprep.subr.bf16.mxu0 %v10667_v22  ;;  %v10679_v41 = vld [vmem:[#allocation12 + $0x5c8] sm:$0xff]  }
0x1652   : > { %9900 = vmatpush3.bf16.msra.mxu1 %v10668_v55  ;;  %9928 = vmatpush3.bf16.msra.mxu0 %v10669_v58 }
0x1653   : > { %9901 = vmatprep.subr.bf16.mxu1 %v10670_v37  ;;  %9929 = vmatprep.subr.bf16.mxu0 %v10671_v63 }
0x1656   : > { %9902 = vmatpush3.bf16.msra.mxu1 %v10672_v39  ;;  %9930 = vmatpush3.bf16.msra.mxu0 %v10673_v35 }
0x1657   : > { %9943 = vmatprep.subr.bf16.mxu1 %v10674_v62  ;;  %9971 = vmatprep.subr.bf16.mxu0 %v10675_v46 }
0x16ab   : > { %v6139_v49 = vpop.f32.mrb[100].mxu1  ;;  %v6192_v60 = vpop.f32.mrb[92].mxu0 }
0x16ac   : > { %v6140_v9 = vadd.f32 %v6139_v49, %v5388_v33  ;;  %v6193_v7 = vadd.f32 %v6192_v60, %v5396_v50  ;;  %v6141_v21 = vpop.f32.mrb[101].mxu1  ;;  %v6194_v52 = vpop.f32.mrb[93].mxu0  ;;  %v10680_v60 = vld [vmem:[#allocation12 + $0x508] sm:$0xff]  }
0x16ad   : > { %v6142_v54 = vadd.f32 %v6141_v21, %v5392_v3  ;;  %v6195_v10 = vadd.f32 %v6194_v52, %v5400_v5  ;;  %v6143_v26 = vpop.f32.mrb[102].mxu1  ;;  %v6196_v28 = vpop.f32.mrb[94].mxu0 }
0x16ae   : > { %v6144_v13 = vadd.f32 %v6143_v26, %v5388_v33  ;;  %v6197_v57 = vadd.f32 %v6196_v28, %v5396_v50  ;;  %v6145_v38 = vpop.f32.mrb[103].mxu1  ;;  %v6198_v15 = vpop.f32.mrb[95].mxu0  ;;  %v6529_v12 = vmax.f32 %v6140_v9, 0.0  ;;  %v6531_v32 = vmax.f32 %v6193_v7, 0.0  ;;  %v10681_v9 = vld [vmem:[#allocation12 + $0x588] sm:$0xff]   ;;  %v10683_v26 = vld [vmem:[#allocation12 + $0x5d0] sm:$0xff]  }
0x16af   : > { %v6146_v6 = vadd.f32 %v6145_v38, %v5392_v3  ;;  %v6199_v4 = vadd.f32 %v6198_v15, %v5400_v5  ;;  %v6530_v19 = vmax.f32 %v6142_v54, 0.0  ;;  %v6532_v40 = vmax.f32 %v6195_v10, 0.0  ;;  %v10682_v10 = vld [vmem:[#allocation12 + $0x550] sm:$0xff]  }
0x16b0   : > { %v6545_v34 = vmax.f32 %v6144_v13, 0.0  ;;  %v6547_v11 = vmax.f32 %v6197_v57, 0.0  ;;  %v10684_v15 = vld [vmem:[#allocation12 + $0x510] sm:$0xff]  }
0x16b1   : > { %v6546_v16 = vmax.f32 %v6146_v6, 0.0  ;;  %v6548_v56 = vmax.f32 %v6199_v4, 0.0  ;;  %v10685_v6 = vld [vmem:[#allocation12 + $0x590] sm:$0xff]   ;;  %v10686_v4 = vld [vmem:[#allocation12 + $0x558] sm:$0xff]  }
0x16b2   : > { %v6593_v1 = vpack.c.bf16 %v6545_v34, %v6529_v12  ;;  %v6595_v24 = vpack.c.bf16 %v6547_v11, %v6531_v32  ;;  %v10687_v12 = vld [vmem:[#allocation12 + $0x5d8] sm:$0xff]   ;;  %v10690_v11 = vld [vmem:[#allocation12 + $0x560] sm:$0xff]  }
0x16b3   : > { %v6594_v43 = vpack.c.bf16 %v6546_v16, %v6530_v19  ;;  %v6596_v0 = vpack.c.bf16 %v6548_v56, %v6532_v40  ;;  %v6149_v48 = vpop.f32.mrb[104].mxu1  ;;  %v6202_v51 = vpop.f32.mrb[96].mxu0  ;;  %v10688_v32 = vld [vmem:[#allocation12 + $0x518] sm:$0xff]   ;;  %v10691_v19 = vld [vmem:[#allocation12 + $0x5e0] sm:$0xff]   ;;  %v10694_v56 = vld [vmem:[#allocation12 + $0x568] sm:$0xff]  }
0x16b4   : > { %v6150_v29 = vadd.f32 %v6149_v48, %v5388_v33  ;;  %v6203_v59 = vadd.f32 %v6202_v51, %v5396_v50  ;;  %v6151_v30 = vpop.f32.mrb[105].mxu1  ;;  %v6204_v53 = vpop.f32.mrb[97].mxu0  ;;  %v10689_v34 = vld [vmem:[#allocation12 + $0x598] sm:$0xff]   ;;  %v10692_v40 = vld [vmem:[#allocation12 + $0x520] sm:$0xff]   ;;  %v13062_v48 = vrot.slane %v13046_v31, %v12270_v8  ;;  %v10698_v51 = vld [vmem:[#allocation12 + $0x570] sm:$0xff]  }
0x16b5   : > { %v6152_v22 = vadd.f32 %v6151_v30, %v5392_v3  ;;  %v6205_v55 = vadd.f32 %v6204_v53, %v5400_v5  ;;  %v6153_v58 = vpop.f32.mrb[106].mxu1  ;;  %v6206_v37 = vpop.f32.mrb[98].mxu0  ;;  %7690 = vmatprep.mubr.bf16.mxu1 %v6594_v43  ;;  %7739 = vmatprep.mubr.bf16.mxu0 %v6596_v0  ;;  %v10693_v16 = vld [vmem:[#allocation12 + $0x5a0] sm:$0xff]   ;;  %v10697_v43 = vld [vmem:[#allocation12 + $0x5a8] sm:$0xff]   ;;  %v13058_v0 = vrot.slane %v13046_v31, %v12267_v44  ;;  %v10700_v53 = vld [vmem:[#allocation12 + $0x530] sm:$0xff]  }
0x16b6   : > { %v6154_v63 = vadd.f32 %v6153_v58, %v5388_v33  ;;  %v6207_v39 = vadd.f32 %v6206_v37, %v5396_v50  ;;  %v6155_v35 = vpop.f32.mrb[107].mxu1  ;;  %v6208_v62 = vpop.f32.mrb[99].mxu0  ;;  %7691 = vmatmul.mubr.bf16.vlgmr.msra.gmra.mrb[132].mxu1 %v6593_v1  ;;  %7740 = vmatmul.mubr.bf16.vlgmr.msra.gmra.mrb[124].mxu0 %v6595_v24  ;;  %v6561_v7 = vmax.f32 %v6150_v29, 0.0  ;;  %v6563_v21 = vmax.f32 %v6203_v59, 0.0  ;;  %v10695_v1 = vld [vmem:[#allocation12 + $0x5e8] sm:$0xff]   ;;  %v10702_v37 = vld [vmem:[#allocation12 + $0x578] sm:$0xff]  }
0x16b7   : > { %v6156_v46 = vadd.f32 %v6155_v35, %v5392_v3  ;;  %v6209_v49 = vadd.f32 %v6208_v62, %v5400_v5  ;;  %9944 = vmatpush3.bf16.msra.mxu1 %v10676_v20  ;;  %9972 = vmatpush3.bf16.msra.mxu0 %v10677_v23  ;;  %v6562_v33 = vmax.f32 %v6152_v22, 0.0  ;;  %v6564_v50 = vmax.f32 %v6205_v55, 0.0  ;;  %v10696_v24 = vld [vmem:[#allocation12 + $0x528] sm:$0xff]   ;;  %v10699_v20 = vld [vmem:[#allocation12 + $0x5f0] sm:$0xff]  }
0x16b8   : > { %v6577_v52 = vmax.f32 %v6154_v63, 0.0  ;;  %v6579_v54 = vmax.f32 %v6207_v39, 0.0  ;;  %9945 = vmatprep.subr.bf16.mxu1 %v10678_v42  ;;  %9973 = vmatprep.subr.bf16.mxu0 %v10679_v41  ;;  %v13066_v23 = vrot.slane %v13046_v31, %v12273_v45  ;;  %v13070_v29 = vrot.slane %v13046_v31, %v12276_v14  ;;  %v10701_v42 = vld [vmem:[#allocation12 + $0x5b0] sm:$0xff]   ;;  %v10703_v63 = vld [vmem:[#allocation12 + $0x5f8] sm:$0xff]  }
0x16b9   : > { %v6578_v28 = vmax.f32 %v6156_v46, 0.0  ;;  %v6580_v13 = vmax.f32 %v6209_v49, 0.0 }
0x16ba   : > { %v6609_v57 = vpack.c.bf16 %v6577_v52, %v6561_v7  ;;  %v6611_v38 = vpack.c.bf16 %v6579_v54, %v6563_v21  ;;  %v10704_v52 = vld [vmem:[#allocation12 + $0x538] sm:$0xff]  }
0x16bb   : > { %v6610_v3 = vpack.c.bf16 %v6578_v28, %v6562_v33  ;;  %v6612_v5 = vpack.c.bf16 %v6580_v13, %v6564_v50  ;;  %9946 = vmatpush3.bf16.msra.mxu1 %v10680_v60  ;;  %9974 = vmatpush3.bf16.msra.mxu0 %v10681_v9  ;;  %v10705_v54 = vld [vmem:[#allocation12 + $0x5b8] sm:$0xff]   ;;  %v10706_v28 = vld [vmem:[#allocation12 + $0x640] sm:$0xff]  }
0x16bc   : > { %9947 = vmatprep.subr.bf16.mxu1 %v10682_v10  ;;  %9975 = vmatprep.subr.bf16.mxu0 %v10683_v26  ;;  %v10707_v13 = vld [vmem:[#allocation12 + $0x6c0] sm:$0xff]  }
0x16bd   : > { %7698 = vmatprep.mubr.bf16.mxu1 %v6610_v3  ;;  %7747 = vmatprep.mubr.bf16.mxu0 %v6612_v5 }
0x16be   : > { %7699 = vmatmul.mubr.bf16.gmra.mrb[136].mxu1 %v6609_v57  ;;  %7748 = vmatmul.mubr.bf16.gmra.mrb[128].mxu0 %v6611_v38 }
0x16bf   : > { %9948 = vmatpush3.bf16.msra.mxu1 %v10684_v15  ;;  %9976 = vmatpush3.bf16.msra.mxu0 %v10685_v6 }
0x16c0   : > { %9949 = vmatprep.subr.bf16.mxu1 %v10686_v4  ;;  %9977 = vmatprep.subr.bf16.mxu0 %v10687_v12 }
0x16c3   : > { %9950 = vmatpush3.bf16.msra.mxu1 %v10688_v32  ;;  %9978 = vmatpush3.bf16.msra.mxu0 %v10689_v34 }
0x16c4   : > { %9951 = vmatprep.subr.bf16.mxu1 %v10690_v11  ;;  %9979 = vmatprep.subr.bf16.mxu0 %v10691_v19  ;;  %v10708_v11 = vld [vmem:[#allocation12 + $0x600] sm:$0xff]  }
0x16c5   : > { %v10709_v19 = vld [vmem:[#allocation12 + $0x680] sm:$0xff]  }
0x16c7   : > { %9952 = vmatpush3.bf16.msra.mxu1 %v10692_v40  ;;  %9980 = vmatpush3.bf16.msra.mxu0 %v10693_v16 }
0x16c8   : > { %9953 = vmatprep.subr.bf16.mxu1 %v10694_v56  ;;  %9981 = vmatprep.subr.bf16.mxu0 %v10695_v1 }
0x16cb   : > { %v6245_v59 = vpop.f32.mrb[108].mxu1  ;;  %v6298_v30 = vpop.f32.mrb[100].mxu0  ;;  %9954 = vmatpush3.bf16.msra.mxu1 %v10696_v24  ;;  %9982 = vmatpush3.bf16.msra.mxu0 %v10697_v43  ;;  %v10710_v24 = vld [vmem:[#allocation12 + $0x648] sm:$0xff]  }
0x16cc   : > { %v6246_v41 = vadd.f32 %v6245_v59, %v13058_v0  ;;  %v6299_v22 = vadd.f32 %v6298_v30, %v13062_v48  ;;  %v6247_v55 = vpop.f32.mrb[109].mxu1  ;;  %v6300_v58 = vpop.f32.mrb[101].mxu0  ;;  %9955 = vmatprep.subr.bf16.mxu1 %v10698_v51  ;;  %9983 = vmatprep.subr.bf16.mxu0 %v10699_v20  ;;  %v10711_v43 = vld [vmem:[#allocation12 + $0x6c8] sm:$0xff]  }
0x16cd   : > { %v6248_v39 = vadd.f32 %v6247_v55, %v13066_v23  ;;  %v6301_v31 = vadd.f32 %v6300_v58, %v13070_v29  ;;  %v6249_v35 = vpop.f32.mrb[110].mxu1  ;;  %v6302_v62 = vpop.f32.mrb[102].mxu0 }
0x16ce   : > { %v6250_v46 = vadd.f32 %v6249_v35, %v13058_v0  ;;  %v6303_v49 = vadd.f32 %v6302_v62, %v13062_v48  ;;  %v6251_v60 = vpop.f32.mrb[111].mxu1  ;;  %v6304_v9 = vpop.f32.mrb[103].mxu0  ;;  %v6533_v10 = vmax.f32 %v6246_v41, 0.0  ;;  %v6535_v26 = vmax.f32 %v6299_v22, 0.0 }
0x16cf   : > { %v6252_v7 = vadd.f32 %v6251_v60, %v13066_v23  ;;  %v6305_v21 = vadd.f32 %v6304_v9, %v13070_v29  ;;  %9956 = vmatpush3.bf16.msra.mxu1 %v10700_v53  ;;  %9984 = vmatpush3.bf16.msra.mxu0 %v10701_v42  ;;  %v6534_v57 = vmax.f32 %v6248_v39, 0.0  ;;  %v6536_v38 = vmax.f32 %v6301_v31, 0.0 }
0x16d0   : > { %v6549_v33 = vmax.f32 %v6250_v46, 0.0  ;;  %v6551_v50 = vmax.f32 %v6303_v49, 0.0  ;;  %9957 = vmatprep.subr.bf16.mxu1 %v10702_v37  ;;  %9985 = vmatprep.subr.bf16.mxu0 %v10703_v63  ;;  %v10712_v37 = vld [vmem:[#allocation12 + $0x608] sm:$0xff]  }
0x16d1   : > { %v6550_v3 = vmax.f32 %v6252_v7, 0.0  ;;  %v6552_v5 = vmax.f32 %v6305_v21, 0.0  ;;  %v10713_v63 = vld [vmem:[#allocation12 + $0x688] sm:$0xff]  }
0x16d2   : > { %v6597_v15 = vpack.c.bf16 %v6549_v33, %v6533_v10  ;;  %v6599_v6 = vpack.c.bf16 %v6551_v50, %v6535_v26  ;;  %v10718_v10 = vld [vmem:[#allocation12 + $0x658] sm:$0xff]  }
0x16d3   : > { %v6598_v4 = vpack.c.bf16 %v6550_v3, %v6534_v57  ;;  %v6600_v12 = vpack.c.bf16 %v6552_v5, %v6536_v38  ;;  %v6255_v32 = vpop.f32.mrb[112].mxu1  ;;  %v6308_v34 = vpop.f32.mrb[104].mxu0  ;;  %9958 = vmatpush3.bf16.msra.mxu1 %v10704_v52  ;;  %9986 = vmatpush3.bf16.msra.mxu0 %v10705_v54  ;;  %v10716_v52 = vld [vmem:[#allocation12 + $0x610] sm:$0xff]   ;;  %v10719_v26 = vld [vmem:[#allocation12 + $0x6d8] sm:$0xff]   ;;  %v10724_v57 = vld [vmem:[#allocation12 + $0x620] sm:$0xff]  }
0x16d4   : > { %v6256_v40 = vadd.f32 %v6255_v32, %v13058_v0  ;;  %v6309_v16 = vadd.f32 %v6308_v34, %v13062_v48  ;;  %v6257_v56 = vpop.f32.mrb[113].mxu1  ;;  %v6310_v1 = vpop.f32.mrb[105].mxu0  ;;  %9999 = vmatprep.subr.bf16.mxu1 %v10706_v28  ;;  %10027 = vmatprep.subr.bf16.mxu0 %v10707_v13  ;;  %v10717_v54 = vld [vmem:[#allocation12 + $0x690] sm:$0xff]   ;;  %v10720_v33 = vld [vmem:[#allocation12 + $0x618] sm:$0xff]   ;;  %v10722_v28 = vld [vmem:[#allocation12 + $0x660] sm:$0xff]  }
0x16d5   : > { %v6258_v51 = vadd.f32 %v6257_v56, %v13066_v23  ;;  %v6311_v20 = vadd.f32 %v6310_v1, %v13070_v29  ;;  %v6259_v59 = vpop.f32.mrb[114].mxu1  ;;  %v6312_v30 = vpop.f32.mrb[106].mxu0  ;;  %7788 = vmatprep.mubr.bf16.mxu1 %v6598_v4  ;;  %7837 = vmatprep.mubr.bf16.mxu0 %v6600_v12  ;;  %v10721_v50 = vld [vmem:[#allocation12 + $0x698] sm:$0xff]   ;;  %v10723_v13 = vld [vmem:[#allocation12 + $0x6e0] sm:$0xff]   ;;  %v10726_v3 = vld [vmem:[#allocation12 + $0x668] sm:$0xff]  }
0x16d6   : > { %v6260_v53 = vadd.f32 %v6259_v59, %v13058_v0  ;;  %v6313_v42 = vadd.f32 %v6312_v30, %v13062_v48  ;;  %v6261_v41 = vpop.f32.mrb[115].mxu1  ;;  %v6314_v22 = vpop.f32.mrb[107].mxu0  ;;  %7789 = vmatmul.mubr.bf16.vlgmr.msra.gmra.mrb[140].mxu1 %v6597_v15  ;;  %7838 = vmatmul.mubr.bf16.vlgmr.msra.gmra.mrb[132].mxu0 %v6599_v6  ;;  %v6565_v39 = vmax.f32 %v6256_v40, 0.0  ;;  %v6567_v31 = vmax.f32 %v6309_v16, 0.0  ;;  %v10714_v0 = vld [vmem:[#allocation12 + $0x650] sm:$0xff]   ;;  %v10725_v38 = vld [vmem:[#allocation12 + $0x6a0] sm:$0xff]  }
0x16d7   : > { %v6262_v55 = vadd.f32 %v6261_v41, %v13066_v23  ;;  %v6315_v58 = vadd.f32 %v6314_v22, %v13070_v29  ;;  %10000 = vmatpush3.bf16.msra.mxu1 %v10708_v11  ;;  %10028 = vmatpush3.bf16.msra.mxu0 %v10709_v19  ;;  %v10715_v48 = vld [vmem:[#allocation12 + $0x6d0] sm:$0xff]   ;;  %v6566_v46 = vmax.f32 %v6258_v51, 0.0  ;;  %v6568_v49 = vmax.f32 %v6311_v20, 0.0  ;;  %v10727_v5 = vld [vmem:[#allocation12 + $0x6e8] sm:$0xff]   ;;  %v10735_v59 = vld [vmem:[#allocation12 + $0x6f8] sm:$0xff]  }
0x16d8   : > { %v6581_v35 = vmax.f32 %v6260_v53, 0.0  ;;  %v6583_v62 = vmax.f32 %v6313_v42, 0.0  ;;  %10001 = vmatprep.subr.bf16.mxu1 %v10710_v24  ;;  %10029 = vmatprep.subr.bf16.mxu0 %v10711_v43  ;;  %v13091_v15 = vld [vmem:[%s13250_s27 + $0x18] sm:$0xff] }
0x16d9   : > { %v6582_v60 = vmax.f32 %v6262_v55, 0.0  ;;  %v6584_v9 = vmax.f32 %v6315_v58, 0.0  ;;  %v10728_v6 = vld [vmem:[#allocation12 + $0x628] sm:$0xff]   ;;  %v13095_v12 = vrot.slane %v13091_v15, %v11642_v25  ;;  %v13099_v32 = vrot.slane %v13091_v15, %v11726_v17  ;;  %v10730_v34 = vld [vmem:[#allocation12 + $0x670] sm:$0xff]  }
0x16da   : > { %v6613_v7 = vpack.c.bf16 %v6581_v35, %v6565_v39  ;;  %v6615_v23 = vpack.c.bf16 %v6583_v62, %v6567_v31  ;;  %v10729_v4 = vld [vmem:[#allocation12 + $0x6a8] sm:$0xff]   ;;  %v10731_v11 = vld [vmem:[#allocation12 + $0x6f0] sm:$0xff]   ;;  %v13103_v19 = vrot.slane %v13091_v15, %v11647_v27  ;;  %v13107_v40 = vrot.slane %v13091_v15, %v12256_v2  ;;  %v10734_v27 = vld [vmem:[#allocation12 + $0x678] sm:$0xff]  }
0x16db   : > { %v6614_v21 = vpack.c.bf16 %v6582_v60, %v6566_v46  ;;  %v6616_v29 = vpack.c.bf16 %v6584_v9, %v6568_v49  ;;  %10002 = vmatpush3.bf16.msra.mxu1 %v10712_v37  ;;  %10030 = vmatpush3.bf16.msra.mxu0 %v10713_v63  ;;  %v10732_v1 = vld [vmem:[#allocation12 + $0x630] sm:$0xff]   ;;  %v10736_v39 = vld [vmem:[#allocation12 + $0x638] sm:$0xff]   ;;  %v10738_v46 = vld [vmem:[#allocation12 + $0x740] sm:$0xff]  }
0x16dc   : > { %10003 = vmatprep.subr.bf16.mxu1 %v10714_v0  ;;  %10031 = vmatprep.subr.bf16.mxu0 %v10715_v48  ;;  %v10733_v24 = vld [vmem:[#allocation12 + $0x6b0] sm:$0xff]   ;;  %v10737_v31 = vld [vmem:[#allocation12 + $0x6b8] sm:$0xff]   ;;  %v10739_v49 = vld [vmem:[#allocation12 + $0x7c0] sm:$0xff]  }
0x16dd   : > { %7796 = vmatprep.mubr.bf16.mxu1 %v6614_v21  ;;  %7845 = vmatprep.mubr.bf16.mxu0 %v6616_v29 }
0x16de   : > { %7797 = vmatmul.mubr.bf16.gmra.mrb[144].mxu1 %v6613_v7  ;;  %7846 = vmatmul.mubr.bf16.gmra.mrb[136].mxu0 %v6615_v23 }
0x16df   : > { %10004 = vmatpush3.bf16.msra.mxu1 %v10716_v52  ;;  %10032 = vmatpush3.bf16.msra.mxu0 %v10717_v54 }
0x16e0   : > { %10005 = vmatprep.subr.bf16.mxu1 %v10718_v10  ;;  %10033 = vmatprep.subr.bf16.mxu0 %v10719_v26 }
0x16e3   : > { %10006 = vmatpush3.bf16.msra.mxu1 %v10720_v33  ;;  %10034 = vmatpush3.bf16.msra.mxu0 %v10721_v50  ;;  %v10740_v33 = vld [vmem:[#allocation12 + $0x700] sm:$0xff]  }
0x16e4   : > { %10007 = vmatprep.subr.bf16.mxu1 %v10722_v28  ;;  %10035 = vmatprep.subr.bf16.mxu0 %v10723_v13  ;;  %v10741_v50 = vld [vmem:[#allocation12 + $0x780] sm:$0xff]  }
0x16e7   : > { %10008 = vmatpush3.bf16.msra.mxu1 %v10724_v57  ;;  %10036 = vmatpush3.bf16.msra.mxu0 %v10725_v38 }
0x16e8   : > { %10009 = vmatprep.subr.bf16.mxu1 %v10726_v3  ;;  %10037 = vmatprep.subr.bf16.mxu0 %v10727_v5  ;;  %v10742_v3 = vld [vmem:[#allocation12 + $0x748] sm:$0xff]  }
0x16e9   : > { %v10743_v5 = vld [vmem:[#allocation12 + $0x7c8] sm:$0xff]  }
0x16eb   : > { %v6351_v16 = vpop.f32.mrb[116].mxu1  ;;  %v6404_v56 = vpop.f32.mrb[108].mxu0  ;;  %10010 = vmatpush3.bf16.msra.mxu1 %v10728_v6  ;;  %10038 = vmatpush3.bf16.msra.mxu0 %v10729_v4 }
0x16ec   : > { %v6352_v43 = vadd.f32 %v6351_v16, %v13095_v12  ;;  %v6405_v17 = vadd.f32 %v6404_v56, %v13099_v32  ;;  %v6353_v51 = vpop.f32.mrb[117].mxu1  ;;  %v6406_v20 = vpop.f32.mrb[109].mxu0  ;;  %10011 = vmatprep.subr.bf16.mxu1 %v10730_v34  ;;  %10039 = vmatprep.subr.bf16.mxu0 %v10731_v11 }
0x16ed   : > { %v6354_v30 = vadd.f32 %v6353_v51, %v13103_v19  ;;  %v6407_v2 = vadd.f32 %v6406_v20, %v13107_v40  ;;  %v6355_v53 = vpop.f32.mrb[118].mxu1  ;;  %v6408_v42 = vpop.f32.mrb[110].mxu0  ;;  %v10744_v51 = vld [vmem:[#allocation12 + $0x708] sm:$0xff]  }
0x16ee   : > { %v6356_v41 = vadd.f32 %v6355_v53, %v13095_v12  ;;  %v6409_v22 = vadd.f32 %v6408_v42, %v13099_v32  ;;  %v6357_v55 = vpop.f32.mrb[119].mxu1  ;;  %v6410_v58 = vpop.f32.mrb[111].mxu0  ;;  %v6537_v35 = vmax.f32 %v6352_v43, 0.0  ;;  %v6539_v62 = vmax.f32 %v6405_v17, 0.0  ;;  %v10745_v20 = vld [vmem:[#allocation12 + $0x788] sm:$0xff]  }
0x16ef   : > { %v6358_v37 = vadd.f32 %v6357_v55, %v13103_v19  ;;  %v6411_v63 = vadd.f32 %v6410_v58, %v13107_v40  ;;  %10012 = vmatpush3.bf16.msra.mxu1 %v10732_v1  ;;  %10040 = vmatpush3.bf16.msra.mxu0 %v10733_v24  ;;  %v6538_v60 = vmax.f32 %v6354_v30, 0.0  ;;  %v6540_v9 = vmax.f32 %v6407_v2, 0.0 }
0x16f0   : > { %v6553_v0 = vmax.f32 %v6356_v41, 0.0  ;;  %v6555_v48 = vmax.f32 %v6409_v22, 0.0  ;;  %10013 = vmatprep.subr.bf16.mxu1 %v10734_v27  ;;  %10041 = vmatprep.subr.bf16.mxu0 %v10735_v59 }
0x16f1   : > { %v6554_v7 = vmax.f32 %v6358_v37, 0.0  ;;  %v6556_v23 = vmax.f32 %v6411_v63, 0.0  ;;  %v10748_v37 = vld [vmem:[#allocation12 + $0x710] sm:$0xff]  }
0x16f2   : > { %v6601_v21 = vpack.c.bf16 %v6553_v0, %v6537_v35  ;;  %v6603_v29 = vpack.c.bf16 %v6555_v48, %v6539_v62  ;;  %v10749_v63 = vld [vmem:[#allocation12 + $0x790] sm:$0xff]   ;;  %v10752_v35 = vld [vmem:[#allocation12 + $0x718] sm:$0xff]   ;;  %v10754_v0 = vld [vmem:[#allocation12 + $0x760] sm:$0xff]  }
0x16f3   : > { %v6602_v52 = vpack.c.bf16 %v6554_v7, %v6538_v60  ;;  %v6604_v54 = vpack.c.bf16 %v6556_v23, %v6540_v9  ;;  %v6361_v10 = vpop.f32.mrb[120].mxu1  ;;  %v6414_v26 = vpop.f32.mrb[112].mxu0  ;;  %10014 = vmatpush3.bf16.msra.mxu1 %v10736_v39  ;;  %10042 = vmatpush3.bf16.msra.mxu0 %v10737_v31  ;;  %v10750_v39 = vld [vmem:[#allocation12 + $0x758] sm:$0xff]   ;;  %v10755_v48 = vld [vmem:[#allocation12 + $0x7e0] sm:$0xff]   ;;  %v10758_v60 = vld [vmem:[#allocation12 + $0x768] sm:$0xff]  }
0x16f4   : > { %v6362_v28 = vadd.f32 %v6361_v10, %v13095_v12  ;;  %v6415_v13 = vadd.f32 %v6414_v26, %v13099_v32  ;;  %v6363_v57 = vpop.f32.mrb[121].mxu1  ;;  %v6416_v38 = vpop.f32.mrb[113].mxu0  ;;  %10055 = vmatprep.subr.bf16.mxu1 %v10738_v46  ;;  %10083 = vmatprep.subr.bf16.mxu0 %v10739_v49  ;;  %v10751_v31 = vld [vmem:[#allocation12 + $0x7d8] sm:$0xff]   ;;  %v10756_v46 = vld [vmem:[#allocation12 + $0x720] sm:$0xff]   ;;  %v10759_v9 = vld [vmem:[#allocation12 + $0x7e8] sm:$0xff]   ;;  %v13131_v10 = vrot.slane %v13091_v15, %v12273_v45 }
0x16f5   : > { %v6364_v6 = vadd.f32 %v6363_v57, %v13103_v19  ;;  %v6417_v4 = vadd.f32 %v6416_v38, %v13107_v40  ;;  %v6365_v34 = vpop.f32.mrb[122].mxu1  ;;  %v6418_v11 = vpop.f32.mrb[114].mxu0  ;;  %7886 = vmatprep.mubr.bf16.mxu1 %v6602_v52  ;;  %7935 = vmatprep.mubr.bf16.mxu0 %v6604_v54  ;;  %v10753_v62 = vld [vmem:[#allocation12 + $0x798] sm:$0xff]   ;;  %v10757_v49 = vld [vmem:[#allocation12 + $0x7a0] sm:$0xff]   ;;  %v10760_v7 = vld [vmem:[#allocation12 + $0x728] sm:$0xff]   ;;  %v13135_v26 = vrot.slane %v13091_v15, %v12276_v14 }
0x16f6   : > { %v6366_v16 = vadd.f32 %v6365_v34, %v13095_v12  ;;  %v6419_v56 = vadd.f32 %v6418_v11, %v13099_v32  ;;  %v6367_v1 = vpop.f32.mrb[123].mxu1  ;;  %v6420_v24 = vpop.f32.mrb[115].mxu0  ;;  %7887 = vmatmul.mubr.bf16.vlgmr.msra.gmra.mrb[148].mxu1 %v6601_v21  ;;  %7936 = vmatmul.mubr.bf16.vlgmr.msra.gmra.mrb[140].mxu0 %v6603_v29  ;;  %v6569_v27 = vmax.f32 %v6362_v28, 0.0  ;;  %v6571_v59 = vmax.f32 %v6415_v13, 0.0  ;;  %v10746_v12 = vld [vmem:[#allocation12 + $0x750] sm:$0xff]   ;;  %v10761_v23 = vld [vmem:[#allocation12 + $0x7a8] sm:$0xff]  }
0x16f7   : > { %v6368_v43 = vadd.f32 %v6367_v1, %v13103_v19  ;;  %v6421_v17 = vadd.f32 %v6420_v24, %v13107_v40  ;;  %10056 = vmatpush3.bf16.msra.mxu1 %v10740_v33  ;;  %10084 = vmatpush3.bf16.msra.mxu0 %v10741_v50  ;;  %v10747_v32 = vld [vmem:[#allocation12 + $0x7d0] sm:$0xff]   ;;  %v6570_v53 = vmax.f32 %v6364_v6, 0.0  ;;  %v6572_v42 = vmax.f32 %v6417_v4, 0.0  ;;  %v10768_v24 = vld [vmem:[#allocation12 + $0x738] sm:$0xff]  }
0x16f8   : > { %v6585_v30 = vmax.f32 %v6366_v16, 0.0  ;;  %v6587_v2 = vmax.f32 %v6419_v56, 0.0  ;;  %10057 = vmatprep.subr.bf16.mxu1 %v10742_v3  ;;  %10085 = vmatprep.subr.bf16.mxu0 %v10743_v5  ;;  %v5436_v21 = vrot.slane %v13091_v15, %v12267_v44  ;;  %v5444_v29 = vrot.slane %v13091_v15, %v12270_v8  ;;  %v10762_v52 = vld [vmem:[#allocation12 + $0x770] sm:$0xff]   ;;  %v10766_v3 = vld [vmem:[#allocation12 + $0x778] sm:$0xff]  }
0x16f9   : > { %v6586_v41 = vmax.f32 %v6368_v43, 0.0  ;;  %v6588_v22 = vmax.f32 %v6421_v17, 0.0  ;;  %v10763_v54 = vld [vmem:[#allocation12 + $0x7f0] sm:$0xff]   ;;  %v10767_v5 = vld [vmem:[#allocation12 + $0x7f8] sm:$0xff]  }
0x16fa   : > { %v6617_v55 = vpack.c.bf16 %v6585_v30, %v6569_v27  ;;  %v6619_v19 = vpack.c.bf16 %v6587_v2, %v6571_v59  ;;  %v10764_v28 = vld [vmem:[#allocation12 + $0x730] sm:$0xff]   ;;  %v10769_v43 = vld [vmem:[#allocation12 + $0x7b8] sm:$0xff]  }
0x16fb   : > { %v6618_v58 = vpack.c.bf16 %v6586_v41, %v6570_v53  ;;  %v6620_v40 = vpack.c.bf16 %v6588_v22, %v6572_v42  ;;  %10058 = vmatpush3.bf16.msra.mxu1 %v10744_v51  ;;  %10086 = vmatpush3.bf16.msra.mxu0 %v10745_v20  ;;  %v10765_v13 = vld [vmem:[#allocation12 + $0x7b0] sm:$0xff]  }
0x16fc   : > { %10059 = vmatprep.subr.bf16.mxu1 %v10746_v12  ;;  %10087 = vmatprep.subr.bf16.mxu0 %v10747_v32 }
0x16fd   : > { %7894 = vmatprep.mubr.bf16.mxu1 %v6618_v58  ;;  %7943 = vmatprep.mubr.bf16.mxu0 %v6620_v40 }
0x16fe   : > { %7895 = vmatmul.mubr.bf16.gmra.mrb[152].mxu1 %v6617_v55  ;;  %7944 = vmatmul.mubr.bf16.gmra.mrb[144].mxu0 %v6619_v19 }
0x16ff   : > { %10060 = vmatpush3.bf16.msra.mxu1 %v10748_v37  ;;  %10088 = vmatpush3.bf16.msra.mxu0 %v10749_v63 }
0x1700   : > { %10061 = vmatprep.subr.bf16.mxu1 %v10750_v39  ;;  %10089 = vmatprep.subr.bf16.mxu0 %v10751_v31 }
0x1703   : > { %10062 = vmatpush3.bf16.msra.mxu1 %v10752_v35  ;;  %10090 = vmatpush3.bf16.msra.mxu0 %v10753_v62 }
0x1704   : > { %10063 = vmatprep.subr.bf16.mxu1 %v10754_v0  ;;  %10091 = vmatprep.subr.bf16.mxu0 %v10755_v48 }
0x1707   : > { %10064 = vmatpush3.bf16.msra.mxu1 %v10756_v46  ;;  %10092 = vmatpush3.bf16.msra.mxu0 %v10757_v49 }
0x1708   : > { %10065 = vmatprep.subr.bf16.mxu1 %v10758_v60  ;;  %10093 = vmatprep.subr.bf16.mxu0 %v10759_v9 }
0x170b   : > { %v6457_v33 = vpop.f32.mrb[124].mxu1  ;;  %v6510_v50 = vpop.f32.mrb[116].mxu0  ;;  %10066 = vmatpush3.bf16.msra.mxu1 %v10760_v7  ;;  %10094 = vmatpush3.bf16.msra.mxu0 %v10761_v23 }
0x170c   : > { %v6458_v44 = vadd.f32 %v6457_v33, %v5436_v21  ;;  %v6511_v57 = vadd.f32 %v6510_v50, %v5444_v29  ;;  %v6459_v38 = vpop.f32.mrb[125].mxu1  ;;  %v6512_v8 = vpop.f32.mrb[117].mxu0  ;;  %10067 = vmatprep.subr.bf16.mxu1 %v10762_v52  ;;  %10095 = vmatprep.subr.bf16.mxu0 %v10763_v54 }
0x170d   : > { %v6460_v45 = vadd.f32 %v6459_v38, %v13131_v10  ;;  %v6513_v6 = vadd.f32 %v6512_v8, %v13135_v26  ;;  %v6461_v14 = vpop.f32.mrb[126].mxu1  ;;  %v6514_v15 = vpop.f32.mrb[118].mxu0  ;;  %v9457_v38 = vld [vmem:[#allocation13 + $0x1] ss:$0 sm:$0xff] }
0x170e   : > { %v6462_v4 = vadd.f32 %v6461_v14, %v5436_v21  ;;  %v6515_v34 = vadd.f32 %v6514_v15, %v5444_v29  ;;  %v6463_v11 = vpop.f32.mrb[127].mxu1  ;;  %v6516_v16 = vpop.f32.mrb[119].mxu0  ;;  %v6541_v17 = vmax.f32 %v6458_v44, 0.0  ;;  %v6543_v51 = vmax.f32 %v6511_v57, 0.0 }
0x170f   : > { %v6464_v56 = vadd.f32 %v6463_v11, %v13131_v10  ;;  %v6517_v1 = vadd.f32 %v6516_v16, %v13135_v26  ;;  %10068 = vmatpush3.bf16.msra.mxu1 %v10764_v28  ;;  %10096 = vmatpush3.bf16.msra.mxu0 %v10765_v13  ;;  %v6542_v59 = vmax.f32 %v6460_v45, 0.0  ;;  %v6544_v30 = vmax.f32 %v6513_v6, 0.0 }
0x1710   : > { %v6557_v20 = vmax.f32 %v6462_v4, 0.0  ;;  %v6559_v27 = vmax.f32 %v6515_v34, 0.0  ;;  %10069 = vmatprep.subr.bf16.mxu1 %v10766_v3  ;;  %10097 = vmatprep.subr.bf16.mxu0 %v10767_v5 }
0x1711   : > { %v6558_v2 = vmax.f32 %v6464_v56, 0.0  ;;  %v6560_v12 = vmax.f32 %v6517_v1, 0.0 }
0x1712   : > { %v6605_v32 = vpack.c.bf16 %v6557_v20, %v6541_v17  ;;  %v6607_v53 = vpack.c.bf16 %v6559_v27, %v6543_v51 }
0x1713   : > { %v6606_v42 = vpack.c.bf16 %v6558_v2, %v6542_v59  ;;  %v6608_v41 = vpack.c.bf16 %v6560_v12, %v6544_v30  ;;  %v6467_v22 = vpop.f32.mrb[128].mxu1  ;;  %v6520_v55 = vpop.f32.mrb[120].mxu0  ;;  %10070 = vmatpush3.bf16.msra.mxu1 %v10768_v24  ;;  %10098 = vmatpush3.bf16.msra.mxu0 %v10769_v43 }
0x1714   : > { %v6468_v19 = vadd.f32 %v6467_v22, %v5436_v21  ;;  %v6521_v58 = vadd.f32 %v6520_v55, %v5444_v29  ;;  %v6469_v40 = vpop.f32.mrb[129].mxu1  ;;  %v6522_v37 = vpop.f32.mrb[121].mxu0 }
0x1715   : > { %v6470_v63 = vadd.f32 %v6469_v40, %v13131_v10  ;;  %v6523_v39 = vadd.f32 %v6522_v37, %v13135_v26  ;;  %v6471_v31 = vpop.f32.mrb[130].mxu1  ;;  %v6524_v35 = vpop.f32.mrb[122].mxu0  ;;  %7984 = vmatprep.mubr.bf16.mxu1 %v6606_v42  ;;  %8033 = vmatprep.mubr.bf16.mxu0 %v6608_v41 }
0x1716   : > { %v6472_v62 = vadd.f32 %v6471_v31, %v5436_v21  ;;  %v6525_v0 = vadd.f32 %v6524_v35, %v5444_v29  ;;  %v6473_v48 = vpop.f32.mrb[131].mxu1  ;;  %v6526_v46 = vpop.f32.mrb[123].mxu0  ;;  %7985 = vmatmul.mubr.bf16.vlgmr.msra.gmra.mrb[156].mxu1 %v6605_v32  ;;  %8034 = vmatmul.mubr.bf16.vlgmr.msra.gmra.mrb[148].mxu0 %v6607_v53  ;;  %v6573_v9 = vmax.f32 %v6468_v19, 0.0  ;;  %v6575_v7 = vmax.f32 %v6521_v58, 0.0 }
0x1717   : > { %v6474_v49 = vadd.f32 %v6473_v48, %v13131_v10  ;;  %v6527_v60 = vadd.f32 %v6526_v46, %v13135_v26  ;;  %v6574_v54 = vmax.f32 %v6470_v63, 0.0  ;;  %v6576_v33 = vmax.f32 %v6523_v39, 0.0 }
0x1718   : > { %v6589_v23 = vmax.f32 %v6472_v62, 0.0  ;;  %v6591_v52 = vmax.f32 %v6525_v0, 0.0 }
0x1719   : > { %v6590_v50 = vmax.f32 %v6474_v49, 0.0  ;;  %v6592_v28 = vmax.f32 %v6527_v60, 0.0 }
0x171a   : > { %v6621_v13 = vpack.c.bf16 %v6589_v23, %v6573_v9  ;;  %v6623_v44 = vpack.c.bf16 %v6591_v52, %v6575_v7 }
0x171b   : > { %v6622_v21 = vpack.c.bf16 %v6590_v50, %v6574_v54  ;;  %v6624_v29 = vpack.c.bf16 %v6592_v28, %v6576_v33 }
0x171d   : > { %7992 = vmatprep.mubr.bf16.mxu1 %v6622_v21  ;;  %8041 = vmatprep.mubr.bf16.mxu0 %v6624_v29 }
0x171e   : > { %7993 = vmatmul.mubr.bf16.gmra.mrb[160].mxu1 %v6621_v13  ;;  %8042 = vmatmul.mubr.bf16.gmra.mrb[152].mxu0 %v6623_v44 }
0x1789   : > { %v9903_v57 = vpop.f32.mrb[132].mxu1  ;;  %v9931_v10 = vpop.f32.mrb[124].mxu0 }
0x178a   : > { %v9904_v26 = vpop.f32.mrb[133].mxu1  ;;  %v9932_v8 = vpop.f32.mrb[125].mxu0 }
0x178b   : > { %v9905_v3 = vadd.f32 %v9904_v26, %v9903_v57  ;;  %v9933_v5 = vadd.f32 %v9932_v8, %v9931_v10  ;;  %v9906_v45 = vpop.f32.mrb[134].mxu1  ;;  %v9934_v6 = vpop.f32.mrb[126].mxu0 }
0x178c   : > { %v9907_v14 = vpop.f32.mrb[135].mxu1  ;;  %v9935_v15 = vpop.f32.mrb[127].mxu0 }
0x178d   : > { %v7693_v4 = vadd.f32 %v9905_v3, %v9457_v38  ;;  %v9908_v34 = vadd.f32 %v9907_v14, %v9906_v45  ;;  %v9936_v11 = vadd.f32 %v9935_v15, %v9934_v6 }
0x178f   : > { %v7742_v16 = vadd.f32 %v9933_v5, %v7693_v4  ;;  %v7696_v56 = vadd.f32 %v9908_v34, %v9457_v38 }
0x1791   : > { %v7745_v1 = vadd.f32 %v9936_v11, %v7696_v56  ;;  %v9909_v24 = vpop.f32.mrb[136].mxu1  ;;  %v9937_v43 = vpop.f32.mrb[128].mxu0 }
0x1792   : > { %v9910_v17 = vpop.f32.mrb[137].mxu1  ;;  %v9938_v51 = vpop.f32.mrb[129].mxu0 }
0x1793   : > { %v9911_v20 = vadd.f32 %v9910_v17, %v9909_v24  ;;  %v9939_v27 = vadd.f32 %v9938_v51, %v9937_v43  ;;  %v9912_v59 = vpop.f32.mrb[138].mxu1  ;;  %v9940_v30 = vpop.f32.mrb[130].mxu0 }
0x1794   : > { %v9913_v2 = vpop.f32.mrb[139].mxu1  ;;  %v9941_v12 = vpop.f32.mrb[131].mxu0 }
0x1795   : > { %v7701_v32 = vadd.f32 %v9911_v20, %v9457_v38  ;;  %v9914_v53 = vadd.f32 %v9913_v2, %v9912_v59  ;;  %v9942_v42 = vadd.f32 %v9941_v12, %v9940_v30 }
0x1797   : > { %v7750_v41 = vadd.f32 %v9939_v27, %v7701_v32  ;;  %v7704_v22 = vadd.f32 %v9914_v53, %v9457_v38 }
0x1799   : > { %v7753_v55 = vadd.f32 %v9942_v42, %v7704_v22 }
0x17a9   : > { %v9959_v19 = vpop.f32.mrb[140].mxu1  ;;  %v9987_v58 = vpop.f32.mrb[132].mxu0 }
0x17aa   : > { %v9960_v40 = vpop.f32.mrb[141].mxu1  ;;  %v9988_v37 = vpop.f32.mrb[133].mxu0 }
0x17ab   : > { %v9961_v63 = vadd.f32 %v9960_v40, %v9959_v19  ;;  %v9989_v39 = vadd.f32 %v9988_v37, %v9987_v58  ;;  %v9962_v31 = vpop.f32.mrb[142].mxu1  ;;  %v9990_v35 = vpop.f32.mrb[134].mxu0 }
0x17ac   : > { %v9963_v62 = vpop.f32.mrb[143].mxu1  ;;  %v9991_v0 = vpop.f32.mrb[135].mxu0 }
0x17ad   : > { %v7791_v48 = vadd.f32 %v9961_v63, %v7742_v16  ;;  %v9964_v46 = vadd.f32 %v9963_v62, %v9962_v31  ;;  %v9992_v49 = vadd.f32 %v9991_v0, %v9990_v35 }
0x17af   : > { %v7840_v60 = vadd.f32 %v9989_v39, %v7791_v48  ;;  %v7794_v9 = vadd.f32 %v9964_v46, %v7745_v1 }
0x17b1   : > { %v7843_v7 = vadd.f32 %v9992_v49, %v7794_v9  ;;  %v9965_v23 = vpop.f32.mrb[144].mxu1  ;;  %v9993_v52 = vpop.f32.mrb[136].mxu0 }
0x17b2   : > { %v9966_v54 = vpop.f32.mrb[145].mxu1  ;;  %v9994_v33 = vpop.f32.mrb[137].mxu0 }
0x17b3   : > { %v9967_v50 = vadd.f32 %v9966_v54, %v9965_v23  ;;  %v9995_v28 = vadd.f32 %v9994_v33, %v9993_v52  ;;  %v9968_v13 = vpop.f32.mrb[146].mxu1  ;;  %v9996_v44 = vpop.f32.mrb[138].mxu0 }
0x17b4   : > { %v9969_v21 = vpop.f32.mrb[147].mxu1  ;;  %v9997_v29 = vpop.f32.mrb[139].mxu0 }
0x17b5   : > { %v7799_v57 = vadd.f32 %v9967_v50, %v7750_v41  ;;  %v9970_v10 = vadd.f32 %v9969_v21, %v9968_v13  ;;  %v9998_v38 = vadd.f32 %v9997_v29, %v9996_v44 }
0x17b7   : > { %v7848_v26 = vadd.f32 %v9995_v28, %v7799_v57  ;;  %v7802_v8 = vadd.f32 %v9970_v10, %v7753_v55 }
0x17b9   : > { %v7851_v3 = vadd.f32 %v9998_v38, %v7802_v8 }
0x17c9   : > { %v10015_v5 = vpop.f32.mrb[148].mxu1  ;;  %v10043_v45 = vpop.f32.mrb[140].mxu0 }
0x17ca   : > { %v10016_v6 = vpop.f32.mrb[149].mxu1  ;;  %v10044_v14 = vpop.f32.mrb[141].mxu0 }
0x17cb   : > { %v10017_v15 = vadd.f32 %v10016_v6, %v10015_v5  ;;  %v10045_v4 = vadd.f32 %v10044_v14, %v10043_v45  ;;  %v10018_v34 = vpop.f32.mrb[150].mxu1  ;;  %v10046_v11 = vpop.f32.mrb[142].mxu0 }
0x17cc   : > { %v10019_v16 = vpop.f32.mrb[151].mxu1  ;;  %v10047_v56 = vpop.f32.mrb[143].mxu0 }
0x17cd   : > { %v7889_v1 = vadd.f32 %v10017_v15, %v7840_v60  ;;  %v10020_v24 = vadd.f32 %v10019_v16, %v10018_v34  ;;  %v10048_v43 = vadd.f32 %v10047_v56, %v10046_v11 }
0x17cf   : > { %v7938_v17 = vadd.f32 %v10045_v4, %v7889_v1  ;;  %v7892_v51 = vadd.f32 %v10020_v24, %v7843_v7 }
0x17d1   : > { %v7941_v20 = vadd.f32 %v10048_v43, %v7892_v51  ;;  %v10021_v27 = vpop.f32.mrb[152].mxu1  ;;  %v10049_v59 = vpop.f32.mrb[144].mxu0 }
0x17d2   : > { %v10022_v30 = vpop.f32.mrb[153].mxu1  ;;  %v10050_v2 = vpop.f32.mrb[145].mxu0 }
0x17d3   : > { %v10023_v12 = vadd.f32 %v10022_v30, %v10021_v27  ;;  %v10051_v32 = vadd.f32 %v10050_v2, %v10049_v59  ;;  %v10024_v53 = vpop.f32.mrb[154].mxu1  ;;  %v10052_v42 = vpop.f32.mrb[146].mxu0  ;;  %v653_v2 = vld [vmem:[#allocation2 + $0x10] sm:$0xff] }
0x17d4   : > { %v10025_v41 = vpop.f32.mrb[155].mxu1  ;;  %v10053_v22 = vpop.f32.mrb[147].mxu0 }
0x17d5   : > { %v7897_v55 = vadd.f32 %v10023_v12, %v7848_v26  ;;  %v10026_v19 = vadd.f32 %v10025_v41, %v10024_v53  ;;  %v10054_v58 = vadd.f32 %v10053_v22, %v10052_v42  ;;  %v11218_v12 = vmov 0.0   ;;  %v654_v22 = vld [vmem:[#allocation2 + $0x18] sm:$0xff] }
0x17d6   : > { %10263 = vmatprep.subr.mxu1 %v11218_v12  ;;  %10265 = vmatprep.mubr.msk.f32.mxu1 %vm11219_vm2, %v11218_v12 }
0x17d7   : > { %v7946_v40 = vadd.f32 %v10051_v32, %v7897_v55  ;;  %v7900_v37 = vadd.f32 %v10026_v19, %v7851_v3 }
0x17d9   : > { %v7949_v63 = vadd.f32 %v10054_v58, %v7900_v37 }
0x17e9   : > { %v10071_v39 = vpop.f32.mrb[156].mxu1  ;;  %v10099_v31 = vpop.f32.mrb[148].mxu0 }
0x17ea   : > { %v10072_v35 = vpop.f32.mrb[157].mxu1  ;;  %v10100_v62 = vpop.f32.mrb[149].mxu0 }
0x17eb   : > { %v10073_v0 = vadd.f32 %v10072_v35, %v10071_v39  ;;  %v10101_v48 = vadd.f32 %v10100_v62, %v10099_v31  ;;  %v10074_v46 = vpop.f32.mrb[158].mxu1  ;;  %v10102_v49 = vpop.f32.mrb[150].mxu0 }
0x17ec   : > { %v10075_v60 = vpop.f32.mrb[159].mxu1  ;;  %v10103_v9 = vpop.f32.mrb[151].mxu0 }
0x17ed   : > { %v7987_v7 = vadd.f32 %v10073_v0, %v7938_v17  ;;  %v10076_v23 = vadd.f32 %v10075_v60, %v10074_v46  ;;  %v10104_v52 = vadd.f32 %v10103_v9, %v10102_v49  ;;  %v9586_v0 = vld [vmem:[#allocation15 + $0x1] ss:$0 sm:$0xff]  ;;  %v9587_v49 = vld [vmem:[#allocation16 + $0x1] ss:$0 sm:$0xff] }
0x17ef   : > { %v8036_v54 = vadd.f32 %v10101_v48, %v7987_v7  ;;  %v7990_v33 = vadd.f32 %v10076_v23, %v7941_v20 }
0x17f1   : > { %v8039_v50 = vadd.f32 %v10104_v52, %v7990_v33  ;;  %v10077_v28 = vpop.f32.mrb[160].mxu1  ;;  %v10105_v13 = vpop.f32.mrb[152].mxu0  ;;  %v8050_v44 = vadd.f32 %v8036_v54, %v12731_v36  ;;  %v10882_v54 = vld [vmem:[%s11602_s30] sm:$0xff] }
0x17f2   : > { %v10078_v21 = vpop.f32.mrb[161].mxu1  ;;  %v10106_v29 = vpop.f32.mrb[153].mxu0 }
0x17f3   : > { %v10079_v57 = vadd.f32 %v10078_v21, %v10077_v28  ;;  %v10107_v10 = vadd.f32 %v10106_v29, %v10105_v13  ;;  %v10080_v38 = vpop.f32.mrb[162].mxu1  ;;  %v10108_v26 = vpop.f32.mrb[154].mxu0  ;;  %8058 = vadd.xlane.f32.xlu0 %v8050_v44  ;;  %v8051_v8 = vadd.f32 %v8039_v50, %v12733_v47  ;;  %v10883_v13 = vld [vmem:[%s11602_s30 + $0x8] sm:$0xff] }
0x17f4   : > { %v10081_v3 = vpop.f32.mrb[163].mxu1  ;;  %v10109_v5 = vpop.f32.mrb[155].mxu0 }
0x17f5   : > { %v7995_v45 = vadd.f32 %v10079_v57, %v7946_v40  ;;  %v10082_v6 = vadd.f32 %v10081_v3, %v10080_v38  ;;  %v10110_v14 = vadd.f32 %v10109_v5, %v10108_v26  ;;  %8060 = vadd.xlane.f32.xlu1 %v8051_v8 }
0x17f7   : > { %v8044_v15 = vadd.f32 %v10107_v10, %v7995_v45  ;;  %v7998_v4 = vadd.f32 %v10082_v6, %v7949_v63  ;;  %v10884_v45 = vld [vmem:[%s11602_s30 + $0x10] sm:$0xff] }
0x17f9   : > { %v8047_v34 = vadd.f32 %v10110_v14, %v7998_v4  ;;  %v8052_v36 = vadd.f32 %v8044_v15, %v12771_v61  ;;  %v652_v61 = vld [vmem:[#allocation2 + $0x8] sm:$0xff] }
0x17fb   : > { %8062 = vadd.xlane.f32.xlu0 %v8052_v36  ;;  %v8053_v11 = vadd.f32 %v8047_v34, %v12755_v18  ;;  %v651_v18 = vld [vmem:[#allocation2] sm:$0xff] }
0x17fd   : > { %8064 = vadd.xlane.f32.xlu1 %v8053_v11 }
0x1880   : > { %v8059_v16 = vpop.xlane.xlu0 %8058 }
0x1881   : > { %v8066_v56 = vmul.f32 0.0078125, %v8059_v16 }
0x1882   : > { %v8061_v1 = vpop.xlane.xlu1 %8060 }
0x1883   : > { %v8070_v24 = vsub.f32 %v8050_v44, %v8066_v56  ;;  %v8067_v47 = vmul.f32 0.0078125, %v8061_v1 }
0x1885   : > { %v8071_v43 = vsub.f32 %v8051_v8, %v8067_v47  ;;  %v8074_v17 = vmul.f32 %v8070_v24, %v8070_v24 }
0x1887   : > { %8078 = vadd.xlane.f32.xlu0 %v8074_v17  ;;  %v8075_v51 = vmul.f32 %v8071_v43, %v8071_v43  ;;  %v10885_v17 = vld [vmem:[%s11602_s30 + $0x18] sm:$0xff]  ;;  %s8820_s30 = sshll.u32 %s11306_s21, 2 }
0x1888   : > { %v8063_v20 = vpop.xlane.xlu0 %8062  ;;  %p637_p2 = scmp.lt.s32.totalorder %s8820_s30, 7 }
0x1889   : > { %v8068_v27 = vmul.f32 0.0078125, %v8063_v20  ;;  %8080 = vadd.xlane.f32.xlu1 %v8075_v51 }
0x188a   : > { %v8065_v32 = vpop.xlane.xlu1 %8064  ;;  %s13254_s30 = smov (!%p637_p2, %s8820_s30), 7 }
0x188b   : > { %v8072_v59 = vsub.f32 %v8052_v36, %v8068_v27  ;;  %v8069_v53 = vmul.f32 0.0078125, %v8065_v32  ;;  %s8821_s18 = sshll.u32 %s13254_s30, 3 }
0x188c   : > { %s13180_s2 = scalar_lea.vmem %s13251_s17, %s8821_s18 }
0x188d   : > { %v8076_v30 = vmul.f32 %v8072_v59, %v8072_v59  ;;  %v13152_v42 = vsub.f32 %v8053_v11, %v8069_v53 }
0x188f   : > { %8082 = vadd.xlane.f32.xlu0 %v8076_v30  ;;  %v8077_v41 = vmul.f32 %v13152_v42, %v13152_v42 }
0x189a   : > { %8137 = vperm.xlu1 %10433, %v652_v61  }
0x189e   : > { %8142 = vperm.xlu1 %10433, %v653_v2  }
0x18a5   : > { %8132 = vperm.xlu0 %10432, %v651_v18  }
0x18c2   : > { %8084 = vadd.xlane.f32.xlu1 %v8077_v41 }
0x18d3   : > { %8147 = vperm.xlu1 %10433, %v654_v22  }
0x1914   : > { %v8079_v55 = vpop.xlane.xlu0 %8078 }
0x1915   : > { %v8086_v19 = vmul.f32 0.0078125, %v8079_v55 }
0x1916   : > { %v8081_v58 = vpop.xlane.xlu1 %8080 }
0x1917   : > { %v8090_v40 = vadd.f32 1e-05, %v8086_v19  ;;  %v8087_v37 = vmul.f32 0.0078125, %v8081_v58 }
0x1919   : > { %10858 = vrsqrt.f32 %v8090_v40  ;;  %v8091_v63 = vadd.f32 1e-05, %v8087_v37 }
0x191a   : > { %v8138_v26 = vpop.permute.xlu1 %8137 }
0x191b   : > { %10860 = vrsqrt.f32 %v8091_v63 }
0x191c   : > { %v8083_v39 = vpop.xlane.xlu0 %8082 }
0x191d   : > { %v8088_v31 = vmul.f32 0.0078125, %v8083_v39 }
0x191e   : > { %v8143_v4 = vpop.permute.xlu1 %8142 }
0x191f   : > { %v8092_v35 = vadd.f32 1e-05, %v8088_v31 }
0x1921   : > { %10862 = vrsqrt.f32 %v8092_v35 }
0x1923   : > { %v10859_v62 = vpop.eup %10858 }
0x1924   : > { %v8098_v48 = vmul.f32 %v10859_v62, %v8070_v24  ;;  %v8133_v28 = vpop.permute.xlu0 %8132 }
0x1925   : > { %v10861_v46 = vpop.eup %10860 }
0x1926   : > { %v8099_v60 = vmul.f32 %v10861_v46, %v8071_v43  ;;  %v8108_v9 = vmul.f32 %v9586_v0, %v8098_v48 }
0x1928   : > { %v8109_v7 = vmul.f32 %v9586_v0, %v8099_v60  ;;  %v8118_v23 = vadd.f32 %v9587_v49, %v8108_v9 }
0x192a   : > { %v8119_v52 = vadd.f32 %v9587_v49, %v8109_v7  ;;  %v8122_v33 = vadd.f32 %v10882_v54, %v8118_v23 }
0x192b   : > { %v10863_v50 = vpop.eup %10862 }
0x192c   : > { %v8123_v44 = vadd.f32 %v10883_v13, %v8119_v52  ;;  %v8100_v21 = vmul.f32 %v10863_v50, %v8072_v59  ;;  %v8126_v29 = vmul.f32 0.5, %v8122_v33 }
0x192e   : > { %v8127_v57 = vmul.f32 0.5, %v8123_v44  ;;  %v8110_v10 = vmul.f32 %v9586_v0, %v8100_v21  ;;  %v8150_v38 = vmul.f32 %v8133_v28, %v8126_v29 }
0x1930   : > { %v8151_v8 = vmul.f32 %v8138_v26, %v8127_v57  ;;  %v8120_v3 = vadd.f32 %v9587_v49, %v8110_v10  ;;  %10264 = vmatpush3.xpose.msra.mxu1 %v8150_v38  ;;  %v8154_v5 = vmul.f32 %v8150_v38, %v8150_v38 }
0x1931   : > { %10268 = vmatprep.subr.mxu1 %v11218_v12 }
0x1932   : > { %v8124_v6 = vadd.f32 %v10884_v45, %v8120_v3  ;;  %8158 = vadd.xlane.f32.xlu1 %v8154_v5  ;;  %v8155_v14 = vmul.f32 %v8151_v8, %v8151_v8 }
0x1933   : > { %10266 = vmatmul.mubr.f32.vlgmr.msra.gmra.mrb[164].mxu1 %v8150_v38 }
0x1934   : > { %v8128_v15 = vmul.f32 0.5, %v8124_v6  ;;  %8160 = vadd.xlane.f32.xlu0 %v8155_v14  ;;  %10269 = vmatpush3.xpose.msra.mxu1 %v8151_v8 }
0x1935   : > { %10270 = vmatprep.mubr.msk.f32.mxu1 %vm11219_vm2, %v11218_v12  ;;  %10273 = vmatprep.subr.mxu1 %v11218_v12 }
0x1936   : > { %v8152_v34 = vmul.f32 %v8143_v4, %v8128_v15 }
0x1937   : > { %10271 = vmatmul.mubr.f32.vlgmr.msra.gmra.mrb[166].mxu1 %v8151_v8 }
0x1938   : > { %10274 = vmatpush3.xpose.msra.mxu1 %v8152_v34  ;;  %10275 = vmatprep.mubr.msk.f32.mxu1 %vm11219_vm2, %v11218_v12  ;;  %v8156_v36 = vmul.f32 %v8152_v34, %v8152_v34 }
0x1939   : > { %10278 = vmatprep.subr.mxu1 %v11218_v12 }
0x193a   : > { %8162 = vadd.xlane.f32.xlu1 %v8156_v36 }
0x193b   : > { %10276 = vmatmul.mubr.f32.vlgmr.msra.gmra.mrb[168].mxu1 %v8152_v34 }
0x193c   : > { %10280 = vmatprep.mubr.msk.f32.mxu1 %vm11219_vm2, %v11218_v12 }
0x194f   : > { %v8085_v11 = vpop.xlane.xlu1 %8084 }
0x1950   : > { %v8089_v16 = vmul.f32 0.0078125, %v8085_v11 }
0x1952   : > { %v8093_v56 = vadd.f32 1e-05, %v8089_v16 }
0x1953   : > { %v8148_v27 = vpop.permute.xlu1 %8147 }
0x1954   : > { %10864 = vrsqrt.f32 %v8093_v56 }
0x195e   : > { %v10865_v1 = vpop.eup %10864 }
0x195f   : > { %v8101_v24 = vmul.f32 %v10865_v1, %v13152_v42 }
0x1961   : > { %v8111_v47 = vmul.f32 %v9586_v0, %v8101_v24 }
0x1963   : > { %v8121_v43 = vadd.f32 %v9587_v49, %v8111_v47 }
0x1965   : > { %v8125_v51 = vadd.f32 %v10885_v17, %v8121_v43 }
0x1967   : > { %v8129_v20 = vmul.f32 0.5, %v8125_v51 }
0x1969   : > { %v8153_v59 = vmul.f32 %v8148_v27, %v8129_v20 }
0x196b   : > { %10279 = vmatpush3.xpose.msra.mxu1 %v8153_v59  ;;  %v8157_v30 = vmul.f32 %v8153_v59, %v8153_v59 }
0x196d   : > { %8164 = vadd.xlane.f32.xlu1 %v8157_v30 }
0x196e   : > { %10281 = vmatmul.mubr.f32.vlgmr.msra.gmra.mrb[170].mxu1 %v8153_v59 }
0x19bf   : > { %v8159_v61 = vpop.xlane.xlu1 %8158 }
0x19c0   : > { %8446 = vxpose.xlu1.b32.start.end [1/1] (short) (narrow) %v8159_v61, 8 }
0x19c1   : > { %v8161_v2 = vpop.xlane.xlu0 %8160 }
0x19c2   : > { %8478 = vxpose.xlu0.b32.start.end [1/1] (short) (narrow) %v8161_v2, 8 }
0x19c7   : > { %v8163_v18 = vpop.xlane.xlu1 %8162 }
0x19c8   : > { %8510 = vxpose.xlu0.b32.start.end [1/1] (short) (narrow) %v8163_v18, 8 }
0x19fa   : > { %v13170_v12 = vpop.xlane.xlu1 %8164 }
0x19fb   : > { %8542 = vxpose.xlu1.b32.start.end [1/1] (short) (narrow) %v13170_v12, 8 }
0x1a06   : > { %v8232_v32 = vpop.f32.mrb[164].mxu1 }
0x1a07   : > { %v10267_v53 = vpop.f32.mrb[165].mxu1  ;;  %v8594_v39 = vmul.f32 2.0, %v8232_v32 }
0x1a0a   : > { %v8302_v42 = vpop.f32.mrb[166].mxu1 }
0x1a0b   : > { %v10272_v41 = vpop.f32.mrb[167].mxu1  ;;  %v8595_v62 = vmul.f32 2.0, %v8302_v42 }
0x1a0e   : > { %v8372_v22 = vpop.f32.mrb[168].mxu1 }
0x1a0f   : > { %v10277_v55 = vpop.f32.mrb[169].mxu1  ;;  %v8596_v23 = vmul.f32 2.0, %v8372_v22 }
0x1a40   : > { %v8462_v19 = vpop.trf.xlu1 }
0x1a41   : > { %v8577_v58 = vrot.slane %v8462_v19, %v11642_v25  ;;  %v8442_v40 = vpop.f32.mrb[170].mxu1 }
0x1a42   : > { %v10282_v37 = vpop.f32.mrb[171].mxu1  ;;  %v8494_v63 = vpop.trf.xlu0  ;;  %v8597_v4 = vmul.f32 2.0, %v8442_v40 }
0x1a43   : > { %v8590_v31 = vadd.f32 %v8577_v58, %v8159_v61  ;;  %v8581_v35 = vrot.slane %v8494_v63, %v11642_v25 }
0x1a45   : > { %v8598_v0 = vsub.f32 %v8590_v31, %v8594_v39  ;;  %v8591_v48 = vadd.f32 %v8581_v35, %v8161_v2 }
0x1a47   : > { %v8602_v46 = vmax.f32 %v8598_v0, 0.0  ;;  %v8599_v49 = vsub.f32 %v8591_v48, %v8595_v62 }
0x1a48   : > { %v8526_v60 = vpop.trf.xlu0 }
0x1a49   : > { %10866 = vrsqrt.f32 %v8602_v46  ;;  %v8603_v9 = vmax.f32 %v8599_v49, 0.0  ;;  %v8585_v7 = vrot.slane %v8526_v60, %v11642_v25  ;;  %vm8608_vm4 = vcmp.eq.f32.partialorder %v8602_v46, inf }
0x1a4a   : > { %v8611_v13 = vand.u32 2147483648, %v8602_v46  ;;  %vm8610_vm5 = vcmp.eq.f32.partialorder %v8602_v46, 0.0 }
0x1a4b   : > { %10868 = vrsqrt.f32 %v8603_v9  ;;  %v8592_v52 = vadd.f32 %v8585_v7, %v8163_v18  ;;  %vm8615_vm6 = vcmp.eq.f32.partialorder %v8603_v9, inf  ;;  %v8618_v10 = vand.u32 2147483648, %v8603_v9 }
0x1a4c   : > { %vm8617_vm7 = vcmp.eq.f32.partialorder %v8603_v9, 0.0 }
0x1a4d   : > { %v8600_v54 = vsub.f32 %v8592_v52, %v8596_v23 }
0x1a4f   : > { %v8604_v33 = vmax.f32 %v8600_v54, 0.0 }
0x1a51   : > { %10870 = vrsqrt.f32 %v8604_v33  ;;  %vm8622_vm8 = vcmp.eq.f32.partialorder %v8604_v33, inf  ;;  %v8625_v5 = vand.u32 2147483648, %v8604_v33  ;;  %vm8624_vm9 = vcmp.eq.f32.partialorder %v8604_v33, 0.0 }
0x1a53   : > { %v10867_v50 = vpop.eup %10866 }
0x1a54   : > { %v8607_v28 = vmul.f32 %v10867_v50, %v8602_v46 }
0x1a55   : > { %v10869_v44 = vpop.eup %10868 }
0x1a56   : > { %v8609_v21 = vsel %vm8608_vm4, %v8602_v46, %v8607_v28  ;;  %v8614_v57 = vmul.f32 %v10869_v44, %v8603_v9 }
0x1a57   : > { %v8612_v29 = vsel %vm8610_vm5, %v8611_v13, %v8609_v21 }
0x1a58   : > { %8635 = vst.msk [vmem:[%s13180_s2] sm:$0xff] %vm8634_vm3, %v8612_v29  ;;  %v8616_v38 = vsel %vm8615_vm6, %v8603_v9, %v8614_v57 }
0x1a59   : > { %v8619_v26 = vsel %vm8617_vm7, %v8618_v10, %v8616_v38 }
0x1a5a   : > { %8636 = vst.msk [vmem:[%s13180_s2 + $0x8] sm:$0xff] %vm8634_vm3, %v8619_v26 }
0x1a5b   : > { %v10871_v8 = vpop.eup %10870 }
0x1a5c   : > { %v8621_v3 = vmul.f32 %v10871_v8, %v8604_v33 }
0x1a5e   : > { %v8623_v45 = vsel %vm8622_vm8, %v8604_v33, %v8621_v3 }
0x1a5f   : > { %v8626_v6 = vsel %vm8624_vm9, %v8625_v5, %v8623_v45 }
0x1a60   : > { %8637 = vst.msk [vmem:[%s13180_s2 + $0x10] sm:$0xff] %vm8634_vm3, %v8626_v6 }
0x1a7b   : > { %v8558_v14 = vpop.trf.xlu1 }
0x1a7c   : > { %v8589_v15 = vrot.slane %v8558_v14, %v11642_v25 }
0x1a7e   : > { %v8593_v34 = vadd.f32 %v8589_v15, %v13170_v12 }
0x1a80   : > { %v8601_v36 = vsub.f32 %v8593_v34, %v8597_v4 }
0x1a82   : > { %v8605_v11 = vmax.f32 %v8601_v36, 0.0 }
0x1a84   : > { %10872 = vrsqrt.f32 %v8605_v11  ;;  %vm8629_vm10 = vcmp.eq.f32.partialorder %v8605_v11, inf  ;;  %v8632_v1 = vand.u32 2147483648, %v8605_v11  ;;  %vm8631_vm11 = vcmp.eq.f32.partialorder %v8605_v11, 0.0 }
0x1a8e   : > { %v10873_v16 = vpop.eup %10872 }
0x1a8f   : > { %v8628_v56 = vmul.f32 %v10873_v16, %v8605_v11 }
0x1a91   : > { %v8630_v24 = vsel %vm8629_vm10, %v8605_v11, %v8628_v56 }
0x1a92   : > { %v8633_v47 = vsel %vm8631_vm11, %v8632_v1, %v8630_v24 }
0x1a93   : > { %8638 = vst.msk [vmem:[%s13180_s2 + $0x18] sm:$0xff] %vm8634_vm3, %v8633_v47 }
0x1a94 PF: > { %s13252_s9 = sld [smem:[#allocation24_spill]] }
0x1a9a   : > { %s31_s18 = sadd.s32 1, %s13252_s9  }
0x1a9b   : > { %p28_p7 = scmp.ge.s32.totalorder %s31_s18, 4  }
0x1a9d   :  { %30 = sbr.rel (!%p28_p7) target bundleno = 13 (0xd), region = 163 }
0x1aa4   :  { %8661 = vsyncpa [#allocation3], 1 }
0x1aa5   :  { %8663 = vsyncpa [#allocation3 + $0x1], 1 }
0x1aa6   :  { %8664 = vsyncpa [#allocation5], 1 }
0x1aa7   :  { %8665 = vsyncpa [#allocation8], 1 }
0x1aa8   :  { %8666 = vsyncpa [#allocation11], 1 }
0x1aa9   :  { %8667 = vsyncpa [#allocation14], 1 }
0x1aaa   :  { %8668 = vsyncpa [#allocation17], 1 }

</bundles_post_ra>
